<compile_context>
chip_gen: v6e
topology: v6e:2x2x1
jax: 0.10.0
libtpu: 0.0.40
codegen_flags: <defaults>
</compile_context>

<pallas_src>
import math
from functools import partial

import jax
import jax.numpy as jnp
from jax.experimental import pallas as pl
from jax.experimental.pallas import tpu as pltpu

# nn.TransformerEncoderLayer fixed hyper-parameters from the module __init__
NHEAD = 8
FF_DIM = 512
LN_EPS = 1e-5


def _layer_norm(x, gamma, beta):
    mu = jnp.mean(x, axis=-1, keepdims=True)
    var = jnp.mean((x - mu) ** 2, axis=-1, keepdims=True)
    return (x - mu) * jax.lax.rsqrt(var + LN_EPS) * gamma + beta


# ---------------------------------------------------------------------------
# Fused kernel: one program = TB batch elements through the WHOLE encoder
# ---------------------------------------------------------------------------
def fused_encoder_kernel(x_ref, wp_ref, bp_ref, pos_ref,
                         wqkv_ref, bqkv_ref, wo_ref, bo_ref,
                         g1_ref, be1_ref, w1_ref, b1_ref,
                         w2_ref, b2_ref, g2_ref, be2_ref,
                         o_ref, *, nhead, num_layers, matmul_dtype):
    TB, S, D = x_ref.shape
    H = wp_ref.shape[1]
    hd = H // nhead
    R = TB * S                                  # flattened row count

    def mm(a, b):                               # MXU matmul, f32 accumulation
        return jnp.dot(a.astype(matmul_dtype), b.astype(matmul_dtype),
                       preferred_element_type=jnp.float32)

    # ---- input projection + positional encoding ---------------------------
    x = x_ref[...].astype(jnp.float32).reshape(R, D)
    y = mm(x, wp_ref[...]) + bp_ref[...]                      # (R, H)
    y = (y.reshape(TB, S, H) + pos_ref[...]).reshape(R, H)

    # ---- transformer encoder layers (post-LN, ReLU FFN) --------------------
    for l in range(num_layers):
        wqkv = wqkv_ref[l]; bqkv = bqkv_ref[l]
        wo = wo_ref[l];     bo = bo_ref[l]
        g1 = g1_ref[l];     be1 = be1_ref[l]
        w1 = w1_ref[l];     b1 = b1_ref[l]
        w2 = w2_ref[l];     b2 = b2_ref[l]
        g2 = g2_ref[l];     be2 = be2_ref[l]

        qkv = mm(y, wqkv) + bqkv                               # (R, 3H); Q pre-scaled
        qkv3 = qkv.reshape(TB, S, 3 * H)
        q3 = qkv3[:, :, 0 * H:1 * H]
        k3 = qkv3[:, :, 1 * H:2 * H]
        v3 = qkv3[:, :, 2 * H:3 * H]

        # Multi-head attention: static head loop, batched over TB, with the
        # output projection folded in per head (no lane-axis concatenate).
        # TODO(synk): for long sequences (S in the hundreds+) tile the key axis
        # flash-style with a fori_loop to bound the (TB, S, S) live temporaries
        # (matters for v7x's 64 MiB VMEM).
        attn = jnp.zeros((R, H), jnp.float32)
        for h in range(nhead):
            sl = slice(h * hd, (h + 1) * hd)
            s = jnp.einsum("bqd,bkd->bqk", q3[:, :, sl], k3[:, :, sl],
                           preferred_element_type=jnp.float32)         # (TB, S, S)
            s = s - jnp.max(s, axis=-1, keepdims=True)
            p = jnp.exp(s)
            # exact reciprocal keeps the check tight; approx=True moves the
            # divide onto the (otherwise idle) EUP when tolerance allows.
            p = p * pl.reciprocal(jnp.sum(p, axis=-1, keepdims=True), approx=False)
            ctx = jnp.einsum("bqk,bkd->bqd", p, v3[:, :, sl],
                             preferred_element_type=jnp.float32)        # (TB, S, hd)
            attn = attn + mm(ctx.reshape(R, hd), wo[sl, :])
        attn = attn + bo

        y1 = _layer_norm(y + attn, g1, be1)                    # post-LN (PyTorch default)

        ff = jnp.maximum(mm(y1, w1) + b1, 0.0)                 # ReLU FFN
        ff = mm(ff, w2) + b2
        y = _layer_norm(y1 + ff, g2, be2)

    # ---- emit only the last timestep (== x[-1] of the seq-major tensor) ----
    o_ref[0] = y.reshape(TB, S, H)[:, S - 1, :].astype(o_ref.dtype)


# ---------------------------------------------------------------------------
# Wrapper
# ---------------------------------------------------------------------------
def _pick_batch_tile(batch):
    """Largest divisor of `batch` giving >= 2 grid steps (both v7x TCs busy)."""
    for tb in range(batch // 2, 0, -1):
        if batch % tb == 0:
            return tb
    return max(batch, 1)


def time_series_encoder(x, kparams, *, nhead=NHEAD, batch_tile=None,
                        matmul_dtype=jnp.float32):
    """x: (B, S, input_dim) -> (B, hidden_dim)   (last-timestep output)."""
    B, S, D = x.shape
    H = kparams["wp"].shape[1]
    L = kparams["wqkv"].shape[0]
    FF = kparams["w1"].shape[2]
    assert H % nhead == 0, "hidden_dim must be divisible by nhead"

    if batch_tile is None:
        batch_tile = _pick_batch_tile(B)
    assert B % batch_tile == 0
    nt = B // batch_tile

    pos = kparams["pos"][:S]                                   # (S, H)

    const = lambda shape: pl.BlockSpec(shape, lambda i, _s=shape: (0,) * len(_s))
    kernel = partial(fused_encoder_kernel, nhead=nhead, num_layers=L,
                     matmul_dtype=matmul_dtype)

    out = pl.pallas_call(
        kernel,
        out_shape=jax.ShapeDtypeStruct((nt, batch_tile, H), jnp.float32),
        grid=(nt,),
        in_specs=[
            pl.BlockSpec((batch_tile, S, D), lambda i: (i, 0, 0)),   # x batch tile
            const((D, H)), const((1, H)), const((S, H)),            # input proj + pos
            const((L, H, 3 * H)), const((L, 1, 3 * H)),             # QKV (Q pre-scaled)
            const((L, H, H)), const((L, 1, H)),                     # out proj
            const((L, 1, H)), const((L, 1, H)),                     # norm1
            const((L, H, FF)), const((L, 1, FF)),                   # linear1
            const((L, FF, H)), const((L, 1, H)),                    # linear2
            const((L, 1, H)), const((L, 1, H)),                     # norm2
        ],
        out_specs=pl.BlockSpec((1, batch_tile, H), lambda i: (i, 0, 0)),
        compiler_params=pltpu.CompilerParams(dimension_semantics=("parallel",)),
    )(x, kparams["wp"], kparams["bp"], pos,
      kparams["wqkv"], kparams["bqkv"], kparams["wo"], kparams["bo"],
      kparams["g1"], kparams["be1"], kparams["w1"], kparams["b1"],
      kparams["w2"], kparams["b2"], kparams["g2"], kparams["be2"])
    return out.reshape(B, H)


# ---------------------------------------------------------------------------
# Deterministic PyTorch-layout parameters + kernel-ready preparation
# ---------------------------------------------------------------------------
def init_torch_params(key, input_dim, hidden_dim, num_layers, max_len=1000):
    """PyTorch-equivalent params (weights stored as (out_features, in_features))."""
    def lin(k, out_f, in_f):
        bound = 1.0 / math.sqrt(in_f)
        kw, kb = jax.random.split(k)
        w = jax.random.uniform(kw, (out_f, in_f), jnp.float32, -bound, bound)
        b = jax.random.uniform(kb, (out_f,), jnp.float32, -bound, bound)
        return w, b

    keys = jax.random.split(key, 2 + num_layers)
    wp, bp = lin(keys[0], hidden_dim, input_dim)
    pos = 0.02 * jax.random.normal(keys[1], (1, max_len, hidden_dim), jnp.float32)

    layers = []
    for i in range(num_layers):
        lk = jax.random.split(keys[2 + i], 4)
        w_in, b_in = lin(lk[0], 3 * hidden_dim, hidden_dim)     # MHA in_proj (QKV)
        w_out, b_out = lin(lk[1], hidden_dim, hidden_dim)       # MHA out_proj
        w1, b1 = lin(lk[2], FF_DIM, hidden_dim)                 # linear1
        w2, b2 = lin(lk[3], hidden_dim, FF_DIM)                 # linear2
        layers.append(dict(
            w_in=w_in, b_in=b_in, w_out=w_out, b_out=b_out,
            w1=w1, b1=b1, w2=w2, b2=b2,
            g1=jnp.ones((hidden_dim,), jnp.float32), be1=jnp.zeros((hidden_dim,), jnp.float32),
            g2=jnp.ones((hidden_dim,), jnp.float32), be2=jnp.zeros((hidden_dim,), jnp.float32),
        ))
    return dict(wp=wp, bp=bp, pos=pos, layers=layers)


def prepare_kernel_params(tp, nhead=NHEAD):
    """Transpose to x@W layout, fold 1/sqrt(head_dim) into the Q weights/bias,
    and stack per-layer tensors along a leading layer axis (VMEM-resident)."""
    hidden = tp["wp"].shape[0]
    scale = 1.0 / math.sqrt(hidden // nhead)

    def stack(fn):
        return jnp.stack([fn(l) for l in tp["layers"]], axis=0)

    def fold_w(l):
        return l["w_in"].T.at[:, :hidden].multiply(scale)       # (H, 3H)

    def fold_b(l):
        return l["b_in"].at[:hidden].multiply(scale).reshape(1, 3 * hidden)

    row = lambda name: (lambda l: l[name].reshape(1, -1))
    return dict(
        wp=tp["wp"].T, bp=tp["bp"].reshape(1, -1), pos=tp["pos"][0],
        wqkv=stack(fold_w), bqkv=stack(fold_b),
        wo=stack(lambda l: l["w_out"].T), bo=stack(row("b_out")),
        g1=stack(row("g1")), be1=stack(row("be1")),
        w1=stack(lambda l: l["w1"].T), b1=stack(row("b1")),
        w2=stack(lambda l: l["w2"].T), b2=stack(row("b2")),
        g2=stack(row("g2")), be2=stack(row("be2")),
    )


# ---------------------------------------------------------------------------
# Pure-JAX reference (faithful to the PyTorch module, uses UNfolded params)
# ---------------------------------------------------------------------------
def ref_forward(x, tp, nhead=NHEAD):
    B, S, _ = x.shape
    H = tp["wp"].shape[0]
    hd = H // nhead
    y = x @ tp["wp"].T + tp["bp"] + tp["pos"][0, :S]
    for p in tp["layers"]:
        qkv = y @ p["w_in"].T + p["b_in"]
        q, k, v = qkv[..., :H], qkv[..., H:2 * H], qkv[..., 2 * H:]
        split = lambda t: t.reshape(B, S, nhead, hd).transpose(0, 2, 1, 3)
        qh, kh, vh = split(q), split(k), split(v)
        s = jnp.einsum("bhqd,bhkd->bhqk", qh, kh) / math.sqrt(hd)
        a = jax.nn.softmax(s, axis=-1)
        o = jnp.einsum("bhqk,bhkd->bhqd", a, vh).transpose(0, 2, 1, 3).reshape(B, S, H)
        o = o @ p["w_out"].T + p["b_out"]
        y1 = _layer_norm(y + o, p["g1"], p["be1"])
        f = jnp.maximum(y1 @ p["w1"].T + p["b1"], 0.0) @ p["w2"].T + p["b2"]
        y = _layer_norm(y1 + f, p["g2"], p["be2"])
    return y[:, -1, :]


if __name__ == "__main__":
    # Module defaults: hidden_dim=128, nhead=8, dim_feedforward=512, num_layers=2.
    B, S, INPUT_DIM, HIDDEN_DIM, NUM_LAYERS = 4, 16, 16, 128, 2

    key = jax.random.PRNGKey(0)
    kx, kp = jax.random.split(key)
    x = jax.random.normal(kx, (B, S, INPUT_DIM), jnp.float32)

    torch_params = init_torch_params(kp, INPUT_DIM, HIDDEN_DIM, NUM_LAYERS)
    kparams = prepare_kernel_params(torch_params)

    out = time_series_encoder(x, kparams)          # fused Pallas kernel
    out = jax.block_until_ready(out)
    assert out.shape == (B, HIDDEN_DIM), out.shape

    ref = ref_forward(x, torch_params)
    err = float(jnp.max(jnp.abs(out - ref)))
    assert err < 5e-4, f"mismatch vs reference: {err}"
    print("KERNEL_OK")
</pallas_src>

<mosaic_0001>
module attributes {stable_mosaic.version = 11 : i64} {
  func.func @fused_encoder_kernel(%arg0: i32, %arg1: memref<2x16x16xf32, #tpu.memory_space<vmem>>, %arg2: memref<16x128xf32, #tpu.memory_space<vmem>>, %arg3: memref<1x128xf32, #tpu.memory_space<vmem>>, %arg4: memref<16x128xf32, #tpu.memory_space<vmem>>, %arg5: memref<2x128x384xf32, #tpu.memory_space<vmem>>, %arg6: memref<2x1x384xf32, #tpu.memory_space<vmem>>, %arg7: memref<2x128x128xf32, #tpu.memory_space<vmem>>, %arg8: memref<2x1x128xf32, #tpu.memory_space<vmem>>, %arg9: memref<2x1x128xf32, #tpu.memory_space<vmem>>, %arg10: memref<2x1x128xf32, #tpu.memory_space<vmem>>, %arg11: memref<2x128x512xf32, #tpu.memory_space<vmem>>, %arg12: memref<2x1x512xf32, #tpu.memory_space<vmem>>, %arg13: memref<2x512x128xf32, #tpu.memory_space<vmem>>, %arg14: memref<2x1x128xf32, #tpu.memory_space<vmem>>, %arg15: memref<2x1x128xf32, #tpu.memory_space<vmem>>, %arg16: memref<2x1x128xf32, #tpu.memory_space<vmem>>, %arg17: memref<1x2x128xf32, #tpu.memory_space<vmem>>) attributes {dimension_semantics = [#tpu.dimension_semantics<parallel>], iteration_bounds = array<i64: 2>, scalar_prefetch = 0 : i64, scratch_operands = 0 : i64, tpu.core_type = #tpu.core_type<tc>, window_params = [{transform_indices = @transform_0, window_bounds = array<i64: 2, 16, 16>}, {pipeline_mode = #tpu.pipeline_mode<synchronous>, transform_indices = @transform_1, window_bounds = array<i64: 16, 128>}, {pipeline_mode = #tpu.pipeline_mode<synchronous>, transform_indices = @transform_2, window_bounds = array<i64: 1, 128>}, {pipeline_mode = #tpu.pipeline_mode<synchronous>, transform_indices = @transform_3, window_bounds = array<i64: 16, 128>}, {pipeline_mode = #tpu.pipeline_mode<synchronous>, transform_indices = @transform_4, window_bounds = array<i64: 2, 128, 384>}, {pipeline_mode = #tpu.pipeline_mode<synchronous>, transform_indices = @transform_5, window_bounds = array<i64: 2, 1, 384>}, {pipeline_mode = #tpu.pipeline_mode<synchronous>, transform_indices = @transform_6, window_bounds = array<i64: 2, 128, 128>}, {pipeline_mode = #tpu.pipeline_mode<synchronous>, transform_indices = @transform_7, window_bounds = array<i64: 2, 1, 128>}, {pipeline_mode = #tpu.pipeline_mode<synchronous>, transform_indices = @transform_8, window_bounds = array<i64: 2, 1, 128>}, {pipeline_mode = #tpu.pipeline_mode<synchronous>, transform_indices = @transform_9, window_bounds = array<i64: 2, 1, 128>}, {pipeline_mode = #tpu.pipeline_mode<synchronous>, transform_indices = @transform_10, window_bounds = array<i64: 2, 128, 512>}, {pipeline_mode = #tpu.pipeline_mode<synchronous>, transform_indices = @transform_11, window_bounds = array<i64: 2, 1, 512>}, {pipeline_mode = #tpu.pipeline_mode<synchronous>, transform_indices = @transform_12, window_bounds = array<i64: 2, 512, 128>}, {pipeline_mode = #tpu.pipeline_mode<synchronous>, transform_indices = @transform_13, window_bounds = array<i64: 2, 1, 128>}, {pipeline_mode = #tpu.pipeline_mode<synchronous>, transform_indices = @transform_14, window_bounds = array<i64: 2, 1, 128>}, {pipeline_mode = #tpu.pipeline_mode<synchronous>, transform_indices = @transform_15, window_bounds = array<i64: 2, 1, 128>}, {transform_indices = @transform_16, window_bounds = array<i64: 1, 2, 128>}]} {
    %c0 = arith.constant 0 : index
    %c0_0 = arith.constant 0 : index
    %c0_1 = arith.constant 0 : index
    %0 = vector.load %arg1[%c0, %c0_0, %c0_1] : memref<2x16x16xf32, #tpu.memory_space<vmem>>, vector<2x16x16xf32>
    %1 = vector.shape_cast %0 : vector<2x16x16xf32> to vector<32x16xf32>
    %c0_2 = arith.constant 0 : index
    %c0_3 = arith.constant 0 : index
    %2 = vector.load %arg2[%c0_2, %c0_3] : memref<16x128xf32, #tpu.memory_space<vmem>>, vector<16x128xf32>
    %cst = arith.constant dense<0.000000e+00> : vector<32x128xf32>
    %3 = tpu.matmul %1, %2, %cst {dimension_numbers = #tpu.dot_dimension_numbers<[1], [0], [0], [1], [0, 0, 1, 1], [], []>} : vector<32x16xf32>, vector<16x128xf32>, vector<32x128xf32> -> vector<32x128xf32>
    %c0_4 = arith.constant 0 : index
    %c0_5 = arith.constant 0 : index
    %4 = vector.load %arg3[%c0_4, %c0_5] : memref<1x128xf32, #tpu.memory_space<vmem>>, vector<1x128xf32>
    %5 = vector.broadcast %4 : vector<1x128xf32> to vector<32x128xf32>
    %6 = arith.addf %3, %5 : vector<32x128xf32>
    %7 = vector.shape_cast %6 : vector<32x128xf32> to vector<2x16x128xf32>
    %c0_6 = arith.constant 0 : index
    %c0_7 = arith.constant 0 : index
    %8 = vector.load %arg4[%c0_6, %c0_7] : memref<16x128xf32, #tpu.memory_space<vmem>>, vector<16x128xf32>
    %9 = vector.shape_cast %8 : vector<16x128xf32> to vector<1x16x128xf32>
    %10 = vector.broadcast %9 : vector<1x16x128xf32> to vector<2x16x128xf32>
    %11 = arith.addf %7, %10 : vector<2x16x128xf32>
    %12 = vector.shape_cast %11 : vector<2x16x128xf32> to vector<32x128xf32>
    %c0_8 = arith.constant 0 : index
    %c0_9 = arith.constant 0 : index
    %c0_10 = arith.constant 0 : index
    %13 = vector.load %arg5[%c0_8, %c0_9, %c0_10] : memref<2x128x384xf32, #tpu.memory_space<vmem>>, vector<1x128x384xf32>
    %14 = vector.shape_cast %13 : vector<1x128x384xf32> to vector<128x384xf32>
    %c0_11 = arith.constant 0 : index
    %c0_12 = arith.constant 0 : index
    %c0_13 = arith.constant 0 : index
    %15 = vector.load %arg6[%c0_11, %c0_12, %c0_13] : memref<2x1x384xf32, #tpu.memory_space<vmem>>, vector<1x1x384xf32>
    %16 = vector.shape_cast %15 : vector<1x1x384xf32> to vector<1x384xf32>
    %c0_14 = arith.constant 0 : index
    %c0_15 = arith.constant 0 : index
    %c0_16 = arith.constant 0 : index
    %17 = vector.load %arg7[%c0_14, %c0_15, %c0_16] : memref<2x128x128xf32, #tpu.memory_space<vmem>>, vector<1x128x128xf32>
    %18 = vector.shape_cast %17 : vector<1x128x128xf32> to vector<128x128xf32>
    %c0_17 = arith.constant 0 : index
    %c0_18 = arith.constant 0 : index
    %c0_19 = arith.constant 0 : index
    %19 = vector.load %arg8[%c0_17, %c0_18, %c0_19] : memref<2x1x128xf32, #tpu.memory_space<vmem>>, vector<1x1x128xf32>
    %20 = vector.shape_cast %19 : vector<1x1x128xf32> to vector<1x128xf32>
    %c0_20 = arith.constant 0 : index
    %c0_21 = arith.constant 0 : index
    %c0_22 = arith.constant 0 : index
    %21 = vector.load %arg9[%c0_20, %c0_21, %c0_22] : memref<2x1x128xf32, #tpu.memory_space<vmem>>, vector<1x1x128xf32>
    %22 = vector.shape_cast %21 : vector<1x1x128xf32> to vector<1x128xf32>
    %c0_23 = arith.constant 0 : index
    %c0_24 = arith.constant 0 : index
    %c0_25 = arith.constant 0 : index
    %23 = vector.load %arg10[%c0_23, %c0_24, %c0_25] : memref<2x1x128xf32, #tpu.memory_space<vmem>>, vector<1x1x128xf32>
    %24 = vector.shape_cast %23 : vector<1x1x128xf32> to vector<1x128xf32>
    %c0_26 = arith.constant 0 : index
    %c0_27 = arith.constant 0 : index
    %c0_28 = arith.constant 0 : index
    %25 = vector.load %arg11[%c0_26, %c0_27, %c0_28] : memref<2x128x512xf32, #tpu.memory_space<vmem>>, vector<1x128x512xf32>
    %26 = vector.shape_cast %25 : vector<1x128x512xf32> to vector<128x512xf32>
    %c0_29 = arith.constant 0 : index
    %c0_30 = arith.constant 0 : index
    %c0_31 = arith.constant 0 : index
    %27 = vector.load %arg12[%c0_29, %c0_30, %c0_31] : memref<2x1x512xf32, #tpu.memory_space<vmem>>, vector<1x1x512xf32>
    %28 = vector.shape_cast %27 : vector<1x1x512xf32> to vector<1x512xf32>
    %c0_32 = arith.constant 0 : index
    %c0_33 = arith.constant 0 : index
    %c0_34 = arith.constant 0 : index
    %29 = vector.load %arg13[%c0_32, %c0_33, %c0_34] : memref<2x512x128xf32, #tpu.memory_space<vmem>>, vector<1x512x128xf32>
    %30 = vector.shape_cast %29 : vector<1x512x128xf32> to vector<512x128xf32>
    %c0_35 = arith.constant 0 : index
    %c0_36 = arith.constant 0 : index
    %c0_37 = arith.constant 0 : index
    %31 = vector.load %arg14[%c0_35, %c0_36, %c0_37] : memref<2x1x128xf32, #tpu.memory_space<vmem>>, vector<1x1x128xf32>
    %32 = vector.shape_cast %31 : vector<1x1x128xf32> to vector<1x128xf32>
    %c0_38 = arith.constant 0 : index
    %c0_39 = arith.constant 0 : index
    %c0_40 = arith.constant 0 : index
    %33 = vector.load %arg15[%c0_38, %c0_39, %c0_40] : memref<2x1x128xf32, #tpu.memory_space<vmem>>, vector<1x1x128xf32>
    %34 = vector.shape_cast %33 : vector<1x1x128xf32> to vector<1x128xf32>
    %c0_41 = arith.constant 0 : index
    %c0_42 = arith.constant 0 : index
    %c0_43 = arith.constant 0 : index
    %35 = vector.load %arg16[%c0_41, %c0_42, %c0_43] : memref<2x1x128xf32, #tpu.memory_space<vmem>>, vector<1x1x128xf32>
    %36 = vector.shape_cast %35 : vector<1x1x128xf32> to vector<1x128xf32>
    %cst_44 = arith.constant dense<0.000000e+00> : vector<32x384xf32>
    %37 = tpu.matmul %12, %14, %cst_44 {dimension_numbers = #tpu.dot_dimension_numbers<[1], [0], [0], [1], [0, 0, 1, 1], [], []>} : vector<32x128xf32>, vector<128x384xf32>, vector<32x384xf32> -> vector<32x384xf32>
    %38 = vector.broadcast %16 : vector<1x384xf32> to vector<32x384xf32>
    %39 = arith.addf %37, %38 : vector<32x384xf32>
    %40 = vector.shape_cast %39 : vector<32x384xf32> to vector<2x16x384xf32>
    %41 = vector.extract_strided_slice %40 {offsets = [0, 0, 0], sizes = [2, 16, 128], strides = [1, 1, 1]} : vector<2x16x384xf32> to vector<2x16x128xf32>
    %42 = vector.extract_strided_slice %40 {offsets = [0, 0, 128], sizes = [2, 16, 128], strides = [1, 1, 1]} : vector<2x16x384xf32> to vector<2x16x128xf32>
    %43 = vector.extract_strided_slice %40 {offsets = [0, 0, 256], sizes = [2, 16, 128], strides = [1, 1, 1]} : vector<2x16x384xf32> to vector<2x16x128xf32>
    %cst_45 = arith.constant 0.000000e+00 : f32
    %44 = vector.broadcast %cst_45 : f32 to vector<32x128xf32>
    %45 = vector.extract_strided_slice %41 {offsets = [0, 0, 0], sizes = [2, 16, 16], strides = [1, 1, 1]} : vector<2x16x128xf32> to vector<2x16x16xf32>
    %46 = vector.extract_strided_slice %42 {offsets = [0, 0, 0], sizes = [2, 16, 16], strides = [1, 1, 1]} : vector<2x16x128xf32> to vector<2x16x16xf32>
    "tpu.trace_start"() <{level = 10 : i32, message = "bqd,bkd->bqk"}> : () -> ()
    %cst_46 = arith.constant dense<0.000000e+00> : vector<2x16x16xf32>
    %47 = tpu.matmul %45, %46, %cst_46 {dimension_numbers = #tpu.dot_dimension_numbers<[2], [2], [1], [1], [0, 0, 0, 1, 1, 1], [0], [0]>} : vector<2x16x16xf32>, vector<2x16x16xf32>, vector<2x16x16xf32> -> vector<2x16x16xf32>
    "tpu.trace_stop"() : () -> ()
    %cst_47 = arith.constant dense<0xFF800000> : vector<2x16xf32>
    %48 = vector.multi_reduction <maximumf>, %47, %cst_47 [2] : vector<2x16x16xf32> to vector<2x16xf32>
    %49 = vector.shape_cast %48 : vector<2x16xf32> to vector<2x16x1xf32>
    %50 = vector.broadcast %49 : vector<2x16x1xf32> to vector<2x16x16xf32>
    %51 = arith.subf %47, %50 : vector<2x16x16xf32>
    %52 = math.exp %51 : vector<2x16x16xf32>
    %cst_48 = arith.constant dense<0.000000e+00> : vector<2x16xf32>
    %53 = vector.multi_reduction <add>, %52, %cst_48 [2] : vector<2x16x16xf32> to vector<2x16xf32>
    %54 = vector.shape_cast %53 : vector<2x16xf32> to vector<2x16x1xf32>
    %55 = tpu.reciprocal %54 : vector<2x16x1xf32> -> vector<2x16x1xf32>
    %56 = vector.broadcast %55 : vector<2x16x1xf32> to vector<2x16x16xf32>
    %57 = arith.mulf %52, %56 : vector<2x16x16xf32>
    %58 = vector.extract_strided_slice %43 {offsets = [0, 0, 0], sizes = [2, 16, 16], strides = [1, 1, 1]} : vector<2x16x128xf32> to vector<2x16x16xf32>
    "tpu.trace_start"() <{level = 10 : i32, message = "bqk,bkd->bqd"}> : () -> ()
    %cst_49 = arith.constant dense<0.000000e+00> : vector<2x16x16xf32>
    %59 = tpu.matmul %57, %58, %cst_49 {dimension_numbers = #tpu.dot_dimension_numbers<[2], [1], [1], [2], [0, 0, 0, 1, 1, 2], [0], [0]>} : vector<2x16x16xf32>, vector<2x16x16xf32>, vector<2x16x16xf32> -> vector<2x16x16xf32>
    "tpu.trace_stop"() : () -> ()
    %60 = vector.shape_cast %59 : vector<2x16x16xf32> to vector<32x16xf32>
    %61 = vector.extract_strided_slice %18 {offsets = [0, 0], sizes = [16, 128], strides = [1, 1]} : vector<128x128xf32> to vector<16x128xf32>
    %cst_50 = arith.constant dense<0.000000e+00> : vector<32x128xf32>
    %62 = tpu.matmul %60, %61, %cst_50 {dimension_numbers = #tpu.dot_dimension_numbers<[1], [0], [0], [1], [0, 0, 1, 1], [], []>} : vector<32x16xf32>, vector<16x128xf32>, vector<32x128xf32> -> vector<32x128xf32>
    %63 = arith.addf %44, %62 : vector<32x128xf32>
    %64 = vector.extract_strided_slice %41 {offsets = [0, 0, 16], sizes = [2, 16, 16], strides = [1, 1, 1]} : vector<2x16x128xf32> to vector<2x16x16xf32>
    %65 = vector.extract_strided_slice %42 {offsets = [0, 0, 16], sizes = [2, 16, 16], strides = [1, 1, 1]} : vector<2x16x128xf32> to vector<2x16x16xf32>
    "tpu.trace_start"() <{level = 10 : i32, message = "bqd,bkd->bqk"}> : () -> ()
    %cst_51 = arith.constant dense<0.000000e+00> : vector<2x16x16xf32>
    %66 = tpu.matmul %64, %65, %cst_51 {dimension_numbers = #tpu.dot_dimension_numbers<[2], [2], [1], [1], [0, 0, 0, 1, 1, 1], [0], [0]>} : vector<2x16x16xf32>, vector<2x16x16xf32>, vector<2x16x16xf32> -> vector<2x16x16xf32>
    "tpu.trace_stop"() : () -> ()
    %cst_52 = arith.constant dense<0xFF800000> : vector<2x16xf32>
    %67 = vector.multi_reduction <maximumf>, %66, %cst_52 [2] : vector<2x16x16xf32> to vector<2x16xf32>
    %68 = vector.shape_cast %67 : vector<2x16xf32> to vector<2x16x1xf32>
    %69 = vector.broadcast %68 : vector<2x16x1xf32> to vector<2x16x16xf32>
    %70 = arith.subf %66, %69 : vector<2x16x16xf32>
    %71 = math.exp %70 : vector<2x16x16xf32>
    %cst_53 = arith.constant dense<0.000000e+00> : vector<2x16xf32>
    %72 = vector.multi_reduction <add>, %71, %cst_53 [2] : vector<2x16x16xf32> to vector<2x16xf32>
    %73 = vector.shape_cast %72 : vector<2x16xf32> to vector<2x16x1xf32>
    %74 = tpu.reciprocal %73 : vector<2x16x1xf32> -> vector<2x16x1xf32>
    %75 = vector.broadcast %74 : vector<2x16x1xf32> to vector<2x16x16xf32>
    %76 = arith.mulf %71, %75 : vector<2x16x16xf32>
    %77 = vector.extract_strided_slice %43 {offsets = [0, 0, 16], sizes = [2, 16, 16], strides = [1, 1, 1]} : vector<2x16x128xf32> to vector<2x16x16xf32>
    "tpu.trace_start"() <{level = 10 : i32, message = "bqk,bkd->bqd"}> : () -> ()
    %cst_54 = arith.constant dense<0.000000e+00> : vector<2x16x16xf32>
    %78 = tpu.matmul %76, %77, %cst_54 {dimension_numbers = #tpu.dot_dimension_numbers<[2], [1], [1], [2], [0, 0, 0, 1, 1, 2], [0], [0]>} : vector<2x16x16xf32>, vector<2x16x16xf32>, vector<2x16x16xf32> -> vector<2x16x16xf32>
    "tpu.trace_stop"() : () -> ()
    %79 = vector.shape_cast %78 : vector<2x16x16xf32> to vector<32x16xf32>
    %80 = vector.extract_strided_slice %18 {offsets = [16, 0], sizes = [16, 128], strides = [1, 1]} : vector<128x128xf32> to vector<16x128xf32>
    %cst_55 = arith.constant dense<0.000000e+00> : vector<32x128xf32>
    %81 = tpu.matmul %79, %80, %cst_55 {dimension_numbers = #tpu.dot_dimension_numbers<[1], [0], [0], [1], [0, 0, 1, 1], [], []>} : vector<32x16xf32>, vector<16x128xf32>, vector<32x128xf32> -> vector<32x128xf32>
    %82 = arith.addf %63, %81 : vector<32x128xf32>
    %83 = vector.extract_strided_slice %41 {offsets = [0, 0, 32], sizes = [2, 16, 16], strides = [1, 1, 1]} : vector<2x16x128xf32> to vector<2x16x16xf32>
    %84 = vector.extract_strided_slice %42 {offsets = [0, 0, 32], sizes = [2, 16, 16], strides = [1, 1, 1]} : vector<2x16x128xf32> to vector<2x16x16xf32>
    "tpu.trace_start"() <{level = 10 : i32, message = "bqd,bkd->bqk"}> : () -> ()
    %cst_56 = arith.constant dense<0.000000e+00> : vector<2x16x16xf32>
    %85 = tpu.matmul %83, %84, %cst_56 {dimension_numbers = #tpu.dot_dimension_numbers<[2], [2], [1], [1], [0, 0, 0, 1, 1, 1], [0], [0]>} : vector<2x16x16xf32>, vector<2x16x16xf32>, vector<2x16x16xf32> -> vector<2x16x16xf32>
    "tpu.trace_stop"() : () -> ()
    %cst_57 = arith.constant dense<0xFF800000> : vector<2x16xf32>
    %86 = vector.multi_reduction <maximumf>, %85, %cst_57 [2] : vector<2x16x16xf32> to vector<2x16xf32>
    %87 = vector.shape_cast %86 : vector<2x16xf32> to vector<2x16x1xf32>
    %88 = vector.broadcast %87 : vector<2x16x1xf32> to vector<2x16x16xf32>
    %89 = arith.subf %85, %88 : vector<2x16x16xf32>
    %90 = math.exp %89 : vector<2x16x16xf32>
    %cst_58 = arith.constant dense<0.000000e+00> : vector<2x16xf32>
    %91 = vector.multi_reduction <add>, %90, %cst_58 [2] : vector<2x16x16xf32> to vector<2x16xf32>
    %92 = vector.shape_cast %91 : vector<2x16xf32> to vector<2x16x1xf32>
    %93 = tpu.reciprocal %92 : vector<2x16x1xf32> -> vector<2x16x1xf32>
    %94 = vector.broadcast %93 : vector<2x16x1xf32> to vector<2x16x16xf32>
    %95 = arith.mulf %90, %94 : vector<2x16x16xf32>
    %96 = vector.extract_strided_slice %43 {offsets = [0, 0, 32], sizes = [2, 16, 16], strides = [1, 1, 1]} : vector<2x16x128xf32> to vector<2x16x16xf32>
    "tpu.trace_start"() <{level = 10 : i32, message = "bqk,bkd->bqd"}> : () -> ()
    %cst_59 = arith.constant dense<0.000000e+00> : vector<2x16x16xf32>
    %97 = tpu.matmul %95, %96, %cst_59 {dimension_numbers = #tpu.dot_dimension_numbers<[2], [1], [1], [2], [0, 0, 0, 1, 1, 2], [0], [0]>} : vector<2x16x16xf32>, vector<2x16x16xf32>, vector<2x16x16xf32> -> vector<2x16x16xf32>
    "tpu.trace_stop"() : () -> ()
    %98 = vector.shape_cast %97 : vector<2x16x16xf32> to vector<32x16xf32>
    %99 = vector.extract_strided_slice %18 {offsets = [32, 0], sizes = [16, 128], strides = [1, 1]} : vector<128x128xf32> to vector<16x128xf32>
    %cst_60 = arith.constant dense<0.000000e+00> : vector<32x128xf32>
    %100 = tpu.matmul %98, %99, %cst_60 {dimension_numbers = #tpu.dot_dimension_numbers<[1], [0], [0], [1], [0, 0, 1, 1], [], []>} : vector<32x16xf32>, vector<16x128xf32>, vector<32x128xf32> -> vector<32x128xf32>
    %101 = arith.addf %82, %100 : vector<32x128xf32>
    %102 = vector.extract_strided_slice %41 {offsets = [0, 0, 48], sizes = [2, 16, 16], strides = [1, 1, 1]} : vector<2x16x128xf32> to vector<2x16x16xf32>
    %103 = vector.extract_strided_slice %42 {offsets = [0, 0, 48], sizes = [2, 16, 16], strides = [1, 1, 1]} : vector<2x16x128xf32> to vector<2x16x16xf32>
    "tpu.trace_start"() <{level = 10 : i32, message = "bqd,bkd->bqk"}> : () -> ()
    %cst_61 = arith.constant dense<0.000000e+00> : vector<2x16x16xf32>
    %104 = tpu.matmul %102, %103, %cst_61 {dimension_numbers = #tpu.dot_dimension_numbers<[2], [2], [1], [1], [0, 0, 0, 1, 1, 1], [0], [0]>} : vector<2x16x16xf32>, vector<2x16x16xf32>, vector<2x16x16xf32> -> vector<2x16x16xf32>
    "tpu.trace_stop"() : () -> ()
    %cst_62 = arith.constant dense<0xFF800000> : vector<2x16xf32>
    %105 = vector.multi_reduction <maximumf>, %104, %cst_62 [2] : vector<2x16x16xf32> to vector<2x16xf32>
    %106 = vector.shape_cast %105 : vector<2x16xf32> to vector<2x16x1xf32>
    %107 = vector.broadcast %106 : vector<2x16x1xf32> to vector<2x16x16xf32>
    %108 = arith.subf %104, %107 : vector<2x16x16xf32>
    %109 = math.exp %108 : vector<2x16x16xf32>
    %cst_63 = arith.constant dense<0.000000e+00> : vector<2x16xf32>
    %110 = vector.multi_reduction <add>, %109, %cst_63 [2] : vector<2x16x16xf32> to vector<2x16xf32>
    %111 = vector.shape_cast %110 : vector<2x16xf32> to vector<2x16x1xf32>
    %112 = tpu.reciprocal %111 : vector<2x16x1xf32> -> vector<2x16x1xf32>
    %113 = vector.broadcast %112 : vector<2x16x1xf32> to vector<2x16x16xf32>
    %114 = arith.mulf %109, %113 : vector<2x16x16xf32>
    %115 = vector.extract_strided_slice %43 {offsets = [0, 0, 48], sizes = [2, 16, 16], strides = [1, 1, 1]} : vector<2x16x128xf32> to vector<2x16x16xf32>
    "tpu.trace_start"() <{level = 10 : i32, message = "bqk,bkd->bqd"}> : () -> ()
    %cst_64 = arith.constant dense<0.000000e+00> : vector<2x16x16xf32>
    %116 = tpu.matmul %114, %115, %cst_64 {dimension_numbers = #tpu.dot_dimension_numbers<[2], [1], [1], [2], [0, 0, 0, 1, 1, 2], [0], [0]>} : vector<2x16x16xf32>, vector<2x16x16xf32>, vector<2x16x16xf32> -> vector<2x16x16xf32>
    "tpu.trace_stop"() : () -> ()
    %117 = vector.shape_cast %116 : vector<2x16x16xf32> to vector<32x16xf32>
    %118 = vector.extract_strided_slice %18 {offsets = [48, 0], sizes = [16, 128], strides = [1, 1]} : vector<128x128xf32> to vector<16x128xf32>
    %cst_65 = arith.constant dense<0.000000e+00> : vector<32x128xf32>
    %119 = tpu.matmul %117, %118, %cst_65 {dimension_numbers = #tpu.dot_dimension_numbers<[1], [0], [0], [1], [0, 0, 1, 1], [], []>} : vector<32x16xf32>, vector<16x128xf32>, vector<32x128xf32> -> vector<32x128xf32>
    %120 = arith.addf %101, %119 : vector<32x128xf32>
    %121 = vector.extract_strided_slice %41 {offsets = [0, 0, 64], sizes = [2, 16, 16], strides = [1, 1, 1]} : vector<2x16x128xf32> to vector<2x16x16xf32>
    %122 = vector.extract_strided_slice %42 {offsets = [0, 0, 64], sizes = [2, 16, 16], strides = [1, 1, 1]} : vector<2x16x128xf32> to vector<2x16x16xf32>
    "tpu.trace_start"() <{level = 10 : i32, message = "bqd,bkd->bqk"}> : () -> ()
    %cst_66 = arith.constant dense<0.000000e+00> : vector<2x16x16xf32>
    %123 = tpu.matmul %121, %122, %cst_66 {dimension_numbers = #tpu.dot_dimension_numbers<[2], [2], [1], [1], [0, 0, 0, 1, 1, 1], [0], [0]>} : vector<2x16x16xf32>, vector<2x16x16xf32>, vector<2x16x16xf32> -> vector<2x16x16xf32>
    "tpu.trace_stop"() : () -> ()
    %cst_67 = arith.constant dense<0xFF800000> : vector<2x16xf32>
    %124 = vector.multi_reduction <maximumf>, %123, %cst_67 [2] : vector<2x16x16xf32> to vector<2x16xf32>
    %125 = vector.shape_cast %124 : vector<2x16xf32> to vector<2x16x1xf32>
    %126 = vector.broadcast %125 : vector<2x16x1xf32> to vector<2x16x16xf32>
    %127 = arith.subf %123, %126 : vector<2x16x16xf32>
    %128 = math.exp %127 : vector<2x16x16xf32>
    %cst_68 = arith.constant dense<0.000000e+00> : vector<2x16xf32>
    %129 = vector.multi_reduction <add>, %128, %cst_68 [2] : vector<2x16x16xf32> to vector<2x16xf32>
    %130 = vector.shape_cast %129 : vector<2x16xf32> to vector<2x16x1xf32>
    %131 = tpu.reciprocal %130 : vector<2x16x1xf32> -> vector<2x16x1xf32>
    %132 = vector.broadcast %131 : vector<2x16x1xf32> to vector<2x16x16xf32>
    %133 = arith.mulf %128, %132 : vector<2x16x16xf32>
    %134 = vector.extract_strided_slice %43 {offsets = [0, 0, 64], sizes = [2, 16, 16], strides = [1, 1, 1]} : vector<2x16x128xf32> to vector<2x16x16xf32>
    "tpu.trace_start"() <{level = 10 : i32, message = "bqk,bkd->bqd"}> : () -> ()
    %cst_69 = arith.constant dense<0.000000e+00> : vector<2x16x16xf32>
    %135 = tpu.matmul %133, %134, %cst_69 {dimension_numbers = #tpu.dot_dimension_numbers<[2], [1], [1], [2], [0, 0, 0, 1, 1, 2], [0], [0]>} : vector<2x16x16xf32>, vector<2x16x16xf32>, vector<2x16x16xf32> -> vector<2x16x16xf32>
    "tpu.trace_stop"() : () -> ()
    %136 = vector.shape_cast %135 : vector<2x16x16xf32> to vector<32x16xf32>
    %137 = vector.extract_strided_slice %18 {offsets = [64, 0], sizes = [16, 128], strides = [1, 1]} : vector<128x128xf32> to vector<16x128xf32>
    %cst_70 = arith.constant dense<0.000000e+00> : vector<32x128xf32>
    %138 = tpu.matmul %136, %137, %cst_70 {dimension_numbers = #tpu.dot_dimension_numbers<[1], [0], [0], [1], [0, 0, 1, 1], [], []>} : vector<32x16xf32>, vector<16x128xf32>, vector<32x128xf32> -> vector<32x128xf32>
    %139 = arith.addf %120, %138 : vector<32x128xf32>
    %140 = vector.extract_strided_slice %41 {offsets = [0, 0, 80], sizes = [2, 16, 16], strides = [1, 1, 1]} : vector<2x16x128xf32> to vector<2x16x16xf32>
    %141 = vector.extract_strided_slice %42 {offsets = [0, 0, 80], sizes = [2, 16, 16], strides = [1, 1, 1]} : vector<2x16x128xf32> to vector<2x16x16xf32>
    "tpu.trace_start"() <{level = 10 : i32, message = "bqd,bkd->bqk"}> : () -> ()
    %cst_71 = arith.constant dense<0.000000e+00> : vector<2x16x16xf32>
    %142 = tpu.matmul %140, %141, %cst_71 {dimension_numbers = #tpu.dot_dimension_numbers<[2], [2], [1], [1], [0, 0, 0, 1, 1, 1], [0], [0]>} : vector<2x16x16xf32>, vector<2x16x16xf32>, vector<2x16x16xf32> -> vector<2x16x16xf32>
    "tpu.trace_stop"() : () -> ()
    %cst_72 = arith.constant dense<0xFF800000> : vector<2x16xf32>
    %143 = vector.multi_reduction <maximumf>, %142, %cst_72 [2] : vector<2x16x16xf32> to vector<2x16xf32>
    %144 = vector.shape_cast %143 : vector<2x16xf32> to vector<2x16x1xf32>
    %145 = vector.broadcast %144 : vector<2x16x1xf32> to vector<2x16x16xf32>
    %146 = arith.subf %142, %145 : vector<2x16x16xf32>
    %147 = math.exp %146 : vector<2x16x16xf32>
    %cst_73 = arith.constant dense<0.000000e+00> : vector<2x16xf32>
    %148 = vector.multi_reduction <add>, %147, %cst_73 [2] : vector<2x16x16xf32> to vector<2x16xf32>
    %149 = vector.shape_cast %148 : vector<2x16xf32> to vector<2x16x1xf32>
    %150 = tpu.reciprocal %149 : vector<2x16x1xf32> -> vector<2x16x1xf32>
    %151 = vector.broadcast %150 : vector<2x16x1xf32> to vector<2x16x16xf32>
    %152 = arith.mulf %147, %151 : vector<2x16x16xf32>
    %153 = vector.extract_strided_slice %43 {offsets = [0, 0, 80], sizes = [2, 16, 16], strides = [1, 1, 1]} : vector<2x16x128xf32> to vector<2x16x16xf32>
    "tpu.trace_start"() <{level = 10 : i32, message = "bqk,bkd->bqd"}> : () -> ()
    %cst_74 = arith.constant dense<0.000000e+00> : vector<2x16x16xf32>
    %154 = tpu.matmul %152, %153, %cst_74 {dimension_numbers = #tpu.dot_dimension_numbers<[2], [1], [1], [2], [0, 0, 0, 1, 1, 2], [0], [0]>} : vector<2x16x16xf32>, vector<2x16x16xf32>, vector<2x16x16xf32> -> vector<2x16x16xf32>
    "tpu.trace_stop"() : () -> ()
    %155 = vector.shape_cast %154 : vector<2x16x16xf32> to vector<32x16xf32>
    %156 = vector.extract_strided_slice %18 {offsets = [80, 0], sizes = [16, 128], strides = [1, 1]} : vector<128x128xf32> to vector<16x128xf32>
    %cst_75 = arith.constant dense<0.000000e+00> : vector<32x128xf32>
    %157 = tpu.matmul %155, %156, %cst_75 {dimension_numbers = #tpu.dot_dimension_numbers<[1], [0], [0], [1], [0, 0, 1, 1], [], []>} : vector<32x16xf32>, vector<16x128xf32>, vector<32x128xf32> -> vector<32x128xf32>
    %158 = arith.addf %139, %157 : vector<32x128xf32>
    %159 = vector.extract_strided_slice %41 {offsets = [0, 0, 96], sizes = [2, 16, 16], strides = [1, 1, 1]} : vector<2x16x128xf32> to vector<2x16x16xf32>
    %160 = vector.extract_strided_slice %42 {offsets = [0, 0, 96], sizes = [2, 16, 16], strides = [1, 1, 1]} : vector<2x16x128xf32> to vector<2x16x16xf32>
    "tpu.trace_start"() <{level = 10 : i32, message = "bqd,bkd->bqk"}> : () -> ()
    %cst_76 = arith.constant dense<0.000000e+00> : vector<2x16x16xf32>
    %161 = tpu.matmul %159, %160, %cst_76 {dimension_numbers = #tpu.dot_dimension_numbers<[2], [2], [1], [1], [0, 0, 0, 1, 1, 1], [0], [0]>} : vector<2x16x16xf32>, vector<2x16x16xf32>, vector<2x16x16xf32> -> vector<2x16x16xf32>
    "tpu.trace_stop"() : () -> ()
    %cst_77 = arith.constant dense<0xFF800000> : vector<2x16xf32>
    %162 = vector.multi_reduction <maximumf>, %161, %cst_77 [2] : vector<2x16x16xf32> to vector<2x16xf32>
    %163 = vector.shape_cast %162 : vector<2x16xf32> to vector<2x16x1xf32>
    %164 = vector.broadcast %163 : vector<2x16x1xf32> to vector<2x16x16xf32>
    %165 = arith.subf %161, %164 : vector<2x16x16xf32>
    %166 = math.exp %165 : vector<2x16x16xf32>
    %cst_78 = arith.constant dense<0.000000e+00> : vector<2x16xf32>
    %167 = vector.multi_reduction <add>, %166, %cst_78 [2] : vector<2x16x16xf32> to vector<2x16xf32>
    %168 = vector.shape_cast %167 : vector<2x16xf32> to vector<2x16x1xf32>
    %169 = tpu.reciprocal %168 : vector<2x16x1xf32> -> vector<2x16x1xf32>
    %170 = vector.broadcast %169 : vector<2x16x1xf32> to vector<2x16x16xf32>
    %171 = arith.mulf %166, %170 : vector<2x16x16xf32>
    %172 = vector.extract_strided_slice %43 {offsets = [0, 0, 96], sizes = [2, 16, 16], strides = [1, 1, 1]} : vector<2x16x128xf32> to vector<2x16x16xf32>
    "tpu.trace_start"() <{level = 10 : i32, message = "bqk,bkd->bqd"}> : () -> ()
    %cst_79 = arith.constant dense<0.000000e+00> : vector<2x16x16xf32>
    %173 = tpu.matmul %171, %172, %cst_79 {dimension_numbers = #tpu.dot_dimension_numbers<[2], [1], [1], [2], [0, 0, 0, 1, 1, 2], [0], [0]>} : vector<2x16x16xf32>, vector<2x16x16xf32>, vector<2x16x16xf32> -> vector<2x16x16xf32>
    "tpu.trace_stop"() : () -> ()
    %174 = vector.shape_cast %173 : vector<2x16x16xf32> to vector<32x16xf32>
    %175 = vector.extract_strided_slice %18 {offsets = [96, 0], sizes = [16, 128], strides = [1, 1]} : vector<128x128xf32> to vector<16x128xf32>
    %cst_80 = arith.constant dense<0.000000e+00> : vector<32x128xf32>
    %176 = tpu.matmul %174, %175, %cst_80 {dimension_numbers = #tpu.dot_dimension_numbers<[1], [0], [0], [1], [0, 0, 1, 1], [], []>} : vector<32x16xf32>, vector<16x128xf32>, vector<32x128xf32> -> vector<32x128xf32>
    %177 = arith.addf %158, %176 : vector<32x128xf32>
    %178 = vector.extract_strided_slice %41 {offsets = [0, 0, 112], sizes = [2, 16, 16], strides = [1, 1, 1]} : vector<2x16x128xf32> to vector<2x16x16xf32>
    %179 = vector.extract_strided_slice %42 {offsets = [0, 0, 112], sizes = [2, 16, 16], strides = [1, 1, 1]} : vector<2x16x128xf32> to vector<2x16x16xf32>
    "tpu.trace_start"() <{level = 10 : i32, message = "bqd,bkd->bqk"}> : () -> ()
    %cst_81 = arith.constant dense<0.000000e+00> : vector<2x16x16xf32>
    %180 = tpu.matmul %178, %179, %cst_81 {dimension_numbers = #tpu.dot_dimension_numbers<[2], [2], [1], [1], [0, 0, 0, 1, 1, 1], [0], [0]>} : vector<2x16x16xf32>, vector<2x16x16xf32>, vector<2x16x16xf32> -> vector<2x16x16xf32>
    "tpu.trace_stop"() : () -> ()
    %cst_82 = arith.constant dense<0xFF800000> : vector<2x16xf32>
    %181 = vector.multi_reduction <maximumf>, %180, %cst_82 [2] : vector<2x16x16xf32> to vector<2x16xf32>
    %182 = vector.shape_cast %181 : vector<2x16xf32> to vector<2x16x1xf32>
    %183 = vector.broadcast %182 : vector<2x16x1xf32> to vector<2x16x16xf32>
    %184 = arith.subf %180, %183 : vector<2x16x16xf32>
    %185 = math.exp %184 : vector<2x16x16xf32>
    %cst_83 = arith.constant dense<0.000000e+00> : vector<2x16xf32>
    %186 = vector.multi_reduction <add>, %185, %cst_83 [2] : vector<2x16x16xf32> to vector<2x16xf32>
    %187 = vector.shape_cast %186 : vector<2x16xf32> to vector<2x16x1xf32>
    %188 = tpu.reciprocal %187 : vector<2x16x1xf32> -> vector<2x16x1xf32>
    %189 = vector.broadcast %188 : vector<2x16x1xf32> to vector<2x16x16xf32>
    %190 = arith.mulf %185, %189 : vector<2x16x16xf32>
    %191 = vector.extract_strided_slice %43 {offsets = [0, 0, 112], sizes = [2, 16, 16], strides = [1, 1, 1]} : vector<2x16x128xf32> to vector<2x16x16xf32>
    "tpu.trace_start"() <{level = 10 : i32, message = "bqk,bkd->bqd"}> : () -> ()
    %cst_84 = arith.constant dense<0.000000e+00> : vector<2x16x16xf32>
    %192 = tpu.matmul %190, %191, %cst_84 {dimension_numbers = #tpu.dot_dimension_numbers<[2], [1], [1], [2], [0, 0, 0, 1, 1, 2], [0], [0]>} : vector<2x16x16xf32>, vector<2x16x16xf32>, vector<2x16x16xf32> -> vector<2x16x16xf32>
    "tpu.trace_stop"() : () -> ()
    %193 = vector.shape_cast %192 : vector<2x16x16xf32> to vector<32x16xf32>
    %194 = vector.extract_strided_slice %18 {offsets = [112, 0], sizes = [16, 128], strides = [1, 1]} : vector<128x128xf32> to vector<16x128xf32>
    %cst_85 = arith.constant dense<0.000000e+00> : vector<32x128xf32>
    %195 = tpu.matmul %193, %194, %cst_85 {dimension_numbers = #tpu.dot_dimension_numbers<[1], [0], [0], [1], [0, 0, 1, 1], [], []>} : vector<32x16xf32>, vector<16x128xf32>, vector<32x128xf32> -> vector<32x128xf32>
    %196 = arith.addf %177, %195 : vector<32x128xf32>
    %197 = vector.broadcast %20 : vector<1x128xf32> to vector<32x128xf32>
    %198 = arith.addf %196, %197 : vector<32x128xf32>
    %199 = arith.addf %12, %198 : vector<32x128xf32>
    %cst_86 = arith.constant dense<0.000000e+00> : vector<32xf32>
    %200 = vector.multi_reduction <add>, %199, %cst_86 [1] : vector<32x128xf32> to vector<32xf32>
    %201 = vector.shape_cast %200 : vector<32xf32> to vector<32x1xf32>
    %cst_87 = arith.constant 1.280000e+02 : f32
    %202 = vector.broadcast %cst_87 : f32 to vector<32x1xf32>
    %203 = arith.divf %201, %202 : vector<32x1xf32>
    %204 = vector.broadcast %203 : vector<32x1xf32> to vector<32x128xf32>
    %205 = arith.subf %199, %204 : vector<32x128xf32>
    %206 = arith.mulf %205, %205 : vector<32x128xf32>
    %cst_88 = arith.constant dense<0.000000e+00> : vector<32xf32>
    %207 = vector.multi_reduction <add>, %206, %cst_88 [1] : vector<32x128xf32> to vector<32xf32>
    %208 = vector.shape_cast %207 : vector<32xf32> to vector<32x1xf32>
    %cst_89 = arith.constant 1.280000e+02 : f32
    %209 = vector.broadcast %cst_89 : f32 to vector<32x1xf32>
    %210 = arith.divf %208, %209 : vector<32x1xf32>
    %211 = vector.broadcast %203 : vector<32x1xf32> to vector<32x128xf32>
    %212 = arith.subf %199, %211 : vector<32x128xf32>
    %cst_90 = arith.constant 9.99999974E-6 : f32
    %213 = vector.broadcast %cst_90 : f32 to vector<32x1xf32>
    %214 = arith.addf %210, %213 : vector<32x1xf32>
    %215 = math.rsqrt %214 : vector<32x1xf32>
    %216 = vector.broadcast %215 : vector<32x1xf32> to vector<32x128xf32>
    %217 = arith.mulf %212, %216 : vector<32x128xf32>
    %218 = vector.broadcast %22 : vector<1x128xf32> to vector<32x128xf32>
    %219 = arith.mulf %217, %218 : vector<32x128xf32>
    %220 = vector.broadcast %24 : vector<1x128xf32> to vector<32x128xf32>
    %221 = arith.addf %219, %220 : vector<32x128xf32>
    %cst_91 = arith.constant dense<0.000000e+00> : vector<32x512xf32>
    %222 = tpu.matmul %221, %26, %cst_91 {dimension_numbers = #tpu.dot_dimension_numbers<[1], [0], [0], [1], [0, 0, 1, 1], [], []>} : vector<32x128xf32>, vector<128x512xf32>, vector<32x512xf32> -> vector<32x512xf32>
    %223 = vector.broadcast %28 : vector<1x512xf32> to vector<32x512xf32>
    %224 = arith.addf %222, %223 : vector<32x512xf32>
    %cst_92 = arith.constant 0.000000e+00 : f32
    %225 = vector.broadcast %cst_92 : f32 to vector<32x512xf32>
    %226 = arith.maximumf %224, %225 : vector<32x512xf32>
    %cst_93 = arith.constant dense<0.000000e+00> : vector<32x128xf32>
    %227 = tpu.matmul %226, %30, %cst_93 {dimension_numbers = #tpu.dot_dimension_numbers<[1], [0], [0], [1], [0, 0, 1, 1], [], []>} : vector<32x512xf32>, vector<512x128xf32>, vector<32x128xf32> -> vector<32x128xf32>
    %228 = vector.broadcast %32 : vector<1x128xf32> to vector<32x128xf32>
    %229 = arith.addf %227, %228 : vector<32x128xf32>
    %230 = arith.addf %221, %229 : vector<32x128xf32>
    %cst_94 = arith.constant dense<0.000000e+00> : vector<32xf32>
    %231 = vector.multi_reduction <add>, %230, %cst_94 [1] : vector<32x128xf32> to vector<32xf32>
    %232 = vector.shape_cast %231 : vector<32xf32> to vector<32x1xf32>
    %cst_95 = arith.constant 1.280000e+02 : f32
    %233 = vector.broadcast %cst_95 : f32 to vector<32x1xf32>
    %234 = arith.divf %232, %233 : vector<32x1xf32>
    %235 = vector.broadcast %234 : vector<32x1xf32> to vector<32x128xf32>
    %236 = arith.subf %230, %235 : vector<32x128xf32>
    %237 = arith.mulf %236, %236 : vector<32x128xf32>
    %cst_96 = arith.constant dense<0.000000e+00> : vector<32xf32>
    %238 = vector.multi_reduction <add>, %237, %cst_96 [1] : vector<32x128xf32> to vector<32xf32>
    %239 = vector.shape_cast %238 : vector<32xf32> to vector<32x1xf32>
    %cst_97 = arith.constant 1.280000e+02 : f32
    %240 = vector.broadcast %cst_97 : f32 to vector<32x1xf32>
    %241 = arith.divf %239, %240 : vector<32x1xf32>
    %242 = vector.broadcast %234 : vector<32x1xf32> to vector<32x128xf32>
    %243 = arith.subf %230, %242 : vector<32x128xf32>
    %cst_98 = arith.constant 9.99999974E-6 : f32
    %244 = vector.broadcast %cst_98 : f32 to vector<32x1xf32>
    %245 = arith.addf %241, %244 : vector<32x1xf32>
    %246 = math.rsqrt %245 : vector<32x1xf32>
    %247 = vector.broadcast %246 : vector<32x1xf32> to vector<32x128xf32>
    %248 = arith.mulf %243, %247 : vector<32x128xf32>
    %249 = vector.broadcast %34 : vector<1x128xf32> to vector<32x128xf32>
    %250 = arith.mulf %248, %249 : vector<32x128xf32>
    %251 = vector.broadcast %36 : vector<1x128xf32> to vector<32x128xf32>
    %252 = arith.addf %250, %251 : vector<32x128xf32>
    %c1 = arith.constant 1 : index
    %c0_99 = arith.constant 0 : index
    %c0_100 = arith.constant 0 : index
    %253 = vector.load %arg5[%c1, %c0_99, %c0_100] : memref<2x128x384xf32, #tpu.memory_space<vmem>>, vector<1x128x384xf32>
    %254 = vector.shape_cast %253 : vector<1x128x384xf32> to vector<128x384xf32>
    %c1_101 = arith.constant 1 : index
    %c0_102 = arith.constant 0 : index
    %c0_103 = arith.constant 0 : index
    %255 = vector.load %arg6[%c1_101, %c0_102, %c0_103] : memref<2x1x384xf32, #tpu.memory_space<vmem>>, vector<1x1x384xf32>
    %256 = vector.shape_cast %255 : vector<1x1x384xf32> to vector<1x384xf32>
    %c1_104 = arith.constant 1 : index
    %c0_105 = arith.constant 0 : index
    %c0_106 = arith.constant 0 : index
    %257 = vector.load %arg7[%c1_104, %c0_105, %c0_106] : memref<2x128x128xf32, #tpu.memory_space<vmem>>, vector<1x128x128xf32>
    %258 = vector.shape_cast %257 : vector<1x128x128xf32> to vector<128x128xf32>
    %c1_107 = arith.constant 1 : index
    %c0_108 = arith.constant 0 : index
    %c0_109 = arith.constant 0 : index
    %259 = vector.load %arg8[%c1_107, %c0_108, %c0_109] : memref<2x1x128xf32, #tpu.memory_space<vmem>>, vector<1x1x128xf32>
    %260 = vector.shape_cast %259 : vector<1x1x128xf32> to vector<1x128xf32>
    %c1_110 = arith.constant 1 : index
    %c0_111 = arith.constant 0 : index
    %c0_112 = arith.constant 0 : index
    %261 = vector.load %arg9[%c1_110, %c0_111, %c0_112] : memref<2x1x128xf32, #tpu.memory_space<vmem>>, vector<1x1x128xf32>
    %262 = vector.shape_cast %261 : vector<1x1x128xf32> to vector<1x128xf32>
    %c1_113 = arith.constant 1 : index
    %c0_114 = arith.constant 0 : index
    %c0_115 = arith.constant 0 : index
    %263 = vector.load %arg10[%c1_113, %c0_114, %c0_115] : memref<2x1x128xf32, #tpu.memory_space<vmem>>, vector<1x1x128xf32>
    %264 = vector.shape_cast %263 : vector<1x1x128xf32> to vector<1x128xf32>
    %c1_116 = arith.constant 1 : index
    %c0_117 = arith.constant 0 : index
    %c0_118 = arith.constant 0 : index
    %265 = vector.load %arg11[%c1_116, %c0_117, %c0_118] : memref<2x128x512xf32, #tpu.memory_space<vmem>>, vector<1x128x512xf32>
    %266 = vector.shape_cast %265 : vector<1x128x512xf32> to vector<128x512xf32>
    %c1_119 = arith.constant 1 : index
    %c0_120 = arith.constant 0 : index
    %c0_121 = arith.constant 0 : index
    %267 = vector.load %arg12[%c1_119, %c0_120, %c0_121] : memref<2x1x512xf32, #tpu.memory_space<vmem>>, vector<1x1x512xf32>
    %268 = vector.shape_cast %267 : vector<1x1x512xf32> to vector<1x512xf32>
    %c1_122 = arith.constant 1 : index
    %c0_123 = arith.constant 0 : index
    %c0_124 = arith.constant 0 : index
    %269 = vector.load %arg13[%c1_122, %c0_123, %c0_124] : memref<2x512x128xf32, #tpu.memory_space<vmem>>, vector<1x512x128xf32>
    %270 = vector.shape_cast %269 : vector<1x512x128xf32> to vector<512x128xf32>
    %c1_125 = arith.constant 1 : index
    %c0_126 = arith.constant 0 : index
    %c0_127 = arith.constant 0 : index
    %271 = vector.load %arg14[%c1_125, %c0_126, %c0_127] : memref<2x1x128xf32, #tpu.memory_space<vmem>>, vector<1x1x128xf32>
    %272 = vector.shape_cast %271 : vector<1x1x128xf32> to vector<1x128xf32>
    %c1_128 = arith.constant 1 : index
    %c0_129 = arith.constant 0 : index
    %c0_130 = arith.constant 0 : index
    %273 = vector.load %arg15[%c1_128, %c0_129, %c0_130] : memref<2x1x128xf32, #tpu.memory_space<vmem>>, vector<1x1x128xf32>
    %274 = vector.shape_cast %273 : vector<1x1x128xf32> to vector<1x128xf32>
    %c1_131 = arith.constant 1 : index
    %c0_132 = arith.constant 0 : index
    %c0_133 = arith.constant 0 : index
    %275 = vector.load %arg16[%c1_131, %c0_132, %c0_133] : memref<2x1x128xf32, #tpu.memory_space<vmem>>, vector<1x1x128xf32>
    %276 = vector.shape_cast %275 : vector<1x1x128xf32> to vector<1x128xf32>
    %cst_134 = arith.constant dense<0.000000e+00> : vector<32x384xf32>
    %277 = tpu.matmul %252, %254, %cst_134 {dimension_numbers = #tpu.dot_dimension_numbers<[1], [0], [0], [1], [0, 0, 1, 1], [], []>} : vector<32x128xf32>, vector<128x384xf32>, vector<32x384xf32> -> vector<32x384xf32>
    %278 = vector.broadcast %256 : vector<1x384xf32> to vector<32x384xf32>
    %279 = arith.addf %277, %278 : vector<32x384xf32>
    %280 = vector.shape_cast %279 : vector<32x384xf32> to vector<2x16x384xf32>
    %281 = vector.extract_strided_slice %280 {offsets = [0, 0, 0], sizes = [2, 16, 128], strides = [1, 1, 1]} : vector<2x16x384xf32> to vector<2x16x128xf32>
    %282 = vector.extract_strided_slice %280 {offsets = [0, 0, 128], sizes = [2, 16, 128], strides = [1, 1, 1]} : vector<2x16x384xf32> to vector<2x16x128xf32>
    %283 = vector.extract_strided_slice %280 {offsets = [0, 0, 256], sizes = [2, 16, 128], strides = [1, 1, 1]} : vector<2x16x384xf32> to vector<2x16x128xf32>
    %cst_135 = arith.constant 0.000000e+00 : f32
    %284 = vector.broadcast %cst_135 : f32 to vector<32x128xf32>
    %285 = vector.extract_strided_slice %281 {offsets = [0, 0, 0], sizes = [2, 16, 16], strides = [1, 1, 1]} : vector<2x16x128xf32> to vector<2x16x16xf32>
    %286 = vector.extract_strided_slice %282 {offsets = [0, 0, 0], sizes = [2, 16, 16], strides = [1, 1, 1]} : vector<2x16x128xf32> to vector<2x16x16xf32>
    "tpu.trace_start"() <{level = 10 : i32, message = "bqd,bkd->bqk"}> : () -> ()
    %cst_136 = arith.constant dense<0.000000e+00> : vector<2x16x16xf32>
    %287 = tpu.matmul %285, %286, %cst_136 {dimension_numbers = #tpu.dot_dimension_numbers<[2], [2], [1], [1], [0, 0, 0, 1, 1, 1], [0], [0]>} : vector<2x16x16xf32>, vector<2x16x16xf32>, vector<2x16x16xf32> -> vector<2x16x16xf32>
    "tpu.trace_stop"() : () -> ()
    %cst_137 = arith.constant dense<0xFF800000> : vector<2x16xf32>
    %288 = vector.multi_reduction <maximumf>, %287, %cst_137 [2] : vector<2x16x16xf32> to vector<2x16xf32>
    %289 = vector.shape_cast %288 : vector<2x16xf32> to vector<2x16x1xf32>
    %290 = vector.broadcast %289 : vector<2x16x1xf32> to vector<2x16x16xf32>
    %291 = arith.subf %287, %290 : vector<2x16x16xf32>
    %292 = math.exp %291 : vector<2x16x16xf32>
    %cst_138 = arith.constant dense<0.000000e+00> : vector<2x16xf32>
    %293 = vector.multi_reduction <add>, %292, %cst_138 [2] : vector<2x16x16xf32> to vector<2x16xf32>
    %294 = vector.shape_cast %293 : vector<2x16xf32> to vector<2x16x1xf32>
    %295 = tpu.reciprocal %294 : vector<2x16x1xf32> -> vector<2x16x1xf32>
    %296 = vector.broadcast %295 : vector<2x16x1xf32> to vector<2x16x16xf32>
    %297 = arith.mulf %292, %296 : vector<2x16x16xf32>
    %298 = vector.extract_strided_slice %283 {offsets = [0, 0, 0], sizes = [2, 16, 16], strides = [1, 1, 1]} : vector<2x16x128xf32> to vector<2x16x16xf32>
    "tpu.trace_start"() <{level = 10 : i32, message = "bqk,bkd->bqd"}> : () -> ()
    %cst_139 = arith.constant dense<0.000000e+00> : vector<2x16x16xf32>
    %299 = tpu.matmul %297, %298, %cst_139 {dimension_numbers = #tpu.dot_dimension_numbers<[2], [1], [1], [2], [0, 0, 0, 1, 1, 2], [0], [0]>} : vector<2x16x16xf32>, vector<2x16x16xf32>, vector<2x16x16xf32> -> vector<2x16x16xf32>
    "tpu.trace_stop"() : () -> ()
    %300 = vector.shape_cast %299 : vector<2x16x16xf32> to vector<32x16xf32>
    %301 = vector.extract_strided_slice %258 {offsets = [0, 0], sizes = [16, 128], strides = [1, 1]} : vector<128x128xf32> to vector<16x128xf32>
    %cst_140 = arith.constant dense<0.000000e+00> : vector<32x128xf32>
    %302 = tpu.matmul %300, %301, %cst_140 {dimension_numbers = #tpu.dot_dimension_numbers<[1], [0], [0], [1], [0, 0, 1, 1], [], []>} : vector<32x16xf32>, vector<16x128xf32>, vector<32x128xf32> -> vector<32x128xf32>
    %303 = arith.addf %284, %302 : vector<32x128xf32>
    %304 = vector.extract_strided_slice %281 {offsets = [0, 0, 16], sizes = [2, 16, 16], strides = [1, 1, 1]} : vector<2x16x128xf32> to vector<2x16x16xf32>
    %305 = vector.extract_strided_slice %282 {offsets = [0, 0, 16], sizes = [2, 16, 16], strides = [1, 1, 1]} : vector<2x16x128xf32> to vector<2x16x16xf32>
    "tpu.trace_start"() <{level = 10 : i32, message = "bqd,bkd->bqk"}> : () -> ()
    %cst_141 = arith.constant dense<0.000000e+00> : vector<2x16x16xf32>
    %306 = tpu.matmul %304, %305, %cst_141 {dimension_numbers = #tpu.dot_dimension_numbers<[2], [2], [1], [1], [0, 0, 0, 1, 1, 1], [0], [0]>} : vector<2x16x16xf32>, vector<2x16x16xf32>, vector<2x16x16xf32> -> vector<2x16x16xf32>
    "tpu.trace_stop"() : () -> ()
    %cst_142 = arith.constant dense<0xFF800000> : vector<2x16xf32>
    %307 = vector.multi_reduction <maximumf>, %306, %cst_142 [2] : vector<2x16x16xf32> to vector<2x16xf32>
    %308 = vector.shape_cast %307 : vector<2x16xf32> to vector<2x16x1xf32>
    %309 = vector.broadcast %308 : vector<2x16x1xf32> to vector<2x16x16xf32>
    %310 = arith.subf %306, %309 : vector<2x16x16xf32>
    %311 = math.exp %310 : vector<2x16x16xf32>
    %cst_143 = arith.constant dense<0.000000e+00> : vector<2x16xf32>
    %312 = vector.multi_reduction <add>, %311, %cst_143 [2] : vector<2x16x16xf32> to vector<2x16xf32>
    %313 = vector.shape_cast %312 : vector<2x16xf32> to vector<2x16x1xf32>
    %314 = tpu.reciprocal %313 : vector<2x16x1xf32> -> vector<2x16x1xf32>
    %315 = vector.broadcast %314 : vector<2x16x1xf32> to vector<2x16x16xf32>
    %316 = arith.mulf %311, %315 : vector<2x16x16xf32>
    %317 = vector.extract_strided_slice %283 {offsets = [0, 0, 16], sizes = [2, 16, 16], strides = [1, 1, 1]} : vector<2x16x128xf32> to vector<2x16x16xf32>
    "tpu.trace_start"() <{level = 10 : i32, message = "bqk,bkd->bqd"}> : () -> ()
    %cst_144 = arith.constant dense<0.000000e+00> : vector<2x16x16xf32>
    %318 = tpu.matmul %316, %317, %cst_144 {dimension_numbers = #tpu.dot_dimension_numbers<[2], [1], [1], [2], [0, 0, 0, 1, 1, 2], [0], [0]>} : vector<2x16x16xf32>, vector<2x16x16xf32>, vector<2x16x16xf32> -> vector<2x16x16xf32>
    "tpu.trace_stop"() : () -> ()
    %319 = vector.shape_cast %318 : vector<2x16x16xf32> to vector<32x16xf32>
    %320 = vector.extract_strided_slice %258 {offsets = [16, 0], sizes = [16, 128], strides = [1, 1]} : vector<128x128xf32> to vector<16x128xf32>
    %cst_145 = arith.constant dense<0.000000e+00> : vector<32x128xf32>
    %321 = tpu.matmul %319, %320, %cst_145 {dimension_numbers = #tpu.dot_dimension_numbers<[1], [0], [0], [1], [0, 0, 1, 1], [], []>} : vector<32x16xf32>, vector<16x128xf32>, vector<32x128xf32> -> vector<32x128xf32>
    %322 = arith.addf %303, %321 : vector<32x128xf32>
    %323 = vector.extract_strided_slice %281 {offsets = [0, 0, 32], sizes = [2, 16, 16], strides = [1, 1, 1]} : vector<2x16x128xf32> to vector<2x16x16xf32>
    %324 = vector.extract_strided_slice %282 {offsets = [0, 0, 32], sizes = [2, 16, 16], strides = [1, 1, 1]} : vector<2x16x128xf32> to vector<2x16x16xf32>
    "tpu.trace_start"() <{level = 10 : i32, message = "bqd,bkd->bqk"}> : () -> ()
    %cst_146 = arith.constant dense<0.000000e+00> : vector<2x16x16xf32>
    %325 = tpu.matmul %323, %324, %cst_146 {dimension_numbers = #tpu.dot_dimension_numbers<[2], [2], [1], [1], [0, 0, 0, 1, 1, 1], [0], [0]>} : vector<2x16x16xf32>, vector<2x16x16xf32>, vector<2x16x16xf32> -> vector<2x16x16xf32>
    "tpu.trace_stop"() : () -> ()
    %cst_147 = arith.constant dense<0xFF800000> : vector<2x16xf32>
    %326 = vector.multi_reduction <maximumf>, %325, %cst_147 [2] : vector<2x16x16xf32> to vector<2x16xf32>
    %327 = vector.shape_cast %326 : vector<2x16xf32> to vector<2x16x1xf32>
    %328 = vector.broadcast %327 : vector<2x16x1xf32> to vector<2x16x16xf32>
    %329 = arith.subf %325, %328 : vector<2x16x16xf32>
    %330 = math.exp %329 : vector<2x16x16xf32>
    %cst_148 = arith.constant dense<0.000000e+00> : vector<2x16xf32>
    %331 = vector.multi_reduction <add>, %330, %cst_148 [2] : vector<2x16x16xf32> to vector<2x16xf32>
    %332 = vector.shape_cast %331 : vector<2x16xf32> to vector<2x16x1xf32>
    %333 = tpu.reciprocal %332 : vector<2x16x1xf32> -> vector<2x16x1xf32>
    %334 = vector.broadcast %333 : vector<2x16x1xf32> to vector<2x16x16xf32>
    %335 = arith.mulf %330, %334 : vector<2x16x16xf32>
    %336 = vector.extract_strided_slice %283 {offsets = [0, 0, 32], sizes = [2, 16, 16], strides = [1, 1, 1]} : vector<2x16x128xf32> to vector<2x16x16xf32>
    "tpu.trace_start"() <{level = 10 : i32, message = "bqk,bkd->bqd"}> : () -> ()
    %cst_149 = arith.constant dense<0.000000e+00> : vector<2x16x16xf32>
    %337 = tpu.matmul %335, %336, %cst_149 {dimension_numbers = #tpu.dot_dimension_numbers<[2], [1], [1], [2], [0, 0, 0, 1, 1, 2], [0], [0]>} : vector<2x16x16xf32>, vector<2x16x16xf32>, vector<2x16x16xf32> -> vector<2x16x16xf32>
    "tpu.trace_stop"() : () -> ()
    %338 = vector.shape_cast %337 : vector<2x16x16xf32> to vector<32x16xf32>
    %339 = vector.extract_strided_slice %258 {offsets = [32, 0], sizes = [16, 128], strides = [1, 1]} : vector<128x128xf32> to vector<16x128xf32>
    %cst_150 = arith.constant dense<0.000000e+00> : vector<32x128xf32>
    %340 = tpu.matmul %338, %339, %cst_150 {dimension_numbers = #tpu.dot_dimension_numbers<[1], [0], [0], [1], [0, 0, 1, 1], [], []>} : vector<32x16xf32>, vector<16x128xf32>, vector<32x128xf32> -> vector<32x128xf32>
    %341 = arith.addf %322, %340 : vector<32x128xf32>
    %342 = vector.extract_strided_slice %281 {offsets = [0, 0, 48], sizes = [2, 16, 16], strides = [1, 1, 1]} : vector<2x16x128xf32> to vector<2x16x16xf32>
    %343 = vector.extract_strided_slice %282 {offsets = [0, 0, 48], sizes = [2, 16, 16], strides = [1, 1, 1]} : vector<2x16x128xf32> to vector<2x16x16xf32>
    "tpu.trace_start"() <{level = 10 : i32, message = "bqd,bkd->bqk"}> : () -> ()
    %cst_151 = arith.constant dense<0.000000e+00> : vector<2x16x16xf32>
    %344 = tpu.matmul %342, %343, %cst_151 {dimension_numbers = #tpu.dot_dimension_numbers<[2], [2], [1], [1], [0, 0, 0, 1, 1, 1], [0], [0]>} : vector<2x16x16xf32>, vector<2x16x16xf32>, vector<2x16x16xf32> -> vector<2x16x16xf32>
    "tpu.trace_stop"() : () -> ()
    %cst_152 = arith.constant dense<0xFF800000> : vector<2x16xf32>
    %345 = vector.multi_reduction <maximumf>, %344, %cst_152 [2] : vector<2x16x16xf32> to vector<2x16xf32>
    %346 = vector.shape_cast %345 : vector<2x16xf32> to vector<2x16x1xf32>
    %347 = vector.broadcast %346 : vector<2x16x1xf32> to vector<2x16x16xf32>
    %348 = arith.subf %344, %347 : vector<2x16x16xf32>
    %349 = math.exp %348 : vector<2x16x16xf32>
    %cst_153 = arith.constant dense<0.000000e+00> : vector<2x16xf32>
    %350 = vector.multi_reduction <add>, %349, %cst_153 [2] : vector<2x16x16xf32> to vector<2x16xf32>
    %351 = vector.shape_cast %350 : vector<2x16xf32> to vector<2x16x1xf32>
    %352 = tpu.reciprocal %351 : vector<2x16x1xf32> -> vector<2x16x1xf32>
    %353 = vector.broadcast %352 : vector<2x16x1xf32> to vector<2x16x16xf32>
    %354 = arith.mulf %349, %353 : vector<2x16x16xf32>
    %355 = vector.extract_strided_slice %283 {offsets = [0, 0, 48], sizes = [2, 16, 16], strides = [1, 1, 1]} : vector<2x16x128xf32> to vector<2x16x16xf32>
    "tpu.trace_start"() <{level = 10 : i32, message = "bqk,bkd->bqd"}> : () -> ()
    %cst_154 = arith.constant dense<0.000000e+00> : vector<2x16x16xf32>
    %356 = tpu.matmul %354, %355, %cst_154 {dimension_numbers = #tpu.dot_dimension_numbers<[2], [1], [1], [2], [0, 0, 0, 1, 1, 2], [0], [0]>} : vector<2x16x16xf32>, vector<2x16x16xf32>, vector<2x16x16xf32> -> vector<2x16x16xf32>
    "tpu.trace_stop"() : () -> ()
    %357 = vector.shape_cast %356 : vector<2x16x16xf32> to vector<32x16xf32>
    %358 = vector.extract_strided_slice %258 {offsets = [48, 0], sizes = [16, 128], strides = [1, 1]} : vector<128x128xf32> to vector<16x128xf32>
    %cst_155 = arith.constant dense<0.000000e+00> : vector<32x128xf32>
    %359 = tpu.matmul %357, %358, %cst_155 {dimension_numbers = #tpu.dot_dimension_numbers<[1], [0], [0], [1], [0, 0, 1, 1], [], []>} : vector<32x16xf32>, vector<16x128xf32>, vector<32x128xf32> -> vector<32x128xf32>
    %360 = arith.addf %341, %359 : vector<32x128xf32>
    %361 = vector.extract_strided_slice %281 {offsets = [0, 0, 64], sizes = [2, 16, 16], strides = [1, 1, 1]} : vector<2x16x128xf32> to vector<2x16x16xf32>
    %362 = vector.extract_strided_slice %282 {offsets = [0, 0, 64], sizes = [2, 16, 16], strides = [1, 1, 1]} : vector<2x16x128xf32> to vector<2x16x16xf32>
    "tpu.trace_start"() <{level = 10 : i32, message = "bqd,bkd->bqk"}> : () -> ()
    %cst_156 = arith.constant dense<0.000000e+00> : vector<2x16x16xf32>
    %363 = tpu.matmul %361, %362, %cst_156 {dimension_numbers = #tpu.dot_dimension_numbers<[2], [2], [1], [1], [0, 0, 0, 1, 1, 1], [0], [0]>} : vector<2x16x16xf32>, vector<2x16x16xf32>, vector<2x16x16xf32> -> vector<2x16x16xf32>
    "tpu.trace_stop"() : () -> ()
    %cst_157 = arith.constant dense<0xFF800000> : vector<2x16xf32>
    %364 = vector.multi_reduction <maximumf>, %363, %cst_157 [2] : vector<2x16x16xf32> to vector<2x16xf32>
    %365 = vector.shape_cast %364 : vector<2x16xf32> to vector<2x16x1xf32>
    %366 = vector.broadcast %365 : vector<2x16x1xf32> to vector<2x16x16xf32>
    %367 = arith.subf %363, %366 : vector<2x16x16xf32>
    %368 = math.exp %367 : vector<2x16x16xf32>
    %cst_158 = arith.constant dense<0.000000e+00> : vector<2x16xf32>
    %369 = vector.multi_reduction <add>, %368, %cst_158 [2] : vector<2x16x16xf32> to vector<2x16xf32>
    %370 = vector.shape_cast %369 : vector<2x16xf32> to vector<2x16x1xf32>
    %371 = tpu.reciprocal %370 : vector<2x16x1xf32> -> vector<2x16x1xf32>
    %372 = vector.broadcast %371 : vector<2x16x1xf32> to vector<2x16x16xf32>
    %373 = arith.mulf %368, %372 : vector<2x16x16xf32>
    %374 = vector.extract_strided_slice %283 {offsets = [0, 0, 64], sizes = [2, 16, 16], strides = [1, 1, 1]} : vector<2x16x128xf32> to vector<2x16x16xf32>
    "tpu.trace_start"() <{level = 10 : i32, message = "bqk,bkd->bqd"}> : () -> ()
    %cst_159 = arith.constant dense<0.000000e+00> : vector<2x16x16xf32>
    %375 = tpu.matmul %373, %374, %cst_159 {dimension_numbers = #tpu.dot_dimension_numbers<[2], [1], [1], [2], [0, 0, 0, 1, 1, 2], [0], [0]>} : vector<2x16x16xf32>, vector<2x16x16xf32>, vector<2x16x16xf32> -> vector<2x16x16xf32>
    "tpu.trace_stop"() : () -> ()
    %376 = vector.shape_cast %375 : vector<2x16x16xf32> to vector<32x16xf32>
    %377 = vector.extract_strided_slice %258 {offsets = [64, 0], sizes = [16, 128], strides = [1, 1]} : vector<128x128xf32> to vector<16x128xf32>
    %cst_160 = arith.constant dense<0.000000e+00> : vector<32x128xf32>
    %378 = tpu.matmul %376, %377, %cst_160 {dimension_numbers = #tpu.dot_dimension_numbers<[1], [0], [0], [1], [0, 0, 1, 1], [], []>} : vector<32x16xf32>, vector<16x128xf32>, vector<32x128xf32> -> vector<32x128xf32>
    %379 = arith.addf %360, %378 : vector<32x128xf32>
    %380 = vector.extract_strided_slice %281 {offsets = [0, 0, 80], sizes = [2, 16, 16], strides = [1, 1, 1]} : vector<2x16x128xf32> to vector<2x16x16xf32>
    %381 = vector.extract_strided_slice %282 {offsets = [0, 0, 80], sizes = [2, 16, 16], strides = [1, 1, 1]} : vector<2x16x128xf32> to vector<2x16x16xf32>
    "tpu.trace_start"() <{level = 10 : i32, message = "bqd,bkd->bqk"}> : () -> ()
    %cst_161 = arith.constant dense<0.000000e+00> : vector<2x16x16xf32>
    %382 = tpu.matmul %380, %381, %cst_161 {dimension_numbers = #tpu.dot_dimension_numbers<[2], [2], [1], [1], [0, 0, 0, 1, 1, 1], [0], [0]>} : vector<2x16x16xf32>, vector<2x16x16xf32>, vector<2x16x16xf32> -> vector<2x16x16xf32>
    "tpu.trace_stop"() : () -> ()
    %cst_162 = arith.constant dense<0xFF800000> : vector<2x16xf32>
    %383 = vector.multi_reduction <maximumf>, %382, %cst_162 [2] : vector<2x16x16xf32> to vector<2x16xf32>
    %384 = vector.shape_cast %383 : vector<2x16xf32> to vector<2x16x1xf32>
    %385 = vector.broadcast %384 : vector<2x16x1xf32> to vector<2x16x16xf32>
    %386 = arith.subf %382, %385 : vector<2x16x16xf32>
    %387 = math.exp %386 : vector<2x16x16xf32>
    %cst_163 = arith.constant dense<0.000000e+00> : vector<2x16xf32>
    %388 = vector.multi_reduction <add>, %387, %cst_163 [2] : vector<2x16x16xf32> to vector<2x16xf32>
    %389 = vector.shape_cast %388 : vector<2x16xf32> to vector<2x16x1xf32>
    %390 = tpu.reciprocal %389 : vector<2x16x1xf32> -> vector<2x16x1xf32>
    %391 = vector.broadcast %390 : vector<2x16x1xf32> to vector<2x16x16xf32>
    %392 = arith.mulf %387, %391 : vector<2x16x16xf32>
    %393 = vector.extract_strided_slice %283 {offsets = [0, 0, 80], sizes = [2, 16, 16], strides = [1, 1, 1]} : vector<2x16x128xf32> to vector<2x16x16xf32>
    "tpu.trace_start"() <{level = 10 : i32, message = "bqk,bkd->bqd"}> : () -> ()
    %cst_164 = arith.constant dense<0.000000e+00> : vector<2x16x16xf32>
    %394 = tpu.matmul %392, %393, %cst_164 {dimension_numbers = #tpu.dot_dimension_numbers<[2], [1], [1], [2], [0, 0, 0, 1, 1, 2], [0], [0]>} : vector<2x16x16xf32>, vector<2x16x16xf32>, vector<2x16x16xf32> -> vector<2x16x16xf32>
    "tpu.trace_stop"() : () -> ()
    %395 = vector.shape_cast %394 : vector<2x16x16xf32> to vector<32x16xf32>
    %396 = vector.extract_strided_slice %258 {offsets = [80, 0], sizes = [16, 128], strides = [1, 1]} : vector<128x128xf32> to vector<16x128xf32>
    %cst_165 = arith.constant dense<0.000000e+00> : vector<32x128xf32>
    %397 = tpu.matmul %395, %396, %cst_165 {dimension_numbers = #tpu.dot_dimension_numbers<[1], [0], [0], [1], [0, 0, 1, 1], [], []>} : vector<32x16xf32>, vector<16x128xf32>, vector<32x128xf32> -> vector<32x128xf32>
    %398 = arith.addf %379, %397 : vector<32x128xf32>
    %399 = vector.extract_strided_slice %281 {offsets = [0, 0, 96], sizes = [2, 16, 16], strides = [1, 1, 1]} : vector<2x16x128xf32> to vector<2x16x16xf32>
    %400 = vector.extract_strided_slice %282 {offsets = [0, 0, 96], sizes = [2, 16, 16], strides = [1, 1, 1]} : vector<2x16x128xf32> to vector<2x16x16xf32>
    "tpu.trace_start"() <{level = 10 : i32, message = "bqd,bkd->bqk"}> : () -> ()
    %cst_166 = arith.constant dense<0.000000e+00> : vector<2x16x16xf32>
    %401 = tpu.matmul %399, %400, %cst_166 {dimension_numbers = #tpu.dot_dimension_numbers<[2], [2], [1], [1], [0, 0, 0, 1, 1, 1], [0], [0]>} : vector<2x16x16xf32>, vector<2x16x16xf32>, vector<2x16x16xf32> -> vector<2x16x16xf32>
    "tpu.trace_stop"() : () -> ()
    %cst_167 = arith.constant dense<0xFF800000> : vector<2x16xf32>
    %402 = vector.multi_reduction <maximumf>, %401, %cst_167 [2] : vector<2x16x16xf32> to vector<2x16xf32>
    %403 = vector.shape_cast %402 : vector<2x16xf32> to vector<2x16x1xf32>
    %404 = vector.broadcast %403 : vector<2x16x1xf32> to vector<2x16x16xf32>
    %405 = arith.subf %401, %404 : vector<2x16x16xf32>
    %406 = math.exp %405 : vector<2x16x16xf32>
    %cst_168 = arith.constant dense<0.000000e+00> : vector<2x16xf32>
    %407 = vector.multi_reduction <add>, %406, %cst_168 [2] : vector<2x16x16xf32> to vector<2x16xf32>
    %408 = vector.shape_cast %407 : vector<2x16xf32> to vector<2x16x1xf32>
    %409 = tpu.reciprocal %408 : vector<2x16x1xf32> -> vector<2x16x1xf32>
    %410 = vector.broadcast %409 : vector<2x16x1xf32> to vector<2x16x16xf32>
    %411 = arith.mulf %406, %410 : vector<2x16x16xf32>
    %412 = vector.extract_strided_slice %283 {offsets = [0, 0, 96], sizes = [2, 16, 16], strides = [1, 1, 1]} : vector<2x16x128xf32> to vector<2x16x16xf32>
    "tpu.trace_start"() <{level = 10 : i32, message = "bqk,bkd->bqd"}> : () -> ()
    %cst_169 = arith.constant dense<0.000000e+00> : vector<2x16x16xf32>
    %413 = tpu.matmul %411, %412, %cst_169 {dimension_numbers = #tpu.dot_dimension_numbers<[2], [1], [1], [2], [0, 0, 0, 1, 1, 2], [0], [0]>} : vector<2x16x16xf32>, vector<2x16x16xf32>, vector<2x16x16xf32> -> vector<2x16x16xf32>
    "tpu.trace_stop"() : () -> ()
    %414 = vector.shape_cast %413 : vector<2x16x16xf32> to vector<32x16xf32>
    %415 = vector.extract_strided_slice %258 {offsets = [96, 0], sizes = [16, 128], strides = [1, 1]} : vector<128x128xf32> to vector<16x128xf32>
    %cst_170 = arith.constant dense<0.000000e+00> : vector<32x128xf32>
    %416 = tpu.matmul %414, %415, %cst_170 {dimension_numbers = #tpu.dot_dimension_numbers<[1], [0], [0], [1], [0, 0, 1, 1], [], []>} : vector<32x16xf32>, vector<16x128xf32>, vector<32x128xf32> -> vector<32x128xf32>
    %417 = arith.addf %398, %416 : vector<32x128xf32>
    %418 = vector.extract_strided_slice %281 {offsets = [0, 0, 112], sizes = [2, 16, 16], strides = [1, 1, 1]} : vector<2x16x128xf32> to vector<2x16x16xf32>
    %419 = vector.extract_strided_slice %282 {offsets = [0, 0, 112], sizes = [2, 16, 16], strides = [1, 1, 1]} : vector<2x16x128xf32> to vector<2x16x16xf32>
    "tpu.trace_start"() <{level = 10 : i32, message = "bqd,bkd->bqk"}> : () -> ()
    %cst_171 = arith.constant dense<0.000000e+00> : vector<2x16x16xf32>
    %420 = tpu.matmul %418, %419, %cst_171 {dimension_numbers = #tpu.dot_dimension_numbers<[2], [2], [1], [1], [0, 0, 0, 1, 1, 1], [0], [0]>} : vector<2x16x16xf32>, vector<2x16x16xf32>, vector<2x16x16xf32> -> vector<2x16x16xf32>
    "tpu.trace_stop"() : () -> ()
    %cst_172 = arith.constant dense<0xFF800000> : vector<2x16xf32>
    %421 = vector.multi_reduction <maximumf>, %420, %cst_172 [2] : vector<2x16x16xf32> to vector<2x16xf32>
    %422 = vector.shape_cast %421 : vector<2x16xf32> to vector<2x16x1xf32>
    %423 = vector.broadcast %422 : vector<2x16x1xf32> to vector<2x16x16xf32>
    %424 = arith.subf %420, %423 : vector<2x16x16xf32>
    %425 = math.exp %424 : vector<2x16x16xf32>
    %cst_173 = arith.constant dense<0.000000e+00> : vector<2x16xf32>
    %426 = vector.multi_reduction <add>, %425, %cst_173 [2] : vector<2x16x16xf32> to vector<2x16xf32>
    %427 = vector.shape_cast %426 : vector<2x16xf32> to vector<2x16x1xf32>
    %428 = tpu.reciprocal %427 : vector<2x16x1xf32> -> vector<2x16x1xf32>
    %429 = vector.broadcast %428 : vector<2x16x1xf32> to vector<2x16x16xf32>
    %430 = arith.mulf %425, %429 : vector<2x16x16xf32>
    %431 = vector.extract_strided_slice %283 {offsets = [0, 0, 112], sizes = [2, 16, 16], strides = [1, 1, 1]} : vector<2x16x128xf32> to vector<2x16x16xf32>
    "tpu.trace_start"() <{level = 10 : i32, message = "bqk,bkd->bqd"}> : () -> ()
    %cst_174 = arith.constant dense<0.000000e+00> : vector<2x16x16xf32>
    %432 = tpu.matmul %430, %431, %cst_174 {dimension_numbers = #tpu.dot_dimension_numbers<[2], [1], [1], [2], [0, 0, 0, 1, 1, 2], [0], [0]>} : vector<2x16x16xf32>, vector<2x16x16xf32>, vector<2x16x16xf32> -> vector<2x16x16xf32>
    "tpu.trace_stop"() : () -> ()
    %433 = vector.shape_cast %432 : vector<2x16x16xf32> to vector<32x16xf32>
    %434 = vector.extract_strided_slice %258 {offsets = [112, 0], sizes = [16, 128], strides = [1, 1]} : vector<128x128xf32> to vector<16x128xf32>
    %cst_175 = arith.constant dense<0.000000e+00> : vector<32x128xf32>
    %435 = tpu.matmul %433, %434, %cst_175 {dimension_numbers = #tpu.dot_dimension_numbers<[1], [0], [0], [1], [0, 0, 1, 1], [], []>} : vector<32x16xf32>, vector<16x128xf32>, vector<32x128xf32> -> vector<32x128xf32>
    %436 = arith.addf %417, %435 : vector<32x128xf32>
    %437 = vector.broadcast %260 : vector<1x128xf32> to vector<32x128xf32>
    %438 = arith.addf %436, %437 : vector<32x128xf32>
    %439 = arith.addf %252, %438 : vector<32x128xf32>
    %cst_176 = arith.constant dense<0.000000e+00> : vector<32xf32>
    %440 = vector.multi_reduction <add>, %439, %cst_176 [1] : vector<32x128xf32> to vector<32xf32>
    %441 = vector.shape_cast %440 : vector<32xf32> to vector<32x1xf32>
    %cst_177 = arith.constant 1.280000e+02 : f32
    %442 = vector.broadcast %cst_177 : f32 to vector<32x1xf32>
    %443 = arith.divf %441, %442 : vector<32x1xf32>
    %444 = vector.broadcast %443 : vector<32x1xf32> to vector<32x128xf32>
    %445 = arith.subf %439, %444 : vector<32x128xf32>
    %446 = arith.mulf %445, %445 : vector<32x128xf32>
    %cst_178 = arith.constant dense<0.000000e+00> : vector<32xf32>
    %447 = vector.multi_reduction <add>, %446, %cst_178 [1] : vector<32x128xf32> to vector<32xf32>
    %448 = vector.shape_cast %447 : vector<32xf32> to vector<32x1xf32>
    %cst_179 = arith.constant 1.280000e+02 : f32
    %449 = vector.broadcast %cst_179 : f32 to vector<32x1xf32>
    %450 = arith.divf %448, %449 : vector<32x1xf32>
    %451 = vector.broadcast %443 : vector<32x1xf32> to vector<32x128xf32>
    %452 = arith.subf %439, %451 : vector<32x128xf32>
    %cst_180 = arith.constant 9.99999974E-6 : f32
    %453 = vector.broadcast %cst_180 : f32 to vector<32x1xf32>
    %454 = arith.addf %450, %453 : vector<32x1xf32>
    %455 = math.rsqrt %454 : vector<32x1xf32>
    %456 = vector.broadcast %455 : vector<32x1xf32> to vector<32x128xf32>
    %457 = arith.mulf %452, %456 : vector<32x128xf32>
    %458 = vector.broadcast %262 : vector<1x128xf32> to vector<32x128xf32>
    %459 = arith.mulf %457, %458 : vector<32x128xf32>
    %460 = vector.broadcast %264 : vector<1x128xf32> to vector<32x128xf32>
    %461 = arith.addf %459, %460 : vector<32x128xf32>
    %cst_181 = arith.constant dense<0.000000e+00> : vector<32x512xf32>
    %462 = tpu.matmul %461, %266, %cst_181 {dimension_numbers = #tpu.dot_dimension_numbers<[1], [0], [0], [1], [0, 0, 1, 1], [], []>} : vector<32x128xf32>, vector<128x512xf32>, vector<32x512xf32> -> vector<32x512xf32>
    %463 = vector.broadcast %268 : vector<1x512xf32> to vector<32x512xf32>
    %464 = arith.addf %462, %463 : vector<32x512xf32>
    %cst_182 = arith.constant 0.000000e+00 : f32
    %465 = vector.broadcast %cst_182 : f32 to vector<32x512xf32>
    %466 = arith.maximumf %464, %465 : vector<32x512xf32>
    %cst_183 = arith.constant dense<0.000000e+00> : vector<32x128xf32>
    %467 = tpu.matmul %466, %270, %cst_183 {dimension_numbers = #tpu.dot_dimension_numbers<[1], [0], [0], [1], [0, 0, 1, 1], [], []>} : vector<32x512xf32>, vector<512x128xf32>, vector<32x128xf32> -> vector<32x128xf32>
    %468 = vector.broadcast %272 : vector<1x128xf32> to vector<32x128xf32>
    %469 = arith.addf %467, %468 : vector<32x128xf32>
    %470 = arith.addf %461, %469 : vector<32x128xf32>
    %cst_184 = arith.constant dense<0.000000e+00> : vector<32xf32>
    %471 = vector.multi_reduction <add>, %470, %cst_184 [1] : vector<32x128xf32> to vector<32xf32>
    %472 = vector.shape_cast %471 : vector<32xf32> to vector<32x1xf32>
    %cst_185 = arith.constant 1.280000e+02 : f32
    %473 = vector.broadcast %cst_185 : f32 to vector<32x1xf32>
    %474 = arith.divf %472, %473 : vector<32x1xf32>
    %475 = vector.broadcast %474 : vector<32x1xf32> to vector<32x128xf32>
    %476 = arith.subf %470, %475 : vector<32x128xf32>
    %477 = arith.mulf %476, %476 : vector<32x128xf32>
    %cst_186 = arith.constant dense<0.000000e+00> : vector<32xf32>
    %478 = vector.multi_reduction <add>, %477, %cst_186 [1] : vector<32x128xf32> to vector<32xf32>
    %479 = vector.shape_cast %478 : vector<32xf32> to vector<32x1xf32>
    %cst_187 = arith.constant 1.280000e+02 : f32
    %480 = vector.broadcast %cst_187 : f32 to vector<32x1xf32>
    %481 = arith.divf %479, %480 : vector<32x1xf32>
    %482 = vector.broadcast %474 : vector<32x1xf32> to vector<32x128xf32>
    %483 = arith.subf %470, %482 : vector<32x128xf32>
    %cst_188 = arith.constant 9.99999974E-6 : f32
    %484 = vector.broadcast %cst_188 : f32 to vector<32x1xf32>
    %485 = arith.addf %481, %484 : vector<32x1xf32>
    %486 = math.rsqrt %485 : vector<32x1xf32>
    %487 = vector.broadcast %486 : vector<32x1xf32> to vector<32x128xf32>
    %488 = arith.mulf %483, %487 : vector<32x128xf32>
    %489 = vector.broadcast %274 : vector<1x128xf32> to vector<32x128xf32>
    %490 = arith.mulf %488, %489 : vector<32x128xf32>
    %491 = vector.broadcast %276 : vector<1x128xf32> to vector<32x128xf32>
    %492 = arith.addf %490, %491 : vector<32x128xf32>
    %493 = vector.shape_cast %492 : vector<32x128xf32> to vector<2x16x128xf32>
    %494 = vector.extract_strided_slice %493 {offsets = [0, 15, 0], sizes = [2, 1, 128], strides = [1, 1, 1]} : vector<2x16x128xf32> to vector<2x1x128xf32>
    %495 = vector.shape_cast %494 : vector<2x1x128xf32> to vector<2x128xf32>
    %c0_189 = arith.constant 0 : index
    %c0_190 = arith.constant 0 : index
    %c0_191 = arith.constant 0 : index
    %496 = vector.load %arg17[%c0_189, %c0_190, %c0_191] : memref<1x2x128xf32, #tpu.memory_space<vmem>>, vector<1x2x128xf32>
    %497 = vector.shape_cast %496 : vector<1x2x128xf32> to vector<2x128xf32>
    %498 = vector.shape_cast %495 : vector<2x128xf32> to vector<1x2x128xf32>
    tpu.vector_store %arg17[%c0_189, %c0_190, %c0_191], %498 {strides = array<i32>} : memref<1x2x128xf32, #tpu.memory_space<vmem>>, vector<1x2x128xf32>,
    return
  }
  func.func @transform_0(%arg0: i32) -> (i32, i32, i32) {
    %c0_i32 = arith.constant 0 : i32
    %c0_i32_0 = arith.constant 0 : i32
    %c0_i32_1 = arith.constant 0 : i32
    return %arg0, %c0_i32, %c0_i32_0 : i32, i32, i32
  }
  func.func @transform_1(%arg0: i32) -> (i32, i32) {
    %c0_i32 = arith.constant 0 : i32
    %c0_i32_0 = arith.constant 0 : i32
    %c0_i32_1 = arith.constant 0 : i32
    return %c0_i32, %c0_i32_0 : i32, i32
  }
  func.func @transform_2(%arg0: i32) -> (i32, i32) {
    %c0_i32 = arith.constant 0 : i32
    %c0_i32_0 = arith.constant 0 : i32
    %c0_i32_1 = arith.constant 0 : i32
    return %c0_i32, %c0_i32_0 : i32, i32
  }
  func.func @transform_3(%arg0: i32) -> (i32, i32) {
    %c0_i32 = arith.constant 0 : i32
    %c0_i32_0 = arith.constant 0 : i32
    %c0_i32_1 = arith.constant 0 : i32
    return %c0_i32, %c0_i32_0 : i32, i32
  }
  func.func @transform_4(%arg0: i32) -> (i32, i32, i32) {
    %c0_i32 = arith.constant 0 : i32
    %c0_i32_0 = arith.constant 0 : i32
    %c0_i32_1 = arith.constant 0 : i32
    %c0_i32_2 = arith.constant 0 : i32
    return %c0_i32, %c0_i32_0, %c0_i32_1 : i32, i32, i32
  }
  func.func @transform_5(%arg0: i32) -> (i32, i32, i32) {
    %c0_i32 = arith.constant 0 : i32
    %c0_i32_0 = arith.constant 0 : i32
    %c0_i32_1 = arith.constant 0 : i32
    %c0_i32_2 = arith.constant 0 : i32
    return %c0_i32, %c0_i32_0, %c0_i32_1 : i32, i32, i32
  }
  func.func @transform_6(%arg0: i32) -> (i32, i32, i32) {
    %c0_i32 = arith.constant 0 : i32
    %c0_i32_0 = arith.constant 0 : i32
    %c0_i32_1 = arith.constant 0 : i32
    %c0_i32_2 = arith.constant 0 : i32
    return %c0_i32, %c0_i32_0, %c0_i32_1 : i32, i32, i32
  }
  func.func @transform_7(%arg0: i32) -> (i32, i32, i32) {
    %c0_i32 = arith.constant 0 : i32
    %c0_i32_0 = arith.constant 0 : i32
    %c0_i32_1 = arith.constant 0 : i32
    %c0_i32_2 = arith.constant 0 : i32
    return %c0_i32, %c0_i32_0, %c0_i32_1 : i32, i32, i32
  }
  func.func @transform_8(%arg0: i32) -> (i32, i32, i32) {
    %c0_i32 = arith.constant 0 : i32
    %c0_i32_0 = arith.constant 0 : i32
    %c0_i32_1 = arith.constant 0 : i32
    %c0_i32_2 = arith.constant 0 : i32
    return %c0_i32, %c0_i32_0, %c0_i32_1 : i32, i32, i32
  }
  func.func @transform_9(%arg0: i32) -> (i32, i32, i32) {
    %c0_i32 = arith.constant 0 : i32
    %c0_i32_0 = arith.constant 0 : i32
    %c0_i32_1 = arith.constant 0 : i32
    %c0_i32_2 = arith.constant 0 : i32
    return %c0_i32, %c0_i32_0, %c0_i32_1 : i32, i32, i32
  }
  func.func @transform_10(%arg0: i32) -> (i32, i32, i32) {
    %c0_i32 = arith.constant 0 : i32
    %c0_i32_0 = arith.constant 0 : i32
    %c0_i32_1 = arith.constant 0 : i32
    %c0_i32_2 = arith.constant 0 : i32
    return %c0_i32, %c0_i32_0, %c0_i32_1 : i32, i32, i32
  }
  func.func @transform_11(%arg0: i32) -> (i32, i32, i32) {
    %c0_i32 = arith.constant 0 : i32
    %c0_i32_0 = arith.constant 0 : i32
    %c0_i32_1 = arith.constant 0 : i32
    %c0_i32_2 = arith.constant 0 : i32
    return %c0_i32, %c0_i32_0, %c0_i32_1 : i32, i32, i32
  }
  func.func @transform_12(%arg0: i32) -> (i32, i32, i32) {
    %c0_i32 = arith.constant 0 : i32
    %c0_i32_0 = arith.constant 0 : i32
    %c0_i32_1 = arith.constant 0 : i32
    %c0_i32_2 = arith.constant 0 : i32
    return %c0_i32, %c0_i32_0, %c0_i32_1 : i32, i32, i32
  }
  func.func @transform_13(%arg0: i32) -> (i32, i32, i32) {
    %c0_i32 = arith.constant 0 : i32
    %c0_i32_0 = arith.constant 0 : i32
    %c0_i32_1 = arith.constant 0 : i32
    %c0_i32_2 = arith.constant 0 : i32
    return %c0_i32, %c0_i32_0, %c0_i32_1 : i32, i32, i32
  }
  func.func @transform_14(%arg0: i32) -> (i32, i32, i32) {
    %c0_i32 = arith.constant 0 : i32
    %c0_i32_0 = arith.constant 0 : i32
    %c0_i32_1 = arith.constant 0 : i32
    %c0_i32_2 = arith.constant 0 : i32
    return %c0_i32, %c0_i32_0, %c0_i32_1 : i32, i32, i32
  }
  func.func @transform_15(%arg0: i32) -> (i32, i32, i32) {
    %c0_i32 = arith.constant 0 : i32
    %c0_i32_0 = arith.constant 0 : i32
    %c0_i32_1 = arith.constant 0 : i32
    %c0_i32_2 = arith.constant 0 : i32
    return %c0_i32, %c0_i32_0, %c0_i32_1 : i32, i32, i32
  }
  func.func @transform_16(%arg0: i32) -> (i32, i32, i32) {
    %c0_i32 = arith.constant 0 : i32
    %c0_i32_0 = arith.constant 0 : i32
    %c0_i32_1 = arith.constant 0 : i32
    return %arg0, %c0_i32, %c0_i32_0 : i32, i32, i32
  }
}

</mosaic_0001>

<bundles_post_ra>
// kernel: tpu_custom_call.1
= control target key start
LH: loop header
LB: loop body
LE: loop exit
PB: predicated region body
PF: predicated region fallthrough
CT: control target
= control target key end

     0   :  { %s14863_s0 = inlined_call_operand.hbm [shape: f32[4,16,16], index: 0, kind: input, shape index: {}]   ;;  %s14864_s1 = inlined_call_operand.hbm [shape: f32[16,128], index: 1, kind: input, shape index: {}]   ;;  %s14865_s2 = inlined_call_operand.hbm [shape: f32[1,128], index: 2, kind: input, shape index: {}]   ;;  %s14866_s3 = inlined_call_operand.hbm [shape: f32[16,128], index: 3, kind: input, shape index: {}]   ;;  %s14867_s4 = inlined_call_operand.hbm [shape: f32[2,128,384], index: 4, kind: input, shape index: {}]   ;;  %s14868_s5 = inlined_call_operand.vmem [shape: f32[2,1,384], index: 5, kind: input, shape index: {}]   ;;  %s14869_s6 = inlined_call_operand.hbm [shape: f32[2,128,128], index: 6, kind: input, shape index: {}]   ;;  %s14870_s7 = inlined_call_operand.vmem [shape: f32[2,1,128], index: 7, kind: input, shape index: {}]   ;;  %s14871_s8 = inlined_call_operand.hbm [shape: f32[2,1,128], index: 8, kind: input, shape index: {}]   ;;  %s14872_s9 = inlined_call_operand.hbm [shape: f32[2,1,128], index: 9, kind: input, shape index: {}]   ;;  %s14873_s10 = inlined_call_operand.hbm [shape: f32[2,128,512], index: 10, kind: input, shape index: {}]   ;;  %s14874_s11 = inlined_call_operand.vmem [shape: f32[2,1,512], index: 11, kind: input, shape index: {}]   ;;  %s14875_s12 = inlined_call_operand.hbm [shape: f32[2,512,128], index: 12, kind: input, shape index: {}]   ;;  %s14876_s13 = inlined_call_operand.vmem [shape: f32[2,1,128], index: 13, kind: input, shape index: {}]   ;;  %s14877_s14 = inlined_call_operand.vmem [shape: f32[2,1,128], index: 14, kind: input, shape index: {}]   ;;  %s14878_s15 = inlined_call_operand.vmem [shape: f32[2,1,128], index: 15, kind: input, shape index: {}]   ;;  %s14879_s16 = inlined_call_operand.hbm [shape: f32[2,2,128], index: 16, kind: output, shape index: {}]  }
   0x1   :  { %14893 = sst [smem:[#allocation28_spill]] %s14863_s0 }
   0x2   :  { %14894 = sst [smem:[#allocation29_spill]] %s14864_s1 }
   0x3   :  { %14895 = sst [smem:[#allocation30_spill]] %s14865_s2 }
   0x4   :  { %14896 = sst [smem:[#allocation31_spill]] %s14866_s3 }
   0x5   :  { %14897 = sst [smem:[#allocation32_spill]] %s14867_s4 }
   0x6   :  { %14898 = sst [smem:[#allocation33_spill]] %s14869_s6 }
   0x7   :  { %14899 = sst [smem:[#allocation34_spill]] %s14871_s8 }
   0x8   :  { %14900 = sst [smem:[#allocation35_spill]] %s14872_s9 }
   0x9   :  { %14901 = sst [smem:[#allocation36_spill]] %s14873_s10 }
   0xa   :  { %14902 = sst [smem:[#allocation37_spill]] %s14875_s12 }
   0xb   :  { %14903 = sst [smem:[#allocation38_spill]] %s14878_s15 }
   0xc   :  { %14904 = sst [smem:[#allocation39_spill]] %s14879_s16 }
   0xd   :  { %21 = vsyncpa [#allocation3], 0 }
   0xe   :  { %23 = vsyncpa [#allocation3 + $0x1], 0 }
   0xf   :  { %24 = vsyncpa [#allocation6], 0 }
  0x10   :  { %25 = vsyncpa [#allocation9], 0 }
  0x11   :  { %26 = vsyncpa [#allocation12], 0 }
  0x12   :  { %27 = vsyncpa [#allocation15], 0 }
  0x13   :  { %28 = vsyncpa [#allocation18], 0 }
  0x14   :  { %29 = vsyncpa [#allocation4], 0 }
  0x15   :  { %31 = vsyncpa [#allocation4 + $0x1], 0  ;;  %s13246_s21 = smov 0   ;;  %s13248_s22 = smov 0  }
  0x16   :  { %s13250_s23 = smov 0   ;;  %s13252_s24 = smov 0  }
  0x17 LB: > { %s13134_s25 = smov [#allocation5]   ;;  %s13267_s27 = sadd.s32 4294967295, %s13132_s24   ;;  %s13132_s24 = sphi %s13252_s24, %s14948_s24   ;;  %s13128_s23 = sphi %s13250_s23, %s14947_s23   ;;  %s13124_s22 = sphi %s13248_s22, %s14946_s22   ;;  %s13120_s21 = sphi %s13246_s21, %s14945_s21  }
  0x18   : > { %s421_s26 = sshll.u32 %s13134_s25, 4  ;;  %p10769_p0 = scmp.ge.s32.totalorder %s13132_s24, 1  ;;  %s422_s26 = int_to_ptr.vmem [resolvable:$true] %s421_s26 }
  0x19   : > { %p14889_p1 = scmp.eq.s32.totalorder %s13267_s27, 0  ;;  %p409_p2 = scmp.lt.s32.totalorder %s13132_s24, 3 }
  0x1a   : > { %s13135_s29 = smov [#allocation8]   ;;  %s13136_s17 = smov [#allocation11]  }
  0x1b   : > { %p13272_p3 = pnand %p10769_p0, %p409_p2  ;;  %s445_s30 = sshll.u32 %s13135_s29, 4  ;;  %s13285_s30 = int_to_ptr.vmem [resolvable:$true] %s445_s30 }
  0x1c   : > { %s474_s18 = sshll.u32 %s13136_s17, 4  ;;  %s12797_s20 = scalar_lea.vmem %s422_s26, 256  ;;  %s13287_s18 = int_to_ptr.vmem [resolvable:$true] %s474_s18 }
  0x1d   : > { %s14905_s28 = scalar_select %p13272_p3, 1, 0 }
  0x1e   : > { %p12389_p5 = pneg %p13272_p3  ;;  %p12798_p8 = scmp.ne.s32.totalorder %s422_s26, %s12797_s20 }
  0x1f   : > { %p12805_p11 = scmp.lt.s32.totalorder %s422_s26, %s422_s26  ;;  %p12806_p12 = scmp.lt.s32.totalorder %s12797_s20, %s12797_s20 }
  0x20   : > { %p13281_p6 = pnand %p12389_p5, %p14889_p1 }
  0x21   : > { %p12807_p13 = por %p12806_p12, %p12805_p11 }
  0x22   : > { %p13291_p7 = pneg %p13281_p6 }
  0x24   : > { %p12800_p9 = pnand %p12798_p8, %p13291_p7 }
  0x26   : > { %p12801_p10 = pneg %p12800_p9 }
  0x28   : > { %p12808_p0 = pnand %p12807_p13, %p12801_p10 }
  0x2a   : > { %12811 = shalt.err (!%p12808_p0)
}
  0x2b   : > { %s14883_s25 = smov 128   ;;  %s14885_s29 = smov 8  }
  0x2c   : > { %s14908_s1 = sld [smem:[#allocation29_spill]]  ;;  %s12823_s15 = scalar_lea.vmem %s13285_s30, 256 }
  0x2d   : > { %p12824_p2 = scmp.ne.s32.totalorder %s13285_s30, %s12823_s15  ;;  %p12831_p9 = scmp.lt.s32.totalorder %s13285_s30, %s13285_s30 }
  0x2e   : > { %p12832_p10 = scmp.lt.s32.totalorder %s12823_s15, %s12823_s15 }
  0x2f   : > { %p12826_p5 = pnand %p12824_p2, %p13291_p7 }
  0x30   : > { %p12833_p11 = por %p12832_p10, %p12831_p9 }
  0x31   : > { %p12827_p8 = pneg %p12826_p5 }
  0x32   : > { %12392 = dma.hbm_to_vmem [thread:$0]  (!%p13281_p6), %s14908_s1, 256, %s422_s26, [#allocation6], %s14883_s25, %s14883_s25, %s14885_s29  }
  0x33   : > { %p12834_p12 = pnand %p12833_p11, %p12827_p8 }
  0x35   : > { %12837 = shalt.err (!%p12834_p12)
}
  0x36   : > { %s14909_s3 = sld [smem:[#allocation31_spill]]  ;;  %s12849_s26 = scalar_lea.vmem %s13287_s18, 4096 }
  0x37   : > { %p12850_p13 = scmp.ne.s32.totalorder %s13287_s18, %s12849_s26  ;;  %p12857_p5 = scmp.lt.s32.totalorder %s13287_s18, %s13287_s18 }
  0x38   : > { %p12858_p8 = scmp.lt.s32.totalorder %s12849_s26, %s12849_s26 }
  0x39   : > { %p12852_p0 = pnand %p12850_p13, %p13291_p7 }
  0x3a   : > { %p12859_p9 = por %p12858_p8, %p12857_p5 }
  0x3b   : > { %p12853_p2 = pneg %p12852_p0 }
  0x3c   : > { %12398 = dma.hbm_to_vmem [thread:$0]  (!%p13281_p6), %s14909_s3, 256, %s13285_s30, [#allocation9], %s14883_s25, %s14883_s25, %s14885_s29  }
  0x3d   : > { %p12860_p10 = pnand %p12859_p9, %p12853_p2 }
  0x3f   : > { %12863 = shalt.err (!%p12860_p10)
}
  0x40   : > { %s14910_s6 = sld [smem:[#allocation33_spill]]  ;;  %s13139_s30 = smov [#allocation14]  }
  0x41   : > { %s503_s20 = sshll.u32 %s13139_s30, 4  ;;  %s13140_s16 = smov [#allocation7]   ;;  %s504_s20 = int_to_ptr.vmem [resolvable:$true] %s503_s20 }
  0x42   : > { %s435_s1 = sshll.u32 %s13140_s16, 4  ;;  %s12875_s26 = scalar_lea.vmem %s504_s20, 32  ;;  %s436_s1 = int_to_ptr.vmem [resolvable:$true] %s435_s1 }
  0x43   : > { %p12876_p11 = scmp.ne.s32.totalorder %s504_s20, %s12875_s26  ;;  %p12883_p0 = scmp.lt.s32.totalorder %s504_s20, %s504_s20 }
  0x44   : > { %p12884_p2 = scmp.lt.s32.totalorder %s12875_s26, %s12875_s26 }
  0x45   : > { %p12878_p12 = pnand %p12876_p11, %p13291_p7 }
  0x46   : > { %12404 = dma.hbm_to_vmem [thread:$0]  (!%p13281_p6), %s14910_s6, 4096, %s13287_s18, [#allocation12], %s14883_s25, %s14883_s25, %s14885_s29  }
  0x47   : > { %p12879_p13 = pneg %p12878_p12  ;;  %p12885_p5 = por %p12884_p2, %p12883_p0 }
  0x49   : > { %p12886_p8 = pnand %p12885_p5, %p12879_p13 }
  0x4b   : > { %12889 = shalt.err (!%p12886_p8)
}
  0x4c   : > { %s14887_s3 = smov 16   ;;  %s14888_s15 = smov 1  }
  0x4d   : > { %s14911_s9 = sld [smem:[#allocation35_spill]]  ;;  %s12901_s30 = scalar_lea.vmem %s436_s1, 16 }
  0x4e   : > { %p12902_p9 = scmp.ne.s32.totalorder %s436_s1, %s12901_s30  ;;  %s12908_s16 = scalar_lea.vmem %s436_s1, 32 }
  0x4f   : > { %p12909_p12 = scmp.lt.s32.totalorder %s436_s1, %s436_s1  ;;  %p12910_p13 = scmp.lt.s32.totalorder %s12908_s16, %s12901_s30 }
  0x50   : > { %p12904_p10 = pnand %p12902_p9, %p13291_p7 }
  0x51   : > { %p12911_p0 = por %p12910_p13, %p12909_p12 }
  0x52   : > { %p12905_p11 = pneg %p12904_p10 }
  0x53   : > { %12410 = dma.hbm_to_vmem [thread:$0]  (!%p13281_p6), %s14911_s9, 32, %s504_s20, [#allocation15], %s14887_s3, %s14887_s3, %s14888_s15  }
  0x54   : > { %p12912_p2 = pnand %p12911_p0, %p12905_p11 }
  0x56   : > { %12915 = shalt.err (!%p12912_p2)
}
  0x57   : > { %s14912_s2 = sld [smem:[#allocation30_spill]]  ;;  %s13143_s20 = smov [#allocation10]  }
  0x58   : > { %s458_s18 = sshll.u32 %s13143_s20, 4  ;;  %s459_s18 = int_to_ptr.vmem [resolvable:$true] %s458_s18 }
  0x59   : > { %s12927_s17 = scalar_lea.vmem %s459_s18, 12288  ;;  %p12935_p10 = scmp.lt.s32.totalorder %s459_s18, %s459_s18 }
  0x5a   : > { %p12928_p5 = scmp.ne.s32.totalorder %s459_s18, %s12927_s17  ;;  %p12936_p4 = scmp.lt.s32.totalorder %s12927_s17, %s12927_s17 }
  0x5c   : > { %p12930_p8 = pnand %p12928_p5, %p13291_p7  ;;  %p12937_p12 = por %p12936_p4, %p12935_p10 }
  0x5d   : > { %12395 = dma.hbm_to_vmem [thread:$0]  (!%p13281_p6), %s14912_s2, 16, %s436_s1, [#allocation6]  }
  0x5e   : > { %p12931_p9 = pneg %p12930_p8 }
  0x60   : > { %p12938_p11 = pnand %p12937_p12, %p12931_p9 }
  0x62   : > { %12941 = shalt.err (!%p12938_p11)
}
  0x63   : > { %s13144_s30 = smov 384   ;;  %s13145_s16 = smov 24  }
  0x64   : > { %s14913_s4 = sld [smem:[#allocation32_spill]]  ;;  %s13146_s26 = smov [#allocation13]  }
  0x65   : > { %s490_s20 = sshll.u32 %s13146_s26, 4  ;;  %s13147_s29 = smov [#allocation16]   ;;  %s491_s20 = int_to_ptr.vmem [resolvable:$true] %s490_s20 }
  0x66   : > { %s516_s3 = sshll.u32 %s13147_s29, 4  ;;  %s12953_s15 = scalar_lea.vmem %s491_s20, 32  ;;  %s517_s3 = int_to_ptr.vmem [resolvable:$true] %s516_s3 }
  0x67   : > { %p12954_p13 = scmp.ne.s32.totalorder %s491_s20, %s12953_s15  ;;  %p12961_p2 = scmp.lt.s32.totalorder %s491_s20, %s491_s20 }
  0x68   : > { %p12962_p5 = scmp.lt.s32.totalorder %s12953_s15, %s12953_s15 }
  0x69   : > { %p12956_p4 = pnand %p12954_p13, %p13291_p7 }
  0x6a   : > { %12401 = dma.hbm_to_vmem [thread:$0]  (!%p13281_p6), %s14913_s4, 12288, %s459_s18, [#allocation9], %s13144_s30, %s13144_s30, %s13145_s16  }
  0x6b   : > { %p12957_p0 = pneg %p12956_p4  ;;  %p12963_p8 = por %p12962_p5, %p12961_p2 }
  0x6d   : > { %p12964_p9 = pnand %p12963_p8, %p12957_p0 }
  0x6f   : > { %12967 = shalt.err (!%p12964_p9)
}
  0x70   : > { %s14914_s17 = smov 1   ;;  %s14915_s18 = smov 16  }
  0x71   : > { %s14916_s8 = sld [smem:[#allocation34_spill]]  ;;  %s12979_s29 = scalar_lea.vmem %s517_s3, 16384 }
  0x72   : > { %p12980_p10 = scmp.ne.s32.totalorder %s517_s3, %s12979_s29  ;;  %p12987_p13 = scmp.lt.s32.totalorder %s517_s3, %s517_s3 }
  0x73   : > { %p12988_p4 = scmp.lt.s32.totalorder %s12979_s29, %s12979_s29 }
  0x74   : > { %p12982_p12 = pnand %p12980_p10, %p13291_p7 }
  0x75   : > { %p12989_p2 = por %p12988_p4, %p12987_p13 }
  0x76   : > { %p12983_p11 = pneg %p12982_p12 }
  0x77   : > { %12407 = dma.hbm_to_vmem [thread:$0]  (!%p13281_p6), %s14916_s8, 32, %s491_s20, [#allocation12], %s14915_s18, %s14915_s18, %s14914_s17  }
  0x78   : > { %p12990_p0 = pnand %p12989_p2, %p12983_p11 }
  0x7a   : > { %12993 = shalt.err (!%p12990_p0)
}
  0x7b   : > { %s13148_s15 = smov 512   ;;  %s13149_s25 = smov 32  }
  0x7c   : > { %s14917_s10 = sld [smem:[#allocation36_spill]]  ;;  %s13150_s20 = smov [#allocation17]  }
  0x7d   : > { %s532_s17 = sshll.u32 %s13150_s20, 4  ;;  %s533_s17 = int_to_ptr.vmem [resolvable:$true] %s532_s17 }
  0x7e   : > { %s13005_s18 = scalar_lea.vmem %s533_s17, 16384  ;;  %p13013_p10 = scmp.lt.s32.totalorder %s533_s17, %s533_s17 }
  0x7f   : > { %p13006_p5 = scmp.ne.s32.totalorder %s533_s17, %s13005_s18  ;;  %p13014_p12 = scmp.lt.s32.totalorder %s13005_s18, %s13005_s18 }
  0x81   : > { %p13008_p8 = pnand %p13006_p5, %p13291_p7  ;;  %p13015_p11 = por %p13014_p12, %p13013_p10 }
  0x82   : > { %12413 = dma.hbm_to_vmem [thread:$0]  (!%p13281_p6), %s14917_s10, 16384, %s517_s3, [#allocation15], %s13148_s15, %s13148_s15, %s13149_s25  }
  0x83   : > { %p13009_p9 = pneg %p13008_p8 }
  0x85   : > { %p13016_p13 = pnand %p13015_p11, %p13009_p9 }
  0x87   : > { %13019 = shalt.err (!%p13016_p13)
}
  0x88   : > { %s14918_s30 = smov 8   ;;  %s14919_s16 = smov 128  }
  0x89   : > { %s14920_s12 = sld [smem:[#allocation37_spill]]  ;;  %s10768_s0 = sadd.s32 4294967294, %s13132_s24  }
  0x8a   : > { %s13388_s19 = sadd.s32 1, %s13132_s24   ;;  %s44_s15 = sadd.s32 1, %s13128_s23 }
  0x8b   : > { %s41_s25 = ssub.s32 %s13132_s24, %s13388_s19  ;;  %p51_p7 = scmp.ne.s32.totalorder %s13128_s23, %s13124_s22 }
  0x8c   : > { %p42_p4 = scmp.eq.s32.totalorder %s41_s25, 0  ;;  %p52_p2 = scmp.eq.s32.totalorder %s13132_s24, 0 }
  0x8d   : > { %p57_p0 = scmp.ne.s32.totalorder %s13124_s22, %s13120_s21  ;;  %p396_p5 = scmp.eq.s32.totalorder %s13267_s27, 1 }
  0x8e   : > { %s13400_s1 = scalar_select %p42_p4, %s13128_s23, %s44_s15  }
  0x8f   : > { %12416 = dma.hbm_to_vmem [thread:$0]  (!%p13281_p6), %s14920_s12, 16384, %s533_s17, [#allocation18], %s14919_s16, %s14919_s16, %s14918_s30  }
  0x90   : > { %14921 = sst [smem:[#allocation27_spill]] %s13400_s1  ;;  %p53_p8 = por %p52_p2, %p51_p7 }
  0x91   : > { %p13404_p9 = por %p14889_p1, %p57_p0  ;;  %p13408_p6 = por %p396_p5, %p51_p7 }
  0x92   : > { %p402_p10 = scmp.eq.s32.totalorder %s10768_s0, 1  ;;  %p12434_p12 = scmp.lt.s32.totalorder %s13132_s24, 2 }
  0x93   : > { %s14922_s26 = scalar_select %p13404_p9, 1, 0 }
  0x94   : > { %s14923_s20 = scalar_select %p13408_p6, 1, 0 }
  0x95   : > { %s555_s17 = sand.u32 1, %s13128_s23   ;;  %p13414_p11 = por %p402_p10, %p57_p0 }
  0x96   : > { %s10780_s29 = sshll.u32 %s555_s17, 5  ;;  %s11080_s3 = sshll.u32 %s13132_s24, 9 }
  0x97   : > { %s14924_s18 = scalar_select %p13414_p11, 1, 0 }
  0x98   : > { %s14925_s2 = sld [smem:[#allocation28_spill]]  ;;  %s559_s6 = scalar_lea.vmem [#allocation2], %s10780_s29 }
  0x99   : > { %s567_s8 = sshll.u32 %s559_s6, 4  ;;  %p13424_p13 = pnand %p12434_p12, %p53_p8  ;;  %s13428_s8 = int_to_ptr.vmem [resolvable:$true] %s567_s8 }
  0x9a   : > { %s13430_s9 = scalar_lea.sflag [#allocation3], %s555_s17 }
  0x9b   : > { %p13022_p4 = pneg %p13424_p13 }
  0x9e   : > { %s13422_s4 = scalar_lea.hbm %s14925_s2, %s11080_s3  ;;  %s13025_s29 = scalar_lea.hbm %s14925_s2, 1024 }
  0x9f   : > { %s13020_s10 = scalar_lea.hbm %s13422_s4, 512  ;;  %p13026_p5 = scmp.lt.s32.totalorder %s13422_s4, %s14925_s2 }
  0xa0   : > { %p13021_p7 = scmp.ne.s32.totalorder %s13422_s4, %s13020_s10  ;;  %p13027_p8 = scmp.lt.s32.totalorder %s13025_s29, %s13020_s10 }
  0xa2   : > { %p13023_p2 = pnand %p13022_p4, %p13021_p7  ;;  %p13028_p10 = por %p13027_p8, %p13026_p5 }
  0xa4   : > { %p13024_p0 = pneg %p13023_p2 }
  0xa6   : > { %p13029_p12 = pnand %p13028_p10, %p13024_p0 }
  0xa8   : > { %13032 = shalt.err (!%p13029_p12)
}
  0xa9   : > { %s13033_s17 = scalar_lea.vmem %s13428_s8, 512  ;;  %s13151_s12 = smov [#allocation2]  }
  0xaa   : > { %p13034_p1 = scmp.ne.s32.totalorder %s13428_s8, %s13033_s17  ;;  %s13038_s1 = sshll.u32 %s13151_s12, 4  ;;  %s13039_s1 = int_to_ptr.vmem [resolvable:$false] %s13038_s1 }
  0xab   : > { %s13040_s3 = scalar_lea.vmem %s13039_s1, 1024  ;;  %p13041_p2 = scmp.lt.s32.totalorder %s13428_s8, %s13039_s1 }
  0xac   : > { %p13036_p11 = pnand %p13034_p1, %p13022_p4  ;;  %p13042_p6 = scmp.lt.s32.totalorder %s13040_s3, %s13033_s17 }
  0xae   : > { %p13037_p7 = pneg %p13036_p11  ;;  %p13043_p9 = por %p13042_p6, %p13041_p2 }
  0xb0   : > { %p13044_p3 = pnand %p13043_p9, %p13037_p7 }
  0xb2   : > { %13047 = shalt.err (!%p13044_p3)
}
  0xb3   : > { %12420 = dma.hbm_to_vmem [thread:$0]  (!%p13424_p13), %s13422_s4, 512, %s13428_s8, %s13430_s9, %s14919_s16, %s14919_s16, %s14918_s30  }
  0xb4   : > { %p14927_p1 = scmp.ne.s32.totalorder %s14905_s28, 0 }
  0xb5   : > { %s13457_s10 = sand.u32 (!%p14927_p1), 1, %s13124_s22   ;;  %p14928_p3 = scmp.ne.s32.totalorder (!%p14927_p1), %s14922_s26, 0 }
  0xb6   : > { %579 = sbr.rel (%p14927_p1) target bundleno = 14339 (0x3803), region = 84  ;;  %s10785_s12 = sshll.u32 (!%p14927_p1), %s13457_s10, 5 }
  0xb7   : > { %s582_s1 = scalar_lea.sflag (!%p14927_p1), [#allocation3], %s13457_s10  ;;  %s13461_s15 = scalar_lea.vmem (!%p14927_p1), [#allocation2], %s10785_s12 }
  0xbb   : > { %13091 = dma.done.wait (%p14928_p3), %s582_s1, 512  }
  0xbc   : > { %13093 = vsyncadd (%p14928_p3), %s582_s1, 4294966784  ;;  %p14929_p9 = scmp.eq.s32.totalorder %s13267_s27, 0 }
  0xbe   : > { %13095 = dma.done.wait (%p14929_p9), [#allocation6], 272   ;;  %p14930_p6 = pmov %p14929_p9 }
  0xc0   : > { %13097 = vsyncadd (%p14930_p6), [#allocation6], 4294967024  ;;  %p14931_p11 = pmov %p14930_p6 }
  0xc1   : > { %p14932_p13 = pmov %p14930_p6 }
  0xc2   : > { %13099 = dma.done.wait (%p14931_p11), [#allocation9], 12544  }
  0xc3   : > { %13101 = vsyncadd (%p14932_p13), [#allocation9], 4294954752  ;;  %p14933_p4 = pmov %p14930_p6 }
  0xc5   : > { %13103 = dma.done.wait (%p14933_p4), [#allocation12], 4128   ;;  %p14934_p0 = pmov %p14933_p4 }
  0xc7   : > { %13105 = vsyncadd (%p14934_p0), [#allocation12], 4294963168  ;;  %p14935_p5 = pmov %p14934_p0 }
  0xc8   : > { %p14936_p8 = pmov %p14934_p0 }
  0xc9   : > { %13107 = dma.done.wait (%p14935_p5), [#allocation15], 16416  }
  0xca   : > { %13109 = vsyncadd (%p14936_p8), [#allocation15], 4294950880  ;;  %p14937_p10 = pmov %p14934_p0 }
  0xcb   : > { %p14938_p12 = pmov %p14934_p0 }
  0xcc   : > { %13111 = dma.done.wait (%p14937_p10), [#allocation18], 16384  }
  0xcd   : > { %13113 = vsyncadd (%p14938_p12), [#allocation18], 4294950912  ;;  %vm684_vm0 = vcmask 130048   ;;  %v676_v0 = vld [vmem:[#allocation5 + $0x8] sm:$0xff]  ;;  %v675_v1 = vld [vmem:[#allocation5] sm:$0xff]  ;;  %v13152_v54 = vmov 0.0  }
  0xce   : > { %v671_v2 = vld [vmem:[%s13461_s15] sm:$0xff]  ;;  %11655 = vmatprep.subr.mxu0 %v676_v0  ;;  %v672_v3 = vld [vmem:[%s13461_s15 + $0x8] sm:$0xff]  ;;  %v834_v4 = vld [vmem:[#allocation10 + $0x170] sm:$0xff]  ;;  %1068 = vmatprep.mubr.f32.mxu1 %v13152_v54  ;;  %s13153_s9 = smov 112   ;;  %s13154_s28 = smov 96  }
  0xcf   : > { %11659 = vmatprep.mubr.msk.f32.mxu0 %vm684_vm0, %v671_v2  ;;  %11656 = vmatpush3.msra.mxu0 %v676_v0  ;;  %v833_v5 = vld [vmem:[#allocation10 + $0x168] sm:$0xff]  ;;  %v835_v6 = vld [vmem:[#allocation10 + $0x178] sm:$0xff]  ;;  %v830_v9 = vld [vmem:[#allocation10 + $0x150] sm:$0xff]  ;;  %s13155_s30 = smov 80   ;;  %s13156_s16 = smov 64  }
  0xd0   : > { %11657 = vmatprep.subr.mxu0 %v675_v1  ;;  %v673_v7 = vld [vmem:[%s13461_s15 + $0x10] sm:$0xff]  ;;  %1004 = vmatprep.subr.mxu1 %v834_v4  ;;  %v831_v8 = vld [vmem:[#allocation10 + $0x158] sm:$0xff]  ;;  %v832_v10 = vld [vmem:[#allocation10 + $0x160] sm:$0xff]  ;;  %s13157_s26 = smov 48   ;;  %s13158_s0 = smov 32  }
  0xd1   : > { %11658 = vmatpush3.msra.mxu0 %v675_v1  ;;  %1005 = vmatpush1.msra.mxu1 %v833_v5  ;;  %v828_v11 = vld [vmem:[#allocation10 + $0x140] sm:$0xff]  ;;  %v674_v12 = vld [vmem:[%s13461_s15 + $0x18] sm:$0xff]  ;;  %v825_v14 = vld [vmem:[#allocation10 + $0x128] sm:$0xff]  ;;  %s13159_s29 = smov 16   ;;  %s14939_s25 = sld [smem:[#allocation38_spill]] }
  0xd2   : > { %11660 = vmatmul.mubr.msk.f32.vlgmr.msra.gmra.mxu0 %vm684_vm0, %v672_v3  ;;  %11665 = vmatprep.subr.mxu0 %v835_v6  ;;  %v827_v13 = vld [vmem:[#allocation10 + $0x138] sm:$0xff]  ;;  %v829_v15 = vld [vmem:[#allocation10 + $0x148] sm:$0xff]  ;;  %v824_v16 = vld [vmem:[#allocation10 + $0x120] sm:$0xff]  ;;  %s10795_s1 = sshll.u32 %s13457_s10, 1  ;;  %s11076_s6 = sshll.u32 %s13267_s27, 5 }
  0xd3   : > { %11662 = vmatprep.mubr.msk.f32.mxu0 %vm684_vm0, %v673_v7  ;;  %1006 = vmatprep.subr.mxu1 %v831_v8  ;;  %v822_v17 = vld [vmem:[#allocation10 + $0x110] sm:$0xff]  ;;  %v821_v19 = vld [vmem:[#allocation10 + $0x108] sm:$0xff]  ;;  %v819_v20 = vld [vmem:[#allocation10 + $0xf8] sm:$0xff]  ;;  %s669_s8 = scalar_lea.vmem [#allocation19], %s10795_s1  ;;  %p14941_p2 = scmp.ne.s32.totalorder %s14923_s20, 0 }
  0xd4   : > { %11666 = vmatpush3.msra.mxu0 %v835_v6  ;;  %1007 = vmatpush1.msra.mxu1 %v830_v9  ;;  %v826_v18 = vld [vmem:[#allocation10 + $0x130] sm:$0xff]  ;;  %v823_v21 = vld [vmem:[#allocation10 + $0x118] sm:$0xff]  ;;  %v816_v23 = vld [vmem:[#allocation10 + $0xe0] sm:$0xff]  ;;  %v989_v6 = vlaneseq  ;;  %s10612_s17 = sshll.u32 %s669_s8, 4  ;;  %s10613_s17 = int_to_ptr.vmem [resolvable:$true] %s10612_s17 }
  0xd5   : > { %11667 = vmatprep.subr.mxu0 %v832_v10  ;;  %1008 = vmatprep.subr.mxu1 %v828_v11  ;;  %v818_v22 = vld [vmem:[#allocation10 + $0xf0] sm:$0xff]  ;;  %v820_v24 = vld [vmem:[#allocation10 + $0x100] sm:$0xff]  ;;  %v815_v25 = vld [vmem:[#allocation10 + $0xd8] sm:$0xff] }
  0xd6   : > { %11663 = vmatmul.mubr.msk.f32.gmra.mxu0 %vm684_vm0, %v674_v12  ;;  %1009 = vmatpush1.msra.mxu1 %v827_v13  ;;  %v813_v26 = vld [vmem:[#allocation10 + $0xc8] sm:$0xff]  ;;  %v812_v28 = vld [vmem:[#allocation10 + $0xc0] sm:$0xff]  ;;  %v810_v29 = vld [vmem:[#allocation10 + $0xb0] sm:$0xff]  ;;  %v13515_v7 = vshrl.u32 %v989_v6, 7 }
  0xd7   : > { %11668 = vmatpush3.msra.mxu0 %v832_v10  ;;  %1010 = vmatprep.subr.mxu1 %v825_v14  ;;  %v817_v27 = vld [vmem:[#allocation10 + $0xe8] sm:$0xff]  ;;  %v814_v30 = vld [vmem:[#allocation10 + $0xd0] sm:$0xff]  ;;  %v807_v32 = vld [vmem:[#allocation10 + $0x98] sm:$0xff] }
  0xd8   : > { %11669 = vmatprep.subr.mxu0 %v829_v15  ;;  %1011 = vmatpush1.msra.mxu1 %v824_v16  ;;  %v809_v31 = vld [vmem:[#allocation10 + $0xa8] sm:$0xff]  ;;  %v811_v33 = vld [vmem:[#allocation10 + $0xb8] sm:$0xff]  ;;  %v806_v34 = vld [vmem:[#allocation10 + $0x90] sm:$0xff]  ;;  %v13518_v8 = vsub.s32 0, %v13515_v7  ;;  %v13527_v13 = vsub.s32 1, %v13515_v7  ;;  %v13532_v16 = vsub.s32 2, %v13515_v7 }
  0xd9   : > { %11670 = vmatpush3.msra.mxu0 %v829_v15  ;;  %1012 = vmatprep.subr.mxu1 %v822_v17  ;;  %v804_v35 = vld [vmem:[#allocation10 + $0x80] sm:$0xff]  ;;  %v803_v37 = vld [vmem:[#allocation10 + $0x78] sm:$0xff]  ;;  %v801_v38 = vld [vmem:[#allocation10 + $0x68] sm:$0xff] }
  0xda   : > { %11671 = vmatprep.subr.mxu0 %v826_v18  ;;  %1013 = vmatpush1.msra.mxu1 %v821_v19  ;;  %v808_v36 = vld [vmem:[#allocation10 + $0xa0] sm:$0xff]  ;;  %v805_v39 = vld [vmem:[#allocation10 + $0x88] sm:$0xff]  ;;  %v798_v41 = vld [vmem:[#allocation10 + $0x50] sm:$0xff] }
  0xdb   : > { %11672 = vmatpush3.msra.mxu0 %v826_v18  ;;  %1014 = vmatprep.subr.mxu1 %v819_v20  ;;  %v800_v40 = vld [vmem:[#allocation10 + $0x60] sm:$0xff]  ;;  %v802_v42 = vld [vmem:[#allocation10 + $0x70] sm:$0xff]  ;;  %v797_v43 = vld [vmem:[#allocation10 + $0x48] sm:$0xff] }
  0xdc   : > { %11673 = vmatprep.subr.mxu0 %v823_v21  ;;  %1015 = vmatpush1.msra.mxu1 %v818_v22  ;;  %v799_v44 = vld [vmem:[#allocation10 + $0x58] sm:$0xff]  ;;  %v794_v46 = vld [vmem:[#allocation10 + $0x30] sm:$0xff]  ;;  %v796_v47 = vld [vmem:[#allocation10 + $0x40] sm:$0xff] }
  0xdd   : > { %11674 = vmatpush3.msra.mxu0 %v823_v21  ;;  %1016 = vmatprep.subr.mxu1 %v816_v23  ;;  %v795_v45 = vld [vmem:[#allocation10 + $0x38] sm:$0xff]  ;;  %v792_v48 = vld [vmem:[#allocation10 + $0x20] sm:$0xff]  ;;  %v793_v50 = vld [vmem:[#allocation10 + $0x28] sm:$0xff] }
  0xde   : > { %11675 = vmatprep.subr.mxu0 %v820_v24  ;;  %1017 = vmatpush1.msra.mxu1 %v815_v25  ;;  %v791_v49 = vld [vmem:[#allocation10 + $0x18] sm:$0xff]  ;;  %v789_v51 = vld [vmem:[#allocation10 + $0x8] sm:$0xff]  ;;  %v788_v52 = vld [vmem:[#allocation10] sm:$0xff] }
  0xdf   : > { %11676 = vmatpush3.msra.mxu0 %v820_v24  ;;  %1018 = vmatprep.subr.mxu1 %v813_v26  ;;  %v790_v53 = vld [vmem:[#allocation10 + $0x10] sm:$0xff]  ;;  %v10796_v55 = vld [vmem:[#allocation7] ss:$0 sm:$0xff]  ;;  %v783_v60 = vld [vmem:[#allocation8 + $0x8] sm:$0xff] }
  0xe0   : > { %11677 = vmatprep.subr.mxu0 %v817_v27  ;;  %1019 = vmatpush1.msra.mxu1 %v812_v28  ;;  %v782_v59 = vld [vmem:[#allocation8] sm:$0xff]  ;;  %v836_v9 = vld [vmem:[%s14868_s5] sm:$0x7] }
  0xe1   : > { %11678 = vmatpush3.msra.mxu0 %v817_v27  ;;  %1020 = vmatprep.subr.mxu1 %v810_v29  ;;  %v992_v10 = vrot.slane %v836_v9, %v13518_v8  ;;  %v996_v17 = vrot.slane %v836_v9, %v13527_v13  ;;  %v13538_v22 = vrot.slane %v836_v9, %v13532_v16 }
  0xe2   : > { %11679 = vmatprep.subr.mxu0 %v814_v30  ;;  %1021 = vmatpush1.msra.mxu1 %v809_v31 }
  0xe3   : > { %11680 = vmatpush3.msra.mxu0 %v814_v30  ;;  %1022 = vmatprep.subr.mxu1 %v807_v32 }
  0xe4   : > { %11681 = vmatprep.subr.mxu0 %v811_v33  ;;  %1023 = vmatpush1.msra.mxu1 %v806_v34 }
  0xe5   : > { %11682 = vmatpush3.msra.mxu0 %v811_v33  ;;  %1024 = vmatprep.subr.mxu1 %v804_v35 }
  0xe6   : > { %11683 = vmatprep.subr.mxu0 %v808_v36  ;;  %1025 = vmatpush1.msra.mxu1 %v803_v37 }
  0xe7   : > { %11684 = vmatpush3.msra.mxu0 %v808_v36  ;;  %1026 = vmatprep.subr.mxu1 %v801_v38 }
  0xe8   : > { %11685 = vmatprep.subr.mxu0 %v805_v39  ;;  %1027 = vmatpush1.msra.mxu1 %v800_v40 }
  0xe9   : > { %11686 = vmatpush3.msra.mxu0 %v805_v39  ;;  %1028 = vmatprep.subr.mxu1 %v798_v41 }
  0xea   : > { %11687 = vmatprep.subr.mxu0 %v802_v42  ;;  %1029 = vmatpush1.msra.mxu1 %v797_v43 }
  0xeb   : > { %11688 = vmatpush3.msra.mxu0 %v802_v42  ;;  %1030 = vmatprep.subr.mxu1 %v795_v45 }
  0xec   : > { %11689 = vmatprep.subr.mxu0 %v799_v44  ;;  %1031 = vmatpush1.msra.mxu1 %v794_v46 }
  0xed   : > { %11690 = vmatpush3.msra.mxu0 %v799_v44  ;;  %1032 = vmatprep.subr.mxu1 %v792_v48 }
  0xee   : > { %11691 = vmatprep.subr.mxu0 %v796_v47  ;;  %1033 = vmatpush1.msra.mxu1 %v791_v49 }
  0xef   : > { %11692 = vmatpush3.msra.mxu0 %v796_v47  ;;  %1034 = vmatprep.subr.mxu1 %v789_v51 }
  0xf0   : > { %11693 = vmatprep.subr.mxu0 %v793_v50  ;;  %1035 = vmatpush1.msra.mxu1 %v788_v52 }
  0xf1   : > { %11694 = vmatpush3.msra.mxu0 %v793_v50 }
  0xf2   : > { %11695 = vmatprep.subr.mxu0 %v790_v53 }
  0xf3   : > { %11696 = vmatpush3.msra.mxu0 %v790_v53 }
 0x192   : > { %v11661_v56 = vpop.f32.mrf.mxu0 }
 0x193   : > { %v769_v57 = vadd.f32 %v11661_v56, %v10796_v55 }
 0x194   : > { %v763_v58 = vpop.f32.mrf.mxu0 }
 0x195   : > { %v764_v61 = vadd.f32 %v10796_v55, %v763_v58  ;;  %v13498_v1 = vadd.f32 %v783_v60, %v769_v57 }
 0x196   : > { %v11664_v62 = vpop.f32.mrf.mxu0 }
 0x197   : > { %v13496_v63 = vadd.f32 %v782_v59, %v764_v61  ;;  %v779_v0 = vadd.f32 %v11664_v62, %v10796_v55 }
 0x198   : > { %v773_v2 = vpop.f32.mrf.mxu0 }
 0x199   : > { %v774_v3 = vadd.f32 %v10796_v55, %v773_v2  ;;  %1069 = vmatmul.mubr.f32.vlgmr.msra.gmra.mxu1 %v13496_v63  ;;  %11697 = vmatprep.mubr.f32.mxu0 %v13496_v63  ;;  %v13502_v4 = vadd.f32 %v783_v60, %v779_v0 }
 0x19a   : > { %11698 = vmatmul.mubr.f32.vlgmr.msra.gmra.mxu0 %v13498_v1  ;;  %1074 = vmatprep.mubr.f32.mxu1 %v13152_v54 }
 0x19b   : > { %v13506_v5 = vadd.f32 %v782_v59, %v774_v3 }
 0x19d   : > { %1075 = vmatmul.mubr.f32.gmra.mxu1 %v13498_v1  ;;  %11700 = vmatprep.mubr.f32.mxu0 %v13506_v5 }
 0x19e   : > { %11701 = vmatmul.mubr.f32.gmra.mxu0 %v13502_v4  ;;  %1080 = vmatprep.mubr.f32.mxu1 %v13152_v54 }
 0x1a1   : > { %1081 = vmatmul.mubr.f32.gmra.mxu1 %v13506_v5 }
 0x1a2   : > { %1086 = vmatprep.mubr.f32.mxu1 %v13152_v54 }
 0x1a5   : > { %1087 = vmatmul.mubr.f32.gmra.mxu1 %v13502_v4 }
 0x259   : > { %v1070_v11 = vpop.f32.mrf.mxu1 }
 0x25a   : > { %v13524_v12 = vadd.f32 %v1070_v11, %v992_v10  ;;  %v11699_v20 = vpop.f32.mrf.mxu0 }
 0x25b   : > { %v1072_v14 = vpop.f32.mrf.mxu1  ;;  %v13553_v28 = vadd.f32 %v11699_v20, %v13538_v22 }
 0x25c   : > { %11707 = vmatprep.mubr.msk.f32.mxu0 %vm684_vm0, %v13524_v12  ;;  %v13540_v23 = vadd.f32 %v1072_v14, %v996_v17  ;;  %v1159_v26 = vpop.f32.mrf.mxu0 }
 0x25d   : > { %v1076_v15 = vpop.f32.mrf.mxu1  ;;  %v13563_v33 = vadd.f32 %v1159_v26, %v13538_v22 }
 0x25e   : > { %v13557_v30 = vadd.f32 %v1076_v15, %v992_v10  ;;  %v11702_v32 = vpop.f32.mrf.mxu0 }
 0x25f   : > { %v1078_v18 = vpop.f32.mrf.mxu1  ;;  %v13575_v35 = vadd.f32 %v11702_v32, %v13538_v22 }
 0x260   : > { %v13535_v19 = vadd.f32 %v1078_v18, %v996_v17  ;;  %v13588_v37 = vpop.f32.mrf.mxu0 }
 0x261   : > { %v1082_v21 = vpop.f32.mrf.mxu1  ;;  %v13623_v32 = vadd.f32 %v13588_v37, %v13538_v22 }
 0x262   : > { %v13542_v24 = vadd.f32 %v1082_v21, %v992_v10  ;;  %11703 = vmatprep.subr.msk.mxu0 %vm684_vm0, %v13535_v19 }
 0x263   : > { %v1084_v25 = vpop.f32.mrf.mxu1  ;;  %11704 = vmatpush3.xpose.msk.msra.mxu0 %vm684_vm0, %v13535_v19 }
 0x264   : > { %11705 = vmatprep.subr.msk.mxu0 %vm684_vm0, %v13540_v23  ;;  %11714 = vmatprep.mubr.msk.f32.mxu1 %vm684_vm0, %v13542_v24  ;;  %v13565_v34 = vadd.f32 %v1084_v25, %v996_v17 }
 0x265   : > { %v1088_v27 = vpop.f32.mrf.mxu1 }
 0x266   : > { %v13584_v36 = vadd.f32 %v1088_v27, %v992_v10 }
 0x267   : > { %v1090_v29 = vpop.f32.mrf.mxu1  ;;  %11706 = vmatpush3.xpose.msk.msra.mxu0 %vm684_vm0, %v13540_v23 }
 0x268   : > { %v13559_v31 = vadd.f32 %v1090_v29, %v996_v17  ;;  %11717 = vmatprep.subr.mxu0 %v13553_v28 }
 0x26a   : > { %11708 = vmatmul.mubr.msk.f32.vlgmr.msra.gmra.mxu0 %vm684_vm0, %v13557_v30  ;;  %11710 = vmatprep.subr.msk.mxu1 %vm684_vm0, %v13559_v31 }
 0x26b   : > { %11711 = vmatpush3.xpose.msk.msra.mxu1 %vm684_vm0, %v13559_v31  ;;  %11718 = vmatpush3.msra.mxu0 %v13553_v28 }
 0x26c   : > { %11712 = vmatprep.subr.msk.mxu1 %vm684_vm0, %v13565_v34  ;;  %11719 = vmatprep.subr.mxu0 %v13563_v33 }
 0x26d   : > { %11720 = vmatpush3.msra.mxu0 %v13563_v33 }
 0x26e   : > { %11724 = vmatprep.subr.mxu0 %v13575_v35 }
 0x26f   : > { %11713 = vmatpush3.xpose.msk.msra.mxu1 %vm684_vm0, %v13565_v34 }
 0x272   : > { %11715 = vmatmul.mubr.msk.f32.vlgmr.msra.gmra.mxu1 %vm684_vm0, %v13584_v36 }
 0x32a   : > { %v11709_v38 = vpop.f32.mrf.mxu0 }
 0x32b   : > { %v1355_v41 = vsel %vm684_vm0, %v11709_v38, -inf }
 0x32c   : > { %v1256_v39 = vpop.f32.mrf.mxu0 }
 0x32d   : > { %v1352_v40 = vsel %vm684_vm0, %v1256_v39, -inf }
 0x32e   : > { %1353 = vmax.xlane.f32.xlu0 %v1352_v40 }
 0x332   : > { %v11716_v42 = vpop.f32.mrf.mxu1  ;;  %1356 = vmax.xlane.f32.xlu0 %v1355_v41 }
 0x333   : > { %v1361_v45 = vsel %vm684_vm0, %v11716_v42, -inf }
 0x334   : > { %v1343_v43 = vpop.f32.mrf.mxu1 }
 0x335   : > { %v1358_v44 = vsel %vm684_vm0, %v1343_v43, -inf }
 0x336   : > { %1359 = vmax.xlane.f32.xlu1 %v1358_v44 }
 0x33a   : > { %1362 = vmax.xlane.f32.xlu1 %v1361_v45 }
 0x348   : > { %1564 = vrot.lane.b32.xlu0 %v13535_v19, %s13153_s9 }
 0x34b   : > { %1562 = vrot.lane.b32.xlu1 %v13540_v23, %s13153_s9 }
 0x34f   : > { %1655 = vrot.lane.b32.xlu1 %v13559_v31, %s13153_s9 }
 0x353   : > { %1558 = vrot.lane.b32.xlu1 %v13524_v12, %s13153_s9 }
 0x3b7   : > { %v1354_v46 = vpop.xlane.xlu0 %1353 }
 0x3b8   : > { %v1364_v47 = vsub.f32 %v1256_v39, %v1354_v46 }
 0x3ba   : > { %v1368_v48 = vmul.f32 1.442695, %v1364_v47 }
 0x3bb   : > { %v1357_v49 = vpop.xlane.xlu0 %1356 }
 0x3bc   : > { %12502 = vpow2.f32 %v1368_v48  ;;  %v1365_v50 = vsub.f32 %v11709_v38, %v1357_v49 }
 0x3be   : > { %v1370_v51 = vmul.f32 1.442695, %v1365_v50 }
 0x3bf   : > { %v1360_v52 = vpop.xlane.xlu1 %1359  ;;  %v1565_v53 = vpop.permute.xlu0 %1564 }
 0x3c0   : > { %12504 = vpow2.f32 %v1370_v51  ;;  %v1366_v55 = vsub.f32 %v1343_v43, %v1360_v52  ;;  %11731 = vmatprep.subr.msk.mxu1 %vm684_vm0, %v1565_v53 }
 0x3c1   : > { %11732 = vmatpush3.xpose.msk.msra.mxu1 %vm684_vm0, %v1565_v53 }
 0x3c2   : > { %v1372_v56 = vmul.f32 1.442695, %v1366_v55 }
 0x3c3   : > { %v1363_v57 = vpop.xlane.xlu1 %1362 }
 0x3c4   : > { %12506 = vpow2.f32 %v1372_v56  ;;  %v1367_v58 = vsub.f32 %v11716_v42, %v1363_v57 }
 0x3c6   : > { %v1374_v59 = vmul.f32 1.442695, %v1367_v58 }
 0x3c7   : > { %v1563_v60 = vpop.permute.xlu1 %1562 }
 0x3c8   : > { %12508 = vpow2.f32 %v1374_v59  ;;  %11733 = vmatprep.subr.msk.mxu1 %vm684_vm0, %v1563_v60 }
 0x3c9   : > { %v12503_v61 = vpop.eup %12502  ;;  %11734 = vmatpush3.xpose.msk.msra.mxu1 %vm684_vm0, %v1563_v60 }
 0x3ca   : > { %v1376_v62 = vsel %vm684_vm0, %v12503_v61, 0.0 }
 0x3cb   : > { %v1656_v0 = vpop.permute.xlu1 %1655  ;;  %1377 = vadd.xlane.f32.xlu0 %v1376_v62 }
 0x3cd   : > { %v12505_v2 = vpop.eup %12504 }
 0x3ce   : > { %v1379_v3 = vsel %vm684_vm0, %v12505_v2, 0.0 }
 0x3cf   : > { %v1559_v6 = vpop.permute.xlu1 %1558  ;;  %1380 = vadd.xlane.f32.xlu1 %v1379_v3 }
 0x3d0   : > { %11735 = vmatprep.mubr.msk.f32.mxu1 %vm684_vm0, %v1559_v6 }
 0x3d1   : > { %v12507_v9 = vpop.eup %12506 }
 0x3d2   : > { %v1382_v10 = vsel %vm684_vm0, %v12507_v9, 0.0 }
 0x3d3   : > { %1383 = vadd.xlane.f32.xlu0 %v1382_v10 }
 0x3d5   : > { %v12509_v11 = vpop.eup %12508 }
 0x3d6   : > { %v1385_v14 = vsel %vm684_vm0, %v12509_v11, 0.0 }
 0x3d7   : > { %1386 = vadd.xlane.f32.xlu1 %v1385_v14 }
 0x3e8   : > { %1653 = vrot.lane.b32.xlu1 %v13565_v34, %s13153_s9 }
 0x3e9   : > { %1560 = vrot.lane.b32.xlu0 %v13557_v30, %s13153_s9 }
 0x3ec   : > { %1651 = vrot.lane.b32.xlu1 %v13584_v36, %s13153_s9 }
 0x3ed   : > { %1649 = vrot.lane.b32.xlu0 %v13542_v24, %s13153_s9 }
 0x454   : > { %v1378_v15 = vpop.xlane.xlu0 %1377 }
 0x455   : > { %12510 = vrcp.f32 %v1378_v15 }
 0x458   : > { %v1381_v17 = vpop.xlane.xlu1 %1380 }
 0x459   : > { %12512 = vrcp.f32 %v1381_v17 }
 0x45c   : > { %v1384_v18 = vpop.xlane.xlu0 %1383 }
 0x45d   : > { %12514 = vrcp.f32 %v1384_v18 }
 0x460   : > { %v1387_v20 = vpop.xlane.xlu1 %1386  ;;  %v1561_v21 = vpop.permute.xlu0 %1560 }
 0x461   : > { %12516 = vrcp.f32 %v1387_v20  ;;  %11736 = vmatmul.mubr.msk.f32.vlgmr.msra.gmra.mxu1 %vm684_vm0, %v1561_v21 }
 0x462   : > { %v12511_v25 = vpop.eup %12510 }
 0x463   : > { %v1392_v26 = vmul.f32 %v12511_v25, %v12503_v61 }
 0x464   : > { %v1650_v42 = vpop.permute.xlu0 %1649  ;;  %v1654_v22 = vpop.permute.xlu1 %1653 }
 0x465   : > { %11721 = vmatprep.mubr.msk.f32.mxu0 %vm684_vm0, %v1392_v26 }
 0x466   : > { %v12513_v27 = vpop.eup %12512 }
 0x467   : > { %v1393_v29 = vmul.f32 %v12513_v27, %v12505_v2 }
 0x468   : > { %v1652_v37 = vpop.permute.xlu1 %1651 }
 0x469   : > { %11722 = vmatmul.mubr.msk.f32.vlgmr.msra.gmra.mxu0 %vm684_vm0, %v1393_v29 }
 0x46a   : > { %v12515_v38 = vpop.eup %12514  ;;  %11725 = vmatpush3.msra.mxu0 %v13575_v35 }
 0x46b   : > { %11726 = vmatprep.subr.mxu0 %v13623_v32  ;;  %v1394_v39 = vmul.f32 %v12515_v38, %v12507_v9 }
 0x46c   : > { %11727 = vmatpush3.msra.mxu0 %v13623_v32 }
 0x46d   : > { %11738 = vmatprep.subr.msk.mxu0 %vm684_vm0, %v1656_v0  ;;  %11728 = vmatprep.mubr.msk.f32.mxu0 %vm684_vm0, %v1394_v39 }
 0x46e   : > { %v12517_v40 = vpop.eup %12516 }
 0x46f   : > { %v1395_v41 = vmul.f32 %v12517_v40, %v12509_v11 }
 0x471   : > { %11729 = vmatmul.mubr.msk.f32.vlgmr.msra.gmra.mxu0 %vm684_vm0, %v1395_v41 }
 0x472   : > { %11739 = vmatpush3.xpose.msk.msra.mxu0 %vm684_vm0, %v1656_v0  ;;  %11742 = vmatprep.mubr.msk.f32.mxu0 %vm684_vm0, %v1650_v42 }
 0x473   : > { %11740 = vmatprep.subr.msk.mxu0 %vm684_vm0, %v1654_v22 }
 0x476   : > { %11741 = vmatpush3.xpose.msk.msra.mxu0 %vm684_vm0, %v1654_v22  ;;  %v840_v22 = vld [vmem:[#allocation11 + $0x18] sm:$0xff] }
 0x479   : > { %11743 = vmatmul.mubr.msk.f32.vlgmr.msra.gmra.mxu0 %vm684_vm0, %v1652_v37 }
 0x521   : > { %v11737_v43 = vpop.f32.mrf.mxu1 }
 0x522   : > { %v1743_v44 = vsel %vm684_vm0, %v11737_v43, -inf }
 0x523   : > { %1744 = vmax.xlane.f32.xlu1 %v1743_v44  ;;  %v1640_v45 = vpop.f32.mrf.mxu1 }
 0x524   : > { %v1740_v46 = vsel %vm684_vm0, %v1640_v45, -inf }
 0x525   : > { %1741 = vmax.xlane.f32.xlu0 %v1740_v46 }
 0x529   : > { %v13639_v47 = vpop.f32.mrf.mxu0 }
 0x52b   : > { %v13641_v48 = vpop.f32.mrf.mxu0 }
 0x531   : > { %v13643_v49 = vpop.f32.mrf.mxu0 }
 0x533   : > { %v13645_v50 = vpop.f32.mrf.mxu0 }
 0x539   : > { %v11744_v51 = vpop.f32.mrf.mxu0 }
 0x53a   : > { %v1749_v55 = vsel %vm684_vm0, %v11744_v51, -inf }
 0x53b   : > { %v1731_v52 = vpop.f32.mrf.mxu0 }
 0x53c   : > { %v1746_v53 = vsel %vm684_vm0, %v1731_v52, -inf }
 0x53d   : > { %1747 = vmax.xlane.f32.xlu0 %v1746_v53  ;;  %v838_v53 = vld [vmem:[#allocation11 + $0x8] sm:$0xff] }
 0x541   : > { %1750 = vmax.xlane.f32.xlu0 %v1749_v55 }
 0x5ac   : > { %v1745_v56 = vpop.xlane.xlu1 %1744 }
 0x5ad   : > { %v1753_v57 = vsub.f32 %v11737_v43, %v1745_v56  ;;  %v839_v43 = vld [vmem:[#allocation11 + $0x10] sm:$0xff] }
 0x5ae   : > { %v1742_v58 = vpop.xlane.xlu0 %1741 }
 0x5af   : > { %v1758_v59 = vmul.f32 1.442695, %v1753_v57  ;;  %v1752_v60 = vsub.f32 %v1640_v45, %v1742_v58 }
 0x5b1   : > { %12518 = vpow2.f32 %v1758_v59  ;;  %v1756_v61 = vmul.f32 1.442695, %v1752_v60  ;;  %v837_v59 = vld [vmem:[#allocation11] sm:$0xff] }
 0x5b3   : > { %12520 = vpow2.f32 %v1756_v61 }
 0x5be   : > { %v12519_v62 = vpop.eup %12518 }
 0x5bf   : > { %v1767_v0 = vsel %vm684_vm0, %v12519_v62, 0.0 }
 0x5c0   : > { %v12521_v2 = vpop.eup %12520  ;;  %1768 = vadd.xlane.f32.xlu1 %v1767_v0 }
 0x5c1   : > { %v1764_v3 = vsel %vm684_vm0, %v12521_v2, 0.0 }
 0x5c2   : > { %1765 = vadd.xlane.f32.xlu0 %v1764_v3 }
 0x5c6   : > { %v1748_v6 = vpop.xlane.xlu0 %1747 }
 0x5c7   : > { %v1754_v9 = vsub.f32 %v1731_v52, %v1748_v6 }
 0x5c9   : > { %v1760_v10 = vmul.f32 1.442695, %v1754_v9 }
 0x5ca   : > { %v1751_v11 = vpop.xlane.xlu0 %1750 }
 0x5cb   : > { %12522 = vpow2.f32 %v1760_v10  ;;  %v1755_v14 = vsub.f32 %v11744_v51, %v1751_v11 }
 0x5cd   : > { %v1762_v15 = vmul.f32 1.442695, %v1755_v14 }
 0x5cf   : > { %12524 = vpow2.f32 %v1762_v15 }
 0x5d8   : > { %v12523_v17 = vpop.eup %12522 }
 0x5d9   : > { %v1770_v18 = vsel %vm684_vm0, %v12523_v17, 0.0 }
 0x5da   : > { %1771 = vadd.xlane.f32.xlu0 %v1770_v18 }
 0x5dc   : > { %v12525_v20 = vpop.eup %12524 }
 0x5dd   : > { %v1773_v21 = vsel %vm684_vm0, %v12525_v20, 0.0 }
 0x5de   : > { %1774 = vadd.xlane.f32.xlu1 %v1773_v21 }
 0x5ef   : > { %1786 = vrot.lane.b32.xlu1 %v13563_v33, %s13153_s9 }
 0x5f0   : > { %1788 = vrot.lane.b32.xlu0 %v13553_v28, %s13153_s9 }
 0x5f3   : > { %1877 = vrot.lane.b32.xlu1 %v13575_v35, %s13153_s9 }
 0x5f4   : > { %2162 = vrot.lane.b32.xlu0 %v13535_v19, %s13154_s28 }
 0x5f7   : > { %1875 = vrot.lane.b32.xlu1 %v13623_v32, %s13153_s9 }
 0x5f8   : > { %2253 = vrot.lane.b32.xlu0 %v13559_v31, %s13154_s28 }
 0x5fb   : > { %2160 = vrot.lane.b32.xlu1 %v13540_v23, %s13154_s28 }
 0x5fc   : > { %2158 = vrot.lane.b32.xlu0 %v13557_v30, %s13154_s28 }
 0x5ff   : > { %2156 = vrot.lane.b32.xlu1 %v13524_v12, %s13154_s28 }
 0x600   : > { %2247 = vrot.lane.b32.xlu0 %v13542_v24, %s13154_s28 }
 0x603   : > { %2251 = vrot.lane.b32.xlu1 %v13565_v34, %s13154_s28 }
 0x607   : > { %2249 = vrot.lane.b32.xlu1 %v13584_v36, %s13154_s28 }
 0x649   : > { %v1769_v27 = vpop.xlane.xlu1 %1768 }
 0x64b   : > { %v1766_v25 = vpop.xlane.xlu0 %1765 }
 0x64c   : > { %12526 = vrcp.f32 %v1766_v25 }
 0x64d   : > { %12528 = vrcp.f32 %v1769_v27 }
 0x659   : > { %v12527_v26 = vpop.eup %12526 }
 0x65a   : > { %v1780_v29 = vmul.f32 %v12527_v26, %v12521_v2  ;;  %v12529_v41 = vpop.eup %12528 }
 0x65b   : > { %v1781_v37 = vmul.f32 %v12529_v41, %v12519_v62 }
 0x65c   : > { %11749 = vmatprep.mubr.msk.f32.mxu1 %vm684_vm0, %v1780_v29 }
 0x663   : > { %v1772_v38 = vpop.xlane.xlu0 %1771 }
 0x664   : > { %12530 = vrcp.f32 %v1772_v38 }
 0x667   : > { %v1775_v39 = vpop.xlane.xlu1 %1774  ;;  %v1789_v40 = vpop.permute.xlu0 %1788 }
 0x668   : > { %12532 = vrcp.f32 %v1775_v39  ;;  %11745 = vmatprep.subr.mxu1 %v1789_v40 }
 0x669   : > { %11746 = vmatpush3.msra.mxu1 %v1789_v40 }
 0x66b   : > { %v1787_v42 = vpop.permute.xlu1 %1786  ;;  %v2163_v44 = vpop.permute.xlu0 %2162 }
 0x66c   : > { %11747 = vmatprep.subr.mxu1 %v1787_v42 }
 0x66d   : > { %11748 = vmatpush3.msra.mxu1 %v1787_v42 }
 0x66e   : > { %11750 = vmatmul.mubr.msk.f32.vlgmr.msra.gmra.mxu1 %vm684_vm0, %v1781_v37  ;;  %11759 = vmatprep.subr.mxu1 %v840_v22 }
 0x66f   : > { %v1878_v45 = vpop.permute.xlu1 %1877  ;;  %11760 = vmatpush3.msra.mxu1 %v840_v22  ;;  %v2254_v55 = vpop.permute.xlu0 %2253 }
 0x670   : > { %11752 = vmatprep.subr.mxu0 %v1878_v45  ;;  %11761 = vmatprep.subr.mxu1 %v839_v43 }
 0x671   : > { %v12531_v46 = vpop.eup %12530  ;;  %11753 = vmatpush3.msra.mxu0 %v1878_v45  ;;  %11762 = vmatpush3.msra.mxu1 %v839_v43 }
 0x672   : > { %11779 = vmatprep.subr.msk.mxu1 %vm684_vm0, %v2163_v44  ;;  %v1782_v51 = vmul.f32 %v12531_v46, %v12523_v17 }
 0x673   : > { %v1876_v52 = vpop.permute.xlu1 %1875  ;;  %v2159_v60 = vpop.permute.xlu0 %2158 }
 0x674   : > { %11754 = vmatprep.subr.mxu0 %v1876_v52  ;;  %11756 = vmatprep.mubr.msk.f32.mxu0 %vm684_vm0, %v1782_v51 }
 0x675   : > { %v12533_v56 = vpop.eup %12532  ;;  %11755 = vmatpush3.msra.mxu0 %v1876_v52 }
 0x676   : > { %11769 = vmatprep.subr.mxu0 %v838_v53  ;;  %v1783_v57 = vmul.f32 %v12533_v56, %v12525_v20 }
 0x677   : > { %v2161_v58 = vpop.permute.xlu1 %2160  ;;  %v2248_v0 = vpop.permute.xlu0 %2247 }
 0x678   : > { %11757 = vmatmul.mubr.msk.f32.vlgmr.msra.gmra.mxu0 %vm684_vm0, %v1783_v57 }
 0x679   : > { %11770 = vmatpush3.msra.mxu0 %v838_v53  ;;  %11773 = vmatprep.mubr.msk.f32.mxu0 %vm684_vm0, %v13641_v48 }
 0x67a   : > { %11771 = vmatprep.subr.mxu0 %v837_v59 }
 0x67b   : > { %11772 = vmatpush3.msra.mxu0 %v837_v59  ;;  %v2157_v61 = vpop.permute.xlu1 %2156 }
 0x67c   : > { %11786 = vmatprep.subr.msk.mxu0 %vm684_vm0, %v2254_v55  ;;  %11774 = vmatmul.mubr.msk.f32.vlgmr.msra.gmra.mxu0 %vm684_vm0, %v13639_v47 }
 0x67d   : > { %11787 = vmatpush3.xpose.msk.msra.mxu0 %vm684_vm0, %v2254_v55  ;;  %11776 = vmatprep.mubr.msk.f32.mxu0 %vm684_vm0, %v13645_v50 }
 0x67f   : > { %v2252_v62 = vpop.permute.xlu1 %2251 }
 0x680   : > { %11777 = vmatmul.mubr.msk.f32.gmra.mxu0 %vm684_vm0, %v13643_v49  ;;  %11788 = vmatprep.subr.msk.mxu0 %vm684_vm0, %v2252_v62 }
 0x681   : > { %11789 = vmatpush3.xpose.msk.msra.mxu0 %vm684_vm0, %v2252_v62  ;;  %11790 = vmatprep.mubr.msk.f32.mxu0 %vm684_vm0, %v2248_v0 }
 0x683   : > { %v2250_v48 = vpop.permute.xlu1 %2249 }
 0x684   : > { %11791 = vmatmul.mubr.msk.f32.vlgmr.msra.gmra.mxu0 %vm684_vm0, %v2250_v48 }
 0x72e   : > { %v11751_v47 = vpop.f32.mrf.mxu1 }
 0x730   : > { %v1864_v2 = vpop.f32.mrf.mxu1 }
 0x731   : > { %11763 = vmatprep.mubr.msk.f32.mxu1 %vm684_vm0, %v1864_v2 }
 0x732   : > { %11764 = vmatmul.mubr.msk.f32.vlgmr.msra.gmra.mxu1 %vm684_vm0, %v11751_v47 }
 0x733   : > { %11780 = vmatpush3.xpose.msk.msra.mxu1 %vm684_vm0, %v2163_v44 }
 0x734   : > { %11781 = vmatprep.subr.msk.mxu1 %vm684_vm0, %v2161_v58 }
 0x737   : > { %11782 = vmatpush3.xpose.msk.msra.mxu1 %vm684_vm0, %v2161_v58 }
 0x738   : > { %v11758_v49 = vpop.f32.mrf.mxu0 }
 0x73a   : > { %v1953_v50 = vpop.f32.mrf.mxu0 }
 0x73b   : > { %11766 = vmatprep.mubr.msk.f32.mxu1 %vm684_vm0, %v1953_v50  ;;  %v842_v50 = vld [vmem:[#allocation11 + $0x28] sm:$0xff] }
 0x73c   : > { %11767 = vmatmul.mubr.msk.f32.gmra.mxu1 %vm684_vm0, %v11758_v49  ;;  %v13705_v3 = vpop.f32.mrf.mxu0 }
 0x73d   : > { %11783 = vmatprep.mubr.msk.f32.mxu1 %vm684_vm0, %v2157_v61 }
 0x73e   : > { %v13707_v6 = vpop.f32.mrf.mxu0 }
 0x740   : > { %11784 = vmatmul.mubr.msk.f32.vlgmr.msra.gmra.mxu1 %vm684_vm0, %v2159_v60  ;;  %v13711_v10 = vpop.f32.mrf.mxu0 }
 0x742   : > { %v13715_v14 = vpop.f32.mrf.mxu0 }
 0x744   : > { %v11792_v18 = vpop.f32.mrf.mxu0 }
 0x745   : > { %v2347_v38 = vsel %vm684_vm0, %v11792_v18, -inf }
 0x746   : > { %v2329_v27 = vpop.f32.mrf.mxu0 }
 0x747   : > { %v2344_v29 = vsel %vm684_vm0, %v2329_v27, -inf }
 0x7f2   : > { %v13709_v9 = vpop.f32.mrf.mxu1 }
 0x7f4   : > { %v13713_v11 = vpop.f32.mrf.mxu1 }
 0x7fc   : > { %v13717_v15 = vpop.f32.mrf.mxu1 }
 0x7fe   : > { %v13719_v17 = vpop.f32.mrf.mxu1 }
 0x800   : > { %v11785_v20 = vpop.f32.mrf.mxu1 }
 0x801   : > { %v2341_v21 = vsel %vm684_vm0, %v11785_v20, -inf }
 0x802   : > { %2342 = vmax.xlane.f32.xlu1 %v2341_v21  ;;  %v2238_v25 = vpop.f32.mrf.mxu1 }
 0x803   : > { %v2338_v26 = vsel %vm684_vm0, %v2238_v25, -inf }
 0x804   : > { %2339 = vmax.xlane.f32.xlu0 %v2338_v26 }
 0x808   : > { %2345 = vmax.xlane.f32.xlu0 %v2344_v29 }
 0x80c   : > { %2348 = vmax.xlane.f32.xlu0 %v2347_v38 }
 0x88b   : > { %v2343_v41 = vpop.xlane.xlu1 %2342 }
 0x88c   : > { %v2351_v37 = vsub.f32 %v11785_v20, %v2343_v41 }
 0x88d   : > { %v2340_v39 = vpop.xlane.xlu0 %2339 }
 0x88e   : > { %v2350_v40 = vsub.f32 %v2238_v25, %v2340_v39  ;;  %v2356_v51 = vmul.f32 1.442695, %v2351_v37  ;;  %v841_v37 = vld [vmem:[#allocation11 + $0x20] sm:$0xff] }
 0x890   : > { %v2354_v43 = vmul.f32 1.442695, %v2350_v40 }
 0x891   : > { %v2346_v42 = vpop.xlane.xlu0 %2345 }
 0x892   : > { %v2352_v22 = vsub.f32 %v2329_v27, %v2346_v42 }
 0x894   : > { %v2358_v44 = vmul.f32 1.442695, %v2352_v22 }
 0x895   : > { %v2349_v45 = vpop.xlane.xlu0 %2348 }
 0x896   : > { %12534 = vpow2.f32 %v2358_v44  ;;  %v2353_v46 = vsub.f32 %v11792_v18, %v2349_v45 }
 0x897   : > { %12536 = vpow2.f32 %v2354_v43 }
 0x898   : > { %v2360_v52 = vmul.f32 1.442695, %v2353_v46 }
 0x89a   : > { %12538 = vpow2.f32 %v2360_v52 }
 0x89b   : > { %12540 = vpow2.f32 %v2356_v51 }
 0x8a3   : > { %v12535_v53 = vpop.eup %12534 }
 0x8a4   : > { %v2368_v55 = vsel %vm684_vm0, %v12535_v53, 0.0  ;;  %v12537_v56 = vpop.eup %12536 }
 0x8a5   : > { %2369 = vadd.xlane.f32.xlu0 %v2368_v55  ;;  %v2362_v58 = vsel %vm684_vm0, %v12537_v56, 0.0 }
 0x8a7   : > { %v12539_v57 = vpop.eup %12538 }
 0x8a8   : > { %v2371_v59 = vsel %vm684_vm0, %v12539_v57, 0.0  ;;  %v12541_v60 = vpop.eup %12540 }
 0x8a9   : > { %2363 = vadd.xlane.f32.xlu0 %v2362_v58  ;;  %2372 = vadd.xlane.f32.xlu1 %v2371_v59  ;;  %v2365_v61 = vsel %vm684_vm0, %v12541_v60, 0.0 }
 0x8ad   : > { %2366 = vadd.xlane.f32.xlu1 %v2365_v61 }
 0x8be   : > { %2382 = vrot.lane.b32.xlu1 %v13563_v33, %s13154_s28 }
 0x8bf   : > { %2384 = vrot.lane.b32.xlu0 %v13553_v28, %s13154_s28 }
 0x8c2   : > { %2471 = vrot.lane.b32.xlu1 %v13575_v35, %s13154_s28 }
 0x8c3   : > { %2663 = vrot.lane.b32.xlu0 %v13535_v19, %s13155_s30 }
 0x8c6   : > { %2469 = vrot.lane.b32.xlu1 %v13623_v32, %s13154_s28 }
 0x8c7   : > { %2754 = vrot.lane.b32.xlu0 %v13559_v31, %s13155_s30 }
 0x8ca   : > { %2661 = vrot.lane.b32.xlu1 %v13540_v23, %s13155_s30 }
 0x8cb   : > { %2659 = vrot.lane.b32.xlu0 %v13557_v30, %s13155_s30 }
 0x8ce   : > { %2657 = vrot.lane.b32.xlu1 %v13524_v12, %s13155_s30 }
 0x8cf   : > { %2748 = vrot.lane.b32.xlu0 %v13542_v24, %s13155_s30 }
 0x8d2   : > { %2752 = vrot.lane.b32.xlu1 %v13565_v34, %s13155_s30 }
 0x8d6   : > { %2750 = vrot.lane.b32.xlu1 %v13584_v36, %s13155_s30 }
 0x92e   : > { %v2370_v62 = vpop.xlane.xlu0 %2369 }
 0x92f   : > { %12542 = vrcp.f32 %v2370_v62 }
 0x932   : > { %v2373_v0 = vpop.xlane.xlu1 %2372  ;;  %v2364_v48 = vpop.xlane.xlu0 %2363 }
 0x933   : > { %12544 = vrcp.f32 %v2373_v0 }
 0x934   : > { %12546 = vrcp.f32 %v2364_v48 }
 0x936   : > { %v2367_v47 = vpop.xlane.xlu1 %2366  ;;  %v2385_v2 = vpop.permute.xlu0 %2384 }
 0x937   : > { %12548 = vrcp.f32 %v2367_v47  ;;  %11793 = vmatprep.subr.mxu1 %v2385_v2 }
 0x938   : > { %11794 = vmatpush3.msra.mxu1 %v2385_v2 }
 0x93a   : > { %v2383_v49 = vpop.permute.xlu1 %2382  ;;  %v2664_v26 = vpop.permute.xlu0 %2663 }
 0x93b   : > { %11795 = vmatprep.subr.mxu1 %v2383_v49 }
 0x93c   : > { %v12543_v18 = vpop.eup %12542  ;;  %11796 = vmatpush3.msra.mxu1 %v2383_v49 }
 0x93d   : > { %v2380_v20 = vmul.f32 %v12543_v18, %v12535_v53  ;;  %11807 = vmatprep.subr.mxu1 %v842_v50 }
 0x93e   : > { %v2472_v21 = vpop.permute.xlu1 %2471  ;;  %v2755_v42 = vpop.permute.xlu0 %2754 }
 0x93f   : > { %11800 = vmatprep.subr.mxu0 %v2472_v21  ;;  %11804 = vmatprep.mubr.msk.f32.mxu0 %vm684_vm0, %v2380_v20 }
 0x940   : > { %v12545_v25 = vpop.eup %12544  ;;  %11801 = vmatpush3.msra.mxu0 %v2472_v21 }
 0x941   : > { %v12547_v27 = vpop.eup %12546  ;;  %v2381_v39 = vmul.f32 %v12545_v25, %v12539_v57 }
 0x942   : > { %v2470_v29 = vpop.permute.xlu1 %2469  ;;  %v2378_v38 = vmul.f32 %v12547_v27, %v12537_v56  ;;  %v2660_v44 = vpop.permute.xlu0 %2659 }
 0x943   : > { %11802 = vmatprep.subr.mxu0 %v2470_v29 }
 0x944   : > { %v12549_v40 = vpop.eup %12548  ;;  %11797 = vmatprep.mubr.msk.f32.mxu1 %vm684_vm0, %v2378_v38  ;;  %11803 = vmatpush3.msra.mxu0 %v2470_v29 }
 0x945   : > { %11805 = vmatmul.mubr.msk.f32.vlgmr.msra.gmra.mxu0 %vm684_vm0, %v2381_v39  ;;  %11817 = vmatprep.subr.msk.mxu0 %vm684_vm0, %v2664_v26  ;;  %v2379_v41 = vmul.f32 %v12549_v40, %v12541_v60 }
 0x946   : > { %v2662_v22 = vpop.permute.xlu1 %2661  ;;  %11818 = vmatpush3.xpose.msk.msra.mxu0 %vm684_vm0, %v2664_v26  ;;  %v2749_v57 = vpop.permute.xlu0 %2748  ;;  %v2153_v26 = vadd.f32 %v13711_v10, %v13717_v15 }
 0x947   : > { %11798 = vmatmul.mubr.msk.f32.vlgmr.msra.gmra.mxu1 %vm684_vm0, %v2379_v41  ;;  %11819 = vmatprep.subr.msk.mxu0 %vm684_vm0, %v2662_v22 }
 0x948   : > { %11808 = vmatpush3.msra.mxu1 %v842_v50  ;;  %v2143_v50 = vadd.f32 %v13705_v3, %v13709_v9 }
 0x949   : > { %11809 = vmatprep.subr.mxu1 %v841_v37 }
 0x94a   : > { %11810 = vmatpush3.msra.mxu1 %v841_v37  ;;  %v2658_v43 = vpop.permute.xlu1 %2657  ;;  %11820 = vmatpush3.xpose.msk.msra.mxu0 %vm684_vm0, %v2662_v22 }
 0x94b   : > { %11824 = vmatprep.subr.msk.mxu1 %vm684_vm0, %v2755_v42  ;;  %11821 = vmatprep.mubr.msk.f32.mxu0 %vm684_vm0, %v2658_v43 }
 0x94d   : > { %11822 = vmatmul.mubr.msk.f32.vlgmr.msra.gmra.mxu0 %vm684_vm0, %v2660_v44 }
 0x94e   : > { %v2753_v53 = vpop.permute.xlu1 %2752 }
 0x952   : > { %v2751_v60 = vpop.permute.xlu1 %2750 }
 0xa05   : > { %v11806_v45 = vpop.f32.mrf.mxu0 }
 0xa07   : > { %v11799_v46 = vpop.f32.mrf.mxu1  ;;  %v2547_v52 = vpop.f32.mrf.mxu0 }
 0xa09   : > { %v2460_v51 = vpop.f32.mrf.mxu1 }
 0xa0a   : > { %11811 = vmatprep.mubr.msk.f32.mxu1 %vm684_vm0, %v2460_v51 }
 0xa0b   : > { %11812 = vmatmul.mubr.msk.f32.vlgmr.msra.gmra.mxu1 %vm684_vm0, %v11799_v46 }
 0xa0c   : > { %11825 = vmatpush3.xpose.msk.msra.mxu1 %vm684_vm0, %v2755_v42  ;;  %11814 = vmatprep.mubr.msk.f32.mxu1 %vm684_vm0, %v2547_v52 }
 0xa0d   : > { %11826 = vmatprep.subr.msk.mxu1 %vm684_vm0, %v2753_v53  ;;  %v11823_v55 = vpop.f32.mrf.mxu0 }
 0xa0e   : > { %v2842_v56 = vsel %vm684_vm0, %v11823_v55, -inf }
 0xa0f   : > { %11815 = vmatmul.mubr.msk.f32.gmra.mxu1 %vm684_vm0, %v11806_v45  ;;  %2843 = vmax.xlane.f32.xlu1 %v2842_v56  ;;  %v2739_v58 = vpop.f32.mrf.mxu0 }
 0xa10   : > { %11827 = vmatpush3.xpose.msk.msra.mxu1 %vm684_vm0, %v2753_v53  ;;  %11828 = vmatprep.mubr.msk.f32.mxu1 %vm684_vm0, %v2749_v57  ;;  %v2839_v59 = vsel %vm684_vm0, %v2739_v58, -inf }
 0xa11   : > { %2840 = vmax.xlane.f32.xlu0 %v2839_v59 }
 0xa13   : > { %11829 = vmatmul.mubr.msk.f32.vlgmr.msra.gmra.mxu1 %vm684_vm0, %v2751_v60 }
 0xa98   : > { %v2844_v61 = vpop.xlane.xlu1 %2843 }
 0xa99   : > { %v2852_v62 = vsub.f32 %v11823_v55, %v2844_v61 }
 0xa9a   : > { %v2841_v2 = vpop.xlane.xlu0 %2840 }
 0xa9b   : > { %v2857_v0 = vmul.f32 1.442695, %v2852_v62  ;;  %v2851_v49 = vsub.f32 %v2739_v58, %v2841_v2 }
 0xa9d   : > { %12550 = vpow2.f32 %v2857_v0  ;;  %v2855_v18 = vmul.f32 1.442695, %v2851_v49  ;;  %v843_v49 = vld [vmem:[#allocation11 + $0x30] sm:$0xff] }
 0xa9f   : > { %12552 = vpow2.f32 %v2855_v18 }
 0xaaa   : > { %v13775_v48 = vpop.eup %12550 }
 0xaab   : > { %v2866_v47 = vsel %vm684_vm0, %v13775_v48, 0.0 }
 0xaac   : > { %2867 = vadd.xlane.f32.xlu1 %v2866_v47  ;;  %v12553_v9 = vpop.eup %12552  ;;  %v844_v47 = vld [vmem:[#allocation11 + $0x38] sm:$0xff] }
 0xaad   : > { %v2863_v42 = vsel %vm684_vm0, %v12553_v9, 0.0 }
 0xacb   : > { %v11813_v20 = vpop.f32.mrf.mxu1 }
 0xacc   : > { %v13781_v21 = vadd.f32 %v11813_v20, %v2143_v50 }
 0xacd   : > { %v13783_v25 = vpop.f32.mrf.mxu1 }
 0xacf   : > { %v11816_v27 = vpop.f32.mrf.mxu1 }
 0xad0   : > { %v13787_v29 = vadd.f32 %v11816_v27, %v2153_v26 }
 0xad1   : > { %v13789_v38 = vpop.f32.mrf.mxu1 }
 0xad3   : > { %v11830_v39 = vpop.f32.mrf.mxu1 }
 0xad4   : > { %v2848_v3 = vsel %vm684_vm0, %v11830_v39, -inf }
 0xad5   : > { %v2830_v40 = vpop.f32.mrf.mxu1 }
 0xad6   : > { %v2845_v41 = vsel %vm684_vm0, %v2830_v40, -inf }
 0xad7   : > { %2846 = vmax.xlane.f32.xlu0 %v2845_v41 }
 0xadb   : > { %2849 = vmax.xlane.f32.xlu0 %v2848_v3 }
 0xadf   : > { %2864 = vadd.xlane.f32.xlu0 %v2863_v42 }
 0xb35   : > { %v2868_v57 = vpop.xlane.xlu1 %2867 }
 0xb60   : > { %v2847_v22 = vpop.xlane.xlu0 %2846 }
 0xb61   : > { %v2853_v10 = vsub.f32 %v2830_v40, %v2847_v22 }
 0xb63   : > { %v2859_v15 = vmul.f32 1.442695, %v2853_v10 }
 0xb64   : > { %v2850_v37 = vpop.xlane.xlu0 %2849 }
 0xb65   : > { %12554 = vpow2.f32 %v2859_v15  ;;  %v2854_v43 = vsub.f32 %v11830_v39, %v2850_v37 }
 0xb67   : > { %v2861_v44 = vmul.f32 1.442695, %v2854_v43 }
 0xb68   : > { %v2865_v45 = vpop.xlane.xlu0 %2864 }
 0xb69   : > { %12556 = vpow2.f32 %v2861_v44 }
 0xb6a   : > { %12558 = vrcp.f32 %v2865_v45 }
 0xb6b   : > { %12560 = vrcp.f32 %v2868_v57 }
 0xb72   : > { %v12555_v46 = vpop.eup %12554 }
 0xb73   : > { %v2869_v51 = vsel %vm684_vm0, %v12555_v46, 0.0 }
 0xb74   : > { %2870 = vadd.xlane.f32.xlu0 %v2869_v51 }
 0xb76   : > { %v12557_v52 = vpop.eup %12556 }
 0xb77   : > { %v12559_v53 = vpop.eup %12558  ;;  %v2872_v55 = vsel %vm684_vm0, %v12557_v52, 0.0 }
 0xb78   : > { %2873 = vadd.xlane.f32.xlu1 %v2872_v55  ;;  %v2879_v56 = vmul.f32 %v12559_v53, %v12553_v9  ;;  %v12561_v61 = vpop.eup %12560 }
 0xb79   : > { %v2880_v2 = vmul.f32 %v12561_v61, %v13775_v48 }
 0xb7a   : > { %11835 = vmatprep.mubr.msk.f32.mxu0 %vm684_vm0, %v2879_v56 }
 0xb89   : > { %2883 = vrot.lane.b32.xlu1 %v13563_v33, %s13155_s30 }
 0xb8a   : > { %2885 = vrot.lane.b32.xlu0 %v13553_v28, %s13155_s30 }
 0xb8d   : > { %2972 = vrot.lane.b32.xlu1 %v13575_v35, %s13155_s30 }
 0xb8e   : > { %3164 = vrot.lane.b32.xlu0 %v13535_v19, %s13156_s16 }
 0xb91   : > { %2970 = vrot.lane.b32.xlu1 %v13623_v32, %s13155_s30 }
 0xb92   : > { %3255 = vrot.lane.b32.xlu0 %v13559_v31, %s13156_s16 }
 0xb95   : > { %3162 = vrot.lane.b32.xlu1 %v13540_v23, %s13156_s16 }
 0xb96   : > { %3160 = vrot.lane.b32.xlu0 %v13557_v30, %s13156_s16 }
 0xb99   : > { %3158 = vrot.lane.b32.xlu1 %v13524_v12, %s13156_s16 }
 0xb9a   : > { %3249 = vrot.lane.b32.xlu0 %v13542_v24, %s13156_s16 }
 0xb9d   : > { %3253 = vrot.lane.b32.xlu1 %v13565_v34, %s13156_s16 }
 0xba1   : > { %3251 = vrot.lane.b32.xlu1 %v13584_v36, %s13156_s16 }
 0xbfd   : > { %v2871_v58 = vpop.xlane.xlu0 %2870 }
 0xbfe   : > { %12562 = vrcp.f32 %v2871_v58 }
 0xc01   : > { %v2874_v59 = vpop.xlane.xlu1 %2873  ;;  %v2886_v60 = vpop.permute.xlu0 %2885 }
 0xc02   : > { %12564 = vrcp.f32 %v2874_v59  ;;  %11831 = vmatprep.subr.mxu0 %v2886_v60 }
 0xc03   : > { %11832 = vmatpush3.msra.mxu0 %v2886_v60 }
 0xc05   : > { %v2884_v62 = vpop.permute.xlu1 %2883  ;;  %v3165_v0 = vpop.permute.xlu0 %3164 }
 0xc06   : > { %11833 = vmatprep.subr.mxu0 %v2884_v62 }
 0xc07   : > { %11834 = vmatpush3.msra.mxu0 %v2884_v62 }
 0xc08   : > { %11836 = vmatmul.mubr.msk.f32.vlgmr.msra.gmra.mxu0 %vm684_vm0, %v2880_v2  ;;  %11845 = vmatprep.subr.mxu0 %v844_v47 }
 0xc09   : > { %v2973_v50 = vpop.permute.xlu1 %2972  ;;  %11846 = vmatpush3.msra.mxu0 %v844_v47  ;;  %v3256_v20 = vpop.permute.xlu0 %3255 }
 0xc0a   : > { %11838 = vmatprep.subr.mxu1 %v2973_v50  ;;  %11847 = vmatprep.subr.mxu0 %v843_v49 }
 0xc0b   : > { %v12563_v18 = vpop.eup %12562  ;;  %11839 = vmatpush3.msra.mxu1 %v2973_v50  ;;  %11848 = vmatpush3.msra.mxu0 %v843_v49 }
 0xc0c   : > { %11862 = vmatprep.subr.msk.mxu0 %vm684_vm0, %v3256_v20  ;;  %v2881_v26 = vmul.f32 %v12563_v18, %v12555_v46 }
 0xc0d   : > { %v2971_v27 = vpop.permute.xlu1 %2970  ;;  %v3161_v3 = vpop.permute.xlu0 %3160 }
 0xc0e   : > { %11840 = vmatprep.subr.mxu1 %v2971_v27  ;;  %11842 = vmatprep.mubr.msk.f32.mxu1 %vm684_vm0, %v2881_v26 }
 0xc0f   : > { %v12565_v48 = vpop.eup %12564  ;;  %11841 = vmatpush3.msra.mxu1 %v2971_v27 }
 0xc10   : > { %11855 = vmatprep.subr.msk.mxu1 %vm684_vm0, %v3165_v0  ;;  %v2882_v39 = vmul.f32 %v12565_v48, %v12557_v52 }
 0xc11   : > { %v3163_v40 = vpop.permute.xlu1 %3162  ;;  %v3250_v37 = vpop.permute.xlu0 %3249 }
 0xc12   : > { %11843 = vmatmul.mubr.msk.f32.vlgmr.msra.gmra.mxu1 %vm684_vm0, %v2882_v39 }
 0xc13   : > { %11856 = vmatpush3.xpose.msk.msra.mxu1 %vm684_vm0, %v3165_v0 }
 0xc14   : > { %11857 = vmatprep.subr.msk.mxu1 %vm684_vm0, %v3163_v40 }
 0xc15   : > { %v3159_v41 = vpop.permute.xlu1 %3158 }
 0xc16   : > { %11859 = vmatprep.mubr.msk.f32.mxu1 %vm684_vm0, %v3159_v41 }
 0xc17   : > { %11858 = vmatpush3.xpose.msk.msra.mxu1 %vm684_vm0, %v3163_v40 }
 0xc19   : > { %v3254_v22 = vpop.permute.xlu1 %3253 }
 0xc1a   : > { %11860 = vmatmul.mubr.msk.f32.vlgmr.msra.gmra.mxu1 %vm684_vm0, %v3161_v3 }
 0xc1d   : > { %v3252_v43 = vpop.permute.xlu1 %3251 }
 0xcc8   : > { %v11837_v9 = vpop.f32.mrf.mxu0 }
 0xcca   : > { %v2961_v42 = vpop.f32.mrf.mxu0 }
 0xccb   : > { %11849 = vmatprep.mubr.msk.f32.mxu0 %vm684_vm0, %v2961_v42 }
 0xccc   : > { %11850 = vmatmul.mubr.msk.f32.vlgmr.msra.gmra.mxu0 %vm684_vm0, %v11837_v9 }
 0xccd   : > { %11863 = vmatpush3.xpose.msk.msra.mxu0 %vm684_vm0, %v3256_v20 }
 0xcce   : > { %11864 = vmatprep.subr.msk.mxu0 %vm684_vm0, %v3254_v22 }
 0xcd1   : > { %11865 = vmatpush3.xpose.msk.msra.mxu0 %vm684_vm0, %v3254_v22 }
 0xcd2   : > { %v11844_v10 = vpop.f32.mrf.mxu1 }
 0xcd4   : > { %v3048_v15 = vpop.f32.mrf.mxu1 }
 0xcd5   : > { %11852 = vmatprep.mubr.msk.f32.mxu0 %vm684_vm0, %v3048_v15 }
 0xcd6   : > { %11853 = vmatmul.mubr.msk.f32.gmra.mxu0 %vm684_vm0, %v11844_v10 }
 0xcd7   : > { %11866 = vmatprep.mubr.msk.f32.mxu0 %vm684_vm0, %v3250_v37 }
 0xcda   : > { %v11861_v44 = vpop.f32.mrf.mxu1  ;;  %11867 = vmatmul.mubr.msk.f32.vlgmr.msra.gmra.mxu0 %vm684_vm0, %v3252_v43 }
 0xcdb   : > { %v3343_v45 = vsel %vm684_vm0, %v11861_v44, -inf }
 0xcdc   : > { %3344 = vmax.xlane.f32.xlu1 %v3343_v45  ;;  %v3240_v46 = vpop.f32.mrf.mxu1 }
 0xcdd   : > { %v3340_v51 = vsel %vm684_vm0, %v3240_v46, -inf }
 0xcde   : > { %3341 = vmax.xlane.f32.xlu0 %v3340_v51 }
 0xd65   : > { %v3345_v52 = vpop.xlane.xlu1 %3344 }
 0xd66   : > { %v3353_v53 = vsub.f32 %v11861_v44, %v3345_v52 }
 0xd67   : > { %v3342_v58 = vpop.xlane.xlu0 %3341 }
 0xd68   : > { %v3358_v55 = vmul.f32 1.442695, %v3353_v53  ;;  %v3352_v60 = vsub.f32 %v3240_v46, %v3342_v58 }
 0xd6a   : > { %12566 = vpow2.f32 %v3358_v55  ;;  %v3356_v62 = vmul.f32 1.442695, %v3352_v60 }
 0xd6c   : > { %12568 = vpow2.f32 %v3356_v62 }
 0xd77   : > { %v13843_v56 = vpop.eup %12566 }
 0xd78   : > { %v3367_v57 = vsel %vm684_vm0, %v13843_v56, 0.0 }
 0xd79   : > { %3368 = vadd.xlane.f32.xlu1 %v3367_v57  ;;  %v12569_v27 = vpop.eup %12568  ;;  %v846_v57 = vld [vmem:[#allocation11 + $0x48] sm:$0xff] }
 0xd8c   : > { %v11851_v59 = vpop.f32.mrf.mxu0 }
 0xd8d   : > { %v13848_v61 = vadd.f32 %v11851_v59, %v13781_v21  ;;  %v3364_v21 = vsel %vm684_vm0, %v12569_v27, 0.0  ;;  %v845_v59 = vld [vmem:[#allocation11 + $0x40] sm:$0xff] }
 0xd8e   : > { %v13850_v0 = vpop.f32.mrf.mxu0 }
 0xd96   : > { %v11854_v47 = vpop.f32.mrf.mxu0 }
 0xd97   : > { %v13853_v2 = vadd.f32 %v11854_v47, %v13787_v29 }
 0xd98   : > { %v13855_v49 = vpop.f32.mrf.mxu0 }
 0xd9a   : > { %v11868_v50 = vpop.f32.mrf.mxu0 }
 0xd9b   : > { %v3349_v26 = vsel %vm684_vm0, %v11868_v50, -inf }
 0xd9c   : > { %v3331_v18 = vpop.f32.mrf.mxu0 }
 0xd9d   : > { %v3346_v20 = vsel %vm684_vm0, %v3331_v18, -inf }
 0xd9e   : > { %3347 = vmax.xlane.f32.xlu0 %v3346_v20 }
 0xda2   : > { %3350 = vmax.xlane.f32.xlu0 %v3349_v26 }
 0xda6   : > { %3365 = vadd.xlane.f32.xlu0 %v3364_v21 }
 0xe02   : > { %v3369_v44 = vpop.xlane.xlu1 %3368 }
 0xe27   : > { %v3348_v48 = vpop.xlane.xlu0 %3347 }
 0xe28   : > { %v3354_v39 = vsub.f32 %v3331_v18, %v3348_v48 }
 0xe2a   : > { %v3360_v40 = vmul.f32 1.442695, %v3354_v39 }
 0xe2b   : > { %v3351_v41 = vpop.xlane.xlu0 %3350 }
 0xe2c   : > { %12570 = vpow2.f32 %v3360_v40  ;;  %v3355_v29 = vsub.f32 %v11868_v50, %v3351_v41 }
 0xe2e   : > { %v3362_v3 = vmul.f32 1.442695, %v3355_v29 }
 0xe2f   : > { %v3366_v9 = vpop.xlane.xlu0 %3365 }
 0xe30   : > { %12572 = vpow2.f32 %v3362_v3 }
 0xe31   : > { %12574 = vrcp.f32 %v3366_v9 }
 0xe32   : > { %12576 = vrcp.f32 %v3369_v44 }
 0xe39   : > { %v12571_v42 = vpop.eup %12570 }
 0xe3a   : > { %v3370_v22 = vsel %vm684_vm0, %v12571_v42, 0.0 }
 0xe3b   : > { %3371 = vadd.xlane.f32.xlu0 %v3370_v22 }
 0xe3d   : > { %v12573_v10 = vpop.eup %12572 }
 0xe3e   : > { %v12575_v15 = vpop.eup %12574  ;;  %v3373_v37 = vsel %vm684_vm0, %v12573_v10, 0.0 }
 0xe3f   : > { %3374 = vadd.xlane.f32.xlu1 %v3373_v37  ;;  %v3380_v43 = vmul.f32 %v12575_v15, %v12569_v27  ;;  %v12577_v52 = vpop.eup %12576 }
 0xe40   : > { %v3381_v58 = vmul.f32 %v12577_v52, %v13843_v56 }
 0xe41   : > { %11873 = vmatprep.mubr.msk.f32.mxu1 %vm684_vm0, %v3380_v43 }
 0xe50   : > { %3384 = vrot.lane.b32.xlu1 %v13563_v33, %s13156_s16 }
 0xe51   : > { %3386 = vrot.lane.b32.xlu0 %v13553_v28, %s13156_s16 }
 0xe54   : > { %3473 = vrot.lane.b32.xlu1 %v13575_v35, %s13156_s16 }
 0xe55   : > { %3665 = vrot.lane.b32.xlu0 %v13535_v19, %s13157_s26 }
 0xe58   : > { %3471 = vrot.lane.b32.xlu1 %v13623_v32, %s13156_s16 }
 0xe59   : > { %3756 = vrot.lane.b32.xlu0 %v13559_v31, %s13157_s26 }
 0xe5c   : > { %3663 = vrot.lane.b32.xlu1 %v13540_v23, %s13157_s26 }
 0xe5d   : > { %3661 = vrot.lane.b32.xlu0 %v13557_v30, %s13157_s26 }
 0xe60   : > { %3659 = vrot.lane.b32.xlu1 %v13524_v12, %s13157_s26 }
 0xe61   : > { %3750 = vrot.lane.b32.xlu0 %v13542_v24, %s13157_s26 }
 0xe64   : > { %3754 = vrot.lane.b32.xlu1 %v13565_v34, %s13157_s26 }
 0xe68   : > { %3752 = vrot.lane.b32.xlu1 %v13584_v36, %s13157_s26 }
 0xec4   : > { %v3372_v45 = vpop.xlane.xlu0 %3371 }
 0xec5   : > { %12578 = vrcp.f32 %v3372_v45 }
 0xec8   : > { %v3375_v46 = vpop.xlane.xlu1 %3374  ;;  %v3387_v51 = vpop.permute.xlu0 %3386 }
 0xec9   : > { %12580 = vrcp.f32 %v3375_v46  ;;  %11869 = vmatprep.subr.mxu1 %v3387_v51 }
 0xeca   : > { %11870 = vmatpush3.msra.mxu1 %v3387_v51 }
 0xecc   : > { %v3385_v53 = vpop.permute.xlu1 %3384  ;;  %v3666_v55 = vpop.permute.xlu0 %3665 }
 0xecd   : > { %11871 = vmatprep.subr.mxu1 %v3385_v53 }
 0xece   : > { %11872 = vmatpush3.msra.mxu1 %v3385_v53 }
 0xecf   : > { %11874 = vmatmul.mubr.msk.f32.vlgmr.msra.gmra.mxu1 %vm684_vm0, %v3381_v58  ;;  %11883 = vmatprep.subr.mxu1 %v846_v57  ;;  %v2148_v58 = vadd.f32 %v13715_v14, %v13719_v17 }
 0xed0   : > { %v3474_v60 = vpop.permute.xlu1 %3473  ;;  %11884 = vmatpush3.msra.mxu1 %v846_v57  ;;  %v3757_v47 = vpop.permute.xlu0 %3756 }
 0xed1   : > { %11876 = vmatprep.subr.mxu0 %v3474_v60  ;;  %11885 = vmatprep.subr.mxu1 %v845_v59 }
 0xed2   : > { %v12579_v62 = vpop.eup %12578  ;;  %11877 = vmatpush3.msra.mxu0 %v3474_v60  ;;  %11886 = vmatpush3.msra.mxu1 %v845_v59  ;;  %v2655_v60 = vadd.f32 %v13789_v38, %v2148_v58 }
 0xed3   : > { %11900 = vmatprep.subr.msk.mxu1 %vm684_vm0, %v3757_v47  ;;  %v3382_v50 = vmul.f32 %v12579_v62, %v12571_v42 }
 0xed4   : > { %v3472_v18 = vpop.permute.xlu1 %3471  ;;  %v3662_v21 = vpop.permute.xlu0 %3661 }
 0xed5   : > { %11878 = vmatprep.subr.mxu0 %v3472_v18  ;;  %11880 = vmatprep.mubr.msk.f32.mxu0 %vm684_vm0, %v3382_v50 }
 0xed6   : > { %v12581_v56 = vpop.eup %12580  ;;  %11879 = vmatpush3.msra.mxu0 %v3472_v18 }
 0xed7   : > { %11893 = vmatprep.subr.msk.mxu0 %vm684_vm0, %v3666_v55  ;;  %v3383_v20 = vmul.f32 %v12581_v56, %v12573_v10 }
 0xed8   : > { %v3664_v26 = vpop.permute.xlu1 %3663  ;;  %v3751_v3 = vpop.permute.xlu0 %3750 }
 0xed9   : > { %11881 = vmatmul.mubr.msk.f32.vlgmr.msra.gmra.mxu0 %vm684_vm0, %v3383_v20 }
 0xeda   : > { %11894 = vmatpush3.xpose.msk.msra.mxu0 %vm684_vm0, %v3666_v55 }
 0xedb   : > { %11895 = vmatprep.subr.msk.mxu0 %vm684_vm0, %v3664_v26 }
 0xedc   : > { %v3660_v27 = vpop.permute.xlu1 %3659 }
 0xedd   : > { %11897 = vmatprep.mubr.msk.f32.mxu0 %vm684_vm0, %v3660_v27 }
 0xede   : > { %11896 = vmatpush3.xpose.msk.msra.mxu0 %vm684_vm0, %v3664_v26 }
 0xee0   : > { %v3755_v40 = vpop.permute.xlu1 %3754 }
 0xee1   : > { %11898 = vmatmul.mubr.msk.f32.vlgmr.msra.gmra.mxu0 %vm684_vm0, %v3662_v21 }
 0xee4   : > { %v3753_v9 = vpop.permute.xlu1 %3752 }
 0xf8f   : > { %v11875_v48 = vpop.f32.mrf.mxu1 }
 0xf91   : > { %v3462_v39 = vpop.f32.mrf.mxu1 }
 0xf92   : > { %11887 = vmatprep.mubr.msk.f32.mxu1 %vm684_vm0, %v3462_v39 }
 0xf93   : > { %11888 = vmatmul.mubr.msk.f32.vlgmr.msra.gmra.mxu1 %vm684_vm0, %v11875_v48 }
 0xf94   : > { %11901 = vmatpush3.xpose.msk.msra.mxu1 %vm684_vm0, %v3757_v47  ;;  %v3156_v47 = vadd.f32 %v13855_v49, %v2655_v60 }
 0xf95   : > { %11902 = vmatprep.subr.msk.mxu1 %vm684_vm0, %v3755_v40 }
 0xf98   : > { %11903 = vmatpush3.xpose.msk.msra.mxu1 %vm684_vm0, %v3755_v40 }
 0xf99   : > { %v11882_v41 = vpop.f32.mrf.mxu0 }
 0xf9b   : > { %v3549_v29 = vpop.f32.mrf.mxu0 }
 0xf9c   : > { %11890 = vmatprep.mubr.msk.f32.mxu1 %vm684_vm0, %v3549_v29 }
 0xf9d   : > { %11891 = vmatmul.mubr.msk.f32.gmra.mxu1 %vm684_vm0, %v11882_v41 }
 0xf9e   : > { %11904 = vmatprep.mubr.msk.f32.mxu1 %vm684_vm0, %v3751_v3 }
 0xfa1   : > { %v11899_v42 = vpop.f32.mrf.mxu0  ;;  %11905 = vmatmul.mubr.msk.f32.vlgmr.msra.gmra.mxu1 %vm684_vm0, %v3753_v9 }
 0xfa2   : > { %v3844_v22 = vsel %vm684_vm0, %v11899_v42, -inf }
 0xfa3   : > { %3845 = vmax.xlane.f32.xlu1 %v3844_v22  ;;  %v3741_v10 = vpop.f32.mrf.mxu0 }
 0xfa4   : > { %v3841_v15 = vsel %vm684_vm0, %v3741_v10, -inf }
 0xfa5   : > { %3842 = vmax.xlane.f32.xlu0 %v3841_v15 }
0x102c   : > { %v3846_v37 = vpop.xlane.xlu1 %3845 }
0x102d   : > { %v3854_v43 = vsub.f32 %v11899_v42, %v3846_v37 }
0x102e   : > { %v3843_v51 = vpop.xlane.xlu0 %3842 }
0x102f   : > { %v3859_v44 = vmul.f32 1.442695, %v3854_v43  ;;  %v3853_v53 = vsub.f32 %v3741_v10, %v3843_v51 }
0x1031   : > { %12582 = vpow2.f32 %v3859_v44  ;;  %v3857_v57 = vmul.f32 1.442695, %v3853_v53 }
0x1033   : > { %12584 = vpow2.f32 %v3857_v57  ;;  %v847_v57 = vld [vmem:[#allocation11 + $0x50] sm:$0xff] }
0x103e   : > { %v13909_v45 = vpop.eup %12582 }
0x103f   : > { %v3868_v46 = vsel %vm684_vm0, %v13909_v45, 0.0 }
0x1040   : > { %3869 = vadd.xlane.f32.xlu1 %v3868_v46  ;;  %v12585_v17 = vpop.eup %12584 }
0x1041   : > { %v3865_v38 = vsel %vm684_vm0, %v12585_v17, 0.0 }
0x1053   : > { %v11889_v52 = vpop.f32.mrf.mxu1 }
0x1054   : > { %v13914_v55 = vadd.f32 %v11889_v52, %v13848_v61  ;;  %v848_v52 = vld [vmem:[#allocation11 + $0x58] sm:$0xff] }
0x1055   : > { %v13918_v59 = vpop.f32.mrf.mxu1 }
0x105d   : > { %v11892_v62 = vpop.f32.mrf.mxu1 }
0x105e   : > { %v13923_v50 = vadd.f32 %v11892_v62, %v13853_v2 }
0x105f   : > { %v3646_v18 = vpop.f32.mrf.mxu1 }
0x1060   : > { %v13925_v56 = vadd.f32 %v3646_v18, %v3156_v47 }
0x1061   : > { %v11906_v61 = vpop.f32.mrf.mxu1 }
0x1062   : > { %v3850_v14 = vsel %vm684_vm0, %v11906_v61, -inf }
0x1063   : > { %v3832_v20 = vpop.f32.mrf.mxu1 }
0x1064   : > { %v3847_v26 = vsel %vm684_vm0, %v3832_v20, -inf }
0x1065   : > { %3848 = vmax.xlane.f32.xlu0 %v3847_v26 }
0x1069   : > { %3851 = vmax.xlane.f32.xlu0 %v3850_v14 }
0x106d   : > { %3866 = vadd.xlane.f32.xlu0 %v3865_v38 }
0x10c9   : > { %v3870_v10 = vpop.xlane.xlu1 %3869 }
0x10ee   : > { %v3849_v27 = vpop.xlane.xlu0 %3848 }
0x10ef   : > { %v3855_v49 = vsub.f32 %v3832_v20, %v3849_v27 }
0x10f1   : > { %v3861_v21 = vmul.f32 1.442695, %v3855_v49 }
0x10f2   : > { %v3852_v2 = vpop.xlane.xlu0 %3851 }
0x10f3   : > { %12586 = vpow2.f32 %v3861_v21  ;;  %v3856_v48 = vsub.f32 %v11906_v61, %v3852_v2 }
0x10f5   : > { %v3863_v39 = vmul.f32 1.442695, %v3856_v48 }
0x10f6   : > { %v3867_v40 = vpop.xlane.xlu0 %3866 }
0x10f7   : > { %12588 = vpow2.f32 %v3863_v39 }
0x10f8   : > { %12590 = vrcp.f32 %v3867_v40 }
0x10f9   : > { %12592 = vrcp.f32 %v3870_v10 }
0x1100   : > { %v12587_v41 = vpop.eup %12586 }
0x1101   : > { %v3871_v29 = vsel %vm684_vm0, %v12587_v41, 0.0 }
0x1102   : > { %3872 = vadd.xlane.f32.xlu0 %v3871_v29 }
0x1104   : > { %v12589_v3 = vpop.eup %12588 }
0x1105   : > { %v12591_v9 = vpop.eup %12590  ;;  %v3874_v42 = vsel %vm684_vm0, %v12589_v3, 0.0 }
0x1106   : > { %3875 = vadd.xlane.f32.xlu1 %v3874_v42  ;;  %v3881_v22 = vmul.f32 %v12591_v9, %v12585_v17  ;;  %v12593_v44 = vpop.eup %12592 }
0x1107   : > { %v3882_v53 = vmul.f32 %v12593_v44, %v13909_v45 }
0x1108   : > { %11911 = vmatprep.mubr.msk.f32.mxu0 %vm684_vm0, %v3881_v22 }
0x1117   : > { %3885 = vrot.lane.b32.xlu1 %v13563_v33, %s13157_s26 }
0x1118   : > { %3887 = vrot.lane.b32.xlu0 %v13553_v28, %s13157_s26 }
0x111b   : > { %3974 = vrot.lane.b32.xlu1 %v13575_v35, %s13157_s26 }
0x111c   : > { %4166 = vrot.lane.b32.xlu0 %v13535_v19, %s13158_s0 }
0x111f   : > { %3972 = vrot.lane.b32.xlu1 %v13623_v32, %s13157_s26 }
0x1120   : > { %4257 = vrot.lane.b32.xlu0 %v13559_v31, %s13158_s0 }
0x1123   : > { %4164 = vrot.lane.b32.xlu1 %v13540_v23, %s13158_s0 }
0x1124   : > { %4162 = vrot.lane.b32.xlu0 %v13557_v30, %s13158_s0 }
0x1127   : > { %4160 = vrot.lane.b32.xlu1 %v13524_v12, %s13158_s0 }
0x1128   : > { %4251 = vrot.lane.b32.xlu0 %v13542_v24, %s13158_s0 }
0x112b   : > { %4255 = vrot.lane.b32.xlu1 %v13565_v34, %s13158_s0 }
0x112f   : > { %4253 = vrot.lane.b32.xlu1 %v13584_v36, %s13158_s0 }
0x118b   : > { %v3873_v15 = vpop.xlane.xlu0 %3872 }
0x118c   : > { %12594 = vrcp.f32 %v3873_v15  ;;  %v2138_v15 = vadd.f32 %v13707_v6, %v13713_v11 }
0x118f   : > { %v3876_v37 = vpop.xlane.xlu1 %3875  ;;  %v3888_v43 = vpop.permute.xlu0 %3887 }
0x1190   : > { %12596 = vrcp.f32 %v3876_v37  ;;  %11907 = vmatprep.subr.mxu0 %v3888_v43  ;;  %v2653_v37 = vadd.f32 %v13783_v25, %v2138_v15 }
0x1191   : > { %11908 = vmatpush3.msra.mxu0 %v3888_v43 }
0x1192   : > { %v3154_v44 = vadd.f32 %v13850_v0, %v2653_v37 }
0x1193   : > { %v3886_v46 = vpop.permute.xlu1 %3885  ;;  %v4167_v51 = vpop.permute.xlu0 %4166 }
0x1194   : > { %11909 = vmatprep.subr.mxu0 %v3886_v46 }
0x1195   : > { %11910 = vmatpush3.msra.mxu0 %v3886_v46 }
0x1196   : > { %11912 = vmatmul.mubr.msk.f32.vlgmr.msra.gmra.mxu0 %vm684_vm0, %v3882_v53  ;;  %11921 = vmatprep.subr.mxu0 %v848_v52 }
0x1197   : > { %v3975_v58 = vpop.permute.xlu1 %3974  ;;  %11922 = vmatpush3.msra.mxu0 %v848_v52  ;;  %v4258_v62 = vpop.permute.xlu0 %4257 }
0x1198   : > { %11914 = vmatprep.subr.mxu1 %v3975_v58  ;;  %11923 = vmatprep.subr.mxu0 %v847_v57 }
0x1199   : > { %v12595_v60 = vpop.eup %12594  ;;  %11915 = vmatpush3.msra.mxu1 %v3975_v58  ;;  %11924 = vmatpush3.msra.mxu0 %v847_v57 }
0x119a   : > { %11938 = vmatprep.subr.msk.mxu0 %vm684_vm0, %v4258_v62  ;;  %v3883_v47 = vmul.f32 %v12595_v60, %v12587_v41 }
0x119b   : > { %v3973_v18 = vpop.permute.xlu1 %3972  ;;  %v4163_v14 = vpop.permute.xlu0 %4162 }
0x119c   : > { %11916 = vmatprep.subr.mxu1 %v3973_v18  ;;  %11918 = vmatprep.mubr.msk.f32.mxu1 %vm684_vm0, %v3883_v47 }
0x119d   : > { %v12597_v45 = vpop.eup %12596  ;;  %11917 = vmatpush3.msra.mxu1 %v3973_v18 }
0x119e   : > { %11931 = vmatprep.subr.msk.mxu1 %vm684_vm0, %v4167_v51  ;;  %v3884_v61 = vmul.f32 %v12597_v45, %v12589_v3 }
0x119f   : > { %v4165_v20 = vpop.permute.xlu1 %4164  ;;  %v4252_v2 = vpop.permute.xlu0 %4251 }
0x11a0   : > { %11919 = vmatmul.mubr.msk.f32.vlgmr.msra.gmra.mxu1 %vm684_vm0, %v3884_v61 }
0x11a1   : > { %11932 = vmatpush3.xpose.msk.msra.mxu1 %vm684_vm0, %v4167_v51  ;;  %v3655_v51 = vadd.f32 %v13918_v59, %v3154_v44 }
0x11a2   : > { %11933 = vmatprep.subr.msk.mxu1 %vm684_vm0, %v4165_v20 }
0x11a3   : > { %v4161_v26 = vpop.permute.xlu1 %4160 }
0x11a4   : > { %11935 = vmatprep.mubr.msk.f32.mxu1 %vm684_vm0, %v4161_v26 }
0x11a5   : > { %11934 = vmatpush3.xpose.msk.msra.mxu1 %vm684_vm0, %v4165_v20 }
0x11a7   : > { %v4256_v27 = vpop.permute.xlu1 %4255 }
0x11a8   : > { %11936 = vmatmul.mubr.msk.f32.vlgmr.msra.gmra.mxu1 %vm684_vm0, %v4163_v14 }
0x11ab   : > { %v4254_v48 = vpop.permute.xlu1 %4253 }
0x1256   : > { %v11913_v17 = vpop.f32.mrf.mxu0 }
0x1258   : > { %v3963_v38 = vpop.f32.mrf.mxu0 }
0x1259   : > { %11925 = vmatprep.mubr.msk.f32.mxu0 %vm684_vm0, %v3963_v38 }
0x125a   : > { %11926 = vmatmul.mubr.msk.f32.vlgmr.msra.gmra.mxu0 %vm684_vm0, %v11913_v17 }
0x125b   : > { %11939 = vmatpush3.xpose.msk.msra.mxu0 %vm684_vm0, %v4258_v62 }
0x125c   : > { %11940 = vmatprep.subr.msk.mxu0 %vm684_vm0, %v4256_v27 }
0x125f   : > { %11941 = vmatpush3.xpose.msk.msra.mxu0 %vm684_vm0, %v4256_v27 }
0x1260   : > { %v11920_v49 = vpop.f32.mrf.mxu1 }
0x1262   : > { %v4050_v21 = vpop.f32.mrf.mxu1 }
0x1263   : > { %11928 = vmatprep.mubr.msk.f32.mxu0 %vm684_vm0, %v4050_v21 }
0x1264   : > { %11929 = vmatmul.mubr.msk.f32.gmra.mxu0 %vm684_vm0, %v11920_v49 }
0x1265   : > { %11942 = vmatprep.mubr.msk.f32.mxu0 %vm684_vm0, %v4252_v2 }
0x1268   : > { %v11937_v39 = vpop.f32.mrf.mxu1  ;;  %11943 = vmatmul.mubr.msk.f32.vlgmr.msra.gmra.mxu0 %vm684_vm0, %v4254_v48 }
0x1269   : > { %v4345_v40 = vsel %vm684_vm0, %v11937_v39, -inf }
0x126a   : > { %4346 = vmax.xlane.f32.xlu1 %v4345_v40  ;;  %v4242_v41 = vpop.f32.mrf.mxu1 }
0x126b   : > { %v4342_v29 = vsel %vm684_vm0, %v4242_v41, -inf }
0x126c   : > { %4343 = vmax.xlane.f32.xlu0 %v4342_v29 }
0x12f3   : > { %v4347_v3 = vpop.xlane.xlu1 %4346 }
0x12f4   : > { %v4355_v9 = vsub.f32 %v11937_v39, %v4347_v3 }
0x12f5   : > { %v4344_v43 = vpop.xlane.xlu0 %4343 }
0x12f6   : > { %v4360_v42 = vmul.f32 1.442695, %v4355_v9  ;;  %v4354_v52 = vsub.f32 %v4242_v41, %v4344_v43  ;;  %v850_v41 = vld [vmem:[#allocation11 + $0x68] sm:$0xff] }
0x12f8   : > { %12598 = vpow2.f32 %v4360_v42  ;;  %v4358_v60 = vmul.f32 1.442695, %v4354_v52 }
0x12fa   : > { %12600 = vpow2.f32 %v4358_v60 }
0x1305   : > { %v13979_v22 = vpop.eup %12598 }
0x1306   : > { %v4369_v10 = vsel %vm684_vm0, %v13979_v22, 0.0 }
0x1307   : > { %4370 = vadd.xlane.f32.xlu1 %v4369_v10  ;;  %v12601_v18 = vpop.eup %12600 }
0x1308   : > { %v4366_v45 = vsel %vm684_vm0, %v12601_v18, 0.0 }
0x131a   : > { %v11927_v46 = vpop.f32.mrf.mxu0 }
0x131b   : > { %v13989_v53 = vadd.f32 %v11927_v46, %v13914_v55 }
0x131c   : > { %v4137_v57 = vpop.f32.mrf.mxu0 }
0x131d   : > { %v13991_v58 = vadd.f32 %v4137_v57, %v3655_v51 }
0x1324   : > { %v11930_v62 = vpop.f32.mrf.mxu0 }
0x1325   : > { %v13994_v6 = vadd.f32 %v11930_v62, %v13923_v50 }
0x1326   : > { %v4147_v11 = vpop.f32.mrf.mxu0 }
0x1327   : > { %v13997_v25 = vadd.f32 %v4147_v11, %v13925_v56 }
0x1328   : > { %v11944_v0 = vpop.f32.mrf.mxu0 }
0x1329   : > { %v4351_v55 = vsel %vm684_vm0, %v11944_v0, -inf }
0x132a   : > { %v4333_v47 = vpop.f32.mrf.mxu0 }
0x132b   : > { %v4348_v59 = vsel %vm684_vm0, %v4333_v47, -inf }
0x132c   : > { %4349 = vmax.xlane.f32.xlu0 %v4348_v59 }
0x1330   : > { %4352 = vmax.xlane.f32.xlu0 %v4351_v55 }
0x1334   : > { %4367 = vadd.xlane.f32.xlu0 %v4366_v45 }
0x13b5   : > { %v4350_v61 = vpop.xlane.xlu0 %4349 }
0x13b6   : > { %v4356_v20 = vsub.f32 %v4333_v47, %v4350_v61 }
0x13b8   : > { %v4362_v50 = vmul.f32 1.442695, %v4356_v20 }
0x13b9   : > { %v4353_v26 = vpop.xlane.xlu0 %4352 }
0x13ba   : > { %12602 = vpow2.f32 %v4362_v50  ;;  %v4357_v14 = vsub.f32 %v11944_v0, %v4353_v26 }
0x13bc   : > { %v4364_v56 = vmul.f32 1.442695, %v4357_v14 }
0x13bd   : > { %v4368_v17 = vpop.xlane.xlu0 %4367 }
0x13be   : > { %12604 = vpow2.f32 %v4364_v56 }
0x13bf   : > { %12606 = vrcp.f32 %v4368_v17 }
0x13c7   : > { %v12603_v38 = vpop.eup %12602 }
0x13c8   : > { %v4372_v27 = vsel %vm684_vm0, %v12603_v38, 0.0 }
0x13c9   : > { %4373 = vadd.xlane.f32.xlu0 %v4372_v27 }
0x13cb   : > { %v12605_v49 = vpop.eup %12604 }
0x13cc   : > { %v12607_v21 = vpop.eup %12606  ;;  %v4375_v2 = vsel %vm684_vm0, %v12605_v49, 0.0 }
0x13cd   : > { %4376 = vadd.xlane.f32.xlu1 %v4375_v2  ;;  %v4382_v48 = vmul.f32 %v12607_v21, %v12601_v18 }
0x13cf   : > { %11949 = vmatprep.mubr.msk.f32.mxu1 %vm684_vm0, %v4382_v48 }
0x13de   : > { %4386 = vrot.lane.b32.xlu1 %v13563_v33, %s13158_s0 }
0x13df   : > { %4388 = vrot.lane.b32.xlu0 %v13553_v28, %s13158_s0 }
0x13e2   : > { %4475 = vrot.lane.b32.xlu1 %v13575_v35, %s13158_s0 }
0x13e3   : > { %4667 = vrot.lane.b32.xlu0 %v13535_v19, %s13159_s29  ;;  %v4371_v19 = vpop.xlane.xlu1 %4370 }
0x13e4   : > { %12608 = vrcp.f32 %v4371_v19 }
0x13e6   : > { %4473 = vrot.lane.b32.xlu1 %v13623_v32, %s13158_s0 }
0x13e7   : > { %4661 = vrot.lane.b32.xlu0 %v13524_v12, %s13159_s29 }
0x13ea   : > { %4665 = vrot.lane.b32.xlu1 %v13540_v23, %s13159_s29 }
0x13eb   : > { %4758 = vrot.lane.b32.xlu0 %v13559_v31, %s13159_s29 }
0x13ee   : > { %4663 = vrot.lane.b32.xlu1 %v13557_v30, %s13159_s29 }
0x13ef   : > { %4752 = vrot.lane.b32.xlu0 %v13542_v24, %s13159_s29 }
0x13f1   : > { %v12609_v31 = vpop.eup %12608 }
0x13f2   : > { %4756 = vrot.lane.b32.xlu1 %v13565_v34, %s13159_s29  ;;  %v4383_v24 = vmul.f32 %v12609_v31, %v13979_v22  ;;  %v849_v34 = vld [vmem:[#allocation11 + $0x60] sm:$0xff] }
0x13f6   : > { %4754 = vrot.lane.b32.xlu1 %v13584_v36, %s13159_s29 }
0x1452   : > { %v4374_v12 = vpop.xlane.xlu0 %4373 }
0x1453   : > { %12610 = vrcp.f32 %v4374_v12 }
0x1456   : > { %v4377_v23 = vpop.xlane.xlu1 %4376  ;;  %v4389_v39 = vpop.permute.xlu0 %4388 }
0x1457   : > { %12612 = vrcp.f32 %v4377_v23  ;;  %11945 = vmatprep.subr.mxu1 %v4389_v39 }
0x1458   : > { %11946 = vmatpush3.msra.mxu1 %v4389_v39 }
0x145a   : > { %v4387_v30 = vpop.permute.xlu1 %4386  ;;  %v4668_v40 = vpop.permute.xlu0 %4667 }
0x145b   : > { %11947 = vmatprep.subr.mxu1 %v4387_v30 }
0x145c   : > { %11948 = vmatpush3.msra.mxu1 %v4387_v30 }
0x145d   : > { %11950 = vmatmul.mubr.msk.f32.vlgmr.msra.gmra.mxu1 %vm684_vm0, %v4383_v24  ;;  %11959 = vmatprep.subr.mxu1 %v850_v41 }
0x145e   : > { %v4476_v36 = vpop.permute.xlu1 %4475  ;;  %v4662_v29 = vpop.permute.xlu0 %4661  ;;  %11960 = vmatpush3.msra.mxu1 %v850_v41 }
0x145f   : > { %11952 = vmatprep.subr.mxu0 %v4476_v36  ;;  %11961 = vmatprep.subr.mxu1 %v849_v34 }
0x1460   : > { %v12611_v3 = vpop.eup %12610  ;;  %11953 = vmatpush3.msra.mxu0 %v4476_v36  ;;  %11962 = vmatpush3.msra.mxu1 %v849_v34 }
0x1461   : > { %v4384_v9 = vmul.f32 %v12611_v3, %v12603_v38 }
0x1462   : > { %v4474_v42 = vpop.permute.xlu1 %4473  ;;  %v4759_v10 = vpop.permute.xlu0 %4758 }
0x1463   : > { %11954 = vmatprep.subr.mxu0 %v4474_v42  ;;  %11956 = vmatprep.mubr.msk.f32.mxu0 %vm684_vm0, %v4384_v9 }
0x1464   : > { %v12613_v22 = vpop.eup %12612  ;;  %11976 = vmatprep.subr.msk.mxu1 %vm684_vm0, %v4759_v10  ;;  %11955 = vmatpush3.msra.mxu0 %v4474_v42 }
0x1465   : > { %11969 = vmatprep.subr.msk.mxu0 %vm684_vm0, %v4668_v40  ;;  %v4385_v15 = vmul.f32 %v12613_v22, %v12605_v49 }
0x1466   : > { %v4666_v37 = vpop.permute.xlu1 %4665  ;;  %v4753_v60 = vpop.permute.xlu0 %4752 }
0x1467   : > { %11957 = vmatmul.mubr.msk.f32.vlgmr.msra.gmra.mxu0 %vm684_vm0, %v4385_v15 }
0x1468   : > { %11970 = vmatpush3.xpose.msk.msra.mxu0 %vm684_vm0, %v4668_v40  ;;  %11973 = vmatprep.mubr.msk.f32.mxu0 %vm684_vm0, %v4662_v29 }
0x1469   : > { %11971 = vmatprep.subr.msk.mxu0 %vm684_vm0, %v4666_v37 }
0x146a   : > { %v4664_v43 = vpop.permute.xlu1 %4663 }
0x146c   : > { %11972 = vmatpush3.xpose.msk.msra.mxu0 %vm684_vm0, %v4666_v37 }
0x146e   : > { %v4757_v51 = vpop.permute.xlu1 %4756 }
0x146f   : > { %11974 = vmatmul.mubr.msk.f32.vlgmr.msra.gmra.mxu0 %vm684_vm0, %v4664_v43 }
0x1472   : > { %v4755_v62 = vpop.permute.xlu1 %4754 }
0x151d   : > { %v11951_v44 = vpop.f32.mrf.mxu1 }
0x151f   : > { %v4464_v46 = vpop.f32.mrf.mxu1 }
0x1520   : > { %11963 = vmatprep.mubr.msk.f32.mxu1 %vm684_vm0, %v4464_v46 }
0x1521   : > { %11964 = vmatmul.mubr.msk.f32.vlgmr.msra.gmra.mxu1 %vm684_vm0, %v11951_v44 }
0x1522   : > { %11977 = vmatpush3.xpose.msk.msra.mxu1 %vm684_vm0, %v4759_v10 }
0x1523   : > { %11978 = vmatprep.subr.msk.mxu1 %vm684_vm0, %v4757_v51 }
0x1526   : > { %11979 = vmatpush3.xpose.msk.msra.mxu1 %vm684_vm0, %v4757_v51 }
0x1527   : > { %v11958_v52 = vpop.f32.mrf.mxu0 }
0x1529   : > { %v4551_v57 = vpop.f32.mrf.mxu0 }
0x152a   : > { %11966 = vmatprep.mubr.msk.f32.mxu1 %vm684_vm0, %v4551_v57  ;;  %v852_v57 = vld [vmem:[#allocation11 + $0x78] sm:$0xff] }
0x152b   : > { %11967 = vmatmul.mubr.msk.f32.gmra.mxu1 %vm684_vm0, %v11958_v52 }
0x152c   : > { %11980 = vmatprep.mubr.msk.f32.mxu1 %vm684_vm0, %v4753_v60  ;;  %v851_v60 = vld [vmem:[#allocation11 + $0x70] sm:$0xff] }
0x152f   : > { %v11975_v11 = vpop.f32.mrf.mxu0  ;;  %11981 = vmatmul.mubr.msk.f32.vlgmr.msra.gmra.mxu1 %vm684_vm0, %v4755_v62 }
0x1530   : > { %v4846_v0 = vsel %vm684_vm0, %v11975_v11, -inf }
0x1531   : > { %4847 = vmax.xlane.f32.xlu1 %v4846_v0  ;;  %v4743_v47 = vpop.f32.mrf.mxu0 }
0x1532   : > { %v4843_v59 = vsel %vm684_vm0, %v4743_v47, -inf }
0x1533   : > { %4844 = vmax.xlane.f32.xlu0 %v4843_v59  ;;  %v10929_v59 = vld [vmem:[%s14870_s7] ss:$0 sm:$0xff] }
0x15ba   : > { %v4848_v55 = vpop.xlane.xlu1 %4847 }
0x15bb   : > { %v4856_v18 = vsub.f32 %v11975_v11, %v4848_v55 }
0x15bc   : > { %v4845_v50 = vpop.xlane.xlu0 %4844 }
0x15bd   : > { %v4861_v45 = vmul.f32 1.442695, %v4856_v18  ;;  %v4855_v14 = vsub.f32 %v4743_v47, %v4845_v50 }
0x15bf   : > { %12614 = vpow2.f32 %v4861_v45  ;;  %v4859_v27 = vmul.f32 1.442695, %v4855_v14 }
0x15c1   : > { %12616 = vpow2.f32 %v4859_v27 }
0x15cc   : > { %v12615_v61 = vpop.eup %12614 }
0x15cd   : > { %v4870_v20 = vsel %vm684_vm0, %v12615_v61, 0.0 }
0x15ce   : > { %4871 = vadd.xlane.f32.xlu1 %v4870_v20  ;;  %v12617_v39 = vpop.eup %12616 }
0x15e1   : > { %v11965_v26 = vpop.f32.mrf.mxu1 }
0x15e2   : > { %v14053_v56 = vadd.f32 %v11965_v26, %v13989_v53 }
0x15e3   : > { %v4638_v17 = vpop.f32.mrf.mxu1 }
0x15e4   : > { %v14056_v38 = vadd.f32 %v4638_v17, %v13991_v58  ;;  %v4867_v58 = vsel %vm684_vm0, %v12617_v39, 0.0 }
0x15eb   : > { %v11968_v49 = vpop.f32.mrf.mxu1 }
0x15ec   : > { %v14059_v21 = vadd.f32 %v11968_v49, %v13994_v6 }
0x15ed   : > { %v4648_v2 = vpop.f32.mrf.mxu1 }
0x15ee   : > { %v14062_v48 = vadd.f32 %v4648_v2, %v13997_v25 }
0x15ef   : > { %v11982_v19 = vpop.f32.mrf.mxu1 }
0x15f0   : > { %v4852_v53 = vsel %vm684_vm0, %v11982_v19, -inf }
0x15f1   : > { %v4834_v12 = vpop.f32.mrf.mxu1 }
0x15f2   : > { %v4849_v23 = vsel %vm684_vm0, %v4834_v12, -inf }
0x15f3   : > { %4850 = vmax.xlane.f32.xlu0 %v4849_v23  ;;  %v917_v23 = vld [vmem:[#allocation16 + $0x1e8] sm:$0xff] }
0x15f7   : > { %4853 = vmax.xlane.f32.xlu0 %v4852_v53  ;;  %v916_v53 = vld [vmem:[#allocation16 + $0x1e0] sm:$0xff] }
0x15fb   : > { %4868 = vadd.xlane.f32.xlu0 %v4867_v58  ;;  %v915_v58 = vld [vmem:[#allocation16 + $0x1d8] sm:$0xff] }
0x1657   : > { %v4872_v10 = vpop.xlane.xlu1 %4871 }
0x167c   : > { %v4851_v31 = vpop.xlane.xlu0 %4850 }
0x167d   : > { %v4857_v30 = vsub.f32 %v4834_v12, %v4851_v31  ;;  %v909_v31 = vld [vmem:[#allocation16 + $0x1a8] sm:$0xff] }
0x167f   : > { %v4863_v6 = vmul.f32 1.442695, %v4857_v30  ;;  %v908_v30 = vld [vmem:[#allocation16 + $0x1a0] sm:$0xff] }
0x1680   : > { %v4854_v40 = vpop.xlane.xlu0 %4853 }
0x1681   : > { %12618 = vpow2.f32 %v4863_v6  ;;  %v4858_v41 = vsub.f32 %v11982_v19, %v4854_v40  ;;  %v910_v6 = vld [vmem:[#allocation16 + $0x1b0] sm:$0xff] }
0x1683   : > { %v4865_v25 = vmul.f32 1.442695, %v4858_v41 }
0x1684   : > { %v4869_v24 = vpop.xlane.xlu0 %4868 }
0x1685   : > { %12620 = vpow2.f32 %v4865_v25 }
0x1686   : > { %12622 = vrcp.f32 %v4869_v24 }
0x1687   : > { %12624 = vrcp.f32 %v4872_v10 }
0x168e   : > { %v12619_v34 = vpop.eup %12618 }
0x168f   : > { %v4873_v36 = vsel %vm684_vm0, %v12619_v34, 0.0 }
0x1690   : > { %4874 = vadd.xlane.f32.xlu0 %v4873_v36 }
0x1692   : > { %v12621_v29 = vpop.eup %12620 }
0x1693   : > { %v12623_v3 = vpop.eup %12622  ;;  %v4876_v9 = vsel %vm684_vm0, %v12621_v29, 0.0 }
0x1694   : > { %4877 = vadd.xlane.f32.xlu1 %v4876_v9  ;;  %v4883_v42 = vmul.f32 %v12623_v3, %v12617_v39  ;;  %v12625_v43 = vpop.eup %12624  ;;  %v913_v39 = vld [vmem:[#allocation16 + $0x1c8] sm:$0xff] }
0x1695   : > { %v4884_v44 = vmul.f32 %v12625_v43, %v12615_v61  ;;  %v907_v43 = vld [vmem:[#allocation16 + $0x198] sm:$0xff] }
0x1696   : > { %11987 = vmatprep.mubr.msk.f32.mxu0 %vm684_vm0, %v4883_v42 }
0x16a5   : > { %4887 = vrot.lane.b32.xlu1 %v13563_v33, %s13159_s29 }
0x16a6   : > { %4889 = vrot.lane.b32.xlu0 %v13553_v28, %s13159_s29 }
0x16a9   : > { %4976 = vrot.lane.b32.xlu1 %v13575_v35, %s13159_s29 }
0x16ad   : > { %4974 = vrot.lane.b32.xlu1 %v13623_v32, %s13159_s29 }
0x1719   : > { %v4875_v22 = vpop.xlane.xlu0 %4874 }
0x171a   : > { %12626 = vrcp.f32 %v4875_v22 }
0x171d   : > { %v4878_v15 = vpop.xlane.xlu1 %4877  ;;  %v4890_v37 = vpop.permute.xlu0 %4889 }
0x171e   : > { %12628 = vrcp.f32 %v4878_v15  ;;  %11983 = vmatprep.subr.mxu0 %v4890_v37 }
0x171f   : > { %11984 = vmatpush3.msra.mxu0 %v4890_v37  ;;  %v905_v37 = vld [vmem:[#allocation16 + $0x188] sm:$0xff] }
0x1721   : > { %v4888_v33 = vpop.permute.xlu1 %4887 }
0x1722   : > { %11985 = vmatprep.subr.mxu0 %v4888_v33 }
0x1723   : > { %11986 = vmatpush3.msra.mxu0 %v4888_v33  ;;  %v904_v33 = vld [vmem:[#allocation16 + $0x180] sm:$0xff] }
0x1724   : > { %11988 = vmatmul.mubr.msk.f32.vlgmr.msra.gmra.mxu0 %vm684_vm0, %v4884_v44  ;;  %11997 = vmatprep.subr.mxu0 %v852_v57  ;;  %v906_v44 = vld [vmem:[#allocation16 + $0x190] sm:$0xff] }
0x1725   : > { %v4977_v28 = vpop.permute.xlu1 %4976  ;;  %11998 = vmatpush3.msra.mxu0 %v852_v57  ;;  %v897_v57 = vld [vmem:[#allocation16 + $0x148] sm:$0xff] }
0x1726   : > { %11990 = vmatprep.subr.mxu1 %v4977_v28  ;;  %11999 = vmatprep.subr.mxu0 %v851_v60 }
0x1727   : > { %v12627_v35 = vpop.eup %12626  ;;  %11991 = vmatpush3.msra.mxu1 %v4977_v28  ;;  %12000 = vmatpush3.msra.mxu0 %v851_v60  ;;  %v899_v60 = vld [vmem:[#allocation16 + $0x158] sm:$0xff] }
0x1728   : > { %v4885_v32 = vmul.f32 %v12627_v35, %v12619_v34  ;;  %v901_v35 = vld [vmem:[#allocation16 + $0x168] sm:$0xff] }
0x1729   : > { %v4975_v46 = vpop.permute.xlu1 %4974 }
0x172a   : > { %11992 = vmatprep.subr.mxu1 %v4975_v46  ;;  %11994 = vmatprep.mubr.msk.f32.mxu1 %vm684_vm0, %v4885_v32  ;;  %v903_v32 = vld [vmem:[#allocation16 + $0x178] sm:$0xff] }
0x172b   : > { %v12629_v51 = vpop.eup %12628  ;;  %11993 = vmatpush3.msra.mxu1 %v4975_v46  ;;  %v900_v46 = vld [vmem:[#allocation16 + $0x160] sm:$0xff] }
0x172c   : > { %v4886_v52 = vmul.f32 %v12629_v51, %v12621_v29  ;;  %5262 = vmatprep.subr.mxu1 %v917_v23  ;;  %v902_v51 = vld [vmem:[#allocation16 + $0x170] sm:$0xff] }
0x172d   : > { %v878_v23 = vld [vmem:[#allocation16 + $0xb0] sm:$0xff] }
0x172e   : > { %11995 = vmatmul.mubr.msk.f32.vlgmr.msra.gmra.mxu1 %vm684_vm0, %v4886_v52 }
0x172f   : > { %5326 = vmatprep.mubr.f32.mxu1 %v13152_v54  ;;  %5263 = vmatpush1.msra.mxu1 %v916_v53  ;;  %v875_v53 = vld [vmem:[#allocation16 + $0x98] sm:$0xff] }
0x1730   : > { %5264 = vmatprep.subr.mxu1 %v913_v39  ;;  %v874_v39 = vld [vmem:[#allocation16 + $0x90] sm:$0xff] }
0x17e4   : > { %v11989_v62 = vpop.f32.mrf.mxu0 }
0x17e6   : > { %v4965_v11 = vpop.f32.mrf.mxu0 }
0x17e7   : > { %12001 = vmatprep.mubr.msk.f32.mxu0 %vm684_vm0, %v4965_v11  ;;  %v898_v11 = vld [vmem:[#allocation16 + $0x150] sm:$0xff] }
0x17e8   : > { %12002 = vmatmul.mubr.msk.f32.vlgmr.msra.gmra.mxu0 %vm684_vm0, %v11989_v62  ;;  %v896_v62 = vld [vmem:[#allocation16 + $0x140] sm:$0xff] }
0x17ee   : > { %v11996_v0 = vpop.f32.mrf.mxu1 }
0x17f0   : > { %v5052_v47 = vpop.f32.mrf.mxu1 }
0x17f1   : > { %12004 = vmatprep.mubr.msk.f32.mxu0 %vm684_vm0, %v5052_v47  ;;  %v895_v47 = vld [vmem:[#allocation16 + $0x138] sm:$0xff] }
0x17f2   : > { %12005 = vmatmul.mubr.msk.f32.gmra.mxu0 %vm684_vm0, %v11996_v0  ;;  %v893_v0 = vld [vmem:[#allocation16 + $0x128] sm:$0xff] }
0x17f3   : > { %5415 = vmatprep.mubr.f32.mxu0 %v13152_v54 }
0x18a8   : > { %v12003_v55 = vpop.f32.mrf.mxu0 }
0x18a9   : > { %v5159_v18 = vadd.f32 %v12003_v55, %v14053_v56  ;;  %v894_v55 = vld [vmem:[#allocation16 + $0x130] sm:$0xff] }
0x18aa   : > { %v5139_v45 = vpop.f32.mrf.mxu0 }
0x18ab   : > { %v5169_v61 = vadd.f32 %v10929_v59, %v5159_v18  ;;  %v5158_v20 = vadd.f32 %v5139_v45, %v14056_v38  ;;  %v889_v18 = vld [vmem:[#allocation16 + $0x108] sm:$0xff]  ;;  %v891_v45 = vld [vmem:[#allocation16 + $0x118] sm:$0xff] }
0x18ad   : > { %v5168_v50 = vadd.f32 %v10929_v59, %v5158_v20  ;;  %v5173_v26 = vadd.f32 %v5169_v61, %v13498_v1  ;;  %v919_v1 = vld [vmem:[#allocation16 + $0x1f8] sm:$0xff]  ;;  %v888_v61 = vld [vmem:[#allocation16 + $0x100] sm:$0xff]  ;;  %v890_v20 = vld [vmem:[#allocation16 + $0x110] sm:$0xff] }
0x18ae   : > { %5351 = vmatprep.subr.mxu0 %v919_v1  ;;  %v873_v1 = vld [vmem:[#allocation16 + $0x88] sm:$0xff] }
0x18af   : > { %5178 = vadd.xlane.f32.xlu1 %v5173_v26  ;;  %v5172_v14 = vadd.f32 %v5168_v50, %v13496_v63  ;;  %v918_v63 = vld [vmem:[#allocation16 + $0x1f0] sm:$0xff]  ;;  %v885_v50 = vld [vmem:[#allocation16 + $0xe8] sm:$0xff] }
0x18b0   : > { %5352 = vmatpush1.msra.mxu0 %v918_v63  ;;  %v872_v63 = vld [vmem:[#allocation16 + $0x80] sm:$0xff] }
0x18b1   : > { %5176 = vadd.xlane.f32.xlu0 %v5172_v14  ;;  %5353 = vmatprep.subr.mxu0 %v915_v58  ;;  %v869_v58 = vld [vmem:[#allocation16 + $0x68] sm:$0xff] }
0x18b2   : > { %v12006_v17 = vpop.f32.mrf.mxu0 }
0x18b3   : > { %v5161_v49 = vadd.f32 %v12006_v17, %v14059_v21  ;;  %v912_v21 = vld [vmem:[#allocation16 + $0x1c0] sm:$0xff]  ;;  %v886_v17 = vld [vmem:[#allocation16 + $0xf0] sm:$0xff] }
0x18b4   : > { %v5149_v27 = vpop.f32.mrf.mxu0  ;;  %5265 = vmatpush1.msra.mxu1 %v912_v21  ;;  %v871_v21 = vld [vmem:[#allocation16 + $0x78] sm:$0xff] }
0x18b5   : > { %v5160_v2 = vadd.f32 %v5149_v27, %v14062_v48  ;;  %v5171_v12 = vadd.f32 %v10929_v59, %v5161_v49  ;;  %v914_v48 = vld [vmem:[#allocation16 + $0x1d0] sm:$0xff]  ;;  %5266 = vmatprep.subr.mxu1 %v909_v31  ;;  %v881_v27 = vld [vmem:[#allocation16 + $0xc8] sm:$0xff]  ;;  %v883_v49 = vld [vmem:[#allocation16 + $0xd8] sm:$0xff] }
0x18b6   : > { %5354 = vmatpush1.msra.mxu0 %v914_v48  ;;  %5267 = vmatpush1.msra.mxu1 %v908_v30  ;;  %v868_v48 = vld [vmem:[#allocation16 + $0x60] sm:$0xff]  ;;  %v870_v31 = vld [vmem:[#allocation16 + $0x70] sm:$0xff]  ;;  %v867_v30 = vld [vmem:[#allocation16 + $0x58] sm:$0xff] }
0x18b7   : > { %v5170_v19 = vadd.f32 %v10929_v59, %v5160_v2  ;;  %v5175_v38 = vadd.f32 %v5171_v12, %v13502_v4  ;;  %5268 = vmatprep.subr.mxu1 %v905_v37  ;;  %v892_v59 = vld [vmem:[#allocation16 + $0x120] sm:$0xff]  ;;  %v877_v12 = vld [vmem:[#allocation16 + $0xa8] sm:$0xff] }
0x18b8   : > { %5269 = vmatpush1.msra.mxu1 %v904_v33  ;;  %v880_v2 = vld [vmem:[#allocation16 + $0xc0] sm:$0xff] }
0x18b9   : > { %v5174_v56 = vadd.f32 %v5170_v19, %v13506_v5  ;;  %v911_v5 = vld [vmem:[#allocation16 + $0x1b8] sm:$0xff]  ;;  %5270 = vmatprep.subr.mxu1 %v901_v35  ;;  %v882_v19 = vld [vmem:[#allocation16 + $0xd0] sm:$0xff] }
0x18ba   : > { %5355 = vmatprep.subr.mxu0 %v911_v5  ;;  %5271 = vmatpush1.msra.mxu1 %v900_v46  ;;  %v865_v5 = vld [vmem:[#allocation16 + $0x48] sm:$0xff] }
0x18bb   : > { %5180 = vadd.xlane.f32.xlu0 %v5174_v56  ;;  %5356 = vmatpush1.msra.mxu0 %v910_v6  ;;  %v864_v6 = vld [vmem:[#allocation16 + $0x40] sm:$0xff] }
0x18bc   : > { %5357 = vmatprep.subr.mxu0 %v907_v43  ;;  %5272 = vmatprep.subr.mxu1 %v897_v57 }
0x18bd   : > { %5358 = vmatpush1.msra.mxu0 %v906_v44  ;;  %5273 = vmatpush1.msra.mxu1 %v896_v62 }
0x18be   : > { %5359 = vmatprep.subr.mxu0 %v903_v32  ;;  %5274 = vmatprep.subr.mxu1 %v893_v0 }
0x18bf   : > { %5182 = vadd.xlane.f32.xlu0 %v5175_v38  ;;  %5360 = vmatpush1.msra.mxu0 %v902_v51 }
0x18c0   : > { %5361 = vmatprep.subr.mxu0 %v899_v60  ;;  %5275 = vmatpush1.msra.mxu1 %v892_v59 }
0x18c1   : > { %5362 = vmatpush1.msra.mxu0 %v898_v11  ;;  %5276 = vmatprep.subr.mxu1 %v889_v18 }
0x18c2   : > { %5363 = vmatprep.subr.mxu0 %v895_v47  ;;  %5277 = vmatpush1.msra.mxu1 %v888_v61 }
0x18c3   : > { %5364 = vmatpush1.msra.mxu0 %v894_v55  ;;  %5278 = vmatprep.subr.mxu1 %v885_v50  ;;  %v10930_v55 = vld [vmem:[#allocation13] ss:$0 sm:$0xff] }
0x18c4   : > { %5365 = vmatprep.subr.mxu0 %v891_v45  ;;  %v10931_v45 = vld [vmem:[#allocation14] ss:$0 sm:$0xff] }
0x18c5   : > { %5366 = vmatpush1.msra.mxu0 %v890_v20  ;;  %v936_v50 = vld [vmem:[#allocation17 + $0x78] sm:$0xff] }
0x1938   : > { %v5179_v4 = vpop.xlane.xlu1 %5178 }
0x1939   : > { %v5186_v40 = vmul.f32 0.0078125, %v5179_v4  ;;  %v866_v4 = vld [vmem:[#allocation16 + $0x50] sm:$0xff] }
0x193a   : > { %v5177_v41 = vpop.xlane.xlu0 %5176 }
0x193b   : > { %v14098_v25 = vsub.f32 %v5173_v26, %v5186_v40  ;;  %v5185_v24 = vmul.f32 0.0078125, %v5177_v41  ;;  %v887_v26 = vld [vmem:[#allocation16 + $0xf8] sm:$0xff]  ;;  %v861_v40 = vld [vmem:[#allocation16 + $0x28] sm:$0xff] }
0x193c   : > { %5367 = vmatprep.subr.mxu0 %v887_v26  ;;  %v863_v41 = vld [vmem:[#allocation16 + $0x38] sm:$0xff] }
0x193d   : > { %v14100_v34 = vsub.f32 %v5172_v14, %v5185_v24  ;;  %v5194_v36 = vmul.f32 %v14098_v25, %v14098_v25  ;;  %v884_v14 = vld [vmem:[#allocation16 + $0xe0] sm:$0xff]  ;;  %5368 = vmatpush1.msra.mxu0 %v886_v17  ;;  %v968_v26 = vld [vmem:[#allocation17 + $0x178] sm:$0xff]  ;;  %v983_v17 = vld [vmem:[#allocation17 + $0x1f0] sm:$0xff] }
0x193e   : > { %5279 = vmatpush1.msra.mxu1 %v884_v14  ;;  %5369 = vmatprep.subr.mxu0 %v883_v49  ;;  %v860_v24 = vld [vmem:[#allocation16 + $0x20] sm:$0xff]  ;;  %v951_v14 = vld [vmem:[#allocation17 + $0xf0] sm:$0xff] }
0x193f   : > { %5199 = vadd.xlane.f32.xlu1 %v5194_v36  ;;  %v5193_v29 = vmul.f32 %v14100_v34, %v14100_v34  ;;  %5280 = vmatprep.subr.mxu1 %v881_v27  ;;  %v862_v36 = vld [vmem:[#allocation16 + $0x30] sm:$0xff] }
0x1940   : > { %5281 = vmatpush1.msra.mxu1 %v880_v2  ;;  %5370 = vmatpush1.msra.mxu0 %v882_v19  ;;  %v935_v27 = vld [vmem:[#allocation17 + $0x70] sm:$0xff]  ;;  %v950_v19 = vld [vmem:[#allocation17 + $0xe8] sm:$0xff] }
0x1941   : > { %5197 = vadd.xlane.f32.xlu0 %v5193_v29  ;;  %5282 = vmatprep.subr.mxu1 %v877_v12  ;;  %v857_v29 = vld [vmem:[#allocation16 + $0x8] sm:$0xff]  ;;  %v967_v49 = vld [vmem:[#allocation17 + $0x170] sm:$0xff] }
0x1942   : > { %v982_v12 = vld [vmem:[#allocation17 + $0x1e8] sm:$0xff] }
0x1944   : > { %v5181_v3 = vpop.xlane.xlu0 %5180 }
0x1945   : > { %v5187_v9 = vmul.f32 0.0078125, %v5181_v3  ;;  %v859_v3 = vld [vmem:[#allocation16 + $0x18] sm:$0xff] }
0x1947   : > { %v14106_v42 = vsub.f32 %v5174_v56, %v5187_v9  ;;  %v879_v56 = vld [vmem:[#allocation16 + $0xb8] sm:$0xff]  ;;  %v856_v9 = vld [vmem:[#allocation16] sm:$0xff] }
0x1948   : > { %v5183_v10 = vpop.xlane.xlu0 %5182  ;;  %5371 = vmatprep.subr.mxu0 %v879_v56  ;;  %v934_v56 = vld [vmem:[#allocation17 + $0x68] sm:$0xff] }
0x1949   : > { %v5188_v22 = vmul.f32 0.0078125, %v5183_v10  ;;  %v5195_v15 = vmul.f32 %v14106_v42, %v14106_v42  ;;  %5372 = vmatpush1.msra.mxu0 %v878_v23  ;;  %v858_v10 = vld [vmem:[#allocation16 + $0x10] sm:$0xff] }
0x194a   : > { %5373 = vmatprep.subr.mxu0 %v875_v53  ;;  %v981_v53 = vld [vmem:[#allocation17 + $0x1e0] sm:$0xff] }
0x194b   : > { %v14110_v28 = vsub.f32 %v5175_v38, %v5188_v22  ;;  %5201 = vadd.xlane.f32.xlu0 %v5195_v15  ;;  %v876_v38 = vld [vmem:[#allocation16 + $0xa0] sm:$0xff]  ;;  %5374 = vmatpush1.msra.mxu0 %v874_v39  ;;  %v952_v22 = vld [vmem:[#allocation17 + $0xf8] sm:$0xff] }
0x194c   : > { %5283 = vmatpush1.msra.mxu1 %v876_v38  ;;  %5375 = vmatprep.subr.mxu0 %v871_v21  ;;  %v984_v15 = vld [vmem:[#allocation17 + $0x1f8] sm:$0xff]  ;;  %v966_v38 = vld [vmem:[#allocation17 + $0x168] sm:$0xff]  ;;  %v965_v21 = vld [vmem:[#allocation17 + $0x160] sm:$0xff] }
0x194d   : > { %v5196_v52 = vmul.f32 %v14110_v28, %v14110_v28  ;;  %5284 = vmatprep.subr.mxu1 %v873_v1  ;;  %5376 = vmatpush1.msra.mxu0 %v870_v31  ;;  %v949_v1 = vld [vmem:[#allocation17 + $0xe0] sm:$0xff]  ;;  %v948_v31 = vld [vmem:[#allocation17 + $0xd8] sm:$0xff] }
0x194e   : > { %5285 = vmatpush1.msra.mxu1 %v872_v63  ;;  %5377 = vmatprep.subr.mxu0 %v867_v30 }
0x194f   : > { %5203 = vadd.xlane.f32.xlu1 %v5196_v52  ;;  %5286 = vmatprep.subr.mxu1 %v869_v58  ;;  %v933_v58 = vld [vmem:[#allocation17 + $0x60] sm:$0xff] }
0x1950   : > { %5287 = vmatpush1.msra.mxu1 %v868_v48  ;;  %5378 = vmatpush1.msra.mxu0 %v866_v4  ;;  %v947_v4 = vld [vmem:[#allocation17 + $0xd0] sm:$0xff] }
0x1951   : > { %5288 = vmatprep.subr.mxu1 %v865_v5  ;;  %5379 = vmatprep.subr.mxu0 %v863_v41  ;;  %v980_v5 = vld [vmem:[#allocation17 + $0x1d8] sm:$0xff]  ;;  %v931_v41 = vld [vmem:[#allocation17 + $0x50] sm:$0xff] }
0x1952   : > { %5289 = vmatpush1.msra.mxu1 %v864_v6  ;;  %5380 = vmatpush1.msra.mxu0 %v862_v36  ;;  %v964_v6 = vld [vmem:[#allocation17 + $0x158] sm:$0xff]  ;;  %v946_v36 = vld [vmem:[#allocation17 + $0xc8] sm:$0xff] }
0x1953   : > { %5290 = vmatprep.subr.mxu1 %v861_v40  ;;  %5381 = vmatprep.subr.mxu0 %v859_v3  ;;  %v979_v40 = vld [vmem:[#allocation17 + $0x1d0] sm:$0xff]  ;;  %v930_v3 = vld [vmem:[#allocation17 + $0x48] sm:$0xff] }
0x1954   : > { %5291 = vmatpush1.msra.mxu1 %v860_v24  ;;  %5382 = vmatpush1.msra.mxu0 %v858_v10  ;;  %v963_v24 = vld [vmem:[#allocation17 + $0x150] sm:$0xff]  ;;  %v945_v10 = vld [vmem:[#allocation17 + $0xc0] sm:$0xff] }
0x1955   : > { %5292 = vmatprep.subr.mxu1 %v857_v29  ;;  %11327 = vmatprep.subr.mxu0 %v984_v15  ;;  %v978_v29 = vld [vmem:[#allocation17 + $0x1c8] sm:$0xff]  ;;  %v929_v15 = vld [vmem:[#allocation17 + $0x40] sm:$0xff] }
0x1956   : > { %5293 = vmatpush1.msra.mxu1 %v856_v9  ;;  %v962_v9 = vld [vmem:[#allocation17 + $0x148] sm:$0xff] }
0x1957   : > { %11283 = vmatprep.subr.mxu1 %v952_v22  ;;  %v977_v22 = vld [vmem:[#allocation17 + $0x1c0] sm:$0xff] }
0x19c8   : > { %v5200_v37 = vpop.xlane.xlu1 %5199 }
0x19c9   : > { %v5206_v43 = vmul.f32 0.0078125, %v5200_v37  ;;  %v961_v37 = vld [vmem:[#allocation17 + $0x140] sm:$0xff] }
0x19ca   : > { %v5198_v33 = vpop.xlane.xlu0 %5197 }
0x19cb   : > { %v5210_v44 = vadd.f32 1e-05, %v5206_v43  ;;  %v5205_v35 = vmul.f32 0.0078125, %v5198_v33  ;;  %v944_v43 = vld [vmem:[#allocation17 + $0xb8] sm:$0xff] }
0x19cc   : > { %v976_v33 = vld [vmem:[#allocation17 + $0x1b8] sm:$0xff] }
0x19cd   : > { %12630 = vrsqrt.f32 %v5210_v44  ;;  %v5209_v32 = vadd.f32 1e-05, %v5205_v35  ;;  %v928_v44 = vld [vmem:[#allocation17 + $0x38] sm:$0xff] }
0x19ce   : > { %v960_v35 = vld [vmem:[#allocation17 + $0x138] sm:$0xff] }
0x19cf   : > { %12632 = vrsqrt.f32 %v5209_v32  ;;  %v943_v32 = vld [vmem:[#allocation17 + $0xb0] sm:$0xff] }
0x19d4   : > { %v5202_v46 = vpop.xlane.xlu0 %5201 }
0x19d5   : > { %v5207_v51 = vmul.f32 0.0078125, %v5202_v46  ;;  %v975_v46 = vld [vmem:[#allocation17 + $0x1b0] sm:$0xff] }
0x19d7   : > { %v5211_v52 = vadd.f32 1e-05, %v5207_v51  ;;  %v927_v51 = vld [vmem:[#allocation17 + $0x30] sm:$0xff] }
0x19d8   : > { %v5204_v57 = vpop.xlane.xlu1 %5203 }
0x19d9   : > { %12634 = vrsqrt.f32 %v5211_v52  ;;  %v5208_v60 = vmul.f32 0.0078125, %v5204_v57  ;;  %v959_v52 = vld [vmem:[#allocation17 + $0x130] sm:$0xff]  ;;  %v942_v57 = vld [vmem:[#allocation17 + $0xa8] sm:$0xff] }
0x19da   : > { %v12631_v62 = vpop.eup %12630 }
0x19db   : > { %v5212_v11 = vadd.f32 1e-05, %v5208_v60  ;;  %v5218_v59 = vmul.f32 %v12631_v62, %v14098_v25  ;;  %v974_v60 = vld [vmem:[#allocation17 + $0x1a8] sm:$0xff] }
0x19dc   : > { %v12633_v0 = vpop.eup %12632  ;;  %v926_v62 = vld [vmem:[#allocation17 + $0x28] sm:$0xff] }
0x19dd   : > { %12636 = vrsqrt.f32 %v5212_v11  ;;  %v5217_v47 = vmul.f32 %v12633_v0, %v14100_v34  ;;  %v5228_v20 = vmul.f32 %v10930_v55, %v5218_v59  ;;  %v958_v11 = vld [vmem:[#allocation17 + $0x128] sm:$0xff]  ;;  %v941_v0 = vld [vmem:[#allocation17 + $0xa0] sm:$0xff] }
0x19de   : > { %v925_v59 = vld [vmem:[#allocation17 + $0x20] sm:$0xff] }
0x19df   : > { %v5227_v18 = vmul.f32 %v10930_v55, %v5217_v47  ;;  %v14122_v34 = vadd.f32 %v10931_v45, %v5228_v20  ;;  %v973_v47 = vld [vmem:[#allocation17 + $0x1a0] sm:$0xff]  ;;  %v924_v20 = vld [vmem:[#allocation17 + $0x18] sm:$0xff] }
0x19e1   : > { %v14116_v61 = vadd.f32 %v10931_v45, %v5227_v18  ;;  %v940_v18 = vld [vmem:[#allocation17 + $0x98] sm:$0xff] }
0x19e3   : > { %5327 = vmatmul.mubr.f32.vlgmr.msra.gmra.mxu1 %v14116_v61  ;;  %5416 = vmatmul.mubr.f32.vlgmr.msra.gmra.mxu0 %v14116_v61 }
0x19e4   : > { %5332 = vmatprep.mubr.f32.mxu1 %v13152_v54  ;;  %5421 = vmatprep.mubr.f32.mxu0 %v13152_v54 }
0x19e5   : > { %11284 = vmatpush3.msra.mxu1 %v936_v50  ;;  %11328 = vmatpush3.msra.mxu0 %v968_v26  ;;  %v956_v50 = vld [vmem:[#allocation17 + $0x118] sm:$0xff]  ;;  %v939_v26 = vld [vmem:[#allocation17 + $0x90] sm:$0xff] }
0x19e6   : > { %v12635_v25 = vpop.eup %12634  ;;  %11285 = vmatprep.subr.mxu1 %v951_v14  ;;  %11329 = vmatprep.subr.mxu0 %v983_v17  ;;  %v971_v14 = vld [vmem:[#allocation17 + $0x190] sm:$0xff] }
0x19e7   : > { %5333 = vmatmul.mubr.f32.gmra.mxu1 %v14122_v34  ;;  %5422 = vmatmul.mubr.f32.gmra.mxu0 %v14122_v34  ;;  %v5219_v2 = vmul.f32 %v12635_v25, %v14106_v42  ;;  %v923_v17 = vld [vmem:[#allocation17 + $0x10] sm:$0xff] }
0x19e8   : > { %5338 = vmatprep.mubr.f32.mxu1 %v13152_v54  ;;  %5427 = vmatprep.mubr.f32.mxu0 %v13152_v54  ;;  %v955_v25 = vld [vmem:[#allocation17 + $0x110] sm:$0xff] }
0x19e9   : > { %v5229_v23 = vmul.f32 %v10930_v55, %v5219_v2  ;;  %11286 = vmatpush3.msra.mxu1 %v935_v27  ;;  %11330 = vmatpush3.msra.mxu0 %v967_v49  ;;  %v938_v27 = vld [vmem:[#allocation17 + $0x88] sm:$0xff] }
0x19ea   : > { %v12637_v63 = vpop.eup %12636  ;;  %11287 = vmatprep.subr.mxu1 %v950_v19  ;;  %11331 = vmatprep.subr.mxu0 %v982_v12  ;;  %v970_v49 = vld [vmem:[#allocation17 + $0x188] sm:$0xff]  ;;  %v937_v12 = vld [vmem:[#allocation17 + $0x80] sm:$0xff] }
0x19eb   : > { %v14129_v39 = vadd.f32 %v10931_v45, %v5229_v23  ;;  %v5220_v42 = vmul.f32 %v12637_v63, %v14110_v28  ;;  %11288 = vmatpush3.msra.mxu1 %v934_v56  ;;  %11332 = vmatpush3.msra.mxu0 %v966_v38  ;;  %v932_v28 = vld [vmem:[#allocation17 + $0x58] sm:$0xff]  ;;  %v922_v2 = vld [vmem:[#allocation17 + $0x8] sm:$0xff]  ;;  %v969_v56 = vld [vmem:[#allocation17 + $0x180] sm:$0xff] }
0x19ec   : > { %11289 = vmatprep.subr.mxu1 %v949_v1  ;;  %11333 = vmatprep.subr.mxu0 %v981_v53  ;;  %v954_v19 = vld [vmem:[#allocation17 + $0x108] sm:$0xff]  ;;  %v921_v38 = vld [vmem:[#allocation17] sm:$0xff]  ;;  %v920_v1 = vld [vmem:[%s14874_s11] sm:$0xf]  ;;  %v5256_v53 = vsub.s32 3, %v13515_v7 }
0x19ed   : > { %5339 = vmatmul.mubr.f32.gmra.mxu1 %v14129_v39  ;;  %5428 = vmatmul.mubr.f32.gmra.mxu0 %v14129_v39  ;;  %v5230_v48 = vmul.f32 %v10930_v55, %v5220_v42  ;;  %v957_v55 = vld [vmem:[#allocation17 + $0x120] sm:$0xff]  ;;  %v5245_v63 = vrot.slane %v920_v1, %v13518_v8  ;;  %v5253_v42 = vrot.slane %v920_v1, %v13532_v16 }
0x19ee   : > { %5344 = vmatprep.mubr.f32.mxu1 %v13152_v54  ;;  %5433 = vmatprep.mubr.f32.mxu0 %v13152_v54  ;;  %v953_v23 = vld [vmem:[#allocation17 + $0x100] sm:$0xff] }
0x19ef   : > { %v14136_v30 = vadd.f32 %v10931_v45, %v5230_v48  ;;  %11290 = vmatpush3.msra.mxu1 %v933_v58  ;;  %11334 = vmatpush3.msra.mxu0 %v965_v21  ;;  %v972_v45 = vld [vmem:[#allocation17 + $0x198] sm:$0xff]  ;;  %v5249_v58 = vrot.slane %v920_v1, %v13527_v13  ;;  %v5257_v21 = vrot.slane %v920_v1, %v5256_v53 }
0x19f0   : > { %11291 = vmatprep.subr.mxu1 %v948_v31  ;;  %11335 = vmatprep.subr.mxu0 %v980_v5 }
0x19f1   : > { %5345 = vmatmul.mubr.f32.gmra.mxu1 %v14136_v30  ;;  %5434 = vmatmul.mubr.f32.gmra.mxu0 %v14136_v30 }
0x19f2   : > { %11292 = vmatpush3.msra.mxu1 %v932_v28  ;;  %11336 = vmatpush3.msra.mxu0 %v964_v6 }
0x19f3   : > { %11293 = vmatprep.subr.mxu1 %v947_v4  ;;  %11337 = vmatprep.subr.mxu0 %v979_v40 }
0x19f4   : > { %11294 = vmatpush3.msra.mxu1 %v931_v41  ;;  %11338 = vmatpush3.msra.mxu0 %v963_v24 }
0x19f5   : > { %11295 = vmatprep.subr.mxu1 %v946_v36  ;;  %11339 = vmatprep.subr.mxu0 %v978_v29 }
0x19f6   : > { %11296 = vmatpush3.msra.mxu1 %v930_v3  ;;  %11340 = vmatpush3.msra.mxu0 %v962_v9 }
0x19f7   : > { %11297 = vmatprep.subr.mxu1 %v945_v10  ;;  %11341 = vmatprep.subr.mxu0 %v977_v22 }
0x19f8   : > { %11298 = vmatpush3.msra.mxu1 %v929_v15  ;;  %11342 = vmatpush3.msra.mxu0 %v961_v37 }
0x19f9   : > { %11299 = vmatprep.subr.mxu1 %v944_v43  ;;  %11343 = vmatprep.subr.mxu0 %v976_v33 }
0x19fa   : > { %11300 = vmatpush3.msra.mxu1 %v928_v44  ;;  %11344 = vmatpush3.msra.mxu0 %v960_v35 }
0x19fb   : > { %11301 = vmatprep.subr.mxu1 %v943_v32  ;;  %11345 = vmatprep.subr.mxu0 %v975_v46 }
0x19fc   : > { %11302 = vmatpush3.msra.mxu1 %v927_v51  ;;  %11346 = vmatpush3.msra.mxu0 %v959_v52 }
0x19fd   : > { %11303 = vmatprep.subr.mxu1 %v942_v57  ;;  %11347 = vmatprep.subr.mxu0 %v974_v60 }
0x19fe   : > { %11304 = vmatpush3.msra.mxu1 %v926_v62  ;;  %11348 = vmatpush3.msra.mxu0 %v958_v11 }
0x19ff   : > { %11305 = vmatprep.subr.mxu1 %v941_v0  ;;  %11349 = vmatprep.subr.mxu0 %v973_v47 }
0x1a00   : > { %11306 = vmatpush3.msra.mxu1 %v925_v59  ;;  %11350 = vmatpush3.msra.mxu0 %v957_v55 }
0x1a01   : > { %11307 = vmatprep.subr.mxu1 %v940_v18  ;;  %11351 = vmatprep.subr.mxu0 %v972_v45 }
0x1a02   : > { %11308 = vmatpush3.msra.mxu1 %v924_v20  ;;  %11352 = vmatpush3.msra.mxu0 %v956_v50 }
0x1a03   : > { %11309 = vmatprep.subr.mxu1 %v939_v26  ;;  %11353 = vmatprep.subr.mxu0 %v971_v14 }
0x1a04   : > { %11310 = vmatpush3.msra.mxu1 %v923_v17  ;;  %11354 = vmatpush3.msra.mxu0 %v955_v25 }
0x1a05   : > { %11311 = vmatprep.subr.mxu1 %v938_v27  ;;  %11355 = vmatprep.subr.mxu0 %v970_v49 }
0x1a06   : > { %11312 = vmatpush3.msra.mxu1 %v922_v2  ;;  %11356 = vmatpush3.msra.mxu0 %v954_v19 }
0x1a07   : > { %11313 = vmatprep.subr.mxu1 %v937_v12  ;;  %11357 = vmatprep.subr.mxu0 %v969_v56 }
0x1a08   : > { %11314 = vmatpush3.msra.mxu1 %v921_v38  ;;  %11358 = vmatpush3.msra.mxu0 %v953_v23 }
0x1aa3   : > { %v5328_v48 = vpop.f32.mrf.mxu1  ;;  %v5417_v31 = vpop.f32.mrf.mxu0 }
0x1aa4   : > { %v5329_v5 = vadd.f32 %v5328_v48, %v5245_v63  ;;  %v5418_v28 = vadd.f32 %v5417_v31, %v5253_v42 }
0x1aa5   : > { %v5330_v6 = vpop.f32.mrf.mxu1  ;;  %v5419_v4 = vpop.f32.mrf.mxu0 }
0x1aa6   : > { %v5331_v40 = vadd.f32 %v5330_v6, %v5249_v58  ;;  %v5420_v41 = vadd.f32 %v5419_v4, %v5257_v21  ;;  %v5440_v9 = vmax.f32 %v5329_v5, 0.0  ;;  %v5442_v10 = vmax.f32 %v5418_v28, 0.0 }
0x1aa7   : > { %v5334_v24 = vpop.f32.mrf.mxu1  ;;  %v5423_v36 = vpop.f32.mrf.mxu0 }
0x1aa8   : > { %v5441_v29 = vmax.f32 %v5331_v40, 0.0  ;;  %v5443_v3 = vmax.f32 %v5420_v41, 0.0  ;;  %v5335_v22 = vadd.f32 %v5334_v24, %v5245_v63  ;;  %v5424_v15 = vadd.f32 %v5423_v36, %v5253_v42 }
0x1aa9   : > { %v5336_v37 = vpop.f32.mrf.mxu1  ;;  %v5425_v43 = vpop.f32.mrf.mxu0 }
0x1aaa   : > { %v5337_v33 = vadd.f32 %v5336_v37, %v5249_v58  ;;  %v5426_v44 = vadd.f32 %v5425_v43, %v5257_v21  ;;  %5526 = vmatprep.mubr.f32.mxu1 %v5441_v29  ;;  %5611 = vmatprep.mubr.f32.mxu0 %v5443_v3  ;;  %v5444_v46 = vmax.f32 %v5335_v22, 0.0  ;;  %v5446_v51 = vmax.f32 %v5424_v15, 0.0 }
0x1aab   : > { %5527 = vmatmul.mubr.f32.vlgmr.msra.gmra.mxu1 %v5440_v9  ;;  %5612 = vmatmul.mubr.f32.vlgmr.msra.gmra.mxu0 %v5442_v10 }
0x1aac   : > { %v5445_v35 = vmax.f32 %v5337_v33, 0.0  ;;  %v5447_v32 = vmax.f32 %v5426_v44, 0.0 }
0x1aad   : > { %v5340_v52 = vpop.f32.mrf.mxu1  ;;  %v5429_v57 = vpop.f32.mrf.mxu0 }
0x1aae   : > { %5531 = vmatprep.mubr.f32.mxu1 %v5445_v35  ;;  %5616 = vmatprep.mubr.f32.mxu0 %v5447_v32  ;;  %v5341_v60 = vadd.f32 %v5340_v52, %v5245_v63  ;;  %v5430_v62 = vadd.f32 %v5429_v57, %v5253_v42 }
0x1aaf   : > { %v5342_v11 = vpop.f32.mrf.mxu1  ;;  %v5431_v0 = vpop.f32.mrf.mxu0  ;;  %5532 = vmatmul.mubr.f32.gmra.mxu1 %v5444_v46  ;;  %5617 = vmatmul.mubr.f32.gmra.mxu0 %v5446_v51 }
0x1ab0   : > { %v5343_v47 = vadd.f32 %v5342_v11, %v5249_v58  ;;  %v5432_v59 = vadd.f32 %v5431_v0, %v5257_v21  ;;  %v5448_v50 = vmax.f32 %v5341_v60, 0.0  ;;  %v5450_v26 = vmax.f32 %v5430_v62, 0.0 }
0x1ab1   : > { %v5346_v55 = vpop.f32.mrf.mxu1  ;;  %v5435_v18 = vpop.f32.mrf.mxu0 }
0x1ab2   : > { %v5449_v45 = vmax.f32 %v5343_v47, 0.0  ;;  %v5451_v20 = vmax.f32 %v5432_v59, 0.0  ;;  %v5347_v14 = vadd.f32 %v5346_v55, %v5245_v63  ;;  %v5436_v17 = vadd.f32 %v5435_v18, %v5253_v42  ;;  %v10932_v63 = vld [vmem:[%s14876_s13] ss:$0 sm:$0xff]  ;;  %v5747_v47 = vld [vmem:[#allocation10 + $0x2f0] sm:$0xff] }
0x1ab3   : > { %v5348_v25 = vpop.f32.mrf.mxu1  ;;  %v5437_v27 = vpop.f32.mrf.mxu0  ;;  %v5744_v59 = vld [vmem:[#allocation10 + $0x2d8] sm:$0xff]  ;;  %5928 = vmatprep.subr.mxu1 %v5747_v47  ;;  %v5743_v55 = vld [vmem:[#allocation10 + $0x2d0] sm:$0xff] }
0x1ab4   : > { %v5349_v49 = vadd.f32 %v5348_v25, %v5249_v58  ;;  %v5438_v2 = vadd.f32 %v5437_v27, %v5257_v21  ;;  %5536 = vmatprep.mubr.f32.mxu1 %v5449_v45  ;;  %5621 = vmatprep.mubr.f32.mxu0 %v5451_v20  ;;  %v5452_v56 = vmax.f32 %v5347_v14, 0.0  ;;  %v5454_v38 = vmax.f32 %v5436_v17, 0.0  ;;  %v5748_v18 = vld [vmem:[#allocation10 + $0x2f8] sm:$0xff]  ;;  %v5741_v45 = vld [vmem:[#allocation10 + $0x2c0] sm:$0xff] }
0x1ab5   : > { %5537 = vmatmul.mubr.f32.gmra.mxu1 %v5448_v50  ;;  %5622 = vmatmul.mubr.f32.gmra.mxu0 %v5450_v26  ;;  %v5745_v20 = vld [vmem:[#allocation10 + $0x2e0] sm:$0xff]  ;;  %v5740_v50 = vld [vmem:[#allocation10 + $0x2b8] sm:$0xff] }
0x1ab6   : > { %v5453_v19 = vmax.f32 %v5349_v49, 0.0  ;;  %v5455_v12 = vmax.f32 %v5438_v2, 0.0  ;;  %12007 = vmatprep.subr.mxu0 %v5748_v18  ;;  %v5737_v26 = vld [vmem:[#allocation10 + $0x2a0] sm:$0xff]  ;;  %v5704_v47 = vld [vmem:[#allocation10 + $0x198] sm:$0xff] }
0x1ab7   : > { %12008 = vmatpush3.msra.mxu0 %v5748_v18  ;;  %v5706_v18 = vld [vmem:[#allocation10 + $0x1a8] sm:$0xff] }
0x1ab8   : > { %5541 = vmatprep.mubr.f32.mxu1 %v5453_v19  ;;  %5626 = vmatprep.mubr.f32.mxu0 %v5455_v12 }
0x1ab9   : > { %5542 = vmatmul.mubr.f32.gmra.mxu1 %v5452_v56  ;;  %5627 = vmatmul.mubr.f32.gmra.mxu0 %v5454_v38 }
0x1aba   : > { %5992 = vmatprep.mubr.f32.mxu1 %v13152_v54  ;;  %12009 = vmatprep.subr.mxu0 %v5745_v20 }
0x1abb   : > { %12010 = vmatpush3.msra.mxu0 %v5745_v20 }
0x1b6b   : > { %v11315_v23 = vpop.f32.mrf.mxu1  ;;  %v11359_v1 = vpop.f32.mrf.mxu0 }
0x1b6d   : > { %v11316_v42 = vpop.f32.mrf.mxu1  ;;  %v11360_v58 = vpop.f32.mrf.mxu0 }
0x1b6e   : > { %v11317_v21 = vadd.f32 %v11316_v42, %v11315_v23  ;;  %v11361_v28 = vadd.f32 %v11360_v58, %v11359_v1  ;;  %v5735_v58 = vld [vmem:[#allocation10 + $0x290] sm:$0xff] }
0x1b6f   : > { %v11318_v48 = vpop.f32.mrf.mxu1  ;;  %v11362_v31 = vpop.f32.mrf.mxu0 }
0x1b70   : > { %v5529_v5 = vadd.f32 %v11317_v21, %v10932_v63  ;;  %v5742_v21 = vld [vmem:[#allocation10 + $0x2c8] sm:$0xff] }
0x1b71   : > { %v11319_v6 = vpop.f32.mrf.mxu1  ;;  %v11363_v4 = vpop.f32.mrf.mxu0  ;;  %12011 = vmatprep.subr.mxu0 %v5742_v21 }
0x1b72   : > { %v5614_v40 = vadd.f32 %v11361_v28, %v5529_v5  ;;  %v11320_v41 = vadd.f32 %v11319_v6, %v11318_v48  ;;  %v11364_v36 = vadd.f32 %v11363_v4, %v11362_v31  ;;  %v5734_v48 = vld [vmem:[#allocation10 + $0x288] sm:$0xff]  ;;  %12012 = vmatpush3.msra.mxu0 %v5742_v21  ;;  %v5732_v5 = vld [vmem:[#allocation10 + $0x278] sm:$0xff]  ;;  %v5739_v28 = vld [vmem:[#allocation10 + $0x2b0] sm:$0xff] }
0x1b73   : > { %12013 = vmatprep.subr.mxu0 %v5739_v28  ;;  %v5731_v6 = vld [vmem:[#allocation10 + $0x270] sm:$0xff]  ;;  %v5729_v4 = vld [vmem:[#allocation10 + $0x260] sm:$0xff] }
0x1b74   : > { %v5534_v24 = vadd.f32 %v11320_v41, %v10932_v63  ;;  %v5632_v29 = vadd.f32 %v5614_v40, %v14116_v61  ;;  %v5736_v40 = vld [vmem:[#allocation10 + $0x298] sm:$0xff]  ;;  %12014 = vmatpush3.msra.mxu0 %v5739_v28 }
0x1b75   : > { %v11321_v3 = vpop.f32.mrf.mxu1  ;;  %v11365_v9 = vpop.f32.mrf.mxu0  ;;  %v5728_v41 = vld [vmem:[#allocation10 + $0x258] sm:$0xff]  ;;  %12015 = vmatprep.subr.mxu0 %v5736_v40 }
0x1b76   : > { %v5619_v10 = vadd.f32 %v11364_v36, %v5534_v24  ;;  %5636 = vadd.xlane.f32.xlu0 %v5632_v29  ;;  %v5726_v24 = vld [vmem:[#allocation10 + $0x248] sm:$0xff]  ;;  %v5733_v36 = vld [vmem:[#allocation10 + $0x280] sm:$0xff]  ;;  %12016 = vmatpush3.msra.mxu0 %v5736_v40 }
0x1b77   : > { %v11322_v22 = vpop.f32.mrf.mxu1  ;;  %v11366_v15 = vpop.f32.mrf.mxu0  ;;  %12017 = vmatprep.subr.mxu0 %v5733_v36 }
0x1b78   : > { %v11323_v37 = vadd.f32 %v11322_v22, %v11321_v3  ;;  %v5633_v43 = vadd.f32 %v5619_v10, %v14122_v34  ;;  %v11367_v32 = vadd.f32 %v11366_v15, %v11365_v9  ;;  %v5746_v34 = vld [vmem:[#allocation10 + $0x2e8] sm:$0xff]  ;;  %v5723_v3 = vld [vmem:[#allocation10 + $0x230] sm:$0xff]  ;;  %12018 = vmatpush3.msra.mxu0 %v5733_v36  ;;  %v5720_v22 = vld [vmem:[#allocation10 + $0x218] sm:$0xff] }
0x1b79   : > { %v11324_v33 = vpop.f32.mrf.mxu1  ;;  %v11368_v44 = vpop.f32.mrf.mxu0  ;;  %5929 = vmatpush1.msra.mxu1 %v5746_v34  ;;  %v5730_v9 = vld [vmem:[#allocation10 + $0x268] sm:$0xff]  ;;  %v5727_v15 = vld [vmem:[#allocation10 + $0x250] sm:$0xff] }
0x1b7a   : > { %v5539_v35 = vadd.f32 %v11323_v37, %v10932_v63  ;;  %5638 = vadd.xlane.f32.xlu1 %v5633_v43  ;;  %5930 = vmatprep.subr.mxu1 %v5744_v59  ;;  %v5722_v10 = vld [vmem:[#allocation10 + $0x228] sm:$0xff]  ;;  %v5719_v37 = vld [vmem:[#allocation10 + $0x210] sm:$0xff]  ;;  %v5709_v59 = vld [vmem:[#allocation10 + $0x1c0] sm:$0xff] }
0x1b7b   : > { %v11325_v46 = vpop.f32.mrf.mxu1  ;;  %v11369_v51 = vpop.f32.mrf.mxu0  ;;  %5931 = vmatpush1.msra.mxu1 %v5743_v55  ;;  %12019 = vmatprep.subr.mxu0 %v5730_v9  ;;  %v5702_v34 = vld [vmem:[#allocation10 + $0x188] sm:$0xff]  ;;  %v5701_v55 = vld [vmem:[#allocation10 + $0x180] sm:$0xff] }
0x1b7c   : > { %v5624_v52 = vadd.f32 %v11367_v32, %v5539_v35  ;;  %v11326_v57 = vadd.f32 %v11325_v46, %v11324_v33  ;;  %v11370_v61 = vadd.f32 %v11369_v51, %v11368_v44  ;;  %5932 = vmatprep.subr.mxu1 %v5741_v45  ;;  %12020 = vmatpush3.msra.mxu0 %v5730_v9  ;;  %v5724_v33 = vld [vmem:[#allocation10 + $0x238] sm:$0xff]  ;;  %v5714_v35 = vld [vmem:[#allocation10 + $0x1e8] sm:$0xff]  ;;  %v5721_v32 = vld [vmem:[#allocation10 + $0x220] sm:$0xff] }
0x1b7d   : > { %5933 = vmatpush1.msra.mxu1 %v5740_v50  ;;  %12021 = vmatprep.subr.mxu0 %v5727_v15  ;;  %v5716_v44 = vld [vmem:[#allocation10 + $0x1f8] sm:$0xff]  ;;  %v5713_v46 = vld [vmem:[#allocation10 + $0x1e0] sm:$0xff]  ;;  %v5711_v51 = vld [vmem:[#allocation10 + $0x1d0] sm:$0xff] }
0x1b7e   : > { %v5544_v60 = vadd.f32 %v11326_v57, %v10932_v63  ;;  %v5634_v62 = vadd.f32 %v5624_v52, %v14129_v39  ;;  %v5738_v39 = vld [vmem:[#allocation10 + $0x2a8] sm:$0xff]  ;;  %12022 = vmatpush3.msra.mxu0 %v5727_v15  ;;  %v5703_v45 = vld [vmem:[#allocation10 + $0x190] sm:$0xff] }
0x1b7f   : > { %5934 = vmatprep.subr.mxu1 %v5738_v39  ;;  %12023 = vmatprep.subr.mxu0 %v5724_v33  ;;  %v5718_v52 = vld [vmem:[#allocation10 + $0x208] sm:$0xff] }
0x1b80   : > { %v5629_v11 = vadd.f32 %v11370_v61, %v5544_v60  ;;  %5640 = vadd.xlane.f32.xlu0 %v5634_v62  ;;  %5935 = vmatpush1.msra.mxu1 %v5737_v26  ;;  %v5710_v57 = vld [vmem:[#allocation10 + $0x1c8] sm:$0xff]  ;;  %v5708_v60 = vld [vmem:[#allocation10 + $0x1b8] sm:$0xff]  ;;  %v5715_v61 = vld [vmem:[#allocation10 + $0x1f0] sm:$0xff] }
0x1b81   : > { %5936 = vmatprep.subr.mxu1 %v5735_v58  ;;  %12024 = vmatpush3.msra.mxu0 %v5724_v33  ;;  %v10934_v58 = vld [vmem:[%s14939_s25] ss:$0 sm:$0xff] }
0x1b82   : > { %v5635_v0 = vadd.f32 %v5629_v11, %v14136_v30  ;;  %5937 = vmatpush1.msra.mxu1 %v5734_v48  ;;  %12025 = vmatprep.subr.mxu0 %v5721_v32  ;;  %v5705_v11 = vld [vmem:[#allocation10 + $0x1a0] sm:$0xff] }
0x1b83   : > { %5938 = vmatprep.subr.mxu1 %v5732_v5  ;;  %12026 = vmatpush3.msra.mxu0 %v5721_v32 }
0x1b84   : > { %5642 = vadd.xlane.f32.xlu1 %v5635_v0  ;;  %5939 = vmatpush1.msra.mxu1 %v5731_v6 }
0x1b85   : > { %5940 = vmatprep.subr.mxu1 %v5729_v4  ;;  %12027 = vmatprep.subr.mxu0 %v5718_v52 }
0x1b86   : > { %5941 = vmatpush1.msra.mxu1 %v5728_v41  ;;  %12028 = vmatpush3.msra.mxu0 %v5718_v52 }
0x1b87   : > { %5942 = vmatprep.subr.mxu1 %v5726_v24  ;;  %12029 = vmatprep.subr.mxu0 %v5715_v61 }
0x1b88   : > { %12030 = vmatpush3.msra.mxu0 %v5715_v61 }
0x1bff   : > { %v5637_v30 = vpop.xlane.xlu0 %5636 }
0x1c00   : > { %v5644_v14 = vmul.f32 0.0078125, %v5637_v30 }
0x1c02   : > { %v14157_v17 = vsub.f32 %v5632_v29, %v5644_v14  ;;  %v5725_v29 = vld [vmem:[#allocation10 + $0x240] sm:$0xff] }
0x1c03   : > { %v5639_v25 = vpop.xlane.xlu1 %5638  ;;  %5943 = vmatpush1.msra.mxu1 %v5725_v29 }
0x1c04   : > { %v5645_v27 = vmul.f32 0.0078125, %v5639_v25  ;;  %v5652_v49 = vmul.f32 %v14157_v17, %v14157_v17  ;;  %5944 = vmatprep.subr.mxu1 %v5723_v3 }
0x1c05   : > { %5945 = vmatpush1.msra.mxu1 %v5722_v10 }
0x1c06   : > { %v14161_v2 = vsub.f32 %v5633_v43, %v5645_v27  ;;  %5656 = vadd.xlane.f32.xlu0 %v5652_v49  ;;  %5946 = vmatprep.subr.mxu1 %v5720_v22  ;;  %v5717_v43 = vld [vmem:[#allocation10 + $0x200] sm:$0xff] }
0x1c07   : > { %5947 = vmatpush1.msra.mxu1 %v5719_v37 }
0x1c08   : > { %v5653_v19 = vmul.f32 %v14161_v2, %v14161_v2  ;;  %5948 = vmatprep.subr.mxu1 %v5717_v43 }
0x1c09   : > { %v5641_v12 = vpop.xlane.xlu0 %5640  ;;  %5949 = vmatpush1.msra.mxu1 %v5716_v44 }
0x1c0a   : > { %v5646_v56 = vmul.f32 0.0078125, %v5641_v12  ;;  %5658 = vadd.xlane.f32.xlu1 %v5653_v19  ;;  %5950 = vmatprep.subr.mxu1 %v5714_v35 }
0x1c0b   : > { %5951 = vmatpush1.msra.mxu1 %v5713_v46 }
0x1c0c   : > { %v14165_v38 = vsub.f32 %v5634_v62, %v5646_v56  ;;  %5952 = vmatprep.subr.mxu1 %v5711_v51  ;;  %v5707_v62 = vld [vmem:[#allocation10 + $0x1b0] sm:$0xff] }
0x1c0d   : > { %v5643_v23 = vpop.xlane.xlu1 %5642  ;;  %5953 = vmatpush1.msra.mxu1 %v5710_v57 }
0x1c0e   : > { %v5647_v1 = vmul.f32 0.0078125, %v5643_v23  ;;  %v5654_v63 = vmul.f32 %v14165_v38, %v14165_v38  ;;  %5954 = vmatprep.subr.mxu1 %v5708_v60 }
0x1c0f   : > { %5955 = vmatpush1.msra.mxu1 %v5707_v62 }
0x1c10   : > { %v14169_v42 = vsub.f32 %v5635_v0, %v5647_v1  ;;  %5660 = vadd.xlane.f32.xlu0 %v5654_v63  ;;  %v5712_v0 = vld [vmem:[#allocation10 + $0x1d8] sm:$0xff]  ;;  %5956 = vmatprep.subr.mxu1 %v5705_v11 }
0x1c11   : > { %12031 = vmatprep.subr.mxu0 %v5712_v0  ;;  %5957 = vmatpush1.msra.mxu1 %v5704_v47  ;;  %v10933_v1 = vld [vmem:[%s14877_s14] ss:$0 sm:$0xff] }
0x1c12   : > { %v5655_v31 = vmul.f32 %v14169_v42, %v14169_v42  ;;  %12032 = vmatpush3.msra.mxu0 %v5712_v0  ;;  %5958 = vmatprep.subr.mxu1 %v5702_v34 }
0x1c13   : > { %12033 = vmatprep.subr.mxu0 %v5709_v59  ;;  %5959 = vmatpush1.msra.mxu1 %v5701_v55 }
0x1c14   : > { %5662 = vadd.xlane.f32.xlu1 %v5655_v31  ;;  %12034 = vmatpush3.msra.mxu0 %v5709_v59 }
0x1c15   : > { %12035 = vmatprep.subr.mxu0 %v5706_v18 }
0x1c16   : > { %12036 = vmatpush3.msra.mxu0 %v5706_v18 }
0x1c17   : > { %12037 = vmatprep.subr.mxu0 %v5703_v45 }
0x1c18   : > { %12038 = vmatpush3.msra.mxu0 %v5703_v45 }
0x1c8f   : > { %v5657_v20 = vpop.xlane.xlu0 %5656 }
0x1c90   : > { %v5664_v50 = vmul.f32 0.0078125, %v5657_v20 }
0x1c92   : > { %v5668_v39 = vadd.f32 1e-05, %v5664_v50 }
0x1c93   : > { %v5659_v26 = vpop.xlane.xlu1 %5658 }
0x1c94   : > { %12638 = vrsqrt.f32 %v5668_v39  ;;  %v5665_v30 = vmul.f32 0.0078125, %v5659_v26 }
0x1c96   : > { %v5669_v14 = vadd.f32 1e-05, %v5665_v30 }
0x1c98   : > { %12640 = vrsqrt.f32 %v5669_v14 }
0x1c99   : > { %v5661_v25 = vpop.xlane.xlu0 %5660 }
0x1c9a   : > { %v5666_v27 = vmul.f32 0.0078125, %v5661_v25 }
0x1c9c   : > { %v5670_v49 = vadd.f32 1e-05, %v5666_v27 }
0x1c9d   : > { %v5663_v19 = vpop.xlane.xlu1 %5662 }
0x1c9e   : > { %12642 = vrsqrt.f32 %v5670_v49  ;;  %v5667_v12 = vmul.f32 0.0078125, %v5663_v19 }
0x1ca0   : > { %v5671_v56 = vadd.f32 1e-05, %v5667_v12 }
0x1ca1   : > { %v12639_v23 = vpop.eup %12638 }
0x1ca2   : > { %12644 = vrsqrt.f32 %v5671_v56  ;;  %v5676_v63 = vmul.f32 %v12639_v23, %v14157_v17 }
0x1ca4   : > { %v5686_v21 = vmul.f32 %v10933_v1, %v5676_v63 }
0x1ca5   : > { %v12641_v48 = vpop.eup %12640 }
0x1ca6   : > { %v14180_v31 = vadd.f32 %v10934_v58, %v5686_v21  ;;  %v5677_v5 = vmul.f32 %v12641_v48, %v14161_v2 }
0x1ca8   : > { %5993 = vmatmul.mubr.f32.vlgmr.msra.gmra.mxu1 %v14180_v31  ;;  %12039 = vmatprep.mubr.f32.mxu0 %v14180_v31  ;;  %v5687_v28 = vmul.f32 %v10933_v1, %v5677_v5 }
0x1ca9   : > { %5998 = vmatprep.mubr.f32.mxu1 %v13152_v54 }
0x1caa   : > { %v14186_v6 = vadd.f32 %v10934_v58, %v5687_v28 }
0x1cab   : > { %v12643_v17 = vpop.eup %12642 }
0x1cac   : > { %5999 = vmatmul.mubr.f32.gmra.mxu1 %v14186_v6  ;;  %12040 = vmatmul.mubr.f32.vlgmr.msra.gmra.mxu0 %v14186_v6  ;;  %v5678_v4 = vmul.f32 %v12643_v17, %v14165_v38  ;;  %v10935_v38 = vld [vmem:[%s14868_s5 + $0x3] sm:$0x7] }
0x1cad   : > { %6004 = vmatprep.mubr.f32.mxu1 %v13152_v54  ;;  %v5916_v3 = vrot.slane %v10935_v38, %v13518_v8  ;;  %v5920_v15 = vrot.slane %v10935_v38, %v13527_v13  ;;  %v14216_v44 = vrot.slane %v10935_v38, %v13532_v16 }
0x1cae   : > { %v5688_v40 = vmul.f32 %v10933_v1, %v5678_v4 }
0x1caf   : > { %v12645_v2 = vpop.eup %12644 }
0x1cb0   : > { %v14192_v41 = vadd.f32 %v10934_v58, %v5688_v40  ;;  %v5679_v24 = vmul.f32 %v12645_v2, %v14169_v42 }
0x1cb2   : > { %6005 = vmatmul.mubr.f32.gmra.mxu1 %v14192_v41  ;;  %12042 = vmatprep.mubr.f32.mxu0 %v14192_v41  ;;  %v5689_v36 = vmul.f32 %v10933_v1, %v5679_v24 }
0x1cb3   : > { %6010 = vmatprep.mubr.f32.mxu1 %v13152_v54 }
0x1cb4   : > { %v14198_v29 = vadd.f32 %v10934_v58, %v5689_v36 }
0x1cb6   : > { %6011 = vmatmul.mubr.f32.gmra.mxu1 %v14198_v29  ;;  %12043 = vmatmul.mubr.f32.gmra.mxu0 %v14198_v29 }
0x1d68   : > { %v5994_v42 = vpop.f32.mrf.mxu1 }
0x1d69   : > { %v14206_v9 = vadd.f32 %v5994_v42, %v5916_v3 }
0x1d6a   : > { %v5996_v10 = vpop.f32.mrf.mxu1 }
0x1d6b   : > { %12049 = vmatprep.mubr.msk.f32.mxu0 %vm684_vm0, %v14206_v9  ;;  %v14213_v33 = vadd.f32 %v5996_v10, %v5920_v15 }
0x1d6c   : > { %v6000_v22 = vpop.f32.mrf.mxu1  ;;  %v12041_v35 = vpop.f32.mrf.mxu0 }
0x1d6d   : > { %v14227_v52 = vadd.f32 %v12041_v35, %v14216_v44  ;;  %v14233_v61 = vadd.f32 %v6000_v22, %v5916_v3 }
0x1d6e   : > { %v6002_v37 = vpop.f32.mrf.mxu1  ;;  %v6083_v57 = vpop.f32.mrf.mxu0 }
0x1d6f   : > { %v14211_v43 = vadd.f32 %v6002_v37, %v5920_v15  ;;  %v14237_v0 = vadd.f32 %v6083_v57, %v14216_v44 }
0x1d71   : > { %12045 = vmatprep.subr.msk.mxu0 %vm684_vm0, %v14211_v43 }
0x1d72   : > { %v6006_v32 = vpop.f32.mrf.mxu1  ;;  %12046 = vmatpush3.xpose.msk.msra.mxu0 %vm684_vm0, %v14211_v43 }
0x1d73   : > { %v14222_v46 = vadd.f32 %v6006_v32, %v5916_v3  ;;  %12047 = vmatprep.subr.msk.mxu0 %vm684_vm0, %v14213_v33 }
0x1d74   : > { %v6008_v51 = vpop.f32.mrf.mxu1 }
0x1d75   : > { %12056 = vmatprep.mubr.msk.f32.mxu1 %vm684_vm0, %v14222_v46  ;;  %v14244_v34 = vadd.f32 %v6008_v51, %v5920_v15 }
0x1d76   : > { %v6012_v60 = vpop.f32.mrf.mxu1  ;;  %12048 = vmatpush3.xpose.msk.msra.mxu0 %vm684_vm0, %v14213_v33  ;;  %v12044_v62 = vpop.f32.mrf.mxu0 }
0x1d77   : > { %12059 = vmatprep.subr.mxu0 %v14227_v52  ;;  %v14247_v59 = vadd.f32 %v12044_v62, %v14216_v44  ;;  %v14260_v55 = vadd.f32 %v6012_v60, %v5916_v3 }
0x1d78   : > { %v6014_v11 = vpop.f32.mrf.mxu1  ;;  %v14264_v18 = vpop.f32.mrf.mxu0 }
0x1d79   : > { %v14239_v47 = vadd.f32 %v6014_v11, %v5920_v15  ;;  %12050 = vmatmul.mubr.msk.f32.vlgmr.msra.gmra.mxu0 %vm684_vm0, %v14233_v61  ;;  %v14298_v60 = vadd.f32 %v14264_v18, %v14216_v44 }
0x1d7a   : > { %12060 = vmatpush3.msra.mxu0 %v14227_v52 }
0x1d7b   : > { %12052 = vmatprep.subr.msk.mxu1 %vm684_vm0, %v14239_v47  ;;  %12061 = vmatprep.subr.mxu0 %v14237_v0 }
0x1d7c   : > { %12053 = vmatpush3.xpose.msk.msra.mxu1 %vm684_vm0, %v14239_v47  ;;  %12062 = vmatpush3.msra.mxu0 %v14237_v0 }
0x1d7d   : > { %12054 = vmatprep.subr.msk.mxu1 %vm684_vm0, %v14244_v34  ;;  %12066 = vmatprep.subr.mxu0 %v14247_v59 }
0x1d80   : > { %12055 = vmatpush3.xpose.msk.msra.mxu1 %vm684_vm0, %v14244_v34 }
0x1d83   : > { %12057 = vmatmul.mubr.msk.f32.vlgmr.msra.gmra.mxu1 %vm684_vm0, %v14260_v55 }
0x1e39   : > { %v12051_v45 = vpop.f32.mrf.mxu0 }
0x1e3a   : > { %v6279_v20 = vsel %vm684_vm0, %v12051_v45, -inf }
0x1e3b   : > { %6280 = vmax.xlane.f32.xlu1 %v6279_v20  ;;  %v6180_v50 = vpop.f32.mrf.mxu0 }
0x1e3c   : > { %v6276_v39 = vsel %vm684_vm0, %v6180_v50, -inf }
0x1e3d   : > { %6277 = vmax.xlane.f32.xlu0 %v6276_v39 }
0x1e43   : > { %v12058_v26 = vpop.f32.mrf.mxu1 }
0x1e44   : > { %v6285_v30 = vsel %vm684_vm0, %v12058_v26, -inf }
0x1e45   : > { %6286 = vmax.xlane.f32.xlu1 %v6285_v30  ;;  %v6267_v14 = vpop.f32.mrf.mxu1 }
0x1e46   : > { %v6282_v25 = vsel %vm684_vm0, %v6267_v14, -inf }
0x1e47   : > { %6283 = vmax.xlane.f32.xlu0 %v6282_v25 }
0x1ec4   : > { %v6281_v27 = vpop.xlane.xlu1 %6280 }
0x1ec5   : > { %v6289_v49 = vsub.f32 %v12051_v45, %v6281_v27 }
0x1ec6   : > { %v6278_v19 = vpop.xlane.xlu0 %6277 }
0x1ec7   : > { %v6294_v12 = vmul.f32 1.442695, %v6289_v49  ;;  %v6288_v56 = vsub.f32 %v6180_v50, %v6278_v19 }
0x1ec9   : > { %12646 = vpow2.f32 %v6294_v12  ;;  %v6292_v23 = vmul.f32 1.442695, %v6288_v56 }
0x1ecb   : > { %12648 = vpow2.f32 %v6292_v23 }
0x1ece   : > { %v6287_v28 = vpop.xlane.xlu1 %6286 }
0x1ecf   : > { %v6291_v4 = vsub.f32 %v12058_v26, %v6287_v28 }
0x1ed0   : > { %v6284_v48 = vpop.xlane.xlu0 %6283 }
0x1ed1   : > { %v6290_v5 = vsub.f32 %v6267_v14, %v6284_v48  ;;  %v6298_v40 = vmul.f32 1.442695, %v6291_v4 }
0x1ed3   : > { %v6296_v17 = vmul.f32 1.442695, %v6290_v5 }
0x1ed5   : > { %12650 = vpow2.f32 %v6296_v17 }
0x1ed6   : > { %v12647_v1 = vpop.eup %12646  ;;  %12652 = vpow2.f32 %v6298_v40 }
0x1ed7   : > { %v6303_v63 = vsel %vm684_vm0, %v12647_v1, 0.0 }
0x1ed8   : > { %v12649_v58 = vpop.eup %12648  ;;  %6304 = vadd.xlane.f32.xlu1 %v6303_v63 }
0x1ed9   : > { %v6300_v21 = vsel %vm684_vm0, %v12649_v58, 0.0 }
0x1eda   : > { %6301 = vadd.xlane.f32.xlu0 %v6300_v21 }
0x1ee2   : > { %v12651_v2 = vpop.eup %12650 }
0x1ee3   : > { %v6306_v24 = vsel %vm684_vm0, %v12651_v2, 0.0  ;;  %v12653_v36 = vpop.eup %12652 }
0x1ee4   : > { %v6309_v38 = vsel %vm684_vm0, %v12653_v36, 0.0 }
0x1ee9   : > { %6486 = vrot.lane.b32.xlu1 %v14213_v33, %s13153_s9 }
0x1eed   : > { %6579 = vrot.lane.b32.xlu1 %v14239_v47, %s13153_s9 }
0x1ef0   : > { %6488 = vrot.lane.b32.xlu0 %v14211_v43, %s13153_s9 }
0x1ef1   : > { %6482 = vrot.lane.b32.xlu1 %v14206_v9, %s13153_s9 }
0x1f0f   : > { %6307 = vadd.xlane.f32.xlu0 %v6306_v24 }
0x1f15   : > { %6310 = vadd.xlane.f32.xlu1 %v6309_v38 }
0x1f25   : > { %6484 = vrot.lane.b32.xlu0 %v14233_v61, %s13153_s9 }
0x1f26   : > { %6577 = vrot.lane.b32.xlu1 %v14244_v34, %s13153_s9 }
0x1f29   : > { %6573 = vrot.lane.b32.xlu0 %v14222_v46, %s13153_s9 }
0x1f2a   : > { %6575 = vrot.lane.b32.xlu1 %v14260_v55, %s13153_s9 }
0x1f61   : > { %v6305_v3 = vpop.xlane.xlu1 %6304 }
0x1f62   : > { %12654 = vrcp.f32 %v6305_v3 }
0x1f63   : > { %v6302_v42 = vpop.xlane.xlu0 %6301 }
0x1f64   : > { %12656 = vrcp.f32 %v6302_v42 }
0x1f65   : > { %v6487_v10 = vpop.permute.xlu1 %6486 }
0x1f67   : > { %v6489_v22 = vpop.permute.xlu0 %6488 }
0x1f68   : > { %12073 = vmatprep.subr.msk.mxu1 %vm684_vm0, %v6489_v22 }
0x1f69   : > { %v6580_v15 = vpop.permute.xlu1 %6579  ;;  %12074 = vmatpush3.xpose.msk.msra.mxu1 %vm684_vm0, %v6489_v22 }
0x1f6a   : > { %12075 = vmatprep.subr.msk.mxu1 %vm684_vm0, %v6487_v10 }
0x1f6d   : > { %v6483_v37 = vpop.permute.xlu1 %6482  ;;  %12076 = vmatpush3.xpose.msk.msra.mxu1 %vm684_vm0, %v6487_v10 }
0x1f6e   : > { %12077 = vmatprep.mubr.msk.f32.mxu1 %vm684_vm0, %v6483_v37 }
0x1f6f   : > { %v12655_v35 = vpop.eup %12654 }
0x1f70   : > { %v6317_v57 = vmul.f32 %v12655_v35, %v12647_v1 }
0x1f71   : > { %v12657_v32 = vpop.eup %12656 }
0x1f72   : > { %v6316_v51 = vmul.f32 %v12657_v32, %v12649_v58 }
0x1f74   : > { %12063 = vmatprep.mubr.msk.f32.mxu0 %vm684_vm0, %v6316_v51 }
0x1f75   : > { %12064 = vmatmul.mubr.msk.f32.vlgmr.msra.gmra.mxu0 %vm684_vm0, %v6317_v57 }
0x1f76   : > { %12067 = vmatpush3.msra.mxu0 %v14247_v59 }
0x1f77   : > { %12068 = vmatprep.subr.mxu0 %v14298_v60 }
0x1f78   : > { %12069 = vmatpush3.msra.mxu0 %v14298_v60 }
0x1f79   : > { %12080 = vmatprep.subr.msk.mxu0 %vm684_vm0, %v6580_v15 }
0x1f98   : > { %v6308_v62 = vpop.xlane.xlu0 %6307 }
0x1f99   : > { %12658 = vrcp.f32 %v6308_v62 }
0x1f9c   : > { %v6485_v11 = vpop.permute.xlu0 %6484 }
0x1f9d   : > { %12078 = vmatmul.mubr.msk.f32.vlgmr.msra.gmra.mxu1 %vm684_vm0, %v6485_v11 }
0x1f9e   : > { %v6311_v45 = vpop.xlane.xlu1 %6310 }
0x1f9f   : > { %12660 = vrcp.f32 %v6311_v45 }
0x1fa0   : > { %v6574_v39 = vpop.permute.xlu0 %6573 }
0x1fa2   : > { %v6578_v26 = vpop.permute.xlu1 %6577 }
0x1fa6   : > { %v12659_v20 = vpop.eup %12658  ;;  %v6576_v30 = vpop.permute.xlu1 %6575 }
0x1fa7   : > { %v6318_v44 = vmul.f32 %v12659_v20, %v12651_v2 }
0x1fa9   : > { %12070 = vmatprep.mubr.msk.f32.mxu0 %vm684_vm0, %v6318_v44 }
0x1fac   : > { %v12661_v18 = vpop.eup %12660 }
0x1fad   : > { %v6319_v50 = vmul.f32 %v12661_v18, %v12653_v36 }
0x1faf   : > { %12071 = vmatmul.mubr.msk.f32.vlgmr.msra.gmra.mxu0 %vm684_vm0, %v6319_v50 }
0x1fb0   : > { %12081 = vmatpush3.xpose.msk.msra.mxu0 %vm684_vm0, %v6580_v15  ;;  %12084 = vmatprep.mubr.msk.f32.mxu0 %vm684_vm0, %v6574_v39 }
0x1fb1   : > { %12082 = vmatprep.subr.msk.mxu0 %vm684_vm0, %v6578_v26 }
0x1fb4   : > { %12083 = vmatpush3.xpose.msk.msra.mxu0 %vm684_vm0, %v6578_v26 }
0x1fb7   : > { %12085 = vmatmul.mubr.msk.f32.vlgmr.msra.gmra.mxu0 %vm684_vm0, %v6576_v30  ;;  %v5755_v30 = vld [vmem:[#allocation11 + $0x98] sm:$0xff] }
0x2035   : > { %v14315_v19 = vpop.f32.mrf.mxu0 }
0x2037   : > { %v14317_v12 = vpop.f32.mrf.mxu0 }
0x205d   : > { %v12079_v14 = vpop.f32.mrf.mxu1 }
0x205e   : > { %v6667_v25 = vsel %vm684_vm0, %v12079_v14, -inf }
0x205f   : > { %6668 = vmax.xlane.f32.xlu1 %v6667_v25  ;;  %v6564_v27 = vpop.f32.mrf.mxu1  ;;  %v5754_v25 = vld [vmem:[#allocation11 + $0x90] sm:$0xff] }
0x2060   : > { %v6664_v49 = vsel %vm684_vm0, %v6564_v27, -inf }
0x2061   : > { %6665 = vmax.xlane.f32.xlu0 %v6664_v49 }
0x206f   : > { %v14319_v56 = vpop.f32.mrf.mxu0 }
0x2071   : > { %v14321_v23 = vpop.f32.mrf.mxu0 }
0x2077   : > { %v12086_v1 = vpop.f32.mrf.mxu0 }
0x2078   : > { %v6673_v21 = vsel %vm684_vm0, %v12086_v1, -inf }
0x2079   : > { %v6655_v63 = vpop.f32.mrf.mxu0 }
0x207a   : > { %v6670_v58 = vsel %vm684_vm0, %v6655_v63, -inf }
0x207b   : > { %6671 = vmax.xlane.f32.xlu0 %v6670_v58 }
0x207f   : > { %6674 = vmax.xlane.f32.xlu0 %v6673_v21  ;;  %v5753_v21 = vld [vmem:[#allocation11 + $0x88] sm:$0xff] }
0x20e8   : > { %v6669_v48 = vpop.xlane.xlu1 %6668 }
0x20e9   : > { %v6677_v5 = vsub.f32 %v12079_v14, %v6669_v48 }
0x20ea   : > { %v6666_v28 = vpop.xlane.xlu0 %6665 }
0x20eb   : > { %v6682_v17 = vmul.f32 1.442695, %v6677_v5  ;;  %v6676_v4 = vsub.f32 %v6564_v27, %v6666_v28 }
0x20ed   : > { %12662 = vpow2.f32 %v6682_v17  ;;  %v6680_v40 = vmul.f32 1.442695, %v6676_v4  ;;  %v5752_v4 = vld [vmem:[#allocation11 + $0x80] sm:$0xff] }
0x20ef   : > { %12664 = vpow2.f32 %v6680_v40 }
0x20fa   : > { %v12663_v2 = vpop.eup %12662 }
0x20fb   : > { %v6691_v24 = vsel %vm684_vm0, %v12663_v2, 0.0 }
0x20fc   : > { %v12665_v36 = vpop.eup %12664  ;;  %6692 = vadd.xlane.f32.xlu1 %v6691_v24 }
0x20fd   : > { %v6688_v38 = vsel %vm684_vm0, %v12665_v36, 0.0 }
0x20fe   : > { %6689 = vadd.xlane.f32.xlu0 %v6688_v38 }
0x2104   : > { %v6672_v3 = vpop.xlane.xlu0 %6671 }
0x2105   : > { %v6678_v42 = vsub.f32 %v6655_v63, %v6672_v3 }
0x2107   : > { %v6684_v10 = vmul.f32 1.442695, %v6678_v42 }
0x2108   : > { %v6675_v22 = vpop.xlane.xlu0 %6674 }
0x2109   : > { %12666 = vpow2.f32 %v6684_v10  ;;  %v6679_v15 = vsub.f32 %v12086_v1, %v6675_v22 }
0x210b   : > { %v6686_v37 = vmul.f32 1.442695, %v6679_v15 }
0x210d   : > { %12668 = vpow2.f32 %v6686_v37 }
0x2116   : > { %v12667_v35 = vpop.eup %12666 }
0x2117   : > { %v6694_v32 = vsel %vm684_vm0, %v12667_v35, 0.0 }
0x2118   : > { %6695 = vadd.xlane.f32.xlu0 %v6694_v32 }
0x211a   : > { %v12669_v51 = vpop.eup %12668 }
0x211b   : > { %v6697_v57 = vsel %vm684_vm0, %v12669_v51, 0.0 }
0x211c   : > { %6698 = vadd.xlane.f32.xlu1 %v6697_v57 }
0x212d   : > { %6710 = vrot.lane.b32.xlu1 %v14237_v0, %s13153_s9 }
0x212e   : > { %6712 = vrot.lane.b32.xlu0 %v14227_v52, %s13153_s9 }
0x2131   : > { %6801 = vrot.lane.b32.xlu1 %v14247_v59, %s13153_s9 }
0x2132   : > { %7086 = vrot.lane.b32.xlu0 %v14211_v43, %s13154_s28 }
0x2135   : > { %6799 = vrot.lane.b32.xlu1 %v14298_v60, %s13153_s9 }
0x2136   : > { %7177 = vrot.lane.b32.xlu0 %v14239_v47, %s13154_s28 }
0x2139   : > { %7084 = vrot.lane.b32.xlu1 %v14213_v33, %s13154_s28 }
0x213a   : > { %7082 = vrot.lane.b32.xlu0 %v14233_v61, %s13154_s28 }
0x213d   : > { %7080 = vrot.lane.b32.xlu1 %v14206_v9, %s13154_s28 }
0x213e   : > { %7171 = vrot.lane.b32.xlu0 %v14222_v46, %s13154_s28 }
0x2141   : > { %7175 = vrot.lane.b32.xlu1 %v14244_v34, %s13154_s28 }
0x2145   : > { %7173 = vrot.lane.b32.xlu1 %v14260_v55, %s13154_s28 }
0x2185   : > { %v6693_v20 = vpop.xlane.xlu1 %6692 }
0x2187   : > { %v6690_v62 = vpop.xlane.xlu0 %6689 }
0x2188   : > { %12670 = vrcp.f32 %v6690_v62 }
0x2189   : > { %12672 = vrcp.f32 %v6693_v20 }
0x2195   : > { %v12671_v11 = vpop.eup %12670 }
0x2196   : > { %v6704_v45 = vmul.f32 %v12671_v11, %v12665_v36  ;;  %v12673_v39 = vpop.eup %12672 }
0x2197   : > { %v6705_v14 = vmul.f32 %v12673_v39, %v12663_v2 }
0x2198   : > { %12091 = vmatprep.mubr.msk.f32.mxu1 %vm684_vm0, %v6704_v45 }
0x21a1   : > { %v6696_v44 = vpop.xlane.xlu0 %6695 }
0x21a2   : > { %12674 = vrcp.f32 %v6696_v44 }
0x21a5   : > { %v6699_v18 = vpop.xlane.xlu1 %6698  ;;  %v6713_v50 = vpop.permute.xlu0 %6712 }
0x21a6   : > { %12676 = vrcp.f32 %v6699_v18  ;;  %12087 = vmatprep.subr.mxu1 %v6713_v50 }
0x21a7   : > { %12088 = vmatpush3.msra.mxu1 %v6713_v50 }
0x21a9   : > { %v6711_v26 = vpop.permute.xlu1 %6710  ;;  %v7087_v27 = vpop.permute.xlu0 %7086 }
0x21aa   : > { %12089 = vmatprep.subr.mxu1 %v6711_v26 }
0x21ab   : > { %12090 = vmatpush3.msra.mxu1 %v6711_v26 }
0x21ac   : > { %12092 = vmatmul.mubr.msk.f32.vlgmr.msra.gmra.mxu1 %vm684_vm0, %v6705_v14  ;;  %12101 = vmatprep.subr.mxu1 %v5755_v30 }
0x21ad   : > { %v6802_v49 = vpop.permute.xlu1 %6801  ;;  %12102 = vmatpush3.msra.mxu1 %v5755_v30  ;;  %v7178_v48 = vpop.permute.xlu0 %7177 }
0x21ae   : > { %12094 = vmatprep.subr.mxu0 %v6802_v49  ;;  %12103 = vmatprep.subr.mxu1 %v5754_v25 }
0x21af   : > { %v12675_v1 = vpop.eup %12674  ;;  %12095 = vmatpush3.msra.mxu0 %v6802_v49  ;;  %12104 = vmatpush3.msra.mxu1 %v5754_v25 }
0x21b0   : > { %12121 = vmatprep.subr.msk.mxu1 %vm684_vm0, %v7087_v27  ;;  %v6706_v63 = vmul.f32 %v12675_v1, %v12667_v35 }
0x21b1   : > { %v6800_v58 = vpop.permute.xlu1 %6799  ;;  %v7083_v40 = vpop.permute.xlu0 %7082 }
0x21b2   : > { %12096 = vmatprep.subr.mxu0 %v6800_v58  ;;  %12098 = vmatprep.mubr.msk.f32.mxu0 %vm684_vm0, %v6706_v63 }
0x21b3   : > { %v12677_v5 = vpop.eup %12676  ;;  %12097 = vmatpush3.msra.mxu0 %v6800_v58 }
0x21b4   : > { %12111 = vmatprep.subr.mxu0 %v5753_v21  ;;  %v6707_v28 = vmul.f32 %v12677_v5, %v12669_v51 }
0x21b5   : > { %v7085_v17 = vpop.permute.xlu1 %7084  ;;  %v7172_v36 = vpop.permute.xlu0 %7171 }
0x21b6   : > { %12099 = vmatmul.mubr.msk.f32.vlgmr.msra.gmra.mxu0 %vm684_vm0, %v6707_v28 }
0x21b7   : > { %12112 = vmatpush3.msra.mxu0 %v5753_v21  ;;  %12115 = vmatprep.mubr.msk.f32.mxu0 %vm684_vm0, %v14317_v12 }
0x21b8   : > { %12113 = vmatprep.subr.mxu0 %v5752_v4 }
0x21b9   : > { %12114 = vmatpush3.msra.mxu0 %v5752_v4  ;;  %v7081_v2 = vpop.permute.xlu1 %7080 }
0x21ba   : > { %12128 = vmatprep.subr.msk.mxu0 %vm684_vm0, %v7178_v48  ;;  %12116 = vmatmul.mubr.msk.f32.vlgmr.msra.gmra.mxu0 %vm684_vm0, %v14315_v19 }
0x21bb   : > { %12129 = vmatpush3.xpose.msk.msra.mxu0 %vm684_vm0, %v7178_v48  ;;  %12118 = vmatprep.mubr.msk.f32.mxu0 %vm684_vm0, %v14321_v23 }
0x21bd   : > { %v7176_v24 = vpop.permute.xlu1 %7175 }
0x21be   : > { %12119 = vmatmul.mubr.msk.f32.gmra.mxu0 %vm684_vm0, %v14319_v56  ;;  %12130 = vmatprep.subr.msk.mxu0 %vm684_vm0, %v7176_v24 }
0x21bf   : > { %12131 = vmatpush3.xpose.msk.msra.mxu0 %vm684_vm0, %v7176_v24  ;;  %12132 = vmatprep.mubr.msk.f32.mxu0 %vm684_vm0, %v7172_v36 }
0x21c1   : > { %v7174_v12 = vpop.permute.xlu1 %7173 }
0x21c2   : > { %12133 = vmatmul.mubr.msk.f32.vlgmr.msra.gmra.mxu0 %vm684_vm0, %v7174_v12 }
0x226c   : > { %v12093_v19 = vpop.f32.mrf.mxu1 }
0x226e   : > { %v6788_v38 = vpop.f32.mrf.mxu1 }
0x226f   : > { %12105 = vmatprep.mubr.msk.f32.mxu1 %vm684_vm0, %v6788_v38 }
0x2270   : > { %12106 = vmatmul.mubr.msk.f32.vlgmr.msra.gmra.mxu1 %vm684_vm0, %v12093_v19 }
0x2271   : > { %12122 = vmatpush3.xpose.msk.msra.mxu1 %vm684_vm0, %v7087_v27 }
0x2272   : > { %12123 = vmatprep.subr.msk.mxu1 %vm684_vm0, %v7085_v17 }
0x2275   : > { %12124 = vmatpush3.xpose.msk.msra.mxu1 %vm684_vm0, %v7085_v17 }
0x2276   : > { %v12100_v56 = vpop.f32.mrf.mxu0 }
0x2278   : > { %v6877_v23 = vpop.f32.mrf.mxu0 }
0x2279   : > { %12108 = vmatprep.mubr.msk.f32.mxu1 %vm684_vm0, %v6877_v23 }
0x227a   : > { %12109 = vmatmul.mubr.msk.f32.gmra.mxu1 %vm684_vm0, %v12100_v56  ;;  %v14381_v3 = vpop.f32.mrf.mxu0 }
0x227b   : > { %12125 = vmatprep.mubr.msk.f32.mxu1 %vm684_vm0, %v7081_v2 }
0x227c   : > { %v14383_v42 = vpop.f32.mrf.mxu0 }
0x227e   : > { %12126 = vmatmul.mubr.msk.f32.vlgmr.msra.gmra.mxu1 %vm684_vm0, %v7083_v40  ;;  %v14387_v22 = vpop.f32.mrf.mxu0 }
0x2280   : > { %v14391_v37 = vpop.f32.mrf.mxu0 }
0x2282   : > { %v12134_v51 = vpop.f32.mrf.mxu0 }
0x2283   : > { %v7271_v18 = vsel %vm684_vm0, %v12134_v51, -inf }
0x2284   : > { %v7253_v20 = vpop.f32.mrf.mxu0 }
0x2285   : > { %v7268_v44 = vsel %vm684_vm0, %v7253_v20, -inf }
0x2330   : > { %v14385_v10 = vpop.f32.mrf.mxu1 }
0x2332   : > { %v14389_v15 = vpop.f32.mrf.mxu1 }
0x233a   : > { %v14393_v35 = vpop.f32.mrf.mxu1 }
0x233c   : > { %v14395_v32 = vpop.f32.mrf.mxu1 }
0x233e   : > { %v12127_v57 = vpop.f32.mrf.mxu1 }
0x233f   : > { %v7265_v62 = vsel %vm684_vm0, %v12127_v57, -inf }
0x2340   : > { %7266 = vmax.xlane.f32.xlu1 %v7265_v62  ;;  %v7162_v11 = vpop.f32.mrf.mxu1 }
0x2341   : > { %v7262_v45 = vsel %vm684_vm0, %v7162_v11, -inf }
0x2342   : > { %7263 = vmax.xlane.f32.xlu0 %v7262_v45 }
0x2346   : > { %7269 = vmax.xlane.f32.xlu0 %v7268_v44 }
0x234a   : > { %7272 = vmax.xlane.f32.xlu0 %v7271_v18 }
0x23c9   : > { %v7267_v26 = vpop.xlane.xlu1 %7266 }
0x23ca   : > { %v7275_v25 = vsub.f32 %v12127_v57, %v7267_v26 }
0x23cb   : > { %v7264_v50 = vpop.xlane.xlu0 %7263 }
0x23cc   : > { %v7274_v39 = vsub.f32 %v7162_v11, %v7264_v50  ;;  %v7280_v58 = vmul.f32 1.442695, %v7275_v25 }
0x23ce   : > { %v7278_v27 = vmul.f32 1.442695, %v7274_v39 }
0x23cf   : > { %v7270_v30 = vpop.xlane.xlu0 %7269 }
0x23d0   : > { %v7276_v14 = vsub.f32 %v7253_v20, %v7270_v30 }
0x23d2   : > { %v7282_v49 = vmul.f32 1.442695, %v7276_v14 }
0x23d3   : > { %v7273_v1 = vpop.xlane.xlu0 %7272 }
0x23d4   : > { %12678 = vpow2.f32 %v7282_v49  ;;  %v7277_v63 = vsub.f32 %v12134_v51, %v7273_v1  ;;  %v5757_v51 = vld [vmem:[#allocation11 + $0xa8] sm:$0xff] }
0x23d5   : > { %12680 = vpow2.f32 %v7278_v27  ;;  %v5756_v27 = vld [vmem:[#allocation11 + $0xa0] sm:$0xff] }
0x23d6   : > { %v7284_v21 = vmul.f32 1.442695, %v7277_v63 }
0x23d8   : > { %12682 = vpow2.f32 %v7284_v21 }
0x23d9   : > { %12684 = vpow2.f32 %v7280_v58 }
0x23e1   : > { %v12679_v48 = vpop.eup %12678 }
0x23e2   : > { %v7292_v5 = vsel %vm684_vm0, %v12679_v48, 0.0  ;;  %v12681_v28 = vpop.eup %12680 }
0x23e3   : > { %7293 = vadd.xlane.f32.xlu0 %v7292_v5  ;;  %v7286_v4 = vsel %vm684_vm0, %v12681_v28, 0.0 }
0x23e5   : > { %v12683_v17 = vpop.eup %12682 }
0x23e6   : > { %v7295_v40 = vsel %vm684_vm0, %v12683_v17, 0.0  ;;  %v12685_v2 = vpop.eup %12684 }
0x23e7   : > { %7287 = vadd.xlane.f32.xlu0 %v7286_v4  ;;  %7296 = vadd.xlane.f32.xlu1 %v7295_v40  ;;  %v7289_v24 = vsel %vm684_vm0, %v12685_v2, 0.0 }
0x23eb   : > { %7290 = vadd.xlane.f32.xlu1 %v7289_v24 }
0x23fc   : > { %7306 = vrot.lane.b32.xlu1 %v14237_v0, %s13154_s28 }
0x23fd   : > { %7308 = vrot.lane.b32.xlu0 %v14227_v52, %s13154_s28 }
0x2400   : > { %7395 = vrot.lane.b32.xlu1 %v14247_v59, %s13154_s28 }
0x2401   : > { %7587 = vrot.lane.b32.xlu0 %v14211_v43, %s13155_s30 }
0x2404   : > { %7393 = vrot.lane.b32.xlu1 %v14298_v60, %s13154_s28  ;;  %s14940_s28 = sld [smem:[#allocation39_spill]] }
0x2405   : > { %7678 = vrot.lane.b32.xlu0 %v14239_v47, %s13155_s30 }
0x2408   : > { %7585 = vrot.lane.b32.xlu1 %v14213_v33, %s13155_s30 }
0x2409   : > { %7583 = vrot.lane.b32.xlu0 %v14233_v61, %s13155_s30 }
0x240c   : > { %7581 = vrot.lane.b32.xlu1 %v14206_v9, %s13155_s30 }
0x240d   : > { %7672 = vrot.lane.b32.xlu0 %v14222_v46, %s13155_s30 }
0x2410   : > { %7676 = vrot.lane.b32.xlu1 %v14244_v34, %s13155_s30 }
0x2414   : > { %7674 = vrot.lane.b32.xlu1 %v14260_v55, %s13155_s30 }
0x246c   : > { %v7294_v36 = vpop.xlane.xlu0 %7293 }
0x246d   : > { %12686 = vrcp.f32 %v7294_v36 }
0x2470   : > { %v7297_v12 = vpop.xlane.xlu1 %7296  ;;  %v7288_v19 = vpop.xlane.xlu0 %7287 }
0x2471   : > { %12688 = vrcp.f32 %v7297_v12 }
0x2472   : > { %12690 = vrcp.f32 %v7288_v19 }
0x2474   : > { %v7291_v38 = vpop.xlane.xlu1 %7290  ;;  %v7309_v56 = vpop.permute.xlu0 %7308 }
0x2475   : > { %12692 = vrcp.f32 %v7291_v38  ;;  %12135 = vmatprep.subr.mxu1 %v7309_v56 }
0x2476   : > { %12136 = vmatpush3.msra.mxu1 %v7309_v56 }
0x2478   : > { %v7307_v23 = vpop.permute.xlu1 %7306  ;;  %v7588_v20 = vpop.permute.xlu0 %7587 }
0x2479   : > { %12137 = vmatprep.subr.mxu1 %v7307_v23 }
0x247a   : > { %v12687_v57 = vpop.eup %12686  ;;  %12138 = vmatpush3.msra.mxu1 %v7307_v23 }
0x247b   : > { %v7304_v62 = vmul.f32 %v12687_v57, %v12679_v48  ;;  %12149 = vmatprep.subr.mxu1 %v5757_v51  ;;  %v7067_v57 = vadd.f32 %v14381_v3, %v14385_v10 }
0x247c   : > { %v7396_v11 = vpop.permute.xlu1 %7395  ;;  %v7679_v14 = vpop.permute.xlu0 %7678 }
0x247d   : > { %12142 = vmatprep.subr.mxu0 %v7396_v11  ;;  %12146 = vmatprep.mubr.msk.f32.mxu0 %vm684_vm0, %v7304_v62 }
0x247e   : > { %v12689_v45 = vpop.eup %12688  ;;  %12143 = vmatpush3.msra.mxu0 %v7396_v11 }
0x247f   : > { %v12691_v44 = vpop.eup %12690  ;;  %v7305_v39 = vmul.f32 %v12689_v45, %v12683_v17  ;;  %v7062_v45 = vadd.f32 %v14383_v42, %v14389_v15 }
0x2480   : > { %v7394_v18 = vpop.permute.xlu1 %7393  ;;  %v7302_v50 = vmul.f32 %v12691_v44, %v12681_v28  ;;  %v7584_v1 = vpop.permute.xlu0 %7583 }
0x2481   : > { %12144 = vmatprep.subr.mxu0 %v7394_v18 }
0x2482   : > { %v12693_v26 = vpop.eup %12692  ;;  %12139 = vmatprep.mubr.msk.f32.mxu1 %vm684_vm0, %v7302_v50  ;;  %12145 = vmatpush3.msra.mxu0 %v7394_v18  ;;  %v7077_v18 = vadd.f32 %v14387_v22, %v14393_v35 }
0x2483   : > { %12147 = vmatmul.mubr.msk.f32.vlgmr.msra.gmra.mxu0 %vm684_vm0, %v7305_v39  ;;  %12159 = vmatprep.subr.msk.mxu0 %vm684_vm0, %v7588_v20  ;;  %v7303_v30 = vmul.f32 %v12693_v26, %v12685_v2  ;;  %v7072_v26 = vadd.f32 %v14391_v37, %v14395_v32 }
0x2484   : > { %v7586_v25 = vpop.permute.xlu1 %7585  ;;  %12160 = vmatpush3.xpose.msk.msra.mxu0 %vm684_vm0, %v7588_v20  ;;  %v7673_v4 = vpop.permute.xlu0 %7672 }
0x2485   : > { %12140 = vmatmul.mubr.msk.f32.vlgmr.msra.gmra.mxu1 %vm684_vm0, %v7303_v30  ;;  %12161 = vmatprep.subr.msk.mxu0 %vm684_vm0, %v7586_v25 }
0x2486   : > { %12150 = vmatpush3.msra.mxu1 %v5757_v51 }
0x2487   : > { %12151 = vmatprep.subr.mxu1 %v5756_v27 }
0x2488   : > { %12152 = vmatpush3.msra.mxu1 %v5756_v27  ;;  %v7582_v49 = vpop.permute.xlu1 %7581  ;;  %12162 = vmatpush3.xpose.msk.msra.mxu0 %vm684_vm0, %v7586_v25 }
0x2489   : > { %12166 = vmatprep.subr.msk.mxu1 %vm684_vm0, %v7679_v14  ;;  %12163 = vmatprep.mubr.msk.f32.mxu0 %vm684_vm0, %v7582_v49 }
0x248b   : > { %12164 = vmatmul.mubr.msk.f32.vlgmr.msra.gmra.mxu0 %vm684_vm0, %v7584_v1 }
0x248c   : > { %v7677_v5 = vpop.permute.xlu1 %7676 }
0x2490   : > { %v7675_v24 = vpop.permute.xlu1 %7674 }
0x2543   : > { %v12148_v63 = vpop.f32.mrf.mxu0 }
0x2545   : > { %v12141_v58 = vpop.f32.mrf.mxu1  ;;  %v7471_v48 = vpop.f32.mrf.mxu0 }
0x2547   : > { %v7384_v21 = vpop.f32.mrf.mxu1 }
0x2548   : > { %12153 = vmatprep.mubr.msk.f32.mxu1 %vm684_vm0, %v7384_v21 }
0x2549   : > { %12154 = vmatmul.mubr.msk.f32.vlgmr.msra.gmra.mxu1 %vm684_vm0, %v12141_v58 }
0x254a   : > { %12167 = vmatpush3.xpose.msk.msra.mxu1 %vm684_vm0, %v7679_v14  ;;  %12156 = vmatprep.mubr.msk.f32.mxu1 %vm684_vm0, %v7471_v48 }
0x254b   : > { %12168 = vmatprep.subr.msk.mxu1 %vm684_vm0, %v7677_v5  ;;  %v12165_v28 = vpop.f32.mrf.mxu0 }
0x254c   : > { %v7766_v17 = vsel %vm684_vm0, %v12165_v28, -inf }
0x254d   : > { %12157 = vmatmul.mubr.msk.f32.gmra.mxu1 %vm684_vm0, %v12148_v63  ;;  %7767 = vmax.xlane.f32.xlu1 %v7766_v17  ;;  %v7663_v40 = vpop.f32.mrf.mxu0 }
0x254e   : > { %12169 = vmatpush3.xpose.msk.msra.mxu1 %vm684_vm0, %v7677_v5  ;;  %12170 = vmatprep.mubr.msk.f32.mxu1 %vm684_vm0, %v7673_v4  ;;  %v7763_v2 = vsel %vm684_vm0, %v7663_v40, -inf }
0x254f   : > { %7764 = vmax.xlane.f32.xlu0 %v7763_v2 }
0x2551   : > { %12171 = vmatmul.mubr.msk.f32.vlgmr.msra.gmra.mxu1 %vm684_vm0, %v7675_v24 }
0x25d6   : > { %v7768_v36 = vpop.xlane.xlu1 %7767 }
0x25d7   : > { %v7776_v12 = vsub.f32 %v12165_v28, %v7768_v36 }
0x25d8   : > { %v7765_v23 = vpop.xlane.xlu0 %7764 }
0x25d9   : > { %v7781_v19 = vmul.f32 1.442695, %v7776_v12  ;;  %v7775_v51 = vsub.f32 %v7663_v40, %v7765_v23  ;;  %v5759_v23 = vld [vmem:[#allocation11 + $0xb8] sm:$0xff] }
0x25db   : > { %12694 = vpow2.f32 %v7781_v19  ;;  %v7779_v62 = vmul.f32 1.442695, %v7775_v51 }
0x25dd   : > { %12696 = vpow2.f32 %v7779_v62 }
0x25e8   : > { %v14451_v38 = vpop.eup %12694 }
0x25e9   : > { %v7790_v56 = vsel %vm684_vm0, %v14451_v38, 0.0 }
0x25ea   : > { %7791 = vadd.xlane.f32.xlu1 %v7790_v56  ;;  %v12697_v22 = vpop.eup %12696 }
0x25eb   : > { %v7787_v35 = vsel %vm684_vm0, %v12697_v22, 0.0 }
0x2609   : > { %v12155_v11 = vpop.f32.mrf.mxu1 }
0x260a   : > { %v14459_v20 = vadd.f32 %v12155_v11, %v7067_v57  ;;  %v5758_v57 = vld [vmem:[#allocation11 + $0xb0] sm:$0xff] }
0x260b   : > { %v7558_v44 = vpop.f32.mrf.mxu1 }
0x260c   : > { %v14463_v50 = vadd.f32 %v7558_v44, %v7062_v45 }
0x260d   : > { %v12158_v39 = vpop.f32.mrf.mxu1 }
0x260e   : > { %v14467_v30 = vadd.f32 %v12158_v39, %v7077_v18 }
0x260f   : > { %v7568_v3 = vpop.f32.mrf.mxu1 }
0x2610   : > { %v14469_v10 = vadd.f32 %v7568_v3, %v7072_v26 }
0x2611   : > { %v12172_v14 = vpop.f32.mrf.mxu1 }
0x2612   : > { %v7772_v25 = vsel %vm684_vm0, %v12172_v14, -inf }
0x2613   : > { %v7754_v42 = vpop.f32.mrf.mxu1 }
0x2614   : > { %v7769_v15 = vsel %vm684_vm0, %v7754_v42, -inf }
0x2615   : > { %7770 = vmax.xlane.f32.xlu0 %v7769_v15 }
0x2619   : > { %7773 = vmax.xlane.f32.xlu0 %v7772_v25 }
0x261d   : > { %7788 = vadd.xlane.f32.xlu0 %v7787_v35 }
0x2673   : > { %v7792_v40 = vpop.xlane.xlu1 %7791 }
0x269e   : > { %v7771_v27 = vpop.xlane.xlu0 %7770 }
0x269f   : > { %v7777_v49 = vsub.f32 %v7754_v42, %v7771_v27 }
0x26a1   : > { %v7783_v37 = vmul.f32 1.442695, %v7777_v49 }
0x26a2   : > { %v7774_v32 = vpop.xlane.xlu0 %7773 }
0x26a3   : > { %12698 = vpow2.f32 %v7783_v37  ;;  %v7778_v1 = vsub.f32 %v12172_v14, %v7774_v32 }
0x26a5   : > { %v7785_v63 = vmul.f32 1.442695, %v7778_v1 }
0x26a6   : > { %v7789_v58 = vpop.xlane.xlu0 %7788 }
0x26a7   : > { %12700 = vpow2.f32 %v7785_v63 }
0x26a8   : > { %12702 = vrcp.f32 %v7789_v58 }
0x26a9   : > { %12704 = vrcp.f32 %v7792_v40 }
0x26b0   : > { %v12699_v21 = vpop.eup %12698 }
0x26b1   : > { %v7793_v48 = vsel %vm684_vm0, %v12699_v21, 0.0 }
0x26b2   : > { %7794 = vadd.xlane.f32.xlu0 %v7793_v48 }
0x26b4   : > { %v12701_v5 = vpop.eup %12700 }
0x26b5   : > { %v12703_v28 = vpop.eup %12702  ;;  %v7796_v17 = vsel %vm684_vm0, %v12701_v5, 0.0 }
0x26b6   : > { %7797 = vadd.xlane.f32.xlu1 %v7796_v17  ;;  %v7803_v4 = vmul.f32 %v12703_v28, %v12697_v22  ;;  %v12705_v12 = vpop.eup %12704 }
0x26b7   : > { %v7804_v51 = vmul.f32 %v12705_v12, %v14451_v38 }
0x26b8   : > { %12177 = vmatprep.mubr.msk.f32.mxu0 %vm684_vm0, %v7803_v4 }
0x26c7   : > { %7807 = vrot.lane.b32.xlu1 %v14237_v0, %s13155_s30 }
0x26c8   : > { %7809 = vrot.lane.b32.xlu0 %v14227_v52, %s13155_s30 }
0x26cb   : > { %7896 = vrot.lane.b32.xlu1 %v14247_v59, %s13155_s30 }
0x26cc   : > { %8088 = vrot.lane.b32.xlu0 %v14211_v43, %s13156_s16 }
0x26cf   : > { %7894 = vrot.lane.b32.xlu1 %v14298_v60, %s13155_s30  ;;  %s10610_s30 = scalar_lea.hbm %s14940_s28, %s11076_s6 }
0x26d0   : > { %8179 = vrot.lane.b32.xlu0 %v14239_v47, %s13156_s16 }
0x26d3   : > { %8086 = vrot.lane.b32.xlu1 %v14213_v33, %s13156_s16 }
0x26d4   : > { %8084 = vrot.lane.b32.xlu0 %v14233_v61, %s13156_s16 }
0x26d7   : > { %8082 = vrot.lane.b32.xlu1 %v14206_v9, %s13156_s16 }
0x26d8   : > { %8173 = vrot.lane.b32.xlu0 %v14222_v46, %s13156_s16 }
0x26db   : > { %8177 = vrot.lane.b32.xlu1 %v14244_v34, %s13156_s16 }
0x26df   : > { %8175 = vrot.lane.b32.xlu1 %v14260_v55, %s13156_s16 }
0x273b   : > { %v7795_v2 = vpop.xlane.xlu0 %7794 }
0x273c   : > { %12706 = vrcp.f32 %v7795_v2 }
0x273f   : > { %v7798_v24 = vpop.xlane.xlu1 %7797  ;;  %v7810_v36 = vpop.permute.xlu0 %7809 }
0x2740   : > { %12708 = vrcp.f32 %v7798_v24  ;;  %12173 = vmatprep.subr.mxu0 %v7810_v36 }
0x2741   : > { %12174 = vmatpush3.msra.mxu0 %v7810_v36 }
0x2743   : > { %v7808_v19 = vpop.permute.xlu1 %7807  ;;  %v8089_v56 = vpop.permute.xlu0 %8088 }
0x2744   : > { %12175 = vmatprep.subr.mxu0 %v7808_v19 }
0x2745   : > { %12176 = vmatpush3.msra.mxu0 %v7808_v19 }
0x2746   : > { %12178 = vmatmul.mubr.msk.f32.vlgmr.msra.gmra.mxu0 %vm684_vm0, %v7804_v51  ;;  %12187 = vmatprep.subr.mxu0 %v5759_v23 }
0x2747   : > { %v7897_v62 = vpop.permute.xlu1 %7896  ;;  %12188 = vmatpush3.msra.mxu0 %v5759_v23  ;;  %v8180_v45 = vpop.permute.xlu0 %8179 }
0x2748   : > { %12180 = vmatprep.subr.mxu1 %v7897_v62  ;;  %12189 = vmatprep.subr.mxu0 %v5758_v57 }
0x2749   : > { %v12707_v11 = vpop.eup %12706  ;;  %12181 = vmatpush3.msra.mxu1 %v7897_v62  ;;  %12190 = vmatpush3.msra.mxu0 %v5758_v57 }
0x274a   : > { %12204 = vmatprep.subr.msk.mxu0 %vm684_vm0, %v8180_v45  ;;  %v7805_v44 = vmul.f32 %v12707_v11, %v12699_v21 }
0x274b   : > { %v7895_v18 = vpop.permute.xlu1 %7894  ;;  %v8085_v14 = vpop.permute.xlu0 %8084 }
0x274c   : > { %12182 = vmatprep.subr.mxu1 %v7895_v18  ;;  %12184 = vmatprep.mubr.msk.f32.mxu1 %vm684_vm0, %v7805_v44 }
0x274d   : > { %v12709_v38 = vpop.eup %12708  ;;  %12183 = vmatpush3.msra.mxu1 %v7895_v18 }
0x274e   : > { %12197 = vmatprep.subr.msk.mxu1 %vm684_vm0, %v8089_v56  ;;  %v7806_v39 = vmul.f32 %v12709_v38, %v12701_v5 }
0x274f   : > { %v8087_v26 = vpop.permute.xlu1 %8086  ;;  %v8174_v27 = vpop.permute.xlu0 %8173 }
0x2750   : > { %12185 = vmatmul.mubr.msk.f32.vlgmr.msra.gmra.mxu1 %vm684_vm0, %v7806_v39 }
0x2751   : > { %12198 = vmatpush3.xpose.msk.msra.mxu1 %vm684_vm0, %v8089_v56 }
0x2752   : > { %12199 = vmatprep.subr.msk.mxu1 %vm684_vm0, %v8087_v26 }
0x2753   : > { %v8083_v3 = vpop.permute.xlu1 %8082 }
0x2754   : > { %12201 = vmatprep.mubr.msk.f32.mxu1 %vm684_vm0, %v8083_v3 }
0x2755   : > { %12200 = vmatpush3.xpose.msk.msra.mxu1 %vm684_vm0, %v8087_v26 }
0x2757   : > { %v8178_v25 = vpop.permute.xlu1 %8177 }
0x2758   : > { %12202 = vmatmul.mubr.msk.f32.vlgmr.msra.gmra.mxu1 %vm684_vm0, %v8085_v14 }
0x275b   : > { %v8176_v49 = vpop.permute.xlu1 %8175 }
0x2806   : > { %v12179_v42 = vpop.f32.mrf.mxu0 }
0x2808   : > { %v7885_v15 = vpop.f32.mrf.mxu0 }
0x2809   : > { %12191 = vmatprep.mubr.msk.f32.mxu0 %vm684_vm0, %v7885_v15 }
0x280a   : > { %12192 = vmatmul.mubr.msk.f32.vlgmr.msra.gmra.mxu0 %vm684_vm0, %v12179_v42 }
0x280b   : > { %12205 = vmatpush3.xpose.msk.msra.mxu0 %vm684_vm0, %v8180_v45 }
0x280c   : > { %12206 = vmatprep.subr.msk.mxu0 %vm684_vm0, %v8178_v25 }
0x280f   : > { %12207 = vmatpush3.xpose.msk.msra.mxu0 %vm684_vm0, %v8178_v25 }
0x2810   : > { %v12186_v22 = vpop.f32.mrf.mxu1 }
0x2812   : > { %v7972_v35 = vpop.f32.mrf.mxu1 }
0x2813   : > { %12194 = vmatprep.mubr.msk.f32.mxu0 %vm684_vm0, %v7972_v35 }
0x2814   : > { %12195 = vmatmul.mubr.msk.f32.gmra.mxu0 %vm684_vm0, %v12186_v22 }
0x2815   : > { %12208 = vmatprep.mubr.msk.f32.mxu0 %vm684_vm0, %v8174_v27 }
0x2818   : > { %v12203_v37 = vpop.f32.mrf.mxu1  ;;  %12209 = vmatmul.mubr.msk.f32.vlgmr.msra.gmra.mxu0 %vm684_vm0, %v8176_v49 }
0x2819   : > { %v8267_v32 = vsel %vm684_vm0, %v12203_v37, -inf }
0x281a   : > { %8268 = vmax.xlane.f32.xlu1 %v8267_v32  ;;  %v8164_v1 = vpop.f32.mrf.mxu1 }
0x281b   : > { %v8264_v63 = vsel %vm684_vm0, %v8164_v1, -inf }
0x281c   : > { %8265 = vmax.xlane.f32.xlu0 %v8264_v63 }
0x28a3   : > { %v8269_v58 = vpop.xlane.xlu1 %8268 }
0x28a4   : > { %v8277_v21 = vsub.f32 %v12203_v37, %v8269_v58  ;;  %v5761_v58 = vld [vmem:[#allocation11 + $0xc8] sm:$0xff] }
0x28a5   : > { %v8266_v17 = vpop.xlane.xlu0 %8265 }
0x28a6   : > { %v8282_v48 = vmul.f32 1.442695, %v8277_v21  ;;  %v8276_v40 = vsub.f32 %v8164_v1, %v8266_v17 }
0x28a8   : > { %12710 = vpow2.f32 %v8282_v48  ;;  %v8280_v12 = vmul.f32 1.442695, %v8276_v40  ;;  %v5760_v48 = vld [vmem:[#allocation11 + $0xc0] sm:$0xff] }
0x28aa   : > { %12712 = vpow2.f32 %v8280_v12 }
0x28b5   : > { %v14523_v5 = vpop.eup %12710 }
0x28b6   : > { %v8291_v28 = vsel %vm684_vm0, %v14523_v5, 0.0 }
0x28b7   : > { %8292 = vadd.xlane.f32.xlu1 %v8291_v28  ;;  %v12713_v45 = vpop.eup %12712 }
0x28ca   : > { %v12193_v4 = vpop.f32.mrf.mxu0 }
0x28cb   : > { %v14528_v2 = vadd.f32 %v12193_v4, %v14459_v20 }
0x28cc   : > { %v8059_v24 = vpop.f32.mrf.mxu0 }
0x28cd   : > { %v14531_v36 = vadd.f32 %v8059_v24, %v14463_v50  ;;  %v8288_v50 = vsel %vm684_vm0, %v12713_v45, 0.0 }
0x28d4   : > { %v12196_v19 = vpop.f32.mrf.mxu0 }
0x28d5   : > { %v14534_v56 = vadd.f32 %v12196_v19, %v14467_v30 }
0x28d6   : > { %v8069_v23 = vpop.f32.mrf.mxu0 }
0x28d7   : > { %v14537_v51 = vadd.f32 %v8069_v23, %v14469_v10 }
0x28d8   : > { %v12210_v57 = vpop.f32.mrf.mxu0 }
0x28d9   : > { %v8273_v20 = vsel %vm684_vm0, %v12210_v57, -inf }
0x28da   : > { %v8255_v62 = vpop.f32.mrf.mxu0 }
0x28db   : > { %v8270_v11 = vsel %vm684_vm0, %v8255_v62, -inf }
0x28dc   : > { %8271 = vmax.xlane.f32.xlu0 %v8270_v11 }
0x28e0   : > { %8274 = vmax.xlane.f32.xlu0 %v8273_v20 }
0x28e4   : > { %8289 = vadd.xlane.f32.xlu0 %v8288_v50 }
0x2940   : > { %v8293_v35 = vpop.xlane.xlu1 %8292 }
0x2965   : > { %v8272_v44 = vpop.xlane.xlu0 %8271 }
0x2966   : > { %v8278_v18 = vsub.f32 %v8255_v62, %v8272_v44 }
0x2968   : > { %v8284_v30 = vmul.f32 1.442695, %v8278_v18 }
0x2969   : > { %v8275_v38 = vpop.xlane.xlu0 %8274 }
0x296a   : > { %12714 = vpow2.f32 %v8284_v30  ;;  %v8279_v39 = vsub.f32 %v12210_v57, %v8275_v38 }
0x296c   : > { %v8286_v10 = vmul.f32 1.442695, %v8279_v39 }
0x296d   : > { %v8290_v26 = vpop.xlane.xlu0 %8289 }
0x296e   : > { %12716 = vpow2.f32 %v8286_v10 }
0x296f   : > { %12718 = vrcp.f32 %v8290_v26 }
0x2970   : > { %12720 = vrcp.f32 %v8293_v35 }
0x2977   : > { %v12715_v3 = vpop.eup %12714 }
0x2978   : > { %v8294_v14 = vsel %vm684_vm0, %v12715_v3, 0.0 }
0x2979   : > { %8295 = vadd.xlane.f32.xlu0 %v8294_v14 }
0x297b   : > { %v12717_v42 = vpop.eup %12716 }
0x297c   : > { %v12719_v15 = vpop.eup %12718  ;;  %v8297_v25 = vsel %vm684_vm0, %v12717_v42, 0.0 }
0x297d   : > { %8298 = vadd.xlane.f32.xlu1 %v8297_v25  ;;  %v8304_v22 = vmul.f32 %v12719_v15, %v12713_v45  ;;  %v12721_v32 = vpop.eup %12720 }
0x297e   : > { %v8305_v21 = vmul.f32 %v12721_v32, %v14523_v5 }
0x297f   : > { %12215 = vmatprep.mubr.msk.f32.mxu1 %vm684_vm0, %v8304_v22 }
0x298e   : > { %8308 = vrot.lane.b32.xlu1 %v14237_v0, %s13156_s16 }
0x298f   : > { %8310 = vrot.lane.b32.xlu0 %v14227_v52, %s13156_s16 }
0x2992   : > { %8397 = vrot.lane.b32.xlu1 %v14247_v59, %s13156_s16 }
0x2993   : > { %8589 = vrot.lane.b32.xlu0 %v14211_v43, %s13157_s26 }
0x2996   : > { %8395 = vrot.lane.b32.xlu1 %v14298_v60, %s13156_s16  ;;  %s10599_s16 = scalar_lea.sflag [#allocation4], %s13457_s10 }
0x2997   : > { %8680 = vrot.lane.b32.xlu0 %v14239_v47, %s13157_s26 }
0x299a   : > { %8587 = vrot.lane.b32.xlu1 %v14213_v33, %s13157_s26 }
0x299b   : > { %8585 = vrot.lane.b32.xlu0 %v14233_v61, %s13157_s26 }
0x299e   : > { %8583 = vrot.lane.b32.xlu1 %v14206_v9, %s13157_s26 }
0x299f   : > { %8674 = vrot.lane.b32.xlu0 %v14222_v46, %s13157_s26 }
0x29a2   : > { %8678 = vrot.lane.b32.xlu1 %v14244_v34, %s13157_s26 }
0x29a6   : > { %8676 = vrot.lane.b32.xlu1 %v14260_v55, %s13157_s26 }
0x2a02   : > { %v8296_v27 = vpop.xlane.xlu0 %8295 }
0x2a03   : > { %12722 = vrcp.f32 %v8296_v27 }
0x2a06   : > { %v8299_v49 = vpop.xlane.xlu1 %8298  ;;  %v8311_v37 = vpop.permute.xlu0 %8310 }
0x2a07   : > { %12724 = vrcp.f32 %v8299_v49  ;;  %12211 = vmatprep.subr.mxu1 %v8311_v37 }
0x2a08   : > { %12212 = vmatpush3.msra.mxu1 %v8311_v37 }
0x2a0a   : > { %v8309_v1 = vpop.permute.xlu1 %8308  ;;  %v8590_v63 = vpop.permute.xlu0 %8589 }
0x2a0b   : > { %12213 = vmatprep.subr.mxu1 %v8309_v1 }
0x2a0c   : > { %12214 = vmatpush3.msra.mxu1 %v8309_v1 }
0x2a0d   : > { %12216 = vmatmul.mubr.msk.f32.vlgmr.msra.gmra.mxu1 %vm684_vm0, %v8305_v21  ;;  %12225 = vmatprep.subr.mxu1 %v5761_v58 }
0x2a0e   : > { %v8398_v28 = vpop.permute.xlu1 %8397  ;;  %12226 = vmatpush3.msra.mxu1 %v5761_v58  ;;  %v8681_v4 = vpop.permute.xlu0 %8680 }
0x2a0f   : > { %12218 = vmatprep.subr.mxu0 %v8398_v28  ;;  %12227 = vmatprep.subr.mxu1 %v5760_v48 }
0x2a10   : > { %v12723_v17 = vpop.eup %12722  ;;  %12219 = vmatpush3.msra.mxu0 %v8398_v28  ;;  %12228 = vmatpush3.msra.mxu1 %v5760_v48 }
0x2a11   : > { %12242 = vmatprep.subr.msk.mxu1 %vm684_vm0, %v8681_v4  ;;  %v8306_v40 = vmul.f32 %v12723_v17, %v12715_v3 }
0x2a12   : > { %v8396_v24 = vpop.permute.xlu1 %8395  ;;  %v8586_v57 = vpop.permute.xlu0 %8585 }
0x2a13   : > { %12220 = vmatprep.subr.mxu0 %v8396_v24  ;;  %12222 = vmatprep.mubr.msk.f32.mxu0 %vm684_vm0, %v8306_v40 }
0x2a14   : > { %v12725_v5 = vpop.eup %12724  ;;  %12221 = vmatpush3.msra.mxu0 %v8396_v24 }
0x2a15   : > { %12235 = vmatprep.subr.msk.mxu0 %vm684_vm0, %v8590_v63  ;;  %v8307_v12 = vmul.f32 %v12725_v5, %v12717_v42 }
0x2a16   : > { %v8588_v19 = vpop.permute.xlu1 %8587  ;;  %v8675_v44 = vpop.permute.xlu0 %8674 }
0x2a17   : > { %12223 = vmatmul.mubr.msk.f32.vlgmr.msra.gmra.mxu0 %vm684_vm0, %v8307_v12 }
0x2a18   : > { %12236 = vmatpush3.xpose.msk.msra.mxu0 %vm684_vm0, %v8590_v63 }
0x2a19   : > { %12237 = vmatprep.subr.msk.mxu0 %vm684_vm0, %v8588_v19 }
0x2a1a   : > { %v8584_v23 = vpop.permute.xlu1 %8583 }
0x2a1b   : > { %12239 = vmatprep.mubr.msk.f32.mxu0 %vm684_vm0, %v8584_v23 }
0x2a1c   : > { %12238 = vmatpush3.xpose.msk.msra.mxu0 %vm684_vm0, %v8588_v19 }
0x2a1e   : > { %v8679_v20 = vpop.permute.xlu1 %8678 }
0x2a1f   : > { %12240 = vmatmul.mubr.msk.f32.vlgmr.msra.gmra.mxu0 %vm684_vm0, %v8586_v57 }
0x2a22   : > { %v8677_v18 = vpop.permute.xlu1 %8676 }
0x2acd   : > { %v12217_v62 = vpop.f32.mrf.mxu1 }
0x2acf   : > { %v8386_v11 = vpop.f32.mrf.mxu1 }
0x2ad0   : > { %12229 = vmatprep.mubr.msk.f32.mxu1 %vm684_vm0, %v8386_v11 }
0x2ad1   : > { %12230 = vmatmul.mubr.msk.f32.vlgmr.msra.gmra.mxu1 %vm684_vm0, %v12217_v62 }
0x2ad2   : > { %12243 = vmatpush3.xpose.msk.msra.mxu1 %vm684_vm0, %v8681_v4 }
0x2ad3   : > { %12244 = vmatprep.subr.msk.mxu1 %vm684_vm0, %v8679_v20 }
0x2ad6   : > { %12245 = vmatpush3.xpose.msk.msra.mxu1 %vm684_vm0, %v8679_v20 }
0x2ad7   : > { %v12224_v45 = vpop.f32.mrf.mxu0 }
0x2ad9   : > { %v8473_v50 = vpop.f32.mrf.mxu0 }
0x2ada   : > { %12232 = vmatprep.mubr.msk.f32.mxu1 %vm684_vm0, %v8473_v50 }
0x2adb   : > { %12233 = vmatmul.mubr.msk.f32.gmra.mxu1 %vm684_vm0, %v12224_v45 }
0x2adc   : > { %12246 = vmatprep.mubr.msk.f32.mxu1 %vm684_vm0, %v8675_v44 }
0x2adf   : > { %v12241_v30 = vpop.f32.mrf.mxu0  ;;  %12247 = vmatmul.mubr.msk.f32.vlgmr.msra.gmra.mxu1 %vm684_vm0, %v8677_v18 }
0x2ae0   : > { %v8768_v38 = vsel %vm684_vm0, %v12241_v30, -inf }
0x2ae1   : > { %8769 = vmax.xlane.f32.xlu1 %v8768_v38  ;;  %v8665_v39 = vpop.f32.mrf.mxu0 }
0x2ae2   : > { %v8765_v10 = vsel %vm684_vm0, %v8665_v39, -inf }
0x2ae3   : > { %8766 = vmax.xlane.f32.xlu0 %v8765_v10 }
0x2b6a   : > { %v8770_v26 = vpop.xlane.xlu1 %8769 }
0x2b6b   : > { %v8778_v3 = vsub.f32 %v12241_v30, %v8770_v26  ;;  %v5763_v26 = vld [vmem:[#allocation11 + $0xd8] sm:$0xff] }
0x2b6c   : > { %v8767_v25 = vpop.xlane.xlu0 %8766 }
0x2b6d   : > { %v8783_v14 = vmul.f32 1.442695, %v8778_v3  ;;  %v8777_v35 = vsub.f32 %v8665_v39, %v8767_v25 }
0x2b6f   : > { %12726 = vpow2.f32 %v8783_v14  ;;  %v8781_v32 = vmul.f32 1.442695, %v8777_v35  ;;  %v5762_v14 = vld [vmem:[#allocation11 + $0xd0] sm:$0xff] }
0x2b71   : > { %12728 = vpow2.f32 %v8781_v32 }
0x2b7c   : > { %v14591_v42 = vpop.eup %12726 }
0x2b7d   : > { %v8792_v15 = vsel %vm684_vm0, %v14591_v42, 0.0 }
0x2b7e   : > { %8793 = vadd.xlane.f32.xlu1 %v8792_v15  ;;  %v12729_v4 = vpop.eup %12728 }
0x2b91   : > { %v12231_v22 = vpop.f32.mrf.mxu1 }
0x2b92   : > { %v14596_v27 = vadd.f32 %v12231_v22, %v14528_v2 }
0x2b93   : > { %v8560_v49 = vpop.f32.mrf.mxu1 }
0x2b94   : > { %v14599_v37 = vadd.f32 %v8560_v49, %v14531_v36  ;;  %v8789_v36 = vsel %vm684_vm0, %v12729_v4, 0.0 }
0x2b9b   : > { %v12234_v1 = vpop.f32.mrf.mxu1 }
0x2b9c   : > { %v14602_v63 = vadd.f32 %v12234_v1, %v14534_v56 }
0x2b9d   : > { %v8570_v58 = vpop.f32.mrf.mxu1 }
0x2b9e   : > { %v14605_v21 = vadd.f32 %v8570_v58, %v14537_v51 }
0x2b9f   : > { %v12248_v48 = vpop.f32.mrf.mxu1 }
0x2ba0   : > { %v8774_v2 = vsel %vm684_vm0, %v12248_v48, -inf }
0x2ba1   : > { %v8756_v28 = vpop.f32.mrf.mxu1 }
0x2ba2   : > { %v8771_v17 = vsel %vm684_vm0, %v8756_v28, -inf }
0x2ba3   : > { %8772 = vmax.xlane.f32.xlu0 %v8771_v17 }
0x2ba7   : > { %8775 = vmax.xlane.f32.xlu0 %v8774_v2 }
0x2bab   : > { %8790 = vadd.xlane.f32.xlu0 %v8789_v36 }
0x2c07   : > { %v8794_v50 = vpop.xlane.xlu1 %8793 }
0x2c2c   : > { %v8773_v40 = vpop.xlane.xlu0 %8772 }
0x2c2d   : > { %v8779_v24 = vsub.f32 %v8756_v28, %v8773_v40 }
0x2c2f   : > { %v8785_v56 = vmul.f32 1.442695, %v8779_v24 }
0x2c30   : > { %v8776_v5 = vpop.xlane.xlu0 %8775 }
0x2c31   : > { %12730 = vpow2.f32 %v8785_v56  ;;  %v8780_v12 = vsub.f32 %v12248_v48, %v8776_v5 }
0x2c33   : > { %v8787_v51 = vmul.f32 1.442695, %v8780_v12 }
0x2c34   : > { %v8791_v19 = vpop.xlane.xlu0 %8790 }
0x2c35   : > { %12732 = vpow2.f32 %v8787_v51 }
0x2c36   : > { %12734 = vrcp.f32 %v8791_v19 }
0x2c37   : > { %12736 = vrcp.f32 %v8794_v50 }
0x2c3e   : > { %v12731_v23 = vpop.eup %12730 }
0x2c3f   : > { %v8795_v57 = vsel %vm684_vm0, %v12731_v23, 0.0 }
0x2c40   : > { %8796 = vadd.xlane.f32.xlu0 %v8795_v57 }
0x2c42   : > { %v12733_v62 = vpop.eup %12732 }
0x2c43   : > { %v12735_v11 = vpop.eup %12734  ;;  %v8798_v20 = vsel %vm684_vm0, %v12733_v62, 0.0 }
0x2c44   : > { %8799 = vadd.xlane.f32.xlu1 %v8798_v20  ;;  %v8805_v45 = vmul.f32 %v12735_v11, %v12729_v4  ;;  %v12737_v38 = vpop.eup %12736 }
0x2c45   : > { %v8806_v3 = vmul.f32 %v12737_v38, %v14591_v42 }
0x2c46   : > { %12253 = vmatprep.mubr.msk.f32.mxu0 %vm684_vm0, %v8805_v45 }
0x2c55   : > { %8809 = vrot.lane.b32.xlu1 %v14237_v0, %s13157_s26 }
0x2c56   : > { %8811 = vrot.lane.b32.xlu0 %v14227_v52, %s13157_s26 }
0x2c59   : > { %8898 = vrot.lane.b32.xlu1 %v14247_v59, %s13157_s26 }
0x2c5a   : > { %9090 = vrot.lane.b32.xlu0 %v14211_v43, %s13158_s0 }
0x2c5d   : > { %8896 = vrot.lane.b32.xlu1 %v14298_v60, %s13157_s26  ;;  %s13048_s26 = scalar_lea.vmem %s10613_s17, 32 }
0x2c5e   : > { %9181 = vrot.lane.b32.xlu0 %v14239_v47, %s13158_s0  ;;  %p13049_p7 = scmp.ne.s32.totalorder %s10613_s17, %s13048_s26 }
0x2c60   : > { %p13050_p1 = pnand %p13049_p7, %p14941_p2 }
0x2c61   : > { %9088 = vrot.lane.b32.xlu1 %v14213_v33, %s13158_s0 }
0x2c62   : > { %9086 = vrot.lane.b32.xlu0 %v14233_v61, %s13158_s0  ;;  %p13051_p3 = pneg %p13050_p1 }
0x2c65   : > { %9084 = vrot.lane.b32.xlu1 %v14206_v9, %s13158_s0 }
0x2c66   : > { %9175 = vrot.lane.b32.xlu0 %v14222_v46, %s13158_s0 }
0x2c69   : > { %9179 = vrot.lane.b32.xlu1 %v14244_v34, %s13158_s0 }
0x2c6d   : > { %9177 = vrot.lane.b32.xlu1 %v14260_v55, %s13158_s0 }
0x2cc9   : > { %v8797_v44 = vpop.xlane.xlu0 %8796 }
0x2cca   : > { %12738 = vrcp.f32 %v8797_v44 }
0x2ccd   : > { %v8800_v18 = vpop.xlane.xlu1 %8799  ;;  %v8812_v30 = vpop.permute.xlu0 %8811 }
0x2cce   : > { %12740 = vrcp.f32 %v8800_v18  ;;  %12249 = vmatprep.subr.mxu0 %v8812_v30 }
0x2ccf   : > { %12250 = vmatpush3.msra.mxu0 %v8812_v30 }
0x2cd1   : > { %v8810_v39 = vpop.permute.xlu1 %8809  ;;  %v9091_v10 = vpop.permute.xlu0 %9090 }
0x2cd2   : > { %12251 = vmatprep.subr.mxu0 %v8810_v39 }
0x2cd3   : > { %12252 = vmatpush3.msra.mxu0 %v8810_v39 }
0x2cd4   : > { %12254 = vmatmul.mubr.msk.f32.vlgmr.msra.gmra.mxu0 %vm684_vm0, %v8806_v3  ;;  %12263 = vmatprep.subr.mxu0 %v5763_v26 }
0x2cd5   : > { %v8899_v15 = vpop.permute.xlu1 %8898  ;;  %12264 = vmatpush3.msra.mxu0 %v5763_v26  ;;  %v9182_v22 = vpop.permute.xlu0 %9181 }
0x2cd6   : > { %12256 = vmatprep.subr.mxu1 %v8899_v15  ;;  %12265 = vmatprep.subr.mxu0 %v5762_v14 }
0x2cd7   : > { %v12739_v25 = vpop.eup %12738  ;;  %12257 = vmatpush3.msra.mxu1 %v8899_v15  ;;  %12266 = vmatpush3.msra.mxu0 %v5762_v14 }
0x2cd8   : > { %12280 = vmatprep.subr.msk.mxu0 %vm684_vm0, %v9182_v22  ;;  %v8807_v35 = vmul.f32 %v12739_v25, %v12731_v23 }
0x2cd9   : > { %v8897_v49 = vpop.permute.xlu1 %8896  ;;  %v9087_v48 = vpop.permute.xlu0 %9086 }
0x2cda   : > { %12258 = vmatprep.subr.mxu1 %v8897_v49  ;;  %12260 = vmatprep.mubr.msk.f32.mxu1 %vm684_vm0, %v8807_v35 }
0x2cdb   : > { %v12741_v42 = vpop.eup %12740  ;;  %12259 = vmatpush3.msra.mxu1 %v8897_v49 }
0x2cdc   : > { %12273 = vmatprep.subr.msk.mxu1 %vm684_vm0, %v9091_v10  ;;  %v8808_v32 = vmul.f32 %v12741_v42, %v12733_v62 }
0x2cdd   : > { %v9089_v1 = vpop.permute.xlu1 %9088  ;;  %v9176_v40 = vpop.permute.xlu0 %9175 }
0x2cde   : > { %12261 = vmatmul.mubr.msk.f32.vlgmr.msra.gmra.mxu1 %vm684_vm0, %v8808_v32 }
0x2cdf   : > { %12274 = vmatpush3.xpose.msk.msra.mxu1 %vm684_vm0, %v9091_v10 }
0x2ce0   : > { %12275 = vmatprep.subr.msk.mxu1 %vm684_vm0, %v9089_v1 }
0x2ce1   : > { %v9085_v58 = vpop.permute.xlu1 %9084 }
0x2ce2   : > { %12277 = vmatprep.mubr.msk.f32.mxu1 %vm684_vm0, %v9085_v58 }
0x2ce3   : > { %12276 = vmatpush3.xpose.msk.msra.mxu1 %vm684_vm0, %v9089_v1 }
0x2ce5   : > { %v9180_v2 = vpop.permute.xlu1 %9179 }
0x2ce6   : > { %12278 = vmatmul.mubr.msk.f32.vlgmr.msra.gmra.mxu1 %vm684_vm0, %v9087_v48 }
0x2ce9   : > { %v9178_v24 = vpop.permute.xlu1 %9177 }
0x2d94   : > { %v12255_v28 = vpop.f32.mrf.mxu0 }
0x2d96   : > { %v8887_v17 = vpop.f32.mrf.mxu0 }
0x2d97   : > { %12267 = vmatprep.mubr.msk.f32.mxu0 %vm684_vm0, %v8887_v17 }
0x2d98   : > { %12268 = vmatmul.mubr.msk.f32.vlgmr.msra.gmra.mxu0 %vm684_vm0, %v12255_v28 }
0x2d99   : > { %12281 = vmatpush3.xpose.msk.msra.mxu0 %vm684_vm0, %v9182_v22 }
0x2d9a   : > { %12282 = vmatprep.subr.msk.mxu0 %vm684_vm0, %v9180_v2 }
0x2d9d   : > { %12283 = vmatpush3.xpose.msk.msra.mxu0 %vm684_vm0, %v9180_v2 }
0x2d9e   : > { %v12262_v4 = vpop.f32.mrf.mxu1 }
0x2da0   : > { %v8974_v36 = vpop.f32.mrf.mxu1 }
0x2da1   : > { %12270 = vmatprep.mubr.msk.f32.mxu0 %vm684_vm0, %v8974_v36 }
0x2da2   : > { %12271 = vmatmul.mubr.msk.f32.gmra.mxu0 %vm684_vm0, %v12262_v4 }
0x2da3   : > { %12284 = vmatprep.mubr.msk.f32.mxu0 %vm684_vm0, %v9176_v40 }
0x2da6   : > { %v12279_v56 = vpop.f32.mrf.mxu1  ;;  %12285 = vmatmul.mubr.msk.f32.vlgmr.msra.gmra.mxu0 %vm684_vm0, %v9178_v24  ;;  %v5765_v24 = vld [vmem:[#allocation11 + $0xe8] sm:$0xff] }
0x2da7   : > { %v9269_v5 = vsel %vm684_vm0, %v12279_v56, -inf }
0x2da8   : > { %9270 = vmax.xlane.f32.xlu1 %v9269_v5  ;;  %v9166_v12 = vpop.f32.mrf.mxu1 }
0x2da9   : > { %v9266_v51 = vsel %vm684_vm0, %v9166_v12, -inf }
0x2daa   : > { %9267 = vmax.xlane.f32.xlu0 %v9266_v51 }
0x2e31   : > { %v9271_v19 = vpop.xlane.xlu1 %9270 }
0x2e32   : > { %v9279_v23 = vsub.f32 %v12279_v56, %v9271_v19 }
0x2e33   : > { %v9268_v20 = vpop.xlane.xlu0 %9267 }
0x2e34   : > { %v9284_v57 = vmul.f32 1.442695, %v9279_v23  ;;  %v9278_v50 = vsub.f32 %v9166_v12, %v9268_v20 }
0x2e36   : > { %12742 = vpow2.f32 %v9284_v57  ;;  %v9282_v38 = vmul.f32 1.442695, %v9278_v50 }
0x2e38   : > { %12744 = vpow2.f32 %v9282_v38 }
0x2e43   : > { %v14659_v62 = vpop.eup %12742 }
0x2e44   : > { %v9293_v11 = vsel %vm684_vm0, %v14659_v62, 0.0 }
0x2e45   : > { %9294 = vadd.xlane.f32.xlu1 %v9293_v11  ;;  %v12745_v22 = vpop.eup %12744 }
0x2e58   : > { %v12269_v45 = vpop.f32.mrf.mxu0 }
0x2e59   : > { %v14664_v44 = vadd.f32 %v12269_v45, %v14596_v27 }
0x2e5a   : > { %v9061_v18 = vpop.f32.mrf.mxu0 }
0x2e5b   : > { %v14667_v30 = vadd.f32 %v9061_v18, %v14599_v37  ;;  %v9290_v37 = vsel %vm684_vm0, %v12745_v22, 0.0 }
0x2e62   : > { %v12272_v39 = vpop.f32.mrf.mxu0 }
0x2e63   : > { %v14670_v10 = vadd.f32 %v12272_v39, %v14602_v63 }
0x2e64   : > { %v9071_v26 = vpop.f32.mrf.mxu0 }
0x2e65   : > { %v14673_v3 = vadd.f32 %v9071_v26, %v14605_v21 }
0x2e66   : > { %v12286_v14 = vpop.f32.mrf.mxu0 }
0x2e67   : > { %v9275_v27 = vsel %vm684_vm0, %v12286_v14, -inf }
0x2e68   : > { %v9257_v15 = vpop.f32.mrf.mxu0 }
0x2e69   : > { %v9272_v25 = vsel %vm684_vm0, %v9257_v15, -inf }
0x2e6a   : > { %9273 = vmax.xlane.f32.xlu0 %v9272_v25 }
0x2e6e   : > { %9276 = vmax.xlane.f32.xlu0 %v9275_v27 }
0x2e72   : > { %9291 = vadd.xlane.f32.xlu0 %v9290_v37 }
0x2ef3   : > { %v9274_v35 = vpop.xlane.xlu0 %9273 }
0x2ef4   : > { %v9280_v49 = vsub.f32 %v9257_v15, %v9274_v35 }
0x2ef6   : > { %v9286_v63 = vmul.f32 1.442695, %v9280_v49 }
0x2ef7   : > { %v9277_v42 = vpop.xlane.xlu0 %9276 }
0x2ef8   : > { %12746 = vpow2.f32 %v9286_v63  ;;  %v9281_v32 = vsub.f32 %v12286_v14, %v9277_v42 }
0x2efa   : > { %v9288_v21 = vmul.f32 1.442695, %v9281_v32 }
0x2efb   : > { %v9292_v1 = vpop.xlane.xlu0 %9291 }
0x2efc   : > { %12748 = vpow2.f32 %v9288_v21 }
0x2efd   : > { %12750 = vrcp.f32 %v9292_v1 }
0x2f05   : > { %v12747_v58 = vpop.eup %12746 }
0x2f06   : > { %v9296_v48 = vsel %vm684_vm0, %v12747_v58, 0.0 }
0x2f07   : > { %9297 = vadd.xlane.f32.xlu0 %v9296_v48 }
0x2f09   : > { %v12749_v28 = vpop.eup %12748 }
0x2f0a   : > { %v12751_v17 = vpop.eup %12750  ;;  %v9299_v2 = vsel %vm684_vm0, %v12749_v28, 0.0 }
0x2f0b   : > { %9300 = vadd.xlane.f32.xlu1 %v9299_v2  ;;  %v9306_v4 = vmul.f32 %v12751_v17, %v12745_v22 }
0x2f0d   : > { %12291 = vmatprep.mubr.msk.f32.mxu1 %vm684_vm0, %v9306_v4 }
0x2f1c   : > { %9310 = vrot.lane.b32.xlu1 %v14237_v0, %s13158_s0 }
0x2f1d   : > { %9312 = vrot.lane.b32.xlu0 %v14227_v52, %s13158_s0 }
0x2f20   : > { %9399 = vrot.lane.b32.xlu1 %v14247_v59, %s13158_s0 }
0x2f21   : > { %9591 = vrot.lane.b32.xlu0 %v14211_v43, %s13159_s29  ;;  %v9295_v43 = vpop.xlane.xlu1 %9294 }
0x2f22   : > { %12752 = vrcp.f32 %v9295_v43 }
0x2f24   : > { %9397 = vrot.lane.b32.xlu1 %v14298_v60, %s13158_s0  ;;  %s13160_s0 = smov [#allocation19]  }
0x2f25   : > { %9585 = vrot.lane.b32.xlu0 %v14206_v9, %s13159_s29 }
0x2f28   : > { %9589 = vrot.lane.b32.xlu1 %v14213_v33, %s13159_s29 }
0x2f29   : > { %9682 = vrot.lane.b32.xlu0 %v14239_v47, %s13159_s29 }
0x2f2c   : > { %9587 = vrot.lane.b32.xlu1 %v14233_v61, %s13159_s29 }
0x2f2d   : > { %9676 = vrot.lane.b32.xlu0 %v14222_v46, %s13159_s29 }
0x2f2f   : > { %v12753_v47 = vpop.eup %12752 }
0x2f30   : > { %9680 = vrot.lane.b32.xlu1 %v14244_v34, %s13159_s29  ;;  %v9307_v46 = vmul.f32 %v12753_v47, %v14659_v62  ;;  %v5764_v34 = vld [vmem:[#allocation11 + $0xe0] sm:$0xff] }
0x2f34   : > { %9678 = vrot.lane.b32.xlu1 %v14260_v55, %s13159_s29 }
0x2f90   : > { %v9298_v9 = vpop.xlane.xlu0 %9297 }
0x2f91   : > { %12754 = vrcp.f32 %v9298_v9 }
0x2f94   : > { %v9301_v33 = vpop.xlane.xlu1 %9300  ;;  %v9313_v36 = vpop.permute.xlu0 %9312 }
0x2f95   : > { %12756 = vrcp.f32 %v9301_v33  ;;  %12287 = vmatprep.subr.mxu1 %v9313_v36 }
0x2f96   : > { %12288 = vmatpush3.msra.mxu1 %v9313_v36 }
0x2f98   : > { %v9311_v61 = vpop.permute.xlu1 %9310  ;;  %v9592_v40 = vpop.permute.xlu0 %9591 }
0x2f99   : > { %12289 = vmatprep.subr.mxu1 %v9311_v61 }
0x2f9a   : > { %12290 = vmatpush3.msra.mxu1 %v9311_v61 }
0x2f9b   : > { %12292 = vmatmul.mubr.msk.f32.vlgmr.msra.gmra.mxu1 %vm684_vm0, %v9307_v46  ;;  %12301 = vmatprep.subr.mxu1 %v5765_v24 }
0x2f9c   : > { %v9400_v55 = vpop.permute.xlu1 %9399  ;;  %v9586_v56 = vpop.permute.xlu0 %9585  ;;  %12302 = vmatpush3.msra.mxu1 %v5765_v24 }
0x2f9d   : > { %12294 = vmatprep.subr.mxu0 %v9400_v55  ;;  %12303 = vmatprep.subr.mxu1 %v5764_v34 }
0x2f9e   : > { %v12755_v5 = vpop.eup %12754  ;;  %12295 = vmatpush3.msra.mxu0 %v9400_v55  ;;  %12304 = vmatpush3.msra.mxu1 %v5764_v34 }
0x2f9f   : > { %v9308_v12 = vmul.f32 %v12755_v5, %v12747_v58 }
0x2fa0   : > { %v9398_v51 = vpop.permute.xlu1 %9397  ;;  %v9683_v19 = vpop.permute.xlu0 %9682 }
0x2fa1   : > { %12296 = vmatprep.subr.mxu0 %v9398_v51  ;;  %12298 = vmatprep.mubr.msk.f32.mxu0 %vm684_vm0, %v9308_v12 }
0x2fa2   : > { %v12757_v23 = vpop.eup %12756  ;;  %12318 = vmatprep.subr.msk.mxu1 %vm684_vm0, %v9683_v19  ;;  %12297 = vmatpush3.msra.mxu0 %v9398_v51 }
0x2fa3   : > { %v9309_v57 = vmul.f32 %v12757_v23, %v12749_v28  ;;  %12311 = vmatprep.subr.msk.mxu0 %vm684_vm0, %v9592_v40 }
0x2fa4   : > { %v9590_v62 = vpop.permute.xlu1 %9589  ;;  %v9677_v39 = vpop.permute.xlu0 %9676 }
0x2fa5   : > { %12299 = vmatmul.mubr.msk.f32.vlgmr.msra.gmra.mxu0 %vm684_vm0, %v9309_v57 }
0x2fa6   : > { %12312 = vmatpush3.xpose.msk.msra.mxu0 %vm684_vm0, %v9592_v40  ;;  %12315 = vmatprep.mubr.msk.f32.mxu0 %vm684_vm0, %v9586_v56 }
0x2fa7   : > { %12313 = vmatprep.subr.msk.mxu0 %vm684_vm0, %v9590_v62 }
0x2fa8   : > { %v9588_v11 = vpop.permute.xlu1 %9587 }
0x2faa   : > { %12314 = vmatpush3.xpose.msk.msra.mxu0 %vm684_vm0, %v9590_v62 }
0x2fac   : > { %v9681_v50 = vpop.permute.xlu1 %9680 }
0x2fad   : > { %12316 = vmatmul.mubr.msk.f32.vlgmr.msra.gmra.mxu0 %vm684_vm0, %v9588_v11 }
0x2fb0   : > { %v9679_v26 = vpop.permute.xlu1 %9678 }
0x305b   : > { %v12293_v20 = vpop.f32.mrf.mxu1 }
0x305d   : > { %v9388_v45 = vpop.f32.mrf.mxu1 }
0x305e   : > { %12305 = vmatprep.mubr.msk.f32.mxu1 %vm684_vm0, %v9388_v45 }
0x305f   : > { %12306 = vmatmul.mubr.msk.f32.vlgmr.msra.gmra.mxu1 %vm684_vm0, %v12293_v20 }
0x3060   : > { %12319 = vmatpush3.xpose.msk.msra.mxu1 %vm684_vm0, %v9683_v19 }
0x3061   : > { %12320 = vmatprep.subr.msk.mxu1 %vm684_vm0, %v9681_v50 }
0x3064   : > { %12321 = vmatpush3.xpose.msk.msra.mxu1 %vm684_vm0, %v9681_v50 }
0x3065   : > { %v12300_v18 = vpop.f32.mrf.mxu0 }
0x3067   : > { %v9475_v38 = vpop.f32.mrf.mxu0 }
0x3068   : > { %12308 = vmatprep.mubr.msk.f32.mxu1 %vm684_vm0, %v9475_v38 }
0x3069   : > { %12309 = vmatmul.mubr.msk.f32.gmra.mxu1 %vm684_vm0, %v12300_v18 }
0x306a   : > { %12322 = vmatprep.mubr.msk.f32.mxu1 %vm684_vm0, %v9677_v39  ;;  %v5767_v39 = vld [vmem:[#allocation11 + $0xf8] sm:$0xff] }
0x306d   : > { %v12317_v14 = vpop.f32.mrf.mxu0  ;;  %12323 = vmatmul.mubr.msk.f32.vlgmr.msra.gmra.mxu1 %vm684_vm0, %v9679_v26  ;;  %v5766_v26 = vld [vmem:[#allocation11 + $0xf0] sm:$0xff] }
0x306e   : > { %v9770_v15 = vsel %vm684_vm0, %v12317_v14, -inf }
0x306f   : > { %9771 = vmax.xlane.f32.xlu1 %v9770_v15  ;;  %v9667_v25 = vpop.f32.mrf.mxu0 }
0x3070   : > { %v9767_v27 = vsel %vm684_vm0, %v9667_v25, -inf }
0x3071   : > { %9768 = vmax.xlane.f32.xlu0 %v9767_v27 }
0x30f8   : > { %v9772_v22 = vpop.xlane.xlu1 %9771 }
0x30f9   : > { %v9780_v37 = vsub.f32 %v12317_v14, %v9772_v22  ;;  %v11069_v22 = vld [vmem:[%s14870_s7 + $0x1] ss:$0 sm:$0xff] }
0x30fa   : > { %v9769_v42 = vpop.xlane.xlu0 %9768 }
0x30fb   : > { %v9785_v35 = vmul.f32 1.442695, %v9780_v37  ;;  %v9779_v21 = vsub.f32 %v9667_v25, %v9769_v42 }
0x30fd   : > { %12758 = vpow2.f32 %v9785_v35  ;;  %v9783_v28 = vmul.f32 1.442695, %v9779_v21 }
0x30ff   : > { %12760 = vpow2.f32 %v9783_v28 }
0x310a   : > { %v12759_v49 = vpop.eup %12758 }
0x310b   : > { %v9794_v63 = vsel %vm684_vm0, %v12759_v49, 0.0 }
0x310c   : > { %9795 = vadd.xlane.f32.xlu1 %v9794_v63  ;;  %v12761_v47 = vpop.eup %12760 }
0x311f   : > { %v12307_v32 = vpop.f32.mrf.mxu1 }
0x3120   : > { %v14729_v1 = vadd.f32 %v12307_v32, %v14664_v44 }
0x3121   : > { %v9562_v58 = vpop.f32.mrf.mxu1 }
0x3122   : > { %v14732_v48 = vadd.f32 %v9562_v58, %v14667_v30  ;;  %v9791_v30 = vsel %vm684_vm0, %v12761_v47, 0.0 }
0x3129   : > { %v12310_v17 = vpop.f32.mrf.mxu1 }
0x312a   : > { %v14735_v2 = vadd.f32 %v12310_v17, %v14670_v10 }
0x312b   : > { %v9572_v4 = vpop.f32.mrf.mxu1 }
0x312c   : > { %v14738_v43 = vadd.f32 %v9572_v4, %v14673_v3 }
0x312d   : > { %v12324_v9 = vpop.f32.mrf.mxu1 }
0x312e   : > { %v9776_v44 = vsel %vm684_vm0, %v12324_v9, -inf }
0x312f   : > { %v9758_v33 = vpop.f32.mrf.mxu1 }
0x3130   : > { %v9773_v36 = vsel %vm684_vm0, %v9758_v33, -inf }
0x3131   : > { %9774 = vmax.xlane.f32.xlu0 %v9773_v36 }
0x3135   : > { %9777 = vmax.xlane.f32.xlu0 %v9776_v44  ;;  %v5836_v44 = vld [vmem:[#allocation16 + $0x3e8] sm:$0xff] }
0x3139   : > { %9792 = vadd.xlane.f32.xlu0 %v9791_v30  ;;  %v5832_v30 = vld [vmem:[#allocation16 + $0x3c8] sm:$0xff] }
0x3195   : > { %v9796_v23 = vpop.xlane.xlu1 %9795 }
0x31ba   : > { %v9775_v61 = vpop.xlane.xlu0 %9774 }
0x31bb   : > { %v9781_v40 = vsub.f32 %v9758_v33, %v9775_v61  ;;  %v5834_v61 = vld [vmem:[#allocation16 + $0x3d8] sm:$0xff] }
0x31bd   : > { %v9787_v10 = vmul.f32 1.442695, %v9781_v40  ;;  %v5828_v40 = vld [vmem:[#allocation16 + $0x3a8] sm:$0xff] }
0x31be   : > { %v9778_v24 = vpop.xlane.xlu0 %9777 }
0x31bf   : > { %12762 = vpow2.f32 %v9787_v10  ;;  %v9782_v46 = vsub.f32 %v12324_v9, %v9778_v24  ;;  %v5827_v10 = vld [vmem:[#allocation16 + $0x3a0] sm:$0xff]  ;;  %v5829_v24 = vld [vmem:[#allocation16 + $0x3b0] sm:$0xff] }
0x31c1   : > { %v9789_v3 = vmul.f32 1.442695, %v9782_v46 }
0x31c2   : > { %v9793_v34 = vpop.xlane.xlu0 %9792 }
0x31c3   : > { %12764 = vpow2.f32 %v9789_v3 }
0x31c4   : > { %12766 = vrcp.f32 %v9793_v34 }
0x31c5   : > { %12768 = vrcp.f32 %v9796_v23 }
0x31cc   : > { %v12763_v55 = vpop.eup %12762 }
0x31cd   : > { %v9797_v56 = vsel %vm684_vm0, %v12763_v55, 0.0 }
0x31ce   : > { %9798 = vadd.xlane.f32.xlu0 %v9797_v56 }
0x31d0   : > { %v12765_v5 = vpop.eup %12764 }
0x31d1   : > { %v12767_v12 = vpop.eup %12766  ;;  %v9800_v51 = vsel %vm684_vm0, %v12765_v5, 0.0 }
0x31d2   : > { %9801 = vadd.xlane.f32.xlu1 %v9800_v51  ;;  %v9807_v19 = vmul.f32 %v12767_v12, %v12761_v47  ;;  %v12769_v20 = vpop.eup %12768  ;;  %v5835_v47 = vld [vmem:[#allocation16 + $0x3e0] sm:$0xff] }
0x31d3   : > { %v9808_v45 = vmul.f32 %v12769_v20, %v12759_v49  ;;  %v5824_v20 = vld [vmem:[#allocation16 + $0x388] sm:$0xff] }
0x31d4   : > { %12329 = vmatprep.mubr.msk.f32.mxu0 %vm684_vm0, %v9807_v19 }
0x31e3   : > { %9811 = vrot.lane.b32.xlu1 %v14237_v0, %s13159_s29 }
0x31e4   : > { %9813 = vrot.lane.b32.xlu0 %v14227_v52, %s13159_s29 }
0x31e7   : > { %9900 = vrot.lane.b32.xlu1 %v14247_v59, %s13159_s29 }
0x31eb   : > { %9898 = vrot.lane.b32.xlu1 %v14298_v60, %s13159_s29  ;;  %s13052_s29 = sshll.u32 %s13160_s0, 4  ;;  %s13053_s29 = int_to_ptr.vmem [resolvable:$false] %s13052_s29 }
0x31ec   : > { %s13054_s12 = scalar_lea.vmem %s13053_s29, 64  ;;  %p13055_p9 = scmp.lt.s32.totalorder %s10613_s17, %s13053_s29 }
0x31ed   : > { %p13056_p6 = scmp.lt.s32.totalorder %s13054_s12, %s13048_s26 }
0x31ef   : > { %p13057_p11 = por %p13056_p6, %p13055_p9 }
0x31f1   : > { %p13058_p13 = pnand %p13057_p11, %p13051_p3 }
0x3257   : > { %v9799_v57 = vpop.xlane.xlu0 %9798 }
0x3258   : > { %12770 = vrcp.f32 %v9799_v57 }
0x325b   : > { %v9802_v62 = vpop.xlane.xlu1 %9801  ;;  %v9814_v11 = vpop.permute.xlu0 %9813 }
0x325c   : > { %12772 = vrcp.f32 %v9802_v62  ;;  %12325 = vmatprep.subr.mxu0 %v9814_v11 }
0x325d   : > { %12326 = vmatpush3.msra.mxu0 %v9814_v11 }
0x325f   : > { %v9812_v0 = vpop.permute.xlu1 %9811 }
0x3260   : > { %12327 = vmatprep.subr.mxu0 %v9812_v0 }
0x3261   : > { %12328 = vmatpush3.msra.mxu0 %v9812_v0  ;;  %v5826_v0 = vld [vmem:[#allocation16 + $0x398] sm:$0xff] }
0x3262   : > { %12330 = vmatmul.mubr.msk.f32.vlgmr.msra.gmra.mxu0 %vm684_vm0, %v9808_v45  ;;  %12339 = vmatprep.subr.mxu0 %v5767_v39  ;;  %v5823_v45 = vld [vmem:[#allocation16 + $0x380] sm:$0xff] }
0x3263   : > { %v9901_v52 = vpop.permute.xlu1 %9900  ;;  %12340 = vmatpush3.msra.mxu0 %v5767_v39 }
0x3264   : > { %12332 = vmatprep.subr.mxu1 %v9901_v52  ;;  %12341 = vmatprep.subr.mxu0 %v5766_v26 }
0x3265   : > { %v12771_v59 = vpop.eup %12770  ;;  %12333 = vmatpush3.msra.mxu1 %v9901_v52  ;;  %12342 = vmatpush3.msra.mxu0 %v5766_v26  ;;  %v5825_v52 = vld [vmem:[#allocation16 + $0x390] sm:$0xff]  ;;  %v5816_v26 = vld [vmem:[#allocation16 + $0x348] sm:$0xff] }
0x3266   : > { %v9809_v60 = vmul.f32 %v12771_v59, %v12763_v55 }
0x3267   : > { %v9899_v50 = vpop.permute.xlu1 %9898 }
0x3268   : > { %12334 = vmatprep.subr.mxu1 %v9899_v50  ;;  %12336 = vmatprep.mubr.msk.f32.mxu1 %vm684_vm0, %v9809_v60  ;;  %v5820_v60 = vld [vmem:[#allocation16 + $0x368] sm:$0xff] }
0x3269   : > { %v12773_v18 = vpop.eup %12772  ;;  %12335 = vmatpush3.msra.mxu1 %v9899_v50  ;;  %v5822_v50 = vld [vmem:[#allocation16 + $0x378] sm:$0xff] }
0x326a   : > { %v9810_v38 = vmul.f32 %v12773_v18, %v12765_v5  ;;  %10185 = vmatprep.subr.mxu1 %v5836_v44  ;;  %v5819_v18 = vld [vmem:[#allocation16 + $0x360] sm:$0xff] }
0x326b   : > { %v5795_v44 = vld [vmem:[#allocation16 + $0x2a0] sm:$0xff] }
0x326c   : > { %12337 = vmatmul.mubr.msk.f32.vlgmr.msra.gmra.mxu1 %vm684_vm0, %v9810_v38  ;;  %v5821_v38 = vld [vmem:[#allocation16 + $0x370] sm:$0xff] }
0x326d   : > { %10249 = vmatprep.mubr.f32.mxu1 %v13152_v54  ;;  %10186 = vmatpush1.msra.mxu1 %v5835_v47  ;;  %v5792_v47 = vld [vmem:[#allocation16 + $0x288] sm:$0xff] }
0x326e   : > { %10187 = vmatprep.subr.mxu1 %v5832_v30  ;;  %v5791_v30 = vld [vmem:[#allocation16 + $0x280] sm:$0xff] }
0x3322   : > { %v12331_v14 = vpop.f32.mrf.mxu0 }
0x3324   : > { %v9889_v15 = vpop.f32.mrf.mxu0 }
0x3325   : > { %12343 = vmatprep.mubr.msk.f32.mxu0 %vm684_vm0, %v9889_v15  ;;  %v5815_v15 = vld [vmem:[#allocation16 + $0x340] sm:$0xff] }
0x3326   : > { %12344 = vmatmul.mubr.msk.f32.vlgmr.msra.gmra.mxu0 %vm684_vm0, %v12331_v14  ;;  %v5818_v14 = vld [vmem:[#allocation16 + $0x358] sm:$0xff] }
0x332c   : > { %v12338_v25 = vpop.f32.mrf.mxu1 }
0x332e   : > { %v9976_v27 = vpop.f32.mrf.mxu1 }
0x332f   : > { %12346 = vmatprep.mubr.msk.f32.mxu0 %vm684_vm0, %v9976_v27  ;;  %v5812_v27 = vld [vmem:[#allocation16 + $0x328] sm:$0xff] }
0x3330   : > { %12347 = vmatmul.mubr.msk.f32.gmra.mxu0 %vm684_vm0, %v12338_v25  ;;  %v5817_v25 = vld [vmem:[#allocation16 + $0x350] sm:$0xff] }
0x3331   : > { %10338 = vmatprep.mubr.f32.mxu0 %v13152_v54 }
0x33e6   : > { %v12345_v37 = vpop.f32.mrf.mxu0 }
0x33e7   : > { %v10083_v35 = vadd.f32 %v12345_v37, %v14729_v1  ;;  %v5811_v37 = vld [vmem:[#allocation16 + $0x320] sm:$0xff] }
0x33e8   : > { %v10063_v49 = vpop.f32.mrf.mxu0 }
0x33e9   : > { %v10093_v63 = vadd.f32 %v11069_v22, %v10083_v35  ;;  %v10082_v42 = vadd.f32 %v10063_v49, %v14732_v48  ;;  %v5813_v35 = vld [vmem:[#allocation16 + $0x330] sm:$0xff]  ;;  %v5808_v49 = vld [vmem:[#allocation16 + $0x308] sm:$0xff] }
0x33eb   : > { %v10092_v32 = vadd.f32 %v11069_v22, %v10082_v42  ;;  %v10097_v21 = vadd.f32 %v10093_v63, %v14186_v6  ;;  %v5838_v6 = vld [vmem:[#allocation16 + $0x3f8] sm:$0xff]  ;;  %v5807_v42 = vld [vmem:[#allocation16 + $0x300] sm:$0xff] }
0x33ec   : > { %10274 = vmatprep.subr.mxu0 %v5838_v6  ;;  %v5810_v63 = vld [vmem:[#allocation16 + $0x318] sm:$0xff]  ;;  %v5797_v6 = vld [vmem:[#allocation16 + $0x2b0] sm:$0xff] }
0x33ed   : > { %10102 = vadd.xlane.f32.xlu1 %v10097_v21  ;;  %v10096_v58 = vadd.f32 %v10092_v32, %v14180_v31  ;;  %v5837_v31 = vld [vmem:[#allocation16 + $0x3f0] sm:$0xff] }
0x33ee   : > { %10275 = vmatpush1.msra.mxu0 %v5837_v31  ;;  %v5809_v32 = vld [vmem:[#allocation16 + $0x310] sm:$0xff]  ;;  %v5794_v31 = vld [vmem:[#allocation16 + $0x298] sm:$0xff] }
0x33ef   : > { %10100 = vadd.xlane.f32.xlu0 %v10096_v58  ;;  %10276 = vmatprep.subr.mxu0 %v5834_v61  ;;  %v5793_v61 = vld [vmem:[#allocation16 + $0x290] sm:$0xff] }
0x33f0   : > { %v12348_v28 = vpop.f32.mrf.mxu0 }
0x33f1   : > { %v10085_v4 = vadd.f32 %v12348_v28, %v14735_v2  ;;  %v5831_v2 = vld [vmem:[#allocation16 + $0x3c0] sm:$0xff] }
0x33f2   : > { %v10073_v17 = vpop.f32.mrf.mxu0  ;;  %10188 = vmatpush1.msra.mxu1 %v5831_v2  ;;  %v5803_v28 = vld [vmem:[#allocation16 + $0x2e0] sm:$0xff]  ;;  %v5788_v2 = vld [vmem:[#allocation16 + $0x268] sm:$0xff] }
0x33f3   : > { %v10084_v9 = vadd.f32 %v10073_v17, %v14738_v43  ;;  %v10095_v36 = vadd.f32 %v11069_v22, %v10085_v4  ;;  %v5833_v43 = vld [vmem:[#allocation16 + $0x3d0] sm:$0xff]  ;;  %10189 = vmatprep.subr.mxu1 %v5828_v40  ;;  %v5800_v4 = vld [vmem:[#allocation16 + $0x2c8] sm:$0xff]  ;;  %v5787_v40 = vld [vmem:[#allocation16 + $0x260] sm:$0xff] }
0x33f4   : > { %10277 = vmatpush1.msra.mxu0 %v5833_v43  ;;  %10190 = vmatpush1.msra.mxu1 %v5827_v10  ;;  %v5805_v17 = vld [vmem:[#allocation16 + $0x2f0] sm:$0xff]  ;;  %v5790_v43 = vld [vmem:[#allocation16 + $0x278] sm:$0xff]  ;;  %v5784_v10 = vld [vmem:[#allocation16 + $0x248] sm:$0xff] }
0x33f5   : > { %v10094_v33 = vadd.f32 %v11069_v22, %v10084_v9  ;;  %v10099_v48 = vadd.f32 %v10095_v36, %v14198_v29  ;;  %10191 = vmatprep.subr.mxu1 %v5824_v20  ;;  %v5814_v22 = vld [vmem:[#allocation16 + $0x338] sm:$0xff]  ;;  %v5801_v36 = vld [vmem:[#allocation16 + $0x2d0] sm:$0xff] }
0x33f6   : > { %10192 = vmatpush1.msra.mxu1 %v5823_v45  ;;  %v5802_v9 = vld [vmem:[#allocation16 + $0x2d8] sm:$0xff] }
0x33f7   : > { %v10098_v1 = vadd.f32 %v10094_v33, %v14192_v41  ;;  %v5830_v41 = vld [vmem:[#allocation16 + $0x3b8] sm:$0xff]  ;;  %10193 = vmatprep.subr.mxu1 %v5820_v60  ;;  %v5799_v33 = vld [vmem:[#allocation16 + $0x2c0] sm:$0xff] }
0x33f8   : > { %10278 = vmatprep.subr.mxu0 %v5830_v41  ;;  %10194 = vmatpush1.msra.mxu1 %v5819_v18  ;;  %v5789_v41 = vld [vmem:[#allocation16 + $0x270] sm:$0xff]  ;;  %v5905_v20 = vld [vmem:[#allocation17 + $0x3f8] sm:$0xff] }
0x33f9   : > { %10104 = vadd.xlane.f32.xlu0 %v10098_v1  ;;  %10279 = vmatpush1.msra.mxu0 %v5829_v24  ;;  %v5786_v24 = vld [vmem:[#allocation16 + $0x258] sm:$0xff] }
0x33fa   : > { %10280 = vmatprep.subr.mxu0 %v5826_v0  ;;  %10195 = vmatprep.subr.mxu1 %v5816_v26 }
0x33fb   : > { %10281 = vmatpush1.msra.mxu0 %v5825_v52  ;;  %10196 = vmatpush1.msra.mxu1 %v5815_v15 }
0x33fc   : > { %10282 = vmatprep.subr.mxu0 %v5822_v50  ;;  %10197 = vmatprep.subr.mxu1 %v5812_v27 }
0x33fd   : > { %10106 = vadd.xlane.f32.xlu0 %v10099_v48  ;;  %10283 = vmatpush1.msra.mxu0 %v5821_v38 }
0x33fe   : > { %10284 = vmatprep.subr.mxu0 %v5818_v14  ;;  %10198 = vmatpush1.msra.mxu1 %v5811_v37 }
0x33ff   : > { %10285 = vmatpush1.msra.mxu0 %v5817_v25  ;;  %10199 = vmatprep.subr.mxu1 %v5808_v49  ;;  %v11070_v49 = vld [vmem:[#allocation13 + $0x1] ss:$0 sm:$0xff] }
0x3400   : > { %10286 = vmatprep.subr.mxu0 %v5814_v22  ;;  %10200 = vmatpush1.msra.mxu1 %v5807_v42  ;;  %v11071_v42 = vld [vmem:[#allocation14 + $0x1] ss:$0 sm:$0xff] }
0x3401   : > { %10287 = vmatpush1.msra.mxu0 %v5813_v35 }
0x3402   : > { %10288 = vmatprep.subr.mxu0 %v5810_v63 }
0x3403   : > { %10289 = vmatpush1.msra.mxu0 %v5809_v32 }
0x3476   : > { %v10103_v29 = vpop.xlane.xlu1 %10102 }
0x3477   : > { %v10109_v46 = vmul.f32 0.0078125, %v10103_v29  ;;  %v5783_v29 = vld [vmem:[#allocation16 + $0x240] sm:$0xff] }
0x3478   : > { %v10101_v3 = vpop.xlane.xlu0 %10100 }
0x3479   : > { %v14774_v34 = vsub.f32 %v10097_v21, %v10109_v46  ;;  %v10108_v55 = vmul.f32 0.0078125, %v10101_v3  ;;  %v5804_v21 = vld [vmem:[#allocation16 + $0x2e8] sm:$0xff]  ;;  %v5785_v46 = vld [vmem:[#allocation16 + $0x250] sm:$0xff] }
0x347a   : > { %10201 = vmatprep.subr.mxu1 %v5804_v21  ;;  %v5780_v3 = vld [vmem:[#allocation16 + $0x228] sm:$0xff] }
0x347b   : > { %v14776_v56 = vsub.f32 %v10096_v58, %v10108_v55  ;;  %v10117_v5 = vmul.f32 %v14774_v34, %v14774_v34  ;;  %v5806_v58 = vld [vmem:[#allocation16 + $0x2f8] sm:$0xff]  ;;  %10202 = vmatpush1.msra.mxu1 %v5803_v28 }
0x347c   : > { %10290 = vmatprep.subr.mxu0 %v5806_v58  ;;  %10203 = vmatprep.subr.mxu1 %v5800_v4  ;;  %v5782_v55 = vld [vmem:[#allocation16 + $0x238] sm:$0xff]  ;;  %v5904_v4 = vld [vmem:[#allocation17 + $0x3f0] sm:$0xff] }
0x347d   : > { %10122 = vadd.xlane.f32.xlu1 %v10117_v5  ;;  %v10116_v12 = vmul.f32 %v14776_v56, %v14776_v56  ;;  %10291 = vmatpush1.msra.mxu0 %v5805_v17  ;;  %v5779_v5 = vld [vmem:[#allocation16 + $0x220] sm:$0xff]  ;;  %v5857_v58 = vld [vmem:[#allocation17 + $0x278] sm:$0xff]  ;;  %v5872_v17 = vld [vmem:[#allocation17 + $0x2f0] sm:$0xff] }
0x347e   : > { %10292 = vmatprep.subr.mxu0 %v5802_v9  ;;  %10204 = vmatpush1.msra.mxu1 %v5799_v33  ;;  %v5889_v28 = vld [vmem:[#allocation17 + $0x378] sm:$0xff]  ;;  %v5888_v33 = vld [vmem:[#allocation17 + $0x370] sm:$0xff] }
0x347f   : > { %10120 = vadd.xlane.f32.xlu0 %v10116_v12  ;;  %10293 = vmatpush1.msra.mxu0 %v5801_v36  ;;  %v5781_v12 = vld [vmem:[#allocation16 + $0x230] sm:$0xff] }
0x3482   : > { %v10105_v51 = vpop.xlane.xlu0 %10104 }
0x3483   : > { %v10110_v19 = vmul.f32 0.0078125, %v10105_v51  ;;  %v5776_v51 = vld [vmem:[#allocation16 + $0x208] sm:$0xff] }
0x3485   : > { %v14782_v23 = vsub.f32 %v10098_v1, %v10110_v19  ;;  %v5796_v1 = vld [vmem:[#allocation16 + $0x2a8] sm:$0xff]  ;;  %v5778_v19 = vld [vmem:[#allocation16 + $0x218] sm:$0xff] }
0x3486   : > { %v10107_v57 = vpop.xlane.xlu0 %10106  ;;  %10205 = vmatprep.subr.mxu1 %v5796_v1  ;;  %v5871_v1 = vld [vmem:[#allocation17 + $0x2e8] sm:$0xff] }
0x3487   : > { %v10111_v62 = vmul.f32 0.0078125, %v10107_v57  ;;  %v10118_v11 = vmul.f32 %v14782_v23, %v14782_v23  ;;  %10206 = vmatpush1.msra.mxu1 %v5795_v44  ;;  %v5775_v57 = vld [vmem:[#allocation16 + $0x200] sm:$0xff]  ;;  %v5855_v44 = vld [vmem:[#allocation17 + $0x268] sm:$0xff] }
0x3488   : > { %10207 = vmatprep.subr.mxu1 %v5792_v47 }
0x3489   : > { %v14786_v59 = vsub.f32 %v10099_v48, %v10111_v62  ;;  %10124 = vadd.xlane.f32.xlu0 %v10118_v11  ;;  %v5798_v48 = vld [vmem:[#allocation16 + $0x2b8] sm:$0xff]  ;;  %10208 = vmatpush1.msra.mxu1 %v5791_v30  ;;  %v5777_v62 = vld [vmem:[#allocation16 + $0x210] sm:$0xff]  ;;  %v5902_v30 = vld [vmem:[#allocation17 + $0x3e0] sm:$0xff] }
0x348a   : > { %10294 = vmatprep.subr.mxu0 %v5798_v48  ;;  %10209 = vmatprep.subr.mxu1 %v5788_v2  ;;  %v5873_v11 = vld [vmem:[#allocation17 + $0x2f8] sm:$0xff]  ;;  %v5903_v48 = vld [vmem:[#allocation17 + $0x3e8] sm:$0xff] }
0x348b   : > { %v10119_v39 = vmul.f32 %v14786_v59, %v14786_v59  ;;  %10295 = vmatpush1.msra.mxu0 %v5797_v6  ;;  %10210 = vmatpush1.msra.mxu1 %v5787_v40  ;;  %v5887_v6 = vld [vmem:[#allocation17 + $0x368] sm:$0xff]  ;;  %v5886_v40 = vld [vmem:[#allocation17 + $0x360] sm:$0xff] }
0x348c   : > { %10296 = vmatprep.subr.mxu0 %v5794_v31  ;;  %10211 = vmatprep.subr.mxu1 %v5784_v10  ;;  %v5870_v31 = vld [vmem:[#allocation17 + $0x2e0] sm:$0xff]  ;;  %v5869_v10 = vld [vmem:[#allocation17 + $0x2d8] sm:$0xff] }
0x348d   : > { %10126 = vadd.xlane.f32.xlu1 %v10119_v39  ;;  %10297 = vmatpush1.msra.mxu0 %v5793_v61 }
0x348e   : > { %10298 = vmatprep.subr.mxu0 %v5790_v43  ;;  %10212 = vmatpush1.msra.mxu1 %v5783_v29 }
0x348f   : > { %10299 = vmatpush1.msra.mxu0 %v5789_v41  ;;  %10213 = vmatprep.subr.mxu1 %v5780_v3  ;;  %v5868_v3 = vld [vmem:[#allocation17 + $0x2d0] sm:$0xff] }
0x3490   : > { %10300 = vmatprep.subr.mxu0 %v5786_v24  ;;  %10214 = vmatpush1.msra.mxu1 %v5779_v5  ;;  %v5901_v24 = vld [vmem:[#allocation17 + $0x3d8] sm:$0xff]  ;;  %v5852_v5 = vld [vmem:[#allocation17 + $0x250] sm:$0xff] }
0x3491   : > { %10301 = vmatpush1.msra.mxu0 %v5785_v46  ;;  %10215 = vmatprep.subr.mxu1 %v5776_v51  ;;  %v5885_v46 = vld [vmem:[#allocation17 + $0x358] sm:$0xff]  ;;  %v5867_v51 = vld [vmem:[#allocation17 + $0x2c8] sm:$0xff] }
0x3492   : > { %10302 = vmatprep.subr.mxu0 %v5782_v55  ;;  %10216 = vmatpush1.msra.mxu1 %v5775_v57  ;;  %v5900_v55 = vld [vmem:[#allocation17 + $0x3d0] sm:$0xff]  ;;  %v5883_v57 = vld [vmem:[#allocation17 + $0x348] sm:$0xff] }
0x3493   : > { %10303 = vmatpush1.msra.mxu0 %v5781_v12  ;;  %11567 = vmatprep.subr.mxu1 %v5873_v11  ;;  %v5884_v12 = vld [vmem:[#allocation17 + $0x350] sm:$0xff]  ;;  %v5898_v11 = vld [vmem:[#allocation17 + $0x3c0] sm:$0xff] }
0x3494   : > { %10304 = vmatprep.subr.mxu0 %v5778_v19  ;;  %v5851_v19 = vld [vmem:[#allocation17 + $0x248] sm:$0xff] }
0x3495   : > { %10305 = vmatpush1.msra.mxu0 %v5777_v62  ;;  %v5866_v62 = vld [vmem:[#allocation17 + $0x2c0] sm:$0xff] }
0x3496   : > { %11611 = vmatprep.subr.mxu0 %v5905_v20  ;;  %v5850_v20 = vld [vmem:[#allocation17 + $0x240] sm:$0xff] }
0x3506   : > { %v10123_v0 = vpop.xlane.xlu1 %10122 }
0x3507   : > { %v10129_v45 = vmul.f32 0.0078125, %v10123_v0  ;;  %v5882_v0 = vld [vmem:[#allocation17 + $0x340] sm:$0xff] }
0x3508   : > { %v10121_v52 = vpop.xlane.xlu0 %10120 }
0x3509   : > { %v10133_v60 = vadd.f32 1e-05, %v10129_v45  ;;  %v10128_v50 = vmul.f32 0.0078125, %v10121_v52  ;;  %v5865_v45 = vld [vmem:[#allocation17 + $0x2b8] sm:$0xff] }
0x350a   : > { %v5897_v52 = vld [vmem:[#allocation17 + $0x3b8] sm:$0xff] }
0x350b   : > { %12774 = vrsqrt.f32 %v10133_v60  ;;  %v10132_v18 = vadd.f32 1e-05, %v10128_v50  ;;  %v5849_v60 = vld [vmem:[#allocation17 + $0x238] sm:$0xff] }
0x350c   : > { %v5881_v50 = vld [vmem:[#allocation17 + $0x338] sm:$0xff] }
0x350d   : > { %12776 = vrsqrt.f32 %v10132_v18  ;;  %v5864_v18 = vld [vmem:[#allocation17 + $0x2b0] sm:$0xff] }
0x3512   : > { %v10125_v38 = vpop.xlane.xlu0 %10124 }
0x3513   : > { %v10130_v39 = vmul.f32 0.0078125, %v10125_v38  ;;  %v5896_v38 = vld [vmem:[#allocation17 + $0x3b0] sm:$0xff] }
0x3515   : > { %v10134_v26 = vadd.f32 1e-05, %v10130_v39  ;;  %v5848_v39 = vld [vmem:[#allocation17 + $0x230] sm:$0xff] }
0x3516   : > { %v10127_v14 = vpop.xlane.xlu1 %10126 }
0x3517   : > { %12778 = vrsqrt.f32 %v10134_v26  ;;  %v10131_v15 = vmul.f32 0.0078125, %v10127_v14  ;;  %v5880_v26 = vld [vmem:[#allocation17 + $0x330] sm:$0xff]  ;;  %v5863_v14 = vld [vmem:[#allocation17 + $0x2a8] sm:$0xff] }
0x3518   : > { %v12775_v25 = vpop.eup %12774 }
0x3519   : > { %v10135_v27 = vadd.f32 1e-05, %v10131_v15  ;;  %v10141_v35 = vmul.f32 %v12775_v25, %v14774_v34  ;;  %v5895_v15 = vld [vmem:[#allocation17 + $0x3a8] sm:$0xff] }
0x351a   : > { %v12777_v22 = vpop.eup %12776  ;;  %v5847_v25 = vld [vmem:[#allocation17 + $0x228] sm:$0xff] }
0x351b   : > { %v10140_v37 = vmul.f32 %v12777_v22, %v14776_v56  ;;  %12780 = vrsqrt.f32 %v10135_v27  ;;  %v10151_v21 = vmul.f32 %v11070_v49, %v10141_v35  ;;  %v5856_v56 = vld [vmem:[#allocation17 + $0x270] sm:$0xff]  ;;  %v5879_v27 = vld [vmem:[#allocation17 + $0x328] sm:$0xff]  ;;  %v5862_v22 = vld [vmem:[#allocation17 + $0x2a0] sm:$0xff] }
0x351c   : > { %v5846_v35 = vld [vmem:[#allocation17 + $0x220] sm:$0xff] }
0x351d   : > { %v10150_v63 = vmul.f32 %v11070_v49, %v10140_v37  ;;  %v14794_v9 = vadd.f32 %v11071_v42, %v10151_v21  ;;  %v5894_v37 = vld [vmem:[#allocation17 + $0x3a0] sm:$0xff]  ;;  %v5877_v21 = vld [vmem:[#allocation17 + $0x318] sm:$0xff] }
0x351f   : > { %v10160_v32 = vadd.f32 %v11071_v42, %v10150_v63  ;;  %v5861_v63 = vld [vmem:[#allocation17 + $0x298] sm:$0xff] }
0x3521   : > { %10250 = vmatmul.mubr.f32.vlgmr.msra.gmra.mxu1 %v10160_v32  ;;  %10339 = vmatmul.mubr.f32.vlgmr.msra.gmra.mxu0 %v10160_v32  ;;  %v5845_v32 = vld [vmem:[#allocation17 + $0x218] sm:$0xff] }
0x3522   : > { %10255 = vmatprep.mubr.f32.mxu1 %v13152_v54  ;;  %10344 = vmatprep.mubr.f32.mxu0 %v13152_v54 }
0x3523   : > { %11568 = vmatpush3.msra.mxu1 %v5857_v58  ;;  %11612 = vmatpush3.msra.mxu0 %v5889_v28  ;;  %v5860_v58 = vld [vmem:[#allocation17 + $0x290] sm:$0xff] }
0x3524   : > { %v12779_v34 = vpop.eup %12778  ;;  %11569 = vmatprep.subr.mxu1 %v5872_v17  ;;  %11613 = vmatprep.subr.mxu0 %v5904_v4  ;;  %v5892_v28 = vld [vmem:[#allocation17 + $0x390] sm:$0xff] }
0x3525   : > { %10256 = vmatmul.mubr.f32.gmra.mxu1 %v14794_v9  ;;  %10345 = vmatmul.mubr.f32.gmra.mxu0 %v14794_v9  ;;  %v10142_v36 = vmul.f32 %v12779_v34, %v14782_v23  ;;  %v5854_v23 = vld [vmem:[#allocation17 + $0x260] sm:$0xff]  ;;  %v5844_v17 = vld [vmem:[#allocation17 + $0x210] sm:$0xff]  ;;  %v5859_v34 = vld [vmem:[#allocation17 + $0x288] sm:$0xff] }
0x3526   : > { %10261 = vmatprep.mubr.f32.mxu1 %v13152_v54  ;;  %10350 = vmatprep.mubr.f32.mxu0 %v13152_v54  ;;  %v5876_v4 = vld [vmem:[#allocation17 + $0x310] sm:$0xff] }
0x3527   : > { %v10152_v47 = vmul.f32 %v11070_v49, %v10142_v36  ;;  %11570 = vmatpush3.msra.mxu1 %v5856_v56  ;;  %11614 = vmatpush3.msra.mxu0 %v5888_v33  ;;  %v5891_v56 = vld [vmem:[#allocation17 + $0x388] sm:$0xff] }
0x3528   : > { %v12781_v61 = vpop.eup %12780  ;;  %11571 = vmatprep.subr.mxu1 %v5871_v1  ;;  %11615 = vmatprep.subr.mxu0 %v5903_v48  ;;  %v5843_v33 = vld [vmem:[#allocation17 + $0x208] sm:$0xff]  ;;  %v5858_v1 = vld [vmem:[#allocation17 + $0x280] sm:$0xff] }
0x3529   : > { %v10162_v2 = vadd.f32 %v11071_v42, %v10152_v47  ;;  %v10143_v43 = vmul.f32 %v12781_v61, %v14786_v59  ;;  %11572 = vmatpush3.msra.mxu1 %v5855_v44  ;;  %11616 = vmatpush3.msra.mxu0 %v5887_v6  ;;  %v5853_v59 = vld [vmem:[#allocation17 + $0x258] sm:$0xff]  ;;  %v5875_v36 = vld [vmem:[#allocation17 + $0x308] sm:$0xff]  ;;  %v5890_v48 = vld [vmem:[#allocation17 + $0x380] sm:$0xff] }
0x352a   : > { %11573 = vmatprep.subr.mxu1 %v5870_v31  ;;  %11617 = vmatprep.subr.mxu0 %v5902_v30  ;;  %v5842_v44 = vld [vmem:[#allocation17 + $0x200] sm:$0xff] }
0x352b   : > { %10262 = vmatmul.mubr.f32.gmra.mxu1 %v10162_v2  ;;  %10351 = vmatmul.mubr.f32.gmra.mxu0 %v10162_v2  ;;  %v10153_v41 = vmul.f32 %v11070_v49, %v10143_v43  ;;  %v5878_v49 = vld [vmem:[#allocation17 + $0x320] sm:$0xff] }
0x352c   : > { %10267 = vmatprep.mubr.f32.mxu1 %v13152_v54  ;;  %10356 = vmatprep.mubr.f32.mxu0 %v13152_v54  ;;  %v5899_v54 = vld [vmem:[#allocation17 + $0x3c8] sm:$0xff]  ;;  %v5874_v6 = vld [vmem:[#allocation17 + $0x300] sm:$0xff] }
0x352d   : > { %v14804_v29 = vadd.f32 %v11071_v42, %v10153_v41  ;;  %11574 = vmatpush3.msra.mxu1 %v5854_v23  ;;  %11618 = vmatpush3.msra.mxu0 %v5886_v40  ;;  %v5893_v42 = vld [vmem:[#allocation17 + $0x398] sm:$0xff] }
0x352e   : > { %11575 = vmatprep.subr.mxu1 %v5869_v10  ;;  %11619 = vmatprep.subr.mxu0 %v5901_v24  ;;  %v10937_v47 = vld [vmem:[%s14874_s11 + $0x4] sm:$0xf] }
0x352f   : > { %10268 = vmatmul.mubr.f32.gmra.mxu1 %v14804_v29  ;;  %10357 = vmatmul.mubr.f32.gmra.mxu0 %v14804_v29  ;;  %v10168_v31 = vrot.slane %v10937_v47, %v13518_v8  ;;  %v10176_v30 = vrot.slane %v10937_v47, %v13532_v16  ;;  %v10172_v61 = vrot.slane %v10937_v47, %v13527_v13 }
0x3530   : > { %11576 = vmatpush3.msra.mxu1 %v5853_v59  ;;  %11620 = vmatpush3.msra.mxu0 %v5885_v46  ;;  %v10180_v2 = vrot.slane %v10937_v47, %v5256_v53 }
0x3531   : > { %11577 = vmatprep.subr.mxu1 %v5868_v3  ;;  %11621 = vmatprep.subr.mxu0 %v5900_v55 }
0x3532   : > { %11578 = vmatpush3.msra.mxu1 %v5852_v5  ;;  %11622 = vmatpush3.msra.mxu0 %v5884_v12 }
0x3533   : > { %11579 = vmatprep.subr.mxu1 %v5867_v51  ;;  %11623 = vmatprep.subr.mxu0 %v5899_v54 }
0x3534   : > { %11580 = vmatpush3.msra.mxu1 %v5851_v19  ;;  %11624 = vmatpush3.msra.mxu0 %v5883_v57 }
0x3535   : > { %11581 = vmatprep.subr.mxu1 %v5866_v62  ;;  %11625 = vmatprep.subr.mxu0 %v5898_v11 }
0x3536   : > { %11582 = vmatpush3.msra.mxu1 %v5850_v20  ;;  %11626 = vmatpush3.msra.mxu0 %v5882_v0 }
0x3537   : > { %11583 = vmatprep.subr.mxu1 %v5865_v45  ;;  %11627 = vmatprep.subr.mxu0 %v5897_v52 }
0x3538   : > { %11584 = vmatpush3.msra.mxu1 %v5849_v60  ;;  %11628 = vmatpush3.msra.mxu0 %v5881_v50 }
0x3539   : > { %11585 = vmatprep.subr.mxu1 %v5864_v18  ;;  %11629 = vmatprep.subr.mxu0 %v5896_v38 }
0x353a   : > { %11586 = vmatpush3.msra.mxu1 %v5848_v39  ;;  %11630 = vmatpush3.msra.mxu0 %v5880_v26 }
0x353b   : > { %11587 = vmatprep.subr.mxu1 %v5863_v14  ;;  %11631 = vmatprep.subr.mxu0 %v5895_v15 }
0x353c   : > { %11588 = vmatpush3.msra.mxu1 %v5847_v25  ;;  %11632 = vmatpush3.msra.mxu0 %v5879_v27 }
0x353d   : > { %11589 = vmatprep.subr.mxu1 %v5862_v22  ;;  %11633 = vmatprep.subr.mxu0 %v5894_v37 }
0x353e   : > { %11590 = vmatpush3.msra.mxu1 %v5846_v35  ;;  %11634 = vmatpush3.msra.mxu0 %v5878_v49 }
0x353f   : > { %11591 = vmatprep.subr.mxu1 %v5861_v63  ;;  %11635 = vmatprep.subr.mxu0 %v5893_v42 }
0x3540   : > { %11592 = vmatpush3.msra.mxu1 %v5845_v32  ;;  %11636 = vmatpush3.msra.mxu0 %v5877_v21 }
0x3541   : > { %11593 = vmatprep.subr.mxu1 %v5860_v58  ;;  %11637 = vmatprep.subr.mxu0 %v5892_v28 }
0x3542   : > { %11594 = vmatpush3.msra.mxu1 %v5844_v17  ;;  %11638 = vmatpush3.msra.mxu0 %v5876_v4 }
0x3543   : > { %11595 = vmatprep.subr.mxu1 %v5859_v34  ;;  %11639 = vmatprep.subr.mxu0 %v5891_v56 }
0x3544   : > { %11596 = vmatpush3.msra.mxu1 %v5843_v33  ;;  %11640 = vmatpush3.msra.mxu0 %v5875_v36 }
0x3545   : > { %11597 = vmatprep.subr.mxu1 %v5858_v1  ;;  %11641 = vmatprep.subr.mxu0 %v5890_v48  ;;  %v11072_v48 = vld [vmem:[%s14876_s13 + $0x1] ss:$0 sm:$0xff] }
0x3546   : > { %11598 = vmatpush3.msra.mxu1 %v5842_v44  ;;  %11642 = vmatpush3.msra.mxu0 %v5874_v6 }
0x35e1   : > { %v10251_v43 = vpop.f32.mrf.mxu1  ;;  %v10340_v23 = vpop.f32.mrf.mxu0 }
0x35e2   : > { %v10252_v40 = vadd.f32 %v10251_v43, %v10168_v31  ;;  %v10341_v41 = vadd.f32 %v10340_v23, %v10176_v30 }
0x35e3   : > { %v10253_v10 = vpop.f32.mrf.mxu1  ;;  %v10342_v24 = vpop.f32.mrf.mxu0 }
0x35e4   : > { %v10254_v59 = vadd.f32 %v10253_v10, %v10172_v61  ;;  %v10343_v46 = vadd.f32 %v10342_v24, %v10180_v2  ;;  %v10363_v8 = vmax.f32 %v10252_v40, 0.0  ;;  %v10365_v51 = vmax.f32 %v10341_v41, 0.0 }
0x35e5   : > { %v10257_v3 = vpop.f32.mrf.mxu1  ;;  %v10346_v55 = vpop.f32.mrf.mxu0 }
0x35e6   : > { %v10364_v5 = vmax.f32 %v10254_v59, 0.0  ;;  %v10366_v12 = vmax.f32 %v10343_v46, 0.0  ;;  %v10258_v16 = vadd.f32 %v10257_v3, %v10168_v31  ;;  %v10347_v54 = vadd.f32 %v10346_v55, %v10176_v30 }
0x35e7   : > { %v10259_v13 = vpop.f32.mrf.mxu1  ;;  %v10348_v19 = vpop.f32.mrf.mxu0 }
0x35e8   : > { %v10260_v7 = vadd.f32 %v10259_v13, %v10172_v61  ;;  %v10349_v53 = vadd.f32 %v10348_v19, %v10180_v2  ;;  %10449 = vmatprep.mubr.f32.mxu1 %v10364_v5  ;;  %10532 = vmatprep.mubr.f32.mxu0 %v10366_v12  ;;  %v10367_v11 = vmax.f32 %v10258_v16, 0.0  ;;  %v10369_v20 = vmax.f32 %v10347_v54, 0.0 }
0x35e9   : > { %10450 = vmatmul.mubr.f32.vlgmr.msra.gmra.mxu1 %v10363_v8  ;;  %10533 = vmatmul.mubr.f32.vlgmr.msra.gmra.mxu0 %v10365_v51 }
0x35ea   : > { %v10368_v57 = vmax.f32 %v10260_v7, 0.0  ;;  %v10370_v62 = vmax.f32 %v10349_v53, 0.0 }
0x35eb   : > { %v10263_v0 = vpop.f32.mrf.mxu1  ;;  %v10352_v45 = vpop.f32.mrf.mxu0 }
0x35ec   : > { %10453 = vmatprep.mubr.f32.mxu1 %v10368_v57  ;;  %10536 = vmatprep.mubr.f32.mxu0 %v10370_v62  ;;  %v10264_v52 = vadd.f32 %v10263_v0, %v10168_v31  ;;  %v10353_v60 = vadd.f32 %v10352_v45, %v10176_v30 }
0x35ed   : > { %v10265_v50 = vpop.f32.mrf.mxu1  ;;  %v10354_v18 = vpop.f32.mrf.mxu0  ;;  %10454 = vmatmul.mubr.f32.gmra.mxu1 %v10367_v11  ;;  %10537 = vmatmul.mubr.f32.gmra.mxu0 %v10369_v20 }
0x35ee   : > { %v10266_v38 = vadd.f32 %v10265_v50, %v10172_v61  ;;  %v10355_v39 = vadd.f32 %v10354_v18, %v10180_v2  ;;  %v10371_v27 = vmax.f32 %v10264_v52, 0.0  ;;  %v10373_v22 = vmax.f32 %v10353_v60, 0.0  ;;  %v11073_v52 = vld [vmem:[%s14877_s14 + $0x1] ss:$0 sm:$0xff] }
0x35ef   : > { %v10269_v26 = vpop.f32.mrf.mxu1  ;;  %v10358_v14 = vpop.f32.mrf.mxu0  ;;  %v11074_v50 = vld [vmem:[%s14939_s25 + $0x1] ss:$0 sm:$0xff] }
0x35f0   : > { %v10372_v15 = vmax.f32 %v10266_v38, 0.0  ;;  %v10374_v25 = vmax.f32 %v10355_v39, 0.0  ;;  %v10270_v37 = vadd.f32 %v10269_v26, %v10168_v31  ;;  %v10359_v35 = vadd.f32 %v10358_v14, %v10176_v30 }
0x35f1   : > { %v10271_v49 = vpop.f32.mrf.mxu1  ;;  %v10360_v63 = vpop.f32.mrf.mxu0 }
0x35f2   : > { %v10272_v42 = vadd.f32 %v10271_v49, %v10172_v61  ;;  %v10361_v32 = vadd.f32 %v10360_v63, %v10180_v2  ;;  %10458 = vmatprep.mubr.f32.mxu1 %v10372_v15  ;;  %10541 = vmatprep.mubr.f32.mxu0 %v10374_v25  ;;  %v10375_v28 = vmax.f32 %v10270_v37, 0.0  ;;  %v10377_v17 = vmax.f32 %v10359_v35, 0.0 }
0x35f3   : > { %10459 = vmatmul.mubr.f32.gmra.mxu1 %v10371_v27  ;;  %10542 = vmatmul.mubr.f32.gmra.mxu0 %v10373_v22 }
0x35f4   : > { %v10376_v21 = vmax.f32 %v10272_v42, 0.0  ;;  %v10378_v58 = vmax.f32 %v10361_v32, 0.0 }
0x35f6   : > { %10462 = vmatprep.mubr.f32.mxu1 %v10376_v21  ;;  %10545 = vmatprep.mubr.f32.mxu0 %v10378_v58 }
0x35f7   : > { %10463 = vmatmul.mubr.f32.gmra.mxu1 %v10375_v28  ;;  %10546 = vmatmul.mubr.f32.gmra.mxu0 %v10377_v17 }
0x36a9   : > { %v11599_v4 = vpop.f32.mrf.mxu1  ;;  %v11643_v34 = vpop.f32.mrf.mxu0 }
0x36ab   : > { %v11600_v56 = vpop.f32.mrf.mxu1  ;;  %v11644_v33 = vpop.f32.mrf.mxu0 }
0x36ad   : > { %v11602_v36 = vpop.f32.mrf.mxu1  ;;  %v11646_v1 = vpop.f32.mrf.mxu0 }
0x36af   : > { %v11603_v44 = vpop.f32.mrf.mxu1  ;;  %v11647_v6 = vpop.f32.mrf.mxu0 }
0x36b0   : > { %v11604_v47 = vadd.f32 %v11603_v44, %v11602_v36  ;;  %v11648_v30 = vadd.f32 %v11647_v6, %v11646_v1 }
0x36b2   : > { %v10456_v31 = vadd.f32 %v11604_v47, %v11072_v48 }
0x36b3   : > { %v11605_v61 = vpop.f32.mrf.mxu1  ;;  %v11649_v2 = vpop.f32.mrf.mxu0 }
0x36b4   : > { %v10539_v43 = vadd.f32 %v11648_v30, %v10456_v31 }
0x36b5   : > { %v11606_v23 = vpop.f32.mrf.mxu1  ;;  %v11650_v40 = vpop.f32.mrf.mxu0 }
0x36b6   : > { %v10551_v41 = vadd.f32 %v10539_v43, %v14794_v9 }
0x36b7   : > { %v11608_v10 = vpop.f32.mrf.mxu1  ;;  %v11652_v24 = vpop.f32.mrf.mxu0 }
0x36b8   : > { %10553 = vadd.xlane.f32.xlu1 %v10551_v41 }
0x36b9   : > { %v11609_v59 = vpop.f32.mrf.mxu1  ;;  %v11653_v46 = vpop.f32.mrf.mxu0 }
0x36ba   : > { %v11610_v3 = vadd.f32 %v11609_v59, %v11608_v10  ;;  %v11654_v5 = vadd.f32 %v11653_v46, %v11652_v24 }
0x36bc   : > { %v10465_v55 = vadd.f32 %v11610_v3, %v11072_v48 }
0x36be   : > { %v10548_v12 = vadd.f32 %v11654_v5, %v10465_v55 }
0x36c0   : > { %v10552_v8 = vadd.f32 %v10548_v12, %v14804_v29 }
0x36c2   : > { %10555 = vadd.xlane.f32.xlu0 %v10552_v8 }
0x3741   : > { %v10554_v51 = vpop.xlane.xlu1 %10553 }
0x3742   : > { %v10557_v16 = vmul.f32 0.0078125, %v10554_v51 }
0x3744   : > { %v10559_v54 = vsub.f32 %v10551_v41, %v10557_v16 }
0x3746   : > { %v10561_v13 = vmul.f32 %v10559_v54, %v10559_v54 }
0x3748   : > { %10563 = vadd.xlane.f32.xlu1 %v10561_v13 }
0x374b   : > { %v10556_v19 = vpop.xlane.xlu0 %10555 }
0x374c   : > { %v10558_v9 = vmul.f32 0.0078125, %v10556_v19 }
0x374e   : > { %v10560_v7 = vsub.f32 %v10552_v8, %v10558_v9 }
0x3750   : > { %v10562_v53 = vmul.f32 %v10560_v7, %v10560_v7 }
0x3752   : > { %10565 = vadd.xlane.f32.xlu0 %v10562_v53 }
0x37d1   : > { %v10564_v57 = vpop.xlane.xlu1 %10563 }
0x37d2   : > { %v10567_v62 = vmul.f32 0.0078125, %v10564_v57 }
0x37d4   : > { %v10569_v11 = vadd.f32 1e-05, %v10567_v62 }
0x37d6   : > { %12782 = vrsqrt.f32 %v10569_v11 }
0x37db   : > { %v10566_v20 = vpop.xlane.xlu0 %10565 }
0x37dc   : > { %v10568_v0 = vmul.f32 0.0078125, %v10566_v20 }
0x37de   : > { %v10570_v29 = vadd.f32 1e-05, %v10568_v0 }
0x37e0   : > { %12784 = vrsqrt.f32 %v10570_v29 }
0x37e3   : > { %v12783_v45 = vpop.eup %12782 }
0x37e4   : > { %v10573_v60 = vmul.f32 %v12783_v45, %v10559_v54 }
0x37e6   : > { %v10581_v18 = vmul.f32 %v11073_v52, %v10573_v60 }
0x37e8   : > { %v10589_v38 = vadd.f32 %v11074_v50, %v10581_v18 }
0x37ea   : > { %10596 = vst [vmem:[%s669_s8 - $0x7] sm:$0x80] %v10589_v38 }
0x37ed   : > { %v12785_v39 = vpop.eup %12784 }
0x37ee   : > { %v10574_v26 = vmul.f32 %v12785_v39, %v10560_v7 }
0x37f0   : > { %v10582_v14 = vmul.f32 %v11073_v52, %v10574_v26 }
0x37f2   : > { %v10590_v15 = vadd.f32 %v11074_v50, %v10582_v14 }
0x37f4   : > { %v10593_v25 = vrot.slane %v10590_v15, 7 }
0x37f6   : > { %10597 = vst [vmem:[%s669_s8 + $0x1] sm:$0x1] %v10593_v25 }
0x37f7   : > { %13061 = shalt.err (!%p13058_p13)
}
0x37f8   : > { %s13062_s27 = scalar_lea.hbm %s10610_s30, 32  ;;  %s13066_s15 = scalar_lea.hbm %s14940_s28, 64 }
0x37f9   : > { %p13063_p4 = scmp.ne.s32.totalorder %s10610_s30, %s13062_s27  ;;  %p13067_p8 = scmp.lt.s32.totalorder %s10610_s30, %s14940_s28 }
0x37fa   : > { %p13068_p10 = scmp.lt.s32.totalorder %s13066_s15, %s13062_s27 }
0x37fb   : > { %p13064_p0 = pnand %p13063_p4, %p14941_p2 }
0x37fc   : > { %p13069_p12 = por %p13068_p10, %p13067_p8 }
0x37fd   : > { %p13065_p5 = pneg %p13064_p0 }
0x37ff   : > { %p13070_p7 = pnand %p13069_p12, %p13065_p5 }
0x3801   : > { %13073 = shalt.err (!%p13070_p7)
}
0x3802   : > { %12387 = dma.vmem_to_hbm [thread:$0]  (%p14941_p2), %s10613_s17, 32, %s10610_s30, %s10599_s16  }
0x3803 PF: > { %s10624_s6 = sand.u32 1, %s13120_s21   ;;  %p14942_p1 = scmp.ne.s32.totalorder %s14924_s18, 0 }
0x3804   : > { %p14943_p3 = scmp.ge.s32.totalorder %s13132_s24, 2  ;;  %s10625_s3 = scalar_lea.sflag [#allocation4], %s10624_s6 }
0x3806   : > { %p12422_p9 = pnand %p14943_p3, %p14942_p1 }
0x3808   : > { %p12423_p6 = pneg %p12422_p9 }
0x380a   : > { %13115 = dma.done.wait (%p12423_p6), %s10625_s3, 32  }
0x380b   : > { %13117 = vsyncadd (%p12423_p6), %s10625_s3, 4294967264  ;;  %s14944_s9 = sld [smem:[#allocation27_spill]]  ;;  %p34_p11 = scmp.ge.s32.totalorder %s13388_s19, 4  }
0x380c   : > { %s14945_s21 = smov %s13124_s22  ;;  %s14946_s22 = smov %s13128_s23 }
0x380d   : > { %s14948_s24 = smov %s13388_s19  ;;  %36 = sbr.rel (!%p34_p11) target bundleno = 23 (0x17), region = 177 }
0x3811   : > { %s14947_s23 = smov %s14944_s9 }
0x3812   :  { %10630 = vsyncpa [#allocation3], 1 }
0x3813   :  { %10632 = vsyncpa [#allocation3 + $0x1], 1 }
0x3814   :  { %10633 = vsyncpa [#allocation6], 1 }
0x3815   :  { %10634 = vsyncpa [#allocation9], 1 }
0x3816   :  { %10635 = vsyncpa [#allocation12], 1 }
0x3817   :  { %10636 = vsyncpa [#allocation15], 1 }
0x3818   :  { %10637 = vsyncpa [#allocation18], 1 }
0x3819   :  { %10638 = vsyncpa [#allocation4], 1 }
0x381a   :  { %10640 = vsyncpa [#allocation4 + $0x1], 1 }

</bundles_post_ra>
